<compile_context>
chip_gen: v5e
topology: v5e:2x2
jax: 0.10.0
libtpu: 0.0.40
codegen_flags: <defaults>
</compile_context>

<pallas_src>
import functools

import jax
import jax.numpy as jnp
from jax import lax
from jax.experimental import pallas as pl
from jax.experimental.pallas import tpu as pltpu

_EPS = 1e-5  # nn.InstanceNorm2d default eps


def _make_hinresblock_kernel(C, H, W, c0, slope, eps, use_hin):
    """Builds the fused kernel for fixed static dims/config."""

    def kernel(x_ref, w1_ref, b1_ref, g_ref, bt_ref, w2_ref, b2_ref, o_ref,
               padx_ref, padm_ref):
        # Zero-padded conv inputs live in VMEM scratch (borders stay zero).
        padx_ref[...] = jnp.zeros_like(padx_ref)
        padm_ref[...] = jnp.zeros_like(padm_ref)
        padx_ref[:, 1:H + 1, 1:W + 1] = x_ref[0].astype(jnp.float32)

        def conv3x3_channel(src_ref, w_ref, b_ref, co):
            """One 3x3 conv output channel, scalar-unrolled over (c_in, tap)."""
            acc = jnp.zeros((H, W), jnp.float32) + b_ref[co]
            for ci in range(C):
                base = (co * C + ci) * 9
                for kh in range(3):
                    for kw in range(3):
                        wv = w_ref[base + kh * 3 + kw]
                        acc = acc + wv * src_ref[ci, kh:kh + H, kw:kw + W]
            return acc

        def lrelu(v):
            return jnp.where(v >= 0, v, slope * v)

        # conv_1 -> LeakyReLU -> half-instance-norm; result goes into the padded
        # scratch that feeds conv_2.
        for co in range(C):
            a = lrelu(conv3x3_channel(padx_ref, w1_ref, b1_ref, co))
            if use_hin and co < c0:
                # InstanceNorm2d over the spatial plane (biased variance), affine.
                s = jnp.sum(a, axis=1, keepdims=True)
                mu = jnp.sum(s, axis=0, keepdims=True) * (1.0 / (H * W))
                cen = a - mu
                sv = jnp.sum(cen * cen, axis=1, keepdims=True)
                var = jnp.sum(sv, axis=0, keepdims=True) * (1.0 / (H * W))
                a = cen * lax.rsqrt(var + eps) * g_ref[co] + bt_ref[co]
            padm_ref[co, 1:H + 1, 1:W + 1] = a

        # conv_2 -> LeakyReLU -> residual add with the original input.
        for co in range(C):
            a = lrelu(conv3x3_channel(padm_ref, w2_ref, b2_ref, co))
            o_ref[0, co] = (x_ref[0, co].astype(jnp.float32) + a).astype(o_ref.dtype)

    return kernel


@functools.partial(jax.jit, static_argnames=("relu_slope", "use_hin"))
def hin_res_block(x, w1, b1, gamma, beta, w2, b2, relu_slope=0.2, use_hin=True):
    """Fused HinResBlock forward. x: (B, C, H, W) NCHW, in_size == out_size == C."""
    B, C, H, W = x.shape
    assert C % 2 == 0, "out_size must be even for torch.chunk(…, 2, dim=1)"
    assert w1.shape == (C, C, 3, 3) and w2.shape == (C, C, 3, 3)
    c0 = C // 2

    kernel = _make_hinresblock_kernel(C, H, W, c0, float(relu_slope), _EPS, bool(use_hin))

    img_spec = pl.BlockSpec((1, C, H, W), lambda b: (b, 0, 0, 0))
    smem_spec = pl.BlockSpec(memory_space=pltpu.MemorySpace.SMEM)

    return pl.pallas_call(
        kernel,
        out_shape=jax.ShapeDtypeStruct((B, C, H, W), x.dtype),
        grid=(B,),
        in_specs=[img_spec, smem_spec, smem_spec, smem_spec, smem_spec, smem_spec, smem_spec],
        out_specs=pl.BlockSpec((1, C, H, W), lambda b: (b, 0, 0, 0)),
        scratch_shapes=[
            pltpu.VMEM((C, H + 2, W + 2), jnp.float32),  # padded conv_1 input (x)
            pltpu.VMEM((C, H + 2, W + 2), jnp.float32),  # padded conv_2 input (HIN output)
        ],
        compiler_params=pltpu.CompilerParams(dimension_semantics=("parallel",)),
    )(
        x,
        w1.reshape(-1).astype(jnp.float32),
        b1.astype(jnp.float32),
        gamma.astype(jnp.float32),
        beta.astype(jnp.float32),
        w2.reshape(-1).astype(jnp.float32),
        b2.astype(jnp.float32),
    )


# ---------------------------------------------------------------------------
# Pure-JAX reference mirroring the PyTorch module exactly (for verification).
# ---------------------------------------------------------------------------
def _conv3x3_ref(x, w, b):
    y = lax.conv_general_dilated(
        x, w, window_strides=(1, 1), padding=((1, 1), (1, 1)),
        dimension_numbers=("NCHW", "OIHW", "NCHW"))
    return y + b[None, :, None, None]


def _reference(x, w1, b1, gamma, beta, w2, b2, relu_slope=0.2, use_hin=True, eps=_EPS):
    def lrelu(v):
        return jnp.where(v >= 0, v, relu_slope * v)

    r = lrelu(_conv3x3_ref(x, w1, b1))
    if use_hin:
        c0 = x.shape[1] // 2
        h1, h2 = r[:, :c0], r[:, c0:]
        mu = jnp.mean(h1, axis=(2, 3), keepdims=True)
        var = jnp.mean((h1 - mu) ** 2, axis=(2, 3), keepdims=True)
        h1 = (h1 - mu) / jnp.sqrt(var + eps) * gamma[None, :, None, None] \
             + beta[None, :, None, None]
        r = jnp.concatenate([h1, h2], axis=1)
    r = lrelu(_conv3x3_ref(r, w2, b2))
    return x + r


if __name__ == "__main__":
    key = jax.random.PRNGKey(0)
    B, C, H, W = 2, 4, 16, 16          # in_size = out_size = 4
    ks = jax.random.split(key, 7)

    x = jax.random.normal(ks[0], (B, C, H, W), dtype=jnp.float32)
    w1 = 0.1 * jax.random.normal(ks[1], (C, C, 3, 3), dtype=jnp.float32)
    b1 = 0.1 * jax.random.normal(ks[2], (C,), dtype=jnp.float32)
    w2 = 0.1 * jax.random.normal(ks[3], (C, C, 3, 3), dtype=jnp.float32)
    b2 = 0.1 * jax.random.normal(ks[4], (C,), dtype=jnp.float32)
    c0 = C // 2
    gamma = 1.0 + 0.1 * jax.random.normal(ks[5], (c0,), dtype=jnp.float32)
    beta = 0.1 * jax.random.normal(ks[6], (c0,), dtype=jnp.float32)

    y = hin_res_block(x, w1, b1, gamma, beta, w2, b2)
    jax.block_until_ready(y)

    y_ref = _reference(x, w1, b1, gamma, beta, w2, b2)
    assert y.shape == x.shape
    err = float(jnp.max(jnp.abs(y - y_ref)))
    assert jnp.allclose(y, y_ref, atol=1e-4, rtol=1e-4), f"max abs err = {err}"

    print("KERNEL_OK")
</pallas_src>

<mosaic_0001>
module attributes {stable_mosaic.version = 11 : i64} {
  func.func @kernel(%arg0: i32, %arg1: memref<1x4x16x16xf32, #tpu.memory_space<vmem>>, %arg2: memref<144xf32, #tpu.memory_space<smem>>, %arg3: memref<4xf32, #tpu.memory_space<smem>>, %arg4: memref<2xf32, #tpu.memory_space<smem>>, %arg5: memref<2xf32, #tpu.memory_space<smem>>, %arg6: memref<144xf32, #tpu.memory_space<smem>>, %arg7: memref<4xf32, #tpu.memory_space<smem>>, %arg8: memref<1x4x16x16xf32, #tpu.memory_space<vmem>>, %arg9: memref<4x18x18xf32, #tpu.memory_space<vmem>>, %arg10: memref<4x18x18xf32, #tpu.memory_space<vmem>>) attributes {dimension_semantics = [#tpu.dimension_semantics<parallel>], iteration_bounds = array<i64: 2>, scalar_prefetch = 0 : i64, scratch_operands = 2 : i64, tpu.core_type = #tpu.core_type<tc>, window_params = [{transform_indices = @transform_0, window_bounds = array<i64: 1, 4, 16, 16>}, {transform_indices = @transform_1, window_bounds = array<i64: 144>}, {transform_indices = @transform_2, window_bounds = array<i64: 4>}, {transform_indices = @transform_3, window_bounds = array<i64: 2>}, {transform_indices = @transform_4, window_bounds = array<i64: 2>}, {transform_indices = @transform_5, window_bounds = array<i64: 144>}, {transform_indices = @transform_6, window_bounds = array<i64: 4>}, {transform_indices = @transform_7, window_bounds = array<i64: 1, 4, 16, 16>}]} {
    %cst = arith.constant 0.000000e+00 : f32
    %0 = vector.broadcast %cst : f32 to vector<4x18x18xf32>
    %c0 = arith.constant 0 : index
    %c0_0 = arith.constant 0 : index
    %c0_1 = arith.constant 0 : index
    %1 = vector.load %arg9[%c0, %c0_0, %c0_1] : memref<4x18x18xf32, #tpu.memory_space<vmem>>, vector<4x18x18xf32>
    tpu.vector_store %arg9[%c0, %c0_0, %c0_1], %0 {strides = array<i32>} : memref<4x18x18xf32, #tpu.memory_space<vmem>>, vector<4x18x18xf32>,
    %cst_2 = arith.constant 0.000000e+00 : f32
    %2 = vector.broadcast %cst_2 : f32 to vector<4x18x18xf32>
    %c0_3 = arith.constant 0 : index
    %c0_4 = arith.constant 0 : index
    %c0_5 = arith.constant 0 : index
    %3 = vector.load %arg10[%c0_3, %c0_4, %c0_5] : memref<4x18x18xf32, #tpu.memory_space<vmem>>, vector<4x18x18xf32>
    tpu.vector_store %arg10[%c0_3, %c0_4, %c0_5], %2 {strides = array<i32>} : memref<4x18x18xf32, #tpu.memory_space<vmem>>, vector<4x18x18xf32>,
    %c0_6 = arith.constant 0 : index
    %c0_7 = arith.constant 0 : index
    %c0_8 = arith.constant 0 : index
    %c0_9 = arith.constant 0 : index
    %4 = vector.load %arg1[%c0_6, %c0_7, %c0_8, %c0_9] : memref<1x4x16x16xf32, #tpu.memory_space<vmem>>, vector<1x4x16x16xf32>
    %5 = vector.shape_cast %4 : vector<1x4x16x16xf32> to vector<4x16x16xf32>
    %c0_10 = arith.constant 0 : index
    %c1 = arith.constant 1 : index
    %c1_11 = arith.constant 1 : index
    %6 = vector.load %arg9[%c0_10, %c1, %c1_11] : memref<4x18x18xf32, #tpu.memory_space<vmem>>, vector<4x16x16xf32>
    tpu.vector_store %arg9[%c0_10, %c1, %c1_11], %5 {strides = array<i32>} : memref<4x18x18xf32, #tpu.memory_space<vmem>>, vector<4x16x16xf32>,
    %cst_12 = arith.constant 0.000000e+00 : f32
    %7 = vector.broadcast %cst_12 : f32 to vector<16x16xf32>
    %c0_13 = arith.constant 0 : index
    %8 = memref.load %arg3[%c0_13] : memref<4xf32, #tpu.memory_space<smem>>
    %9 = vector.broadcast %8 : f32 to vector<16x16xf32>
    %10 = arith.addf %7, %9 : vector<16x16xf32>
    %c0_14 = arith.constant 0 : index
    %11 = memref.load %arg2[%c0_14] : memref<144xf32, #tpu.memory_space<smem>>
    %c0_15 = arith.constant 0 : index
    %c0_16 = arith.constant 0 : index
    %c0_17 = arith.constant 0 : index
    %12 = vector.load %arg9[%c0_15, %c0_16, %c0_17] : memref<4x18x18xf32, #tpu.memory_space<vmem>>, vector<1x16x16xf32>
    %13 = vector.shape_cast %12 : vector<1x16x16xf32> to vector<16x16xf32>
    %14 = vector.broadcast %11 : f32 to vector<16x16xf32>
    %15 = arith.mulf %14, %13 : vector<16x16xf32>
    %16 = arith.addf %10, %15 : vector<16x16xf32>
    %c1_18 = arith.constant 1 : index
    %17 = memref.load %arg2[%c1_18] : memref<144xf32, #tpu.memory_space<smem>>
    %c0_19 = arith.constant 0 : index
    %c0_20 = arith.constant 0 : index
    %c1_21 = arith.constant 1 : index
    %18 = vector.load %arg9[%c0_19, %c0_20, %c1_21] : memref<4x18x18xf32, #tpu.memory_space<vmem>>, vector<1x16x16xf32>
    %19 = vector.shape_cast %18 : vector<1x16x16xf32> to vector<16x16xf32>
    %20 = vector.broadcast %17 : f32 to vector<16x16xf32>
    %21 = arith.mulf %20, %19 : vector<16x16xf32>
    %22 = arith.addf %16, %21 : vector<16x16xf32>
    %c2 = arith.constant 2 : index
    %23 = memref.load %arg2[%c2] : memref<144xf32, #tpu.memory_space<smem>>
    %c0_22 = arith.constant 0 : index
    %c0_23 = arith.constant 0 : index
    %c2_24 = arith.constant 2 : index
    %24 = vector.load %arg9[%c0_22, %c0_23, %c2_24] : memref<4x18x18xf32, #tpu.memory_space<vmem>>, vector<1x16x16xf32>
    %25 = vector.shape_cast %24 : vector<1x16x16xf32> to vector<16x16xf32>
    %26 = vector.broadcast %23 : f32 to vector<16x16xf32>
    %27 = arith.mulf %26, %25 : vector<16x16xf32>
    %28 = arith.addf %22, %27 : vector<16x16xf32>
    %c3 = arith.constant 3 : index
    %29 = memref.load %arg2[%c3] : memref<144xf32, #tpu.memory_space<smem>>
    %c0_25 = arith.constant 0 : index
    %c1_26 = arith.constant 1 : index
    %c0_27 = arith.constant 0 : index
    %30 = vector.load %arg9[%c0_25, %c1_26, %c0_27] : memref<4x18x18xf32, #tpu.memory_space<vmem>>, vector<1x16x16xf32>
    %31 = vector.shape_cast %30 : vector<1x16x16xf32> to vector<16x16xf32>
    %32 = vector.broadcast %29 : f32 to vector<16x16xf32>
    %33 = arith.mulf %32, %31 : vector<16x16xf32>
    %34 = arith.addf %28, %33 : vector<16x16xf32>
    %c4 = arith.constant 4 : index
    %35 = memref.load %arg2[%c4] : memref<144xf32, #tpu.memory_space<smem>>
    %c0_28 = arith.constant 0 : index
    %c1_29 = arith.constant 1 : index
    %c1_30 = arith.constant 1 : index
    %36 = vector.load %arg9[%c0_28, %c1_29, %c1_30] : memref<4x18x18xf32, #tpu.memory_space<vmem>>, vector<1x16x16xf32>
    %37 = vector.shape_cast %36 : vector<1x16x16xf32> to vector<16x16xf32>
    %38 = vector.broadcast %35 : f32 to vector<16x16xf32>
    %39 = arith.mulf %38, %37 : vector<16x16xf32>
    %40 = arith.addf %34, %39 : vector<16x16xf32>
    %c5 = arith.constant 5 : index
    %41 = memref.load %arg2[%c5] : memref<144xf32, #tpu.memory_space<smem>>
    %c0_31 = arith.constant 0 : index
    %c1_32 = arith.constant 1 : index
    %c2_33 = arith.constant 2 : index
    %42 = vector.load %arg9[%c0_31, %c1_32, %c2_33] : memref<4x18x18xf32, #tpu.memory_space<vmem>>, vector<1x16x16xf32>
    %43 = vector.shape_cast %42 : vector<1x16x16xf32> to vector<16x16xf32>
    %44 = vector.broadcast %41 : f32 to vector<16x16xf32>
    %45 = arith.mulf %44, %43 : vector<16x16xf32>
    %46 = arith.addf %40, %45 : vector<16x16xf32>
    %c6 = arith.constant 6 : index
    %47 = memref.load %arg2[%c6] : memref<144xf32, #tpu.memory_space<smem>>
    %c0_34 = arith.constant 0 : index
    %c2_35 = arith.constant 2 : index
    %c0_36 = arith.constant 0 : index
    %48 = vector.load %arg9[%c0_34, %c2_35, %c0_36] : memref<4x18x18xf32, #tpu.memory_space<vmem>>, vector<1x16x16xf32>
    %49 = vector.shape_cast %48 : vector<1x16x16xf32> to vector<16x16xf32>
    %50 = vector.broadcast %47 : f32 to vector<16x16xf32>
    %51 = arith.mulf %50, %49 : vector<16x16xf32>
    %52 = arith.addf %46, %51 : vector<16x16xf32>
    %c7 = arith.constant 7 : index
    %53 = memref.load %arg2[%c7] : memref<144xf32, #tpu.memory_space<smem>>
    %c0_37 = arith.constant 0 : index
    %c2_38 = arith.constant 2 : index
    %c1_39 = arith.constant 1 : index
    %54 = vector.load %arg9[%c0_37, %c2_38, %c1_39] : memref<4x18x18xf32, #tpu.memory_space<vmem>>, vector<1x16x16xf32>
    %55 = vector.shape_cast %54 : vector<1x16x16xf32> to vector<16x16xf32>
    %56 = vector.broadcast %53 : f32 to vector<16x16xf32>
    %57 = arith.mulf %56, %55 : vector<16x16xf32>
    %58 = arith.addf %52, %57 : vector<16x16xf32>
    %c8 = arith.constant 8 : index
    %59 = memref.load %arg2[%c8] : memref<144xf32, #tpu.memory_space<smem>>
    %c0_40 = arith.constant 0 : index
    %c2_41 = arith.constant 2 : index
    %c2_42 = arith.constant 2 : index
    %60 = vector.load %arg9[%c0_40, %c2_41, %c2_42] : memref<4x18x18xf32, #tpu.memory_space<vmem>>, vector<1x16x16xf32>
    %61 = vector.shape_cast %60 : vector<1x16x16xf32> to vector<16x16xf32>
    %62 = vector.broadcast %59 : f32 to vector<16x16xf32>
    %63 = arith.mulf %62, %61 : vector<16x16xf32>
    %64 = arith.addf %58, %63 : vector<16x16xf32>
    %c9 = arith.constant 9 : index
    %65 = memref.load %arg2[%c9] : memref<144xf32, #tpu.memory_space<smem>>
    %c1_43 = arith.constant 1 : index
    %c0_44 = arith.constant 0 : index
    %c0_45 = arith.constant 0 : index
    %66 = vector.load %arg9[%c1_43, %c0_44, %c0_45] : memref<4x18x18xf32, #tpu.memory_space<vmem>>, vector<1x16x16xf32>
    %67 = vector.shape_cast %66 : vector<1x16x16xf32> to vector<16x16xf32>
    %68 = vector.broadcast %65 : f32 to vector<16x16xf32>
    %69 = arith.mulf %68, %67 : vector<16x16xf32>
    %70 = arith.addf %64, %69 : vector<16x16xf32>
    %c10 = arith.constant 10 : index
    %71 = memref.load %arg2[%c10] : memref<144xf32, #tpu.memory_space<smem>>
    %c1_46 = arith.constant 1 : index
    %c0_47 = arith.constant 0 : index
    %c1_48 = arith.constant 1 : index
    %72 = vector.load %arg9[%c1_46, %c0_47, %c1_48] : memref<4x18x18xf32, #tpu.memory_space<vmem>>, vector<1x16x16xf32>
    %73 = vector.shape_cast %72 : vector<1x16x16xf32> to vector<16x16xf32>
    %74 = vector.broadcast %71 : f32 to vector<16x16xf32>
    %75 = arith.mulf %74, %73 : vector<16x16xf32>
    %76 = arith.addf %70, %75 : vector<16x16xf32>
    %c11 = arith.constant 11 : index
    %77 = memref.load %arg2[%c11] : memref<144xf32, #tpu.memory_space<smem>>
    %c1_49 = arith.constant 1 : index
    %c0_50 = arith.constant 0 : index
    %c2_51 = arith.constant 2 : index
    %78 = vector.load %arg9[%c1_49, %c0_50, %c2_51] : memref<4x18x18xf32, #tpu.memory_space<vmem>>, vector<1x16x16xf32>
    %79 = vector.shape_cast %78 : vector<1x16x16xf32> to vector<16x16xf32>
    %80 = vector.broadcast %77 : f32 to vector<16x16xf32>
    %81 = arith.mulf %80, %79 : vector<16x16xf32>
    %82 = arith.addf %76, %81 : vector<16x16xf32>
    %c12 = arith.constant 12 : index
    %83 = memref.load %arg2[%c12] : memref<144xf32, #tpu.memory_space<smem>>
    %c1_52 = arith.constant 1 : index
    %c1_53 = arith.constant 1 : index
    %c0_54 = arith.constant 0 : index
    %84 = vector.load %arg9[%c1_52, %c1_53, %c0_54] : memref<4x18x18xf32, #tpu.memory_space<vmem>>, vector<1x16x16xf32>
    %85 = vector.shape_cast %84 : vector<1x16x16xf32> to vector<16x16xf32>
    %86 = vector.broadcast %83 : f32 to vector<16x16xf32>
    %87 = arith.mulf %86, %85 : vector<16x16xf32>
    %88 = arith.addf %82, %87 : vector<16x16xf32>
    %c13 = arith.constant 13 : index
    %89 = memref.load %arg2[%c13] : memref<144xf32, #tpu.memory_space<smem>>
    %c1_55 = arith.constant 1 : index
    %c1_56 = arith.constant 1 : index
    %c1_57 = arith.constant 1 : index
    %90 = vector.load %arg9[%c1_55, %c1_56, %c1_57] : memref<4x18x18xf32, #tpu.memory_space<vmem>>, vector<1x16x16xf32>
    %91 = vector.shape_cast %90 : vector<1x16x16xf32> to vector<16x16xf32>
    %92 = vector.broadcast %89 : f32 to vector<16x16xf32>
    %93 = arith.mulf %92, %91 : vector<16x16xf32>
    %94 = arith.addf %88, %93 : vector<16x16xf32>
    %c14 = arith.constant 14 : index
    %95 = memref.load %arg2[%c14] : memref<144xf32, #tpu.memory_space<smem>>
    %c1_58 = arith.constant 1 : index
    %c1_59 = arith.constant 1 : index
    %c2_60 = arith.constant 2 : index
    %96 = vector.load %arg9[%c1_58, %c1_59, %c2_60] : memref<4x18x18xf32, #tpu.memory_space<vmem>>, vector<1x16x16xf32>
    %97 = vector.shape_cast %96 : vector<1x16x16xf32> to vector<16x16xf32>
    %98 = vector.broadcast %95 : f32 to vector<16x16xf32>
    %99 = arith.mulf %98, %97 : vector<16x16xf32>
    %100 = arith.addf %94, %99 : vector<16x16xf32>
    %c15 = arith.constant 15 : index
    %101 = memref.load %arg2[%c15] : memref<144xf32, #tpu.memory_space<smem>>
    %c1_61 = arith.constant 1 : index
    %c2_62 = arith.constant 2 : index
    %c0_63 = arith.constant 0 : index
    %102 = vector.load %arg9[%c1_61, %c2_62, %c0_63] : memref<4x18x18xf32, #tpu.memory_space<vmem>>, vector<1x16x16xf32>
    %103 = vector.shape_cast %102 : vector<1x16x16xf32> to vector<16x16xf32>
    %104 = vector.broadcast %101 : f32 to vector<16x16xf32>
    %105 = arith.mulf %104, %103 : vector<16x16xf32>
    %106 = arith.addf %100, %105 : vector<16x16xf32>
    %c16 = arith.constant 16 : index
    %107 = memref.load %arg2[%c16] : memref<144xf32, #tpu.memory_space<smem>>
    %c1_64 = arith.constant 1 : index
    %c2_65 = arith.constant 2 : index
    %c1_66 = arith.constant 1 : index
    %108 = vector.load %arg9[%c1_64, %c2_65, %c1_66] : memref<4x18x18xf32, #tpu.memory_space<vmem>>, vector<1x16x16xf32>
    %109 = vector.shape_cast %108 : vector<1x16x16xf32> to vector<16x16xf32>
    %110 = vector.broadcast %107 : f32 to vector<16x16xf32>
    %111 = arith.mulf %110, %109 : vector<16x16xf32>
    %112 = arith.addf %106, %111 : vector<16x16xf32>
    %c17 = arith.constant 17 : index
    %113 = memref.load %arg2[%c17] : memref<144xf32, #tpu.memory_space<smem>>
    %c1_67 = arith.constant 1 : index
    %c2_68 = arith.constant 2 : index
    %c2_69 = arith.constant 2 : index
    %114 = vector.load %arg9[%c1_67, %c2_68, %c2_69] : memref<4x18x18xf32, #tpu.memory_space<vmem>>, vector<1x16x16xf32>
    %115 = vector.shape_cast %114 : vector<1x16x16xf32> to vector<16x16xf32>
    %116 = vector.broadcast %113 : f32 to vector<16x16xf32>
    %117 = arith.mulf %116, %115 : vector<16x16xf32>
    %118 = arith.addf %112, %117 : vector<16x16xf32>
    %c18 = arith.constant 18 : index
    %119 = memref.load %arg2[%c18] : memref<144xf32, #tpu.memory_space<smem>>
    %c2_70 = arith.constant 2 : index
    %c0_71 = arith.constant 0 : index
    %c0_72 = arith.constant 0 : index
    %120 = vector.load %arg9[%c2_70, %c0_71, %c0_72] : memref<4x18x18xf32, #tpu.memory_space<vmem>>, vector<1x16x16xf32>
    %121 = vector.shape_cast %120 : vector<1x16x16xf32> to vector<16x16xf32>
    %122 = vector.broadcast %119 : f32 to vector<16x16xf32>
    %123 = arith.mulf %122, %121 : vector<16x16xf32>
    %124 = arith.addf %118, %123 : vector<16x16xf32>
    %c19 = arith.constant 19 : index
    %125 = memref.load %arg2[%c19] : memref<144xf32, #tpu.memory_space<smem>>
    %c2_73 = arith.constant 2 : index
    %c0_74 = arith.constant 0 : index
    %c1_75 = arith.constant 1 : index
    %126 = vector.load %arg9[%c2_73, %c0_74, %c1_75] : memref<4x18x18xf32, #tpu.memory_space<vmem>>, vector<1x16x16xf32>
    %127 = vector.shape_cast %126 : vector<1x16x16xf32> to vector<16x16xf32>
    %128 = vector.broadcast %125 : f32 to vector<16x16xf32>
    %129 = arith.mulf %128, %127 : vector<16x16xf32>
    %130 = arith.addf %124, %129 : vector<16x16xf32>
    %c20 = arith.constant 20 : index
    %131 = memref.load %arg2[%c20] : memref<144xf32, #tpu.memory_space<smem>>
    %c2_76 = arith.constant 2 : index
    %c0_77 = arith.constant 0 : index
    %c2_78 = arith.constant 2 : index
    %132 = vector.load %arg9[%c2_76, %c0_77, %c2_78] : memref<4x18x18xf32, #tpu.memory_space<vmem>>, vector<1x16x16xf32>
    %133 = vector.shape_cast %132 : vector<1x16x16xf32> to vector<16x16xf32>
    %134 = vector.broadcast %131 : f32 to vector<16x16xf32>
    %135 = arith.mulf %134, %133 : vector<16x16xf32>
    %136 = arith.addf %130, %135 : vector<16x16xf32>
    %c21 = arith.constant 21 : index
    %137 = memref.load %arg2[%c21] : memref<144xf32, #tpu.memory_space<smem>>
    %c2_79 = arith.constant 2 : index
    %c1_80 = arith.constant 1 : index
    %c0_81 = arith.constant 0 : index
    %138 = vector.load %arg9[%c2_79, %c1_80, %c0_81] : memref<4x18x18xf32, #tpu.memory_space<vmem>>, vector<1x16x16xf32>
    %139 = vector.shape_cast %138 : vector<1x16x16xf32> to vector<16x16xf32>
    %140 = vector.broadcast %137 : f32 to vector<16x16xf32>
    %141 = arith.mulf %140, %139 : vector<16x16xf32>
    %142 = arith.addf %136, %141 : vector<16x16xf32>
    %c22 = arith.constant 22 : index
    %143 = memref.load %arg2[%c22] : memref<144xf32, #tpu.memory_space<smem>>
    %c2_82 = arith.constant 2 : index
    %c1_83 = arith.constant 1 : index
    %c1_84 = arith.constant 1 : index
    %144 = vector.load %arg9[%c2_82, %c1_83, %c1_84] : memref<4x18x18xf32, #tpu.memory_space<vmem>>, vector<1x16x16xf32>
    %145 = vector.shape_cast %144 : vector<1x16x16xf32> to vector<16x16xf32>
    %146 = vector.broadcast %143 : f32 to vector<16x16xf32>
    %147 = arith.mulf %146, %145 : vector<16x16xf32>
    %148 = arith.addf %142, %147 : vector<16x16xf32>
    %c23 = arith.constant 23 : index
    %149 = memref.load %arg2[%c23] : memref<144xf32, #tpu.memory_space<smem>>
    %c2_85 = arith.constant 2 : index
    %c1_86 = arith.constant 1 : index
    %c2_87 = arith.constant 2 : index
    %150 = vector.load %arg9[%c2_85, %c1_86, %c2_87] : memref<4x18x18xf32, #tpu.memory_space<vmem>>, vector<1x16x16xf32>
    %151 = vector.shape_cast %150 : vector<1x16x16xf32> to vector<16x16xf32>
    %152 = vector.broadcast %149 : f32 to vector<16x16xf32>
    %153 = arith.mulf %152, %151 : vector<16x16xf32>
    %154 = arith.addf %148, %153 : vector<16x16xf32>
    %c24 = arith.constant 24 : index
    %155 = memref.load %arg2[%c24] : memref<144xf32, #tpu.memory_space<smem>>
    %c2_88 = arith.constant 2 : index
    %c2_89 = arith.constant 2 : index
    %c0_90 = arith.constant 0 : index
    %156 = vector.load %arg9[%c2_88, %c2_89, %c0_90] : memref<4x18x18xf32, #tpu.memory_space<vmem>>, vector<1x16x16xf32>
    %157 = vector.shape_cast %156 : vector<1x16x16xf32> to vector<16x16xf32>
    %158 = vector.broadcast %155 : f32 to vector<16x16xf32>
    %159 = arith.mulf %158, %157 : vector<16x16xf32>
    %160 = arith.addf %154, %159 : vector<16x16xf32>
    %c25 = arith.constant 25 : index
    %161 = memref.load %arg2[%c25] : memref<144xf32, #tpu.memory_space<smem>>
    %c2_91 = arith.constant 2 : index
    %c2_92 = arith.constant 2 : index
    %c1_93 = arith.constant 1 : index
    %162 = vector.load %arg9[%c2_91, %c2_92, %c1_93] : memref<4x18x18xf32, #tpu.memory_space<vmem>>, vector<1x16x16xf32>
    %163 = vector.shape_cast %162 : vector<1x16x16xf32> to vector<16x16xf32>
    %164 = vector.broadcast %161 : f32 to vector<16x16xf32>
    %165 = arith.mulf %164, %163 : vector<16x16xf32>
    %166 = arith.addf %160, %165 : vector<16x16xf32>
    %c26 = arith.constant 26 : index
    %167 = memref.load %arg2[%c26] : memref<144xf32, #tpu.memory_space<smem>>
    %c2_94 = arith.constant 2 : index
    %c2_95 = arith.constant 2 : index
    %c2_96 = arith.constant 2 : index
    %168 = vector.load %arg9[%c2_94, %c2_95, %c2_96] : memref<4x18x18xf32, #tpu.memory_space<vmem>>, vector<1x16x16xf32>
    %169 = vector.shape_cast %168 : vector<1x16x16xf32> to vector<16x16xf32>
    %170 = vector.broadcast %167 : f32 to vector<16x16xf32>
    %171 = arith.mulf %170, %169 : vector<16x16xf32>
    %172 = arith.addf %166, %171 : vector<16x16xf32>
    %c27 = arith.constant 27 : index
    %173 = memref.load %arg2[%c27] : memref<144xf32, #tpu.memory_space<smem>>
    %c3_97 = arith.constant 3 : index
    %c0_98 = arith.constant 0 : index
    %c0_99 = arith.constant 0 : index
    %174 = vector.load %arg9[%c3_97, %c0_98, %c0_99] : memref<4x18x18xf32, #tpu.memory_space<vmem>>, vector<1x16x16xf32>
    %175 = vector.shape_cast %174 : vector<1x16x16xf32> to vector<16x16xf32>
    %176 = vector.broadcast %173 : f32 to vector<16x16xf32>
    %177 = arith.mulf %176, %175 : vector<16x16xf32>
    %178 = arith.addf %172, %177 : vector<16x16xf32>
    %c28 = arith.constant 28 : index
    %179 = memref.load %arg2[%c28] : memref<144xf32, #tpu.memory_space<smem>>
    %c3_100 = arith.constant 3 : index
    %c0_101 = arith.constant 0 : index
    %c1_102 = arith.constant 1 : index
    %180 = vector.load %arg9[%c3_100, %c0_101, %c1_102] : memref<4x18x18xf32, #tpu.memory_space<vmem>>, vector<1x16x16xf32>
    %181 = vector.shape_cast %180 : vector<1x16x16xf32> to vector<16x16xf32>
    %182 = vector.broadcast %179 : f32 to vector<16x16xf32>
    %183 = arith.mulf %182, %181 : vector<16x16xf32>
    %184 = arith.addf %178, %183 : vector<16x16xf32>
    %c29 = arith.constant 29 : index
    %185 = memref.load %arg2[%c29] : memref<144xf32, #tpu.memory_space<smem>>
    %c3_103 = arith.constant 3 : index
    %c0_104 = arith.constant 0 : index
    %c2_105 = arith.constant 2 : index
    %186 = vector.load %arg9[%c3_103, %c0_104, %c2_105] : memref<4x18x18xf32, #tpu.memory_space<vmem>>, vector<1x16x16xf32>
    %187 = vector.shape_cast %186 : vector<1x16x16xf32> to vector<16x16xf32>
    %188 = vector.broadcast %185 : f32 to vector<16x16xf32>
    %189 = arith.mulf %188, %187 : vector<16x16xf32>
    %190 = arith.addf %184, %189 : vector<16x16xf32>
    %c30 = arith.constant 30 : index
    %191 = memref.load %arg2[%c30] : memref<144xf32, #tpu.memory_space<smem>>
    %c3_106 = arith.constant 3 : index
    %c1_107 = arith.constant 1 : index
    %c0_108 = arith.constant 0 : index
    %192 = vector.load %arg9[%c3_106, %c1_107, %c0_108] : memref<4x18x18xf32, #tpu.memory_space<vmem>>, vector<1x16x16xf32>
    %193 = vector.shape_cast %192 : vector<1x16x16xf32> to vector<16x16xf32>
    %194 = vector.broadcast %191 : f32 to vector<16x16xf32>
    %195 = arith.mulf %194, %193 : vector<16x16xf32>
    %196 = arith.addf %190, %195 : vector<16x16xf32>
    %c31 = arith.constant 31 : index
    %197 = memref.load %arg2[%c31] : memref<144xf32, #tpu.memory_space<smem>>
    %c3_109 = arith.constant 3 : index
    %c1_110 = arith.constant 1 : index
    %c1_111 = arith.constant 1 : index
    %198 = vector.load %arg9[%c3_109, %c1_110, %c1_111] : memref<4x18x18xf32, #tpu.memory_space<vmem>>, vector<1x16x16xf32>
    %199 = vector.shape_cast %198 : vector<1x16x16xf32> to vector<16x16xf32>
    %200 = vector.broadcast %197 : f32 to vector<16x16xf32>
    %201 = arith.mulf %200, %199 : vector<16x16xf32>
    %202 = arith.addf %196, %201 : vector<16x16xf32>
    %c32 = arith.constant 32 : index
    %203 = memref.load %arg2[%c32] : memref<144xf32, #tpu.memory_space<smem>>
    %c3_112 = arith.constant 3 : index
    %c1_113 = arith.constant 1 : index
    %c2_114 = arith.constant 2 : index
    %204 = vector.load %arg9[%c3_112, %c1_113, %c2_114] : memref<4x18x18xf32, #tpu.memory_space<vmem>>, vector<1x16x16xf32>
    %205 = vector.shape_cast %204 : vector<1x16x16xf32> to vector<16x16xf32>
    %206 = vector.broadcast %203 : f32 to vector<16x16xf32>
    %207 = arith.mulf %206, %205 : vector<16x16xf32>
    %208 = arith.addf %202, %207 : vector<16x16xf32>
    %c33 = arith.constant 33 : index
    %209 = memref.load %arg2[%c33] : memref<144xf32, #tpu.memory_space<smem>>
    %c3_115 = arith.constant 3 : index
    %c2_116 = arith.constant 2 : index
    %c0_117 = arith.constant 0 : index
    %210 = vector.load %arg9[%c3_115, %c2_116, %c0_117] : memref<4x18x18xf32, #tpu.memory_space<vmem>>, vector<1x16x16xf32>
    %211 = vector.shape_cast %210 : vector<1x16x16xf32> to vector<16x16xf32>
    %212 = vector.broadcast %209 : f32 to vector<16x16xf32>
    %213 = arith.mulf %212, %211 : vector<16x16xf32>
    %214 = arith.addf %208, %213 : vector<16x16xf32>
    %c34 = arith.constant 34 : index
    %215 = memref.load %arg2[%c34] : memref<144xf32, #tpu.memory_space<smem>>
    %c3_118 = arith.constant 3 : index
    %c2_119 = arith.constant 2 : index
    %c1_120 = arith.constant 1 : index
    %216 = vector.load %arg9[%c3_118, %c2_119, %c1_120] : memref<4x18x18xf32, #tpu.memory_space<vmem>>, vector<1x16x16xf32>
    %217 = vector.shape_cast %216 : vector<1x16x16xf32> to vector<16x16xf32>
    %218 = vector.broadcast %215 : f32 to vector<16x16xf32>
    %219 = arith.mulf %218, %217 : vector<16x16xf32>
    %220 = arith.addf %214, %219 : vector<16x16xf32>
    %c35 = arith.constant 35 : index
    %221 = memref.load %arg2[%c35] : memref<144xf32, #tpu.memory_space<smem>>
    %c3_121 = arith.constant 3 : index
    %c2_122 = arith.constant 2 : index
    %c2_123 = arith.constant 2 : index
    %222 = vector.load %arg9[%c3_121, %c2_122, %c2_123] : memref<4x18x18xf32, #tpu.memory_space<vmem>>, vector<1x16x16xf32>
    %223 = vector.shape_cast %222 : vector<1x16x16xf32> to vector<16x16xf32>
    %224 = vector.broadcast %221 : f32 to vector<16x16xf32>
    %225 = arith.mulf %224, %223 : vector<16x16xf32>
    %226 = arith.addf %220, %225 : vector<16x16xf32>
    %cst_124 = arith.constant 0.000000e+00 : f32
    %227 = vector.broadcast %cst_124 : f32 to vector<16x16xf32>
    %228 = arith.cmpf oge, %226, %227 : vector<16x16xf32>
    %cst_125 = arith.constant 2.000000e-01 : f32
    %229 = vector.broadcast %cst_125 : f32 to vector<16x16xf32>
    %230 = arith.mulf %229, %226 : vector<16x16xf32>
    %231 = arith.select %228, %226, %230 : vector<16x16xi1>, vector<16x16xf32>
    %cst_126 = arith.constant dense<0.000000e+00> : vector<16xf32>
    %232 = vector.multi_reduction <add>, %231, %cst_126 [1] : vector<16x16xf32> to vector<16xf32>
    %233 = vector.shape_cast %232 : vector<16xf32> to vector<16x1xf32>
    %cst_127 = arith.constant dense<0.000000e+00> : vector<1xf32>
    %234 = vector.multi_reduction <add>, %233, %cst_127 [0] : vector<16x1xf32> to vector<1xf32>
    %235 = vector.shape_cast %234 : vector<1xf32> to vector<1x1xf32>
    %cst_128 = arith.constant 3.906250e-03 : f32
    %236 = vector.broadcast %cst_128 : f32 to vector<1x1xf32>
    %237 = arith.mulf %235, %236 : vector<1x1xf32>
    %238 = vector.broadcast %237 : vector<1x1xf32> to vector<16x16xf32>
    %239 = arith.subf %231, %238 : vector<16x16xf32>
    %240 = arith.mulf %239, %239 : vector<16x16xf32>
    %cst_129 = arith.constant dense<0.000000e+00> : vector<16xf32>
    %241 = vector.multi_reduction <add>, %240, %cst_129 [1] : vector<16x16xf32> to vector<16xf32>
    %242 = vector.shape_cast %241 : vector<16xf32> to vector<16x1xf32>
    %cst_130 = arith.constant dense<0.000000e+00> : vector<1xf32>
    %243 = vector.multi_reduction <add>, %242, %cst_130 [0] : vector<16x1xf32> to vector<1xf32>
    %244 = vector.shape_cast %243 : vector<1xf32> to vector<1x1xf32>
    %cst_131 = arith.constant 3.906250e-03 : f32
    %245 = vector.broadcast %cst_131 : f32 to vector<1x1xf32>
    %246 = arith.mulf %244, %245 : vector<1x1xf32>
    %cst_132 = arith.constant 9.99999974E-6 : f32
    %247 = vector.broadcast %cst_132 : f32 to vector<1x1xf32>
    %248 = arith.addf %246, %247 : vector<1x1xf32>
    %249 = math.rsqrt %248 : vector<1x1xf32>
    %250 = vector.broadcast %249 : vector<1x1xf32> to vector<16x16xf32>
    %251 = arith.mulf %239, %250 : vector<16x16xf32>
    %c0_133 = arith.constant 0 : index
    %252 = memref.load %arg4[%c0_133] : memref<2xf32, #tpu.memory_space<smem>>
    %253 = vector.broadcast %252 : f32 to vector<16x16xf32>
    %254 = arith.mulf %251, %253 : vector<16x16xf32>
    %c0_134 = arith.constant 0 : index
    %255 = memref.load %arg5[%c0_134] : memref<2xf32, #tpu.memory_space<smem>>
    %256 = vector.broadcast %255 : f32 to vector<16x16xf32>
    %257 = arith.addf %254, %256 : vector<16x16xf32>
    %c0_135 = arith.constant 0 : index
    %c1_136 = arith.constant 1 : index
    %c1_137 = arith.constant 1 : index
    %258 = vector.load %arg10[%c0_135, %c1_136, %c1_137] : memref<4x18x18xf32, #tpu.memory_space<vmem>>, vector<1x16x16xf32>
    %259 = vector.shape_cast %258 : vector<1x16x16xf32> to vector<16x16xf32>
    %260 = vector.shape_cast %257 : vector<16x16xf32> to vector<1x16x16xf32>
    tpu.vector_store %arg10[%c0_135, %c1_136, %c1_137], %260 {strides = array<i32>} : memref<4x18x18xf32, #tpu.memory_space<vmem>>, vector<1x16x16xf32>,
    %cst_138 = arith.constant 0.000000e+00 : f32
    %261 = vector.broadcast %cst_138 : f32 to vector<16x16xf32>
    %c1_139 = arith.constant 1 : index
    %262 = memref.load %arg3[%c1_139] : memref<4xf32, #tpu.memory_space<smem>>
    %263 = vector.broadcast %262 : f32 to vector<16x16xf32>
    %264 = arith.addf %261, %263 : vector<16x16xf32>
    %c36 = arith.constant 36 : index
    %265 = memref.load %arg2[%c36] : memref<144xf32, #tpu.memory_space<smem>>
    %c0_140 = arith.constant 0 : index
    %c0_141 = arith.constant 0 : index
    %c0_142 = arith.constant 0 : index
    %266 = vector.load %arg9[%c0_140, %c0_141, %c0_142] : memref<4x18x18xf32, #tpu.memory_space<vmem>>, vector<1x16x16xf32>
    %267 = vector.shape_cast %266 : vector<1x16x16xf32> to vector<16x16xf32>
    %268 = vector.broadcast %265 : f32 to vector<16x16xf32>
    %269 = arith.mulf %268, %267 : vector<16x16xf32>
    %270 = arith.addf %264, %269 : vector<16x16xf32>
    %c37 = arith.constant 37 : index
    %271 = memref.load %arg2[%c37] : memref<144xf32, #tpu.memory_space<smem>>
    %c0_143 = arith.constant 0 : index
    %c0_144 = arith.constant 0 : index
    %c1_145 = arith.constant 1 : index
    %272 = vector.load %arg9[%c0_143, %c0_144, %c1_145] : memref<4x18x18xf32, #tpu.memory_space<vmem>>, vector<1x16x16xf32>
    %273 = vector.shape_cast %272 : vector<1x16x16xf32> to vector<16x16xf32>
    %274 = vector.broadcast %271 : f32 to vector<16x16xf32>
    %275 = arith.mulf %274, %273 : vector<16x16xf32>
    %276 = arith.addf %270, %275 : vector<16x16xf32>
    %c38 = arith.constant 38 : index
    %277 = memref.load %arg2[%c38] : memref<144xf32, #tpu.memory_space<smem>>
    %c0_146 = arith.constant 0 : index
    %c0_147 = arith.constant 0 : index
    %c2_148 = arith.constant 2 : index
    %278 = vector.load %arg9[%c0_146, %c0_147, %c2_148] : memref<4x18x18xf32, #tpu.memory_space<vmem>>, vector<1x16x16xf32>
    %279 = vector.shape_cast %278 : vector<1x16x16xf32> to vector<16x16xf32>
    %280 = vector.broadcast %277 : f32 to vector<16x16xf32>
    %281 = arith.mulf %280, %279 : vector<16x16xf32>
    %282 = arith.addf %276, %281 : vector<16x16xf32>
    %c39 = arith.constant 39 : index
    %283 = memref.load %arg2[%c39] : memref<144xf32, #tpu.memory_space<smem>>
    %c0_149 = arith.constant 0 : index
    %c1_150 = arith.constant 1 : index
    %c0_151 = arith.constant 0 : index
    %284 = vector.load %arg9[%c0_149, %c1_150, %c0_151] : memref<4x18x18xf32, #tpu.memory_space<vmem>>, vector<1x16x16xf32>
    %285 = vector.shape_cast %284 : vector<1x16x16xf32> to vector<16x16xf32>
    %286 = vector.broadcast %283 : f32 to vector<16x16xf32>
    %287 = arith.mulf %286, %285 : vector<16x16xf32>
    %288 = arith.addf %282, %287 : vector<16x16xf32>
    %c40 = arith.constant 40 : index
    %289 = memref.load %arg2[%c40] : memref<144xf32, #tpu.memory_space<smem>>
    %c0_152 = arith.constant 0 : index
    %c1_153 = arith.constant 1 : index
    %c1_154 = arith.constant 1 : index
    %290 = vector.load %arg9[%c0_152, %c1_153, %c1_154] : memref<4x18x18xf32, #tpu.memory_space<vmem>>, vector<1x16x16xf32>
    %291 = vector.shape_cast %290 : vector<1x16x16xf32> to vector<16x16xf32>
    %292 = vector.broadcast %289 : f32 to vector<16x16xf32>
    %293 = arith.mulf %292, %291 : vector<16x16xf32>
    %294 = arith.addf %288, %293 : vector<16x16xf32>
    %c41 = arith.constant 41 : index
    %295 = memref.load %arg2[%c41] : memref<144xf32, #tpu.memory_space<smem>>
    %c0_155 = arith.constant 0 : index
    %c1_156 = arith.constant 1 : index
    %c2_157 = arith.constant 2 : index
    %296 = vector.load %arg9[%c0_155, %c1_156, %c2_157] : memref<4x18x18xf32, #tpu.memory_space<vmem>>, vector<1x16x16xf32>
    %297 = vector.shape_cast %296 : vector<1x16x16xf32> to vector<16x16xf32>
    %298 = vector.broadcast %295 : f32 to vector<16x16xf32>
    %299 = arith.mulf %298, %297 : vector<16x16xf32>
    %300 = arith.addf %294, %299 : vector<16x16xf32>
    %c42 = arith.constant 42 : index
    %301 = memref.load %arg2[%c42] : memref<144xf32, #tpu.memory_space<smem>>
    %c0_158 = arith.constant 0 : index
    %c2_159 = arith.constant 2 : index
    %c0_160 = arith.constant 0 : index
    %302 = vector.load %arg9[%c0_158, %c2_159, %c0_160] : memref<4x18x18xf32, #tpu.memory_space<vmem>>, vector<1x16x16xf32>
    %303 = vector.shape_cast %302 : vector<1x16x16xf32> to vector<16x16xf32>
    %304 = vector.broadcast %301 : f32 to vector<16x16xf32>
    %305 = arith.mulf %304, %303 : vector<16x16xf32>
    %306 = arith.addf %300, %305 : vector<16x16xf32>
    %c43 = arith.constant 43 : index
    %307 = memref.load %arg2[%c43] : memref<144xf32, #tpu.memory_space<smem>>
    %c0_161 = arith.constant 0 : index
    %c2_162 = arith.constant 2 : index
    %c1_163 = arith.constant 1 : index
    %308 = vector.load %arg9[%c0_161, %c2_162, %c1_163] : memref<4x18x18xf32, #tpu.memory_space<vmem>>, vector<1x16x16xf32>
    %309 = vector.shape_cast %308 : vector<1x16x16xf32> to vector<16x16xf32>
    %310 = vector.broadcast %307 : f32 to vector<16x16xf32>
    %311 = arith.mulf %310, %309 : vector<16x16xf32>
    %312 = arith.addf %306, %311 : vector<16x16xf32>
    %c44 = arith.constant 44 : index
    %313 = memref.load %arg2[%c44] : memref<144xf32, #tpu.memory_space<smem>>
    %c0_164 = arith.constant 0 : index
    %c2_165 = arith.constant 2 : index
    %c2_166 = arith.constant 2 : index
    %314 = vector.load %arg9[%c0_164, %c2_165, %c2_166] : memref<4x18x18xf32, #tpu.memory_space<vmem>>, vector<1x16x16xf32>
    %315 = vector.shape_cast %314 : vector<1x16x16xf32> to vector<16x16xf32>
    %316 = vector.broadcast %313 : f32 to vector<16x16xf32>
    %317 = arith.mulf %316, %315 : vector<16x16xf32>
    %318 = arith.addf %312, %317 : vector<16x16xf32>
    %c45 = arith.constant 45 : index
    %319 = memref.load %arg2[%c45] : memref<144xf32, #tpu.memory_space<smem>>
    %c1_167 = arith.constant 1 : index
    %c0_168 = arith.constant 0 : index
    %c0_169 = arith.constant 0 : index
    %320 = vector.load %arg9[%c1_167, %c0_168, %c0_169] : memref<4x18x18xf32, #tpu.memory_space<vmem>>, vector<1x16x16xf32>
    %321 = vector.shape_cast %320 : vector<1x16x16xf32> to vector<16x16xf32>
    %322 = vector.broadcast %319 : f32 to vector<16x16xf32>
    %323 = arith.mulf %322, %321 : vector<16x16xf32>
    %324 = arith.addf %318, %323 : vector<16x16xf32>
    %c46 = arith.constant 46 : index
    %325 = memref.load %arg2[%c46] : memref<144xf32, #tpu.memory_space<smem>>
    %c1_170 = arith.constant 1 : index
    %c0_171 = arith.constant 0 : index
    %c1_172 = arith.constant 1 : index
    %326 = vector.load %arg9[%c1_170, %c0_171, %c1_172] : memref<4x18x18xf32, #tpu.memory_space<vmem>>, vector<1x16x16xf32>
    %327 = vector.shape_cast %326 : vector<1x16x16xf32> to vector<16x16xf32>
    %328 = vector.broadcast %325 : f32 to vector<16x16xf32>
    %329 = arith.mulf %328, %327 : vector<16x16xf32>
    %330 = arith.addf %324, %329 : vector<16x16xf32>
    %c47 = arith.constant 47 : index
    %331 = memref.load %arg2[%c47] : memref<144xf32, #tpu.memory_space<smem>>
    %c1_173 = arith.constant 1 : index
    %c0_174 = arith.constant 0 : index
    %c2_175 = arith.constant 2 : index
    %332 = vector.load %arg9[%c1_173, %c0_174, %c2_175] : memref<4x18x18xf32, #tpu.memory_space<vmem>>, vector<1x16x16xf32>
    %333 = vector.shape_cast %332 : vector<1x16x16xf32> to vector<16x16xf32>
    %334 = vector.broadcast %331 : f32 to vector<16x16xf32>
    %335 = arith.mulf %334, %333 : vector<16x16xf32>
    %336 = arith.addf %330, %335 : vector<16x16xf32>
    %c48 = arith.constant 48 : index
    %337 = memref.load %arg2[%c48] : memref<144xf32, #tpu.memory_space<smem>>
    %c1_176 = arith.constant 1 : index
    %c1_177 = arith.constant 1 : index
    %c0_178 = arith.constant 0 : index
    %338 = vector.load %arg9[%c1_176, %c1_177, %c0_178] : memref<4x18x18xf32, #tpu.memory_space<vmem>>, vector<1x16x16xf32>
    %339 = vector.shape_cast %338 : vector<1x16x16xf32> to vector<16x16xf32>
    %340 = vector.broadcast %337 : f32 to vector<16x16xf32>
    %341 = arith.mulf %340, %339 : vector<16x16xf32>
    %342 = arith.addf %336, %341 : vector<16x16xf32>
    %c49 = arith.constant 49 : index
    %343 = memref.load %arg2[%c49] : memref<144xf32, #tpu.memory_space<smem>>
    %c1_179 = arith.constant 1 : index
    %c1_180 = arith.constant 1 : index
    %c1_181 = arith.constant 1 : index
    %344 = vector.load %arg9[%c1_179, %c1_180, %c1_181] : memref<4x18x18xf32, #tpu.memory_space<vmem>>, vector<1x16x16xf32>
    %345 = vector.shape_cast %344 : vector<1x16x16xf32> to vector<16x16xf32>
    %346 = vector.broadcast %343 : f32 to vector<16x16xf32>
    %347 = arith.mulf %346, %345 : vector<16x16xf32>
    %348 = arith.addf %342, %347 : vector<16x16xf32>
    %c50 = arith.constant 50 : index
    %349 = memref.load %arg2[%c50] : memref<144xf32, #tpu.memory_space<smem>>
    %c1_182 = arith.constant 1 : index
    %c1_183 = arith.constant 1 : index
    %c2_184 = arith.constant 2 : index
    %350 = vector.load %arg9[%c1_182, %c1_183, %c2_184] : memref<4x18x18xf32, #tpu.memory_space<vmem>>, vector<1x16x16xf32>
    %351 = vector.shape_cast %350 : vector<1x16x16xf32> to vector<16x16xf32>
    %352 = vector.broadcast %349 : f32 to vector<16x16xf32>
    %353 = arith.mulf %352, %351 : vector<16x16xf32>
    %354 = arith.addf %348, %353 : vector<16x16xf32>
    %c51 = arith.constant 51 : index
    %355 = memref.load %arg2[%c51] : memref<144xf32, #tpu.memory_space<smem>>
    %c1_185 = arith.constant 1 : index
    %c2_186 = arith.constant 2 : index
    %c0_187 = arith.constant 0 : index
    %356 = vector.load %arg9[%c1_185, %c2_186, %c0_187] : memref<4x18x18xf32, #tpu.memory_space<vmem>>, vector<1x16x16xf32>
    %357 = vector.shape_cast %356 : vector<1x16x16xf32> to vector<16x16xf32>
    %358 = vector.broadcast %355 : f32 to vector<16x16xf32>
    %359 = arith.mulf %358, %357 : vector<16x16xf32>
    %360 = arith.addf %354, %359 : vector<16x16xf32>
    %c52 = arith.constant 52 : index
    %361 = memref.load %arg2[%c52] : memref<144xf32, #tpu.memory_space<smem>>
    %c1_188 = arith.constant 1 : index
    %c2_189 = arith.constant 2 : index
    %c1_190 = arith.constant 1 : index
    %362 = vector.load %arg9[%c1_188, %c2_189, %c1_190] : memref<4x18x18xf32, #tpu.memory_space<vmem>>, vector<1x16x16xf32>
    %363 = vector.shape_cast %362 : vector<1x16x16xf32> to vector<16x16xf32>
    %364 = vector.broadcast %361 : f32 to vector<16x16xf32>
    %365 = arith.mulf %364, %363 : vector<16x16xf32>
    %366 = arith.addf %360, %365 : vector<16x16xf32>
    %c53 = arith.constant 53 : index
    %367 = memref.load %arg2[%c53] : memref<144xf32, #tpu.memory_space<smem>>
    %c1_191 = arith.constant 1 : index
    %c2_192 = arith.constant 2 : index
    %c2_193 = arith.constant 2 : index
    %368 = vector.load %arg9[%c1_191, %c2_192, %c2_193] : memref<4x18x18xf32, #tpu.memory_space<vmem>>, vector<1x16x16xf32>
    %369 = vector.shape_cast %368 : vector<1x16x16xf32> to vector<16x16xf32>
    %370 = vector.broadcast %367 : f32 to vector<16x16xf32>
    %371 = arith.mulf %370, %369 : vector<16x16xf32>
    %372 = arith.addf %366, %371 : vector<16x16xf32>
    %c54 = arith.constant 54 : index
    %373 = memref.load %arg2[%c54] : memref<144xf32, #tpu.memory_space<smem>>
    %c2_194 = arith.constant 2 : index
    %c0_195 = arith.constant 0 : index
    %c0_196 = arith.constant 0 : index
    %374 = vector.load %arg9[%c2_194, %c0_195, %c0_196] : memref<4x18x18xf32, #tpu.memory_space<vmem>>, vector<1x16x16xf32>
    %375 = vector.shape_cast %374 : vector<1x16x16xf32> to vector<16x16xf32>
    %376 = vector.broadcast %373 : f32 to vector<16x16xf32>
    %377 = arith.mulf %376, %375 : vector<16x16xf32>
    %378 = arith.addf %372, %377 : vector<16x16xf32>
    %c55 = arith.constant 55 : index
    %379 = memref.load %arg2[%c55] : memref<144xf32, #tpu.memory_space<smem>>
    %c2_197 = arith.constant 2 : index
    %c0_198 = arith.constant 0 : index
    %c1_199 = arith.constant 1 : index
    %380 = vector.load %arg9[%c2_197, %c0_198, %c1_199] : memref<4x18x18xf32, #tpu.memory_space<vmem>>, vector<1x16x16xf32>
    %381 = vector.shape_cast %380 : vector<1x16x16xf32> to vector<16x16xf32>
    %382 = vector.broadcast %379 : f32 to vector<16x16xf32>
    %383 = arith.mulf %382, %381 : vector<16x16xf32>
    %384 = arith.addf %378, %383 : vector<16x16xf32>
    %c56 = arith.constant 56 : index
    %385 = memref.load %arg2[%c56] : memref<144xf32, #tpu.memory_space<smem>>
    %c2_200 = arith.constant 2 : index
    %c0_201 = arith.constant 0 : index
    %c2_202 = arith.constant 2 : index
    %386 = vector.load %arg9[%c2_200, %c0_201, %c2_202] : memref<4x18x18xf32, #tpu.memory_space<vmem>>, vector<1x16x16xf32>
    %387 = vector.shape_cast %386 : vector<1x16x16xf32> to vector<16x16xf32>
    %388 = vector.broadcast %385 : f32 to vector<16x16xf32>
    %389 = arith.mulf %388, %387 : vector<16x16xf32>
    %390 = arith.addf %384, %389 : vector<16x16xf32>
    %c57 = arith.constant 57 : index
    %391 = memref.load %arg2[%c57] : memref<144xf32, #tpu.memory_space<smem>>
    %c2_203 = arith.constant 2 : index
    %c1_204 = arith.constant 1 : index
    %c0_205 = arith.constant 0 : index
    %392 = vector.load %arg9[%c2_203, %c1_204, %c0_205] : memref<4x18x18xf32, #tpu.memory_space<vmem>>, vector<1x16x16xf32>
    %393 = vector.shape_cast %392 : vector<1x16x16xf32> to vector<16x16xf32>
    %394 = vector.broadcast %391 : f32 to vector<16x16xf32>
    %395 = arith.mulf %394, %393 : vector<16x16xf32>
    %396 = arith.addf %390, %395 : vector<16x16xf32>
    %c58 = arith.constant 58 : index
    %397 = memref.load %arg2[%c58] : memref<144xf32, #tpu.memory_space<smem>>
    %c2_206 = arith.constant 2 : index
    %c1_207 = arith.constant 1 : index
    %c1_208 = arith.constant 1 : index
    %398 = vector.load %arg9[%c2_206, %c1_207, %c1_208] : memref<4x18x18xf32, #tpu.memory_space<vmem>>, vector<1x16x16xf32>
    %399 = vector.shape_cast %398 : vector<1x16x16xf32> to vector<16x16xf32>
    %400 = vector.broadcast %397 : f32 to vector<16x16xf32>
    %401 = arith.mulf %400, %399 : vector<16x16xf32>
    %402 = arith.addf %396, %401 : vector<16x16xf32>
    %c59 = arith.constant 59 : index
    %403 = memref.load %arg2[%c59] : memref<144xf32, #tpu.memory_space<smem>>
    %c2_209 = arith.constant 2 : index
    %c1_210 = arith.constant 1 : index
    %c2_211 = arith.constant 2 : index
    %404 = vector.load %arg9[%c2_209, %c1_210, %c2_211] : memref<4x18x18xf32, #tpu.memory_space<vmem>>, vector<1x16x16xf32>
    %405 = vector.shape_cast %404 : vector<1x16x16xf32> to vector<16x16xf32>
    %406 = vector.broadcast %403 : f32 to vector<16x16xf32>
    %407 = arith.mulf %406, %405 : vector<16x16xf32>
    %408 = arith.addf %402, %407 : vector<16x16xf32>
    %c60 = arith.constant 60 : index
    %409 = memref.load %arg2[%c60] : memref<144xf32, #tpu.memory_space<smem>>
    %c2_212 = arith.constant 2 : index
    %c2_213 = arith.constant 2 : index
    %c0_214 = arith.constant 0 : index
    %410 = vector.load %arg9[%c2_212, %c2_213, %c0_214] : memref<4x18x18xf32, #tpu.memory_space<vmem>>, vector<1x16x16xf32>
    %411 = vector.shape_cast %410 : vector<1x16x16xf32> to vector<16x16xf32>
    %412 = vector.broadcast %409 : f32 to vector<16x16xf32>
    %413 = arith.mulf %412, %411 : vector<16x16xf32>
    %414 = arith.addf %408, %413 : vector<16x16xf32>
    %c61 = arith.constant 61 : index
    %415 = memref.load %arg2[%c61] : memref<144xf32, #tpu.memory_space<smem>>
    %c2_215 = arith.constant 2 : index
    %c2_216 = arith.constant 2 : index
    %c1_217 = arith.constant 1 : index
    %416 = vector.load %arg9[%c2_215, %c2_216, %c1_217] : memref<4x18x18xf32, #tpu.memory_space<vmem>>, vector<1x16x16xf32>
    %417 = vector.shape_cast %416 : vector<1x16x16xf32> to vector<16x16xf32>
    %418 = vector.broadcast %415 : f32 to vector<16x16xf32>
    %419 = arith.mulf %418, %417 : vector<16x16xf32>
    %420 = arith.addf %414, %419 : vector<16x16xf32>
    %c62 = arith.constant 62 : index
    %421 = memref.load %arg2[%c62] : memref<144xf32, #tpu.memory_space<smem>>
    %c2_218 = arith.constant 2 : index
    %c2_219 = arith.constant 2 : index
    %c2_220 = arith.constant 2 : index
    %422 = vector.load %arg9[%c2_218, %c2_219, %c2_220] : memref<4x18x18xf32, #tpu.memory_space<vmem>>, vector<1x16x16xf32>
    %423 = vector.shape_cast %422 : vector<1x16x16xf32> to vector<16x16xf32>
    %424 = vector.broadcast %421 : f32 to vector<16x16xf32>
    %425 = arith.mulf %424, %423 : vector<16x16xf32>
    %426 = arith.addf %420, %425 : vector<16x16xf32>
    %c63 = arith.constant 63 : index
    %427 = memref.load %arg2[%c63] : memref<144xf32, #tpu.memory_space<smem>>
    %c3_221 = arith.constant 3 : index
    %c0_222 = arith.constant 0 : index
    %c0_223 = arith.constant 0 : index
    %428 = vector.load %arg9[%c3_221, %c0_222, %c0_223] : memref<4x18x18xf32, #tpu.memory_space<vmem>>, vector<1x16x16xf32>
    %429 = vector.shape_cast %428 : vector<1x16x16xf32> to vector<16x16xf32>
    %430 = vector.broadcast %427 : f32 to vector<16x16xf32>
    %431 = arith.mulf %430, %429 : vector<16x16xf32>
    %432 = arith.addf %426, %431 : vector<16x16xf32>
    %c64 = arith.constant 64 : index
    %433 = memref.load %arg2[%c64] : memref<144xf32, #tpu.memory_space<smem>>
    %c3_224 = arith.constant 3 : index
    %c0_225 = arith.constant 0 : index
    %c1_226 = arith.constant 1 : index
    %434 = vector.load %arg9[%c3_224, %c0_225, %c1_226] : memref<4x18x18xf32, #tpu.memory_space<vmem>>, vector<1x16x16xf32>
    %435 = vector.shape_cast %434 : vector<1x16x16xf32> to vector<16x16xf32>
    %436 = vector.broadcast %433 : f32 to vector<16x16xf32>
    %437 = arith.mulf %436, %435 : vector<16x16xf32>
    %438 = arith.addf %432, %437 : vector<16x16xf32>
    %c65 = arith.constant 65 : index
    %439 = memref.load %arg2[%c65] : memref<144xf32, #tpu.memory_space<smem>>
    %c3_227 = arith.constant 3 : index
    %c0_228 = arith.constant 0 : index
    %c2_229 = arith.constant 2 : index
    %440 = vector.load %arg9[%c3_227, %c0_228, %c2_229] : memref<4x18x18xf32, #tpu.memory_space<vmem>>, vector<1x16x16xf32>
    %441 = vector.shape_cast %440 : vector<1x16x16xf32> to vector<16x16xf32>
    %442 = vector.broadcast %439 : f32 to vector<16x16xf32>
    %443 = arith.mulf %442, %441 : vector<16x16xf32>
    %444 = arith.addf %438, %443 : vector<16x16xf32>
    %c66 = arith.constant 66 : index
    %445 = memref.load %arg2[%c66] : memref<144xf32, #tpu.memory_space<smem>>
    %c3_230 = arith.constant 3 : index
    %c1_231 = arith.constant 1 : index
    %c0_232 = arith.constant 0 : index
    %446 = vector.load %arg9[%c3_230, %c1_231, %c0_232] : memref<4x18x18xf32, #tpu.memory_space<vmem>>, vector<1x16x16xf32>
    %447 = vector.shape_cast %446 : vector<1x16x16xf32> to vector<16x16xf32>
    %448 = vector.broadcast %445 : f32 to vector<16x16xf32>
    %449 = arith.mulf %448, %447 : vector<16x16xf32>
    %450 = arith.addf %444, %449 : vector<16x16xf32>
    %c67 = arith.constant 67 : index
    %451 = memref.load %arg2[%c67] : memref<144xf32, #tpu.memory_space<smem>>
    %c3_233 = arith.constant 3 : index
    %c1_234 = arith.constant 1 : index
    %c1_235 = arith.constant 1 : index
    %452 = vector.load %arg9[%c3_233, %c1_234, %c1_235] : memref<4x18x18xf32, #tpu.memory_space<vmem>>, vector<1x16x16xf32>
    %453 = vector.shape_cast %452 : vector<1x16x16xf32> to vector<16x16xf32>
    %454 = vector.broadcast %451 : f32 to vector<16x16xf32>
    %455 = arith.mulf %454, %453 : vector<16x16xf32>
    %456 = arith.addf %450, %455 : vector<16x16xf32>
    %c68 = arith.constant 68 : index
    %457 = memref.load %arg2[%c68] : memref<144xf32, #tpu.memory_space<smem>>
    %c3_236 = arith.constant 3 : index
    %c1_237 = arith.constant 1 : index
    %c2_238 = arith.constant 2 : index
    %458 = vector.load %arg9[%c3_236, %c1_237, %c2_238] : memref<4x18x18xf32, #tpu.memory_space<vmem>>, vector<1x16x16xf32>
    %459 = vector.shape_cast %458 : vector<1x16x16xf32> to vector<16x16xf32>
    %460 = vector.broadcast %457 : f32 to vector<16x16xf32>
    %461 = arith.mulf %460, %459 : vector<16x16xf32>
    %462 = arith.addf %456, %461 : vector<16x16xf32>
    %c69 = arith.constant 69 : index
    %463 = memref.load %arg2[%c69] : memref<144xf32, #tpu.memory_space<smem>>
    %c3_239 = arith.constant 3 : index
    %c2_240 = arith.constant 2 : index
    %c0_241 = arith.constant 0 : index
    %464 = vector.load %arg9[%c3_239, %c2_240, %c0_241] : memref<4x18x18xf32, #tpu.memory_space<vmem>>, vector<1x16x16xf32>
    %465 = vector.shape_cast %464 : vector<1x16x16xf32> to vector<16x16xf32>
    %466 = vector.broadcast %463 : f32 to vector<16x16xf32>
    %467 = arith.mulf %466, %465 : vector<16x16xf32>
    %468 = arith.addf %462, %467 : vector<16x16xf32>
    %c70 = arith.constant 70 : index
    %469 = memref.load %arg2[%c70] : memref<144xf32, #tpu.memory_space<smem>>
    %c3_242 = arith.constant 3 : index
    %c2_243 = arith.constant 2 : index
    %c1_244 = arith.constant 1 : index
    %470 = vector.load %arg9[%c3_242, %c2_243, %c1_244] : memref<4x18x18xf32, #tpu.memory_space<vmem>>, vector<1x16x16xf32>
    %471 = vector.shape_cast %470 : vector<1x16x16xf32> to vector<16x16xf32>
    %472 = vector.broadcast %469 : f32 to vector<16x16xf32>
    %473 = arith.mulf %472, %471 : vector<16x16xf32>
    %474 = arith.addf %468, %473 : vector<16x16xf32>
    %c71 = arith.constant 71 : index
    %475 = memref.load %arg2[%c71] : memref<144xf32, #tpu.memory_space<smem>>
    %c3_245 = arith.constant 3 : index
    %c2_246 = arith.constant 2 : index
    %c2_247 = arith.constant 2 : index
    %476 = vector.load %arg9[%c3_245, %c2_246, %c2_247] : memref<4x18x18xf32, #tpu.memory_space<vmem>>, vector<1x16x16xf32>
    %477 = vector.shape_cast %476 : vector<1x16x16xf32> to vector<16x16xf32>
    %478 = vector.broadcast %475 : f32 to vector<16x16xf32>
    %479 = arith.mulf %478, %477 : vector<16x16xf32>
    %480 = arith.addf %474, %479 : vector<16x16xf32>
    %cst_248 = arith.constant 0.000000e+00 : f32
    %481 = vector.broadcast %cst_248 : f32 to vector<16x16xf32>
    %482 = arith.cmpf oge, %480, %481 : vector<16x16xf32>
    %cst_249 = arith.constant 2.000000e-01 : f32
    %483 = vector.broadcast %cst_249 : f32 to vector<16x16xf32>
    %484 = arith.mulf %483, %480 : vector<16x16xf32>
    %485 = arith.select %482, %480, %484 : vector<16x16xi1>, vector<16x16xf32>
    %cst_250 = arith.constant dense<0.000000e+00> : vector<16xf32>
    %486 = vector.multi_reduction <add>, %485, %cst_250 [1] : vector<16x16xf32> to vector<16xf32>
    %487 = vector.shape_cast %486 : vector<16xf32> to vector<16x1xf32>
    %cst_251 = arith.constant dense<0.000000e+00> : vector<1xf32>
    %488 = vector.multi_reduction <add>, %487, %cst_251 [0] : vector<16x1xf32> to vector<1xf32>
    %489 = vector.shape_cast %488 : vector<1xf32> to vector<1x1xf32>
    %cst_252 = arith.constant 3.906250e-03 : f32
    %490 = vector.broadcast %cst_252 : f32 to vector<1x1xf32>
    %491 = arith.mulf %489, %490 : vector<1x1xf32>
    %492 = vector.broadcast %491 : vector<1x1xf32> to vector<16x16xf32>
    %493 = arith.subf %485, %492 : vector<16x16xf32>
    %494 = arith.mulf %493, %493 : vector<16x16xf32>
    %cst_253 = arith.constant dense<0.000000e+00> : vector<16xf32>
    %495 = vector.multi_reduction <add>, %494, %cst_253 [1] : vector<16x16xf32> to vector<16xf32>
    %496 = vector.shape_cast %495 : vector<16xf32> to vector<16x1xf32>
    %cst_254 = arith.constant dense<0.000000e+00> : vector<1xf32>
    %497 = vector.multi_reduction <add>, %496, %cst_254 [0] : vector<16x1xf32> to vector<1xf32>
    %498 = vector.shape_cast %497 : vector<1xf32> to vector<1x1xf32>
    %cst_255 = arith.constant 3.906250e-03 : f32
    %499 = vector.broadcast %cst_255 : f32 to vector<1x1xf32>
    %500 = arith.mulf %498, %499 : vector<1x1xf32>
    %cst_256 = arith.constant 9.99999974E-6 : f32
    %501 = vector.broadcast %cst_256 : f32 to vector<1x1xf32>
    %502 = arith.addf %500, %501 : vector<1x1xf32>
    %503 = math.rsqrt %502 : vector<1x1xf32>
    %504 = vector.broadcast %503 : vector<1x1xf32> to vector<16x16xf32>
    %505 = arith.mulf %493, %504 : vector<16x16xf32>
    %c1_257 = arith.constant 1 : index
    %506 = memref.load %arg4[%c1_257] : memref<2xf32, #tpu.memory_space<smem>>
    %507 = vector.broadcast %506 : f32 to vector<16x16xf32>
    %508 = arith.mulf %505, %507 : vector<16x16xf32>
    %c1_258 = arith.constant 1 : index
    %509 = memref.load %arg5[%c1_258] : memref<2xf32, #tpu.memory_space<smem>>
    %510 = vector.broadcast %509 : f32 to vector<16x16xf32>
    %511 = arith.addf %508, %510 : vector<16x16xf32>
    %c1_259 = arith.constant 1 : index
    %c1_260 = arith.constant 1 : index
    %c1_261 = arith.constant 1 : index
    %512 = vector.load %arg10[%c1_259, %c1_260, %c1_261] : memref<4x18x18xf32, #tpu.memory_space<vmem>>, vector<1x16x16xf32>
    %513 = vector.shape_cast %512 : vector<1x16x16xf32> to vector<16x16xf32>
    %514 = vector.shape_cast %511 : vector<16x16xf32> to vector<1x16x16xf32>
    tpu.vector_store %arg10[%c1_259, %c1_260, %c1_261], %514 {strides = array<i32>} : memref<4x18x18xf32, #tpu.memory_space<vmem>>, vector<1x16x16xf32>,
    %cst_262 = arith.constant 0.000000e+00 : f32
    %515 = vector.broadcast %cst_262 : f32 to vector<16x16xf32>
    %c2_263 = arith.constant 2 : index
    %516 = memref.load %arg3[%c2_263] : memref<4xf32, #tpu.memory_space<smem>>
    %517 = vector.broadcast %516 : f32 to vector<16x16xf32>
    %518 = arith.addf %515, %517 : vector<16x16xf32>
    %c72 = arith.constant 72 : index
    %519 = memref.load %arg2[%c72] : memref<144xf32, #tpu.memory_space<smem>>
    %c0_264 = arith.constant 0 : index
    %c0_265 = arith.constant 0 : index
    %c0_266 = arith.constant 0 : index
    %520 = vector.load %arg9[%c0_264, %c0_265, %c0_266] : memref<4x18x18xf32, #tpu.memory_space<vmem>>, vector<1x16x16xf32>
    %521 = vector.shape_cast %520 : vector<1x16x16xf32> to vector<16x16xf32>
    %522 = vector.broadcast %519 : f32 to vector<16x16xf32>
    %523 = arith.mulf %522, %521 : vector<16x16xf32>
    %524 = arith.addf %518, %523 : vector<16x16xf32>
    %c73 = arith.constant 73 : index
    %525 = memref.load %arg2[%c73] : memref<144xf32, #tpu.memory_space<smem>>
    %c0_267 = arith.constant 0 : index
    %c0_268 = arith.constant 0 : index
    %c1_269 = arith.constant 1 : index
    %526 = vector.load %arg9[%c0_267, %c0_268, %c1_269] : memref<4x18x18xf32, #tpu.memory_space<vmem>>, vector<1x16x16xf32>
    %527 = vector.shape_cast %526 : vector<1x16x16xf32> to vector<16x16xf32>
    %528 = vector.broadcast %525 : f32 to vector<16x16xf32>
    %529 = arith.mulf %528, %527 : vector<16x16xf32>
    %530 = arith.addf %524, %529 : vector<16x16xf32>
    %c74 = arith.constant 74 : index
    %531 = memref.load %arg2[%c74] : memref<144xf32, #tpu.memory_space<smem>>
    %c0_270 = arith.constant 0 : index
    %c0_271 = arith.constant 0 : index
    %c2_272 = arith.constant 2 : index
    %532 = vector.load %arg9[%c0_270, %c0_271, %c2_272] : memref<4x18x18xf32, #tpu.memory_space<vmem>>, vector<1x16x16xf32>
    %533 = vector.shape_cast %532 : vector<1x16x16xf32> to vector<16x16xf32>
    %534 = vector.broadcast %531 : f32 to vector<16x16xf32>
    %535 = arith.mulf %534, %533 : vector<16x16xf32>
    %536 = arith.addf %530, %535 : vector<16x16xf32>
    %c75 = arith.constant 75 : index
    %537 = memref.load %arg2[%c75] : memref<144xf32, #tpu.memory_space<smem>>
    %c0_273 = arith.constant 0 : index
    %c1_274 = arith.constant 1 : index
    %c0_275 = arith.constant 0 : index
    %538 = vector.load %arg9[%c0_273, %c1_274, %c0_275] : memref<4x18x18xf32, #tpu.memory_space<vmem>>, vector<1x16x16xf32>
    %539 = vector.shape_cast %538 : vector<1x16x16xf32> to vector<16x16xf32>
    %540 = vector.broadcast %537 : f32 to vector<16x16xf32>
    %541 = arith.mulf %540, %539 : vector<16x16xf32>
    %542 = arith.addf %536, %541 : vector<16x16xf32>
    %c76 = arith.constant 76 : index
    %543 = memref.load %arg2[%c76] : memref<144xf32, #tpu.memory_space<smem>>
    %c0_276 = arith.constant 0 : index
    %c1_277 = arith.constant 1 : index
    %c1_278 = arith.constant 1 : index
    %544 = vector.load %arg9[%c0_276, %c1_277, %c1_278] : memref<4x18x18xf32, #tpu.memory_space<vmem>>, vector<1x16x16xf32>
    %545 = vector.shape_cast %544 : vector<1x16x16xf32> to vector<16x16xf32>
    %546 = vector.broadcast %543 : f32 to vector<16x16xf32>
    %547 = arith.mulf %546, %545 : vector<16x16xf32>
    %548 = arith.addf %542, %547 : vector<16x16xf32>
    %c77 = arith.constant 77 : index
    %549 = memref.load %arg2[%c77] : memref<144xf32, #tpu.memory_space<smem>>
    %c0_279 = arith.constant 0 : index
    %c1_280 = arith.constant 1 : index
    %c2_281 = arith.constant 2 : index
    %550 = vector.load %arg9[%c0_279, %c1_280, %c2_281] : memref<4x18x18xf32, #tpu.memory_space<vmem>>, vector<1x16x16xf32>
    %551 = vector.shape_cast %550 : vector<1x16x16xf32> to vector<16x16xf32>
    %552 = vector.broadcast %549 : f32 to vector<16x16xf32>
    %553 = arith.mulf %552, %551 : vector<16x16xf32>
    %554 = arith.addf %548, %553 : vector<16x16xf32>
    %c78 = arith.constant 78 : index
    %555 = memref.load %arg2[%c78] : memref<144xf32, #tpu.memory_space<smem>>
    %c0_282 = arith.constant 0 : index
    %c2_283 = arith.constant 2 : index
    %c0_284 = arith.constant 0 : index
    %556 = vector.load %arg9[%c0_282, %c2_283, %c0_284] : memref<4x18x18xf32, #tpu.memory_space<vmem>>, vector<1x16x16xf32>
    %557 = vector.shape_cast %556 : vector<1x16x16xf32> to vector<16x16xf32>
    %558 = vector.broadcast %555 : f32 to vector<16x16xf32>
    %559 = arith.mulf %558, %557 : vector<16x16xf32>
    %560 = arith.addf %554, %559 : vector<16x16xf32>
    %c79 = arith.constant 79 : index
    %561 = memref.load %arg2[%c79] : memref<144xf32, #tpu.memory_space<smem>>
    %c0_285 = arith.constant 0 : index
    %c2_286 = arith.constant 2 : index
    %c1_287 = arith.constant 1 : index
    %562 = vector.load %arg9[%c0_285, %c2_286, %c1_287] : memref<4x18x18xf32, #tpu.memory_space<vmem>>, vector<1x16x16xf32>
    %563 = vector.shape_cast %562 : vector<1x16x16xf32> to vector<16x16xf32>
    %564 = vector.broadcast %561 : f32 to vector<16x16xf32>
    %565 = arith.mulf %564, %563 : vector<16x16xf32>
    %566 = arith.addf %560, %565 : vector<16x16xf32>
    %c80 = arith.constant 80 : index
    %567 = memref.load %arg2[%c80] : memref<144xf32, #tpu.memory_space<smem>>
    %c0_288 = arith.constant 0 : index
    %c2_289 = arith.constant 2 : index
    %c2_290 = arith.constant 2 : index
    %568 = vector.load %arg9[%c0_288, %c2_289, %c2_290] : memref<4x18x18xf32, #tpu.memory_space<vmem>>, vector<1x16x16xf32>
    %569 = vector.shape_cast %568 : vector<1x16x16xf32> to vector<16x16xf32>
    %570 = vector.broadcast %567 : f32 to vector<16x16xf32>
    %571 = arith.mulf %570, %569 : vector<16x16xf32>
    %572 = arith.addf %566, %571 : vector<16x16xf32>
    %c81 = arith.constant 81 : index
    %573 = memref.load %arg2[%c81] : memref<144xf32, #tpu.memory_space<smem>>
    %c1_291 = arith.constant 1 : index
    %c0_292 = arith.constant 0 : index
    %c0_293 = arith.constant 0 : index
    %574 = vector.load %arg9[%c1_291, %c0_292, %c0_293] : memref<4x18x18xf32, #tpu.memory_space<vmem>>, vector<1x16x16xf32>
    %575 = vector.shape_cast %574 : vector<1x16x16xf32> to vector<16x16xf32>
    %576 = vector.broadcast %573 : f32 to vector<16x16xf32>
    %577 = arith.mulf %576, %575 : vector<16x16xf32>
    %578 = arith.addf %572, %577 : vector<16x16xf32>
    %c82 = arith.constant 82 : index
    %579 = memref.load %arg2[%c82] : memref<144xf32, #tpu.memory_space<smem>>
    %c1_294 = arith.constant 1 : index
    %c0_295 = arith.constant 0 : index
    %c1_296 = arith.constant 1 : index
    %580 = vector.load %arg9[%c1_294, %c0_295, %c1_296] : memref<4x18x18xf32, #tpu.memory_space<vmem>>, vector<1x16x16xf32>
    %581 = vector.shape_cast %580 : vector<1x16x16xf32> to vector<16x16xf32>
    %582 = vector.broadcast %579 : f32 to vector<16x16xf32>
    %583 = arith.mulf %582, %581 : vector<16x16xf32>
    %584 = arith.addf %578, %583 : vector<16x16xf32>
    %c83 = arith.constant 83 : index
    %585 = memref.load %arg2[%c83] : memref<144xf32, #tpu.memory_space<smem>>
    %c1_297 = arith.constant 1 : index
    %c0_298 = arith.constant 0 : index
    %c2_299 = arith.constant 2 : index
    %586 = vector.load %arg9[%c1_297, %c0_298, %c2_299] : memref<4x18x18xf32, #tpu.memory_space<vmem>>, vector<1x16x16xf32>
    %587 = vector.shape_cast %586 : vector<1x16x16xf32> to vector<16x16xf32>
    %588 = vector.broadcast %585 : f32 to vector<16x16xf32>
    %589 = arith.mulf %588, %587 : vector<16x16xf32>
    %590 = arith.addf %584, %589 : vector<16x16xf32>
    %c84 = arith.constant 84 : index
    %591 = memref.load %arg2[%c84] : memref<144xf32, #tpu.memory_space<smem>>
    %c1_300 = arith.constant 1 : index
    %c1_301 = arith.constant 1 : index
    %c0_302 = arith.constant 0 : index
    %592 = vector.load %arg9[%c1_300, %c1_301, %c0_302] : memref<4x18x18xf32, #tpu.memory_space<vmem>>, vector<1x16x16xf32>
    %593 = vector.shape_cast %592 : vector<1x16x16xf32> to vector<16x16xf32>
    %594 = vector.broadcast %591 : f32 to vector<16x16xf32>
    %595 = arith.mulf %594, %593 : vector<16x16xf32>
    %596 = arith.addf %590, %595 : vector<16x16xf32>
    %c85 = arith.constant 85 : index
    %597 = memref.load %arg2[%c85] : memref<144xf32, #tpu.memory_space<smem>>
    %c1_303 = arith.constant 1 : index
    %c1_304 = arith.constant 1 : index
    %c1_305 = arith.constant 1 : index
    %598 = vector.load %arg9[%c1_303, %c1_304, %c1_305] : memref<4x18x18xf32, #tpu.memory_space<vmem>>, vector<1x16x16xf32>
    %599 = vector.shape_cast %598 : vector<1x16x16xf32> to vector<16x16xf32>
    %600 = vector.broadcast %597 : f32 to vector<16x16xf32>
    %601 = arith.mulf %600, %599 : vector<16x16xf32>
    %602 = arith.addf %596, %601 : vector<16x16xf32>
    %c86 = arith.constant 86 : index
    %603 = memref.load %arg2[%c86] : memref<144xf32, #tpu.memory_space<smem>>
    %c1_306 = arith.constant 1 : index
    %c1_307 = arith.constant 1 : index
    %c2_308 = arith.constant 2 : index
    %604 = vector.load %arg9[%c1_306, %c1_307, %c2_308] : memref<4x18x18xf32, #tpu.memory_space<vmem>>, vector<1x16x16xf32>
    %605 = vector.shape_cast %604 : vector<1x16x16xf32> to vector<16x16xf32>
    %606 = vector.broadcast %603 : f32 to vector<16x16xf32>
    %607 = arith.mulf %606, %605 : vector<16x16xf32>
    %608 = arith.addf %602, %607 : vector<16x16xf32>
    %c87 = arith.constant 87 : index
    %609 = memref.load %arg2[%c87] : memref<144xf32, #tpu.memory_space<smem>>
    %c1_309 = arith.constant 1 : index
    %c2_310 = arith.constant 2 : index
    %c0_311 = arith.constant 0 : index
    %610 = vector.load %arg9[%c1_309, %c2_310, %c0_311] : memref<4x18x18xf32, #tpu.memory_space<vmem>>, vector<1x16x16xf32>
    %611 = vector.shape_cast %610 : vector<1x16x16xf32> to vector<16x16xf32>
    %612 = vector.broadcast %609 : f32 to vector<16x16xf32>
    %613 = arith.mulf %612, %611 : vector<16x16xf32>
    %614 = arith.addf %608, %613 : vector<16x16xf32>
    %c88 = arith.constant 88 : index
    %615 = memref.load %arg2[%c88] : memref<144xf32, #tpu.memory_space<smem>>
    %c1_312 = arith.constant 1 : index
    %c2_313 = arith.constant 2 : index
    %c1_314 = arith.constant 1 : index
    %616 = vector.load %arg9[%c1_312, %c2_313, %c1_314] : memref<4x18x18xf32, #tpu.memory_space<vmem>>, vector<1x16x16xf32>
    %617 = vector.shape_cast %616 : vector<1x16x16xf32> to vector<16x16xf32>
    %618 = vector.broadcast %615 : f32 to vector<16x16xf32>
    %619 = arith.mulf %618, %617 : vector<16x16xf32>
    %620 = arith.addf %614, %619 : vector<16x16xf32>
    %c89 = arith.constant 89 : index
    %621 = memref.load %arg2[%c89] : memref<144xf32, #tpu.memory_space<smem>>
    %c1_315 = arith.constant 1 : index
    %c2_316 = arith.constant 2 : index
    %c2_317 = arith.constant 2 : index
    %622 = vector.load %arg9[%c1_315, %c2_316, %c2_317] : memref<4x18x18xf32, #tpu.memory_space<vmem>>, vector<1x16x16xf32>
    %623 = vector.shape_cast %622 : vector<1x16x16xf32> to vector<16x16xf32>
    %624 = vector.broadcast %621 : f32 to vector<16x16xf32>
    %625 = arith.mulf %624, %623 : vector<16x16xf32>
    %626 = arith.addf %620, %625 : vector<16x16xf32>
    %c90 = arith.constant 90 : index
    %627 = memref.load %arg2[%c90] : memref<144xf32, #tpu.memory_space<smem>>
    %c2_318 = arith.constant 2 : index
    %c0_319 = arith.constant 0 : index
    %c0_320 = arith.constant 0 : index
    %628 = vector.load %arg9[%c2_318, %c0_319, %c0_320] : memref<4x18x18xf32, #tpu.memory_space<vmem>>, vector<1x16x16xf32>
    %629 = vector.shape_cast %628 : vector<1x16x16xf32> to vector<16x16xf32>
    %630 = vector.broadcast %627 : f32 to vector<16x16xf32>
    %631 = arith.mulf %630, %629 : vector<16x16xf32>
    %632 = arith.addf %626, %631 : vector<16x16xf32>
    %c91 = arith.constant 91 : index
    %633 = memref.load %arg2[%c91] : memref<144xf32, #tpu.memory_space<smem>>
    %c2_321 = arith.constant 2 : index
    %c0_322 = arith.constant 0 : index
    %c1_323 = arith.constant 1 : index
    %634 = vector.load %arg9[%c2_321, %c0_322, %c1_323] : memref<4x18x18xf32, #tpu.memory_space<vmem>>, vector<1x16x16xf32>
    %635 = vector.shape_cast %634 : vector<1x16x16xf32> to vector<16x16xf32>
    %636 = vector.broadcast %633 : f32 to vector<16x16xf32>
    %637 = arith.mulf %636, %635 : vector<16x16xf32>
    %638 = arith.addf %632, %637 : vector<16x16xf32>
    %c92 = arith.constant 92 : index
    %639 = memref.load %arg2[%c92] : memref<144xf32, #tpu.memory_space<smem>>
    %c2_324 = arith.constant 2 : index
    %c0_325 = arith.constant 0 : index
    %c2_326 = arith.constant 2 : index
    %640 = vector.load %arg9[%c2_324, %c0_325, %c2_326] : memref<4x18x18xf32, #tpu.memory_space<vmem>>, vector<1x16x16xf32>
    %641 = vector.shape_cast %640 : vector<1x16x16xf32> to vector<16x16xf32>
    %642 = vector.broadcast %639 : f32 to vector<16x16xf32>
    %643 = arith.mulf %642, %641 : vector<16x16xf32>
    %644 = arith.addf %638, %643 : vector<16x16xf32>
    %c93 = arith.constant 93 : index
    %645 = memref.load %arg2[%c93] : memref<144xf32, #tpu.memory_space<smem>>
    %c2_327 = arith.constant 2 : index
    %c1_328 = arith.constant 1 : index
    %c0_329 = arith.constant 0 : index
    %646 = vector.load %arg9[%c2_327, %c1_328, %c0_329] : memref<4x18x18xf32, #tpu.memory_space<vmem>>, vector<1x16x16xf32>
    %647 = vector.shape_cast %646 : vector<1x16x16xf32> to vector<16x16xf32>
    %648 = vector.broadcast %645 : f32 to vector<16x16xf32>
    %649 = arith.mulf %648, %647 : vector<16x16xf32>
    %650 = arith.addf %644, %649 : vector<16x16xf32>
    %c94 = arith.constant 94 : index
    %651 = memref.load %arg2[%c94] : memref<144xf32, #tpu.memory_space<smem>>
    %c2_330 = arith.constant 2 : index
    %c1_331 = arith.constant 1 : index
    %c1_332 = arith.constant 1 : index
    %652 = vector.load %arg9[%c2_330, %c1_331, %c1_332] : memref<4x18x18xf32, #tpu.memory_space<vmem>>, vector<1x16x16xf32>
    %653 = vector.shape_cast %652 : vector<1x16x16xf32> to vector<16x16xf32>
    %654 = vector.broadcast %651 : f32 to vector<16x16xf32>
    %655 = arith.mulf %654, %653 : vector<16x16xf32>
    %656 = arith.addf %650, %655 : vector<16x16xf32>
    %c95 = arith.constant 95 : index
    %657 = memref.load %arg2[%c95] : memref<144xf32, #tpu.memory_space<smem>>
    %c2_333 = arith.constant 2 : index
    %c1_334 = arith.constant 1 : index
    %c2_335 = arith.constant 2 : index
    %658 = vector.load %arg9[%c2_333, %c1_334, %c2_335] : memref<4x18x18xf32, #tpu.memory_space<vmem>>, vector<1x16x16xf32>
    %659 = vector.shape_cast %658 : vector<1x16x16xf32> to vector<16x16xf32>
    %660 = vector.broadcast %657 : f32 to vector<16x16xf32>
    %661 = arith.mulf %660, %659 : vector<16x16xf32>
    %662 = arith.addf %656, %661 : vector<16x16xf32>
    %c96 = arith.constant 96 : index
    %663 = memref.load %arg2[%c96] : memref<144xf32, #tpu.memory_space<smem>>
    %c2_336 = arith.constant 2 : index
    %c2_337 = arith.constant 2 : index
    %c0_338 = arith.constant 0 : index
    %664 = vector.load %arg9[%c2_336, %c2_337, %c0_338] : memref<4x18x18xf32, #tpu.memory_space<vmem>>, vector<1x16x16xf32>
    %665 = vector.shape_cast %664 : vector<1x16x16xf32> to vector<16x16xf32>
    %666 = vector.broadcast %663 : f32 to vector<16x16xf32>
    %667 = arith.mulf %666, %665 : vector<16x16xf32>
    %668 = arith.addf %662, %667 : vector<16x16xf32>
    %c97 = arith.constant 97 : index
    %669 = memref.load %arg2[%c97] : memref<144xf32, #tpu.memory_space<smem>>
    %c2_339 = arith.constant 2 : index
    %c2_340 = arith.constant 2 : index
    %c1_341 = arith.constant 1 : index
    %670 = vector.load %arg9[%c2_339, %c2_340, %c1_341] : memref<4x18x18xf32, #tpu.memory_space<vmem>>, vector<1x16x16xf32>
    %671 = vector.shape_cast %670 : vector<1x16x16xf32> to vector<16x16xf32>
    %672 = vector.broadcast %669 : f32 to vector<16x16xf32>
    %673 = arith.mulf %672, %671 : vector<16x16xf32>
    %674 = arith.addf %668, %673 : vector<16x16xf32>
    %c98 = arith.constant 98 : index
    %675 = memref.load %arg2[%c98] : memref<144xf32, #tpu.memory_space<smem>>
    %c2_342 = arith.constant 2 : index
    %c2_343 = arith.constant 2 : index
    %c2_344 = arith.constant 2 : index
    %676 = vector.load %arg9[%c2_342, %c2_343, %c2_344] : memref<4x18x18xf32, #tpu.memory_space<vmem>>, vector<1x16x16xf32>
    %677 = vector.shape_cast %676 : vector<1x16x16xf32> to vector<16x16xf32>
    %678 = vector.broadcast %675 : f32 to vector<16x16xf32>
    %679 = arith.mulf %678, %677 : vector<16x16xf32>
    %680 = arith.addf %674, %679 : vector<16x16xf32>
    %c99 = arith.constant 99 : index
    %681 = memref.load %arg2[%c99] : memref<144xf32, #tpu.memory_space<smem>>
    %c3_345 = arith.constant 3 : index
    %c0_346 = arith.constant 0 : index
    %c0_347 = arith.constant 0 : index
    %682 = vector.load %arg9[%c3_345, %c0_346, %c0_347] : memref<4x18x18xf32, #tpu.memory_space<vmem>>, vector<1x16x16xf32>
    %683 = vector.shape_cast %682 : vector<1x16x16xf32> to vector<16x16xf32>
    %684 = vector.broadcast %681 : f32 to vector<16x16xf32>
    %685 = arith.mulf %684, %683 : vector<16x16xf32>
    %686 = arith.addf %680, %685 : vector<16x16xf32>
    %c100 = arith.constant 100 : index
    %687 = memref.load %arg2[%c100] : memref<144xf32, #tpu.memory_space<smem>>
    %c3_348 = arith.constant 3 : index
    %c0_349 = arith.constant 0 : index
    %c1_350 = arith.constant 1 : index
    %688 = vector.load %arg9[%c3_348, %c0_349, %c1_350] : memref<4x18x18xf32, #tpu.memory_space<vmem>>, vector<1x16x16xf32>
    %689 = vector.shape_cast %688 : vector<1x16x16xf32> to vector<16x16xf32>
    %690 = vector.broadcast %687 : f32 to vector<16x16xf32>
    %691 = arith.mulf %690, %689 : vector<16x16xf32>
    %692 = arith.addf %686, %691 : vector<16x16xf32>
    %c101 = arith.constant 101 : index
    %693 = memref.load %arg2[%c101] : memref<144xf32, #tpu.memory_space<smem>>
    %c3_351 = arith.constant 3 : index
    %c0_352 = arith.constant 0 : index
    %c2_353 = arith.constant 2 : index
    %694 = vector.load %arg9[%c3_351, %c0_352, %c2_353] : memref<4x18x18xf32, #tpu.memory_space<vmem>>, vector<1x16x16xf32>
    %695 = vector.shape_cast %694 : vector<1x16x16xf32> to vector<16x16xf32>
    %696 = vector.broadcast %693 : f32 to vector<16x16xf32>
    %697 = arith.mulf %696, %695 : vector<16x16xf32>
    %698 = arith.addf %692, %697 : vector<16x16xf32>
    %c102 = arith.constant 102 : index
    %699 = memref.load %arg2[%c102] : memref<144xf32, #tpu.memory_space<smem>>
    %c3_354 = arith.constant 3 : index
    %c1_355 = arith.constant 1 : index
    %c0_356 = arith.constant 0 : index
    %700 = vector.load %arg9[%c3_354, %c1_355, %c0_356] : memref<4x18x18xf32, #tpu.memory_space<vmem>>, vector<1x16x16xf32>
    %701 = vector.shape_cast %700 : vector<1x16x16xf32> to vector<16x16xf32>
    %702 = vector.broadcast %699 : f32 to vector<16x16xf32>
    %703 = arith.mulf %702, %701 : vector<16x16xf32>
    %704 = arith.addf %698, %703 : vector<16x16xf32>
    %c103 = arith.constant 103 : index
    %705 = memref.load %arg2[%c103] : memref<144xf32, #tpu.memory_space<smem>>
    %c3_357 = arith.constant 3 : index
    %c1_358 = arith.constant 1 : index
    %c1_359 = arith.constant 1 : index
    %706 = vector.load %arg9[%c3_357, %c1_358, %c1_359] : memref<4x18x18xf32, #tpu.memory_space<vmem>>, vector<1x16x16xf32>
    %707 = vector.shape_cast %706 : vector<1x16x16xf32> to vector<16x16xf32>
    %708 = vector.broadcast %705 : f32 to vector<16x16xf32>
    %709 = arith.mulf %708, %707 : vector<16x16xf32>
    %710 = arith.addf %704, %709 : vector<16x16xf32>
    %c104 = arith.constant 104 : index
    %711 = memref.load %arg2[%c104] : memref<144xf32, #tpu.memory_space<smem>>
    %c3_360 = arith.constant 3 : index
    %c1_361 = arith.constant 1 : index
    %c2_362 = arith.constant 2 : index
    %712 = vector.load %arg9[%c3_360, %c1_361, %c2_362] : memref<4x18x18xf32, #tpu.memory_space<vmem>>, vector<1x16x16xf32>
    %713 = vector.shape_cast %712 : vector<1x16x16xf32> to vector<16x16xf32>
    %714 = vector.broadcast %711 : f32 to vector<16x16xf32>
    %715 = arith.mulf %714, %713 : vector<16x16xf32>
    %716 = arith.addf %710, %715 : vector<16x16xf32>
    %c105 = arith.constant 105 : index
    %717 = memref.load %arg2[%c105] : memref<144xf32, #tpu.memory_space<smem>>
    %c3_363 = arith.constant 3 : index
    %c2_364 = arith.constant 2 : index
    %c0_365 = arith.constant 0 : index
    %718 = vector.load %arg9[%c3_363, %c2_364, %c0_365] : memref<4x18x18xf32, #tpu.memory_space<vmem>>, vector<1x16x16xf32>
    %719 = vector.shape_cast %718 : vector<1x16x16xf32> to vector<16x16xf32>
    %720 = vector.broadcast %717 : f32 to vector<16x16xf32>
    %721 = arith.mulf %720, %719 : vector<16x16xf32>
    %722 = arith.addf %716, %721 : vector<16x16xf32>
    %c106 = arith.constant 106 : index
    %723 = memref.load %arg2[%c106] : memref<144xf32, #tpu.memory_space<smem>>
    %c3_366 = arith.constant 3 : index
    %c2_367 = arith.constant 2 : index
    %c1_368 = arith.constant 1 : index
    %724 = vector.load %arg9[%c3_366, %c2_367, %c1_368] : memref<4x18x18xf32, #tpu.memory_space<vmem>>, vector<1x16x16xf32>
    %725 = vector.shape_cast %724 : vector<1x16x16xf32> to vector<16x16xf32>
    %726 = vector.broadcast %723 : f32 to vector<16x16xf32>
    %727 = arith.mulf %726, %725 : vector<16x16xf32>
    %728 = arith.addf %722, %727 : vector<16x16xf32>
    %c107 = arith.constant 107 : index
    %729 = memref.load %arg2[%c107] : memref<144xf32, #tpu.memory_space<smem>>
    %c3_369 = arith.constant 3 : index
    %c2_370 = arith.constant 2 : index
    %c2_371 = arith.constant 2 : index
    %730 = vector.load %arg9[%c3_369, %c2_370, %c2_371] : memref<4x18x18xf32, #tpu.memory_space<vmem>>, vector<1x16x16xf32>
    %731 = vector.shape_cast %730 : vector<1x16x16xf32> to vector<16x16xf32>
    %732 = vector.broadcast %729 : f32 to vector<16x16xf32>
    %733 = arith.mulf %732, %731 : vector<16x16xf32>
    %734 = arith.addf %728, %733 : vector<16x16xf32>
    %cst_372 = arith.constant 0.000000e+00 : f32
    %735 = vector.broadcast %cst_372 : f32 to vector<16x16xf32>
    %736 = arith.cmpf oge, %734, %735 : vector<16x16xf32>
    %cst_373 = arith.constant 2.000000e-01 : f32
    %737 = vector.broadcast %cst_373 : f32 to vector<16x16xf32>
    %738 = arith.mulf %737, %734 : vector<16x16xf32>
    %739 = arith.select %736, %734, %738 : vector<16x16xi1>, vector<16x16xf32>
    %c2_374 = arith.constant 2 : index
    %c1_375 = arith.constant 1 : index
    %c1_376 = arith.constant 1 : index
    %740 = vector.load %arg10[%c2_374, %c1_375, %c1_376] : memref<4x18x18xf32, #tpu.memory_space<vmem>>, vector<1x16x16xf32>
    %741 = vector.shape_cast %740 : vector<1x16x16xf32> to vector<16x16xf32>
    %742 = vector.shape_cast %739 : vector<16x16xf32> to vector<1x16x16xf32>
    tpu.vector_store %arg10[%c2_374, %c1_375, %c1_376], %742 {strides = array<i32>} : memref<4x18x18xf32, #tpu.memory_space<vmem>>, vector<1x16x16xf32>,
    %cst_377 = arith.constant 0.000000e+00 : f32
    %743 = vector.broadcast %cst_377 : f32 to vector<16x16xf32>
    %c3_378 = arith.constant 3 : index
    %744 = memref.load %arg3[%c3_378] : memref<4xf32, #tpu.memory_space<smem>>
    %745 = vector.broadcast %744 : f32 to vector<16x16xf32>
    %746 = arith.addf %743, %745 : vector<16x16xf32>
    %c108 = arith.constant 108 : index
    %747 = memref.load %arg2[%c108] : memref<144xf32, #tpu.memory_space<smem>>
    %c0_379 = arith.constant 0 : index
    %c0_380 = arith.constant 0 : index
    %c0_381 = arith.constant 0 : index
    %748 = vector.load %arg9[%c0_379, %c0_380, %c0_381] : memref<4x18x18xf32, #tpu.memory_space<vmem>>, vector<1x16x16xf32>
    %749 = vector.shape_cast %748 : vector<1x16x16xf32> to vector<16x16xf32>
    %750 = vector.broadcast %747 : f32 to vector<16x16xf32>
    %751 = arith.mulf %750, %749 : vector<16x16xf32>
    %752 = arith.addf %746, %751 : vector<16x16xf32>
    %c109 = arith.constant 109 : index
    %753 = memref.load %arg2[%c109] : memref<144xf32, #tpu.memory_space<smem>>
    %c0_382 = arith.constant 0 : index
    %c0_383 = arith.constant 0 : index
    %c1_384 = arith.constant 1 : index
    %754 = vector.load %arg9[%c0_382, %c0_383, %c1_384] : memref<4x18x18xf32, #tpu.memory_space<vmem>>, vector<1x16x16xf32>
    %755 = vector.shape_cast %754 : vector<1x16x16xf32> to vector<16x16xf32>
    %756 = vector.broadcast %753 : f32 to vector<16x16xf32>
    %757 = arith.mulf %756, %755 : vector<16x16xf32>
    %758 = arith.addf %752, %757 : vector<16x16xf32>
    %c110 = arith.constant 110 : index
    %759 = memref.load %arg2[%c110] : memref<144xf32, #tpu.memory_space<smem>>
    %c0_385 = arith.constant 0 : index
    %c0_386 = arith.constant 0 : index
    %c2_387 = arith.constant 2 : index
    %760 = vector.load %arg9[%c0_385, %c0_386, %c2_387] : memref<4x18x18xf32, #tpu.memory_space<vmem>>, vector<1x16x16xf32>
    %761 = vector.shape_cast %760 : vector<1x16x16xf32> to vector<16x16xf32>
    %762 = vector.broadcast %759 : f32 to vector<16x16xf32>
    %763 = arith.mulf %762, %761 : vector<16x16xf32>
    %764 = arith.addf %758, %763 : vector<16x16xf32>
    %c111 = arith.constant 111 : index
    %765 = memref.load %arg2[%c111] : memref<144xf32, #tpu.memory_space<smem>>
    %c0_388 = arith.constant 0 : index
    %c1_389 = arith.constant 1 : index
    %c0_390 = arith.constant 0 : index
    %766 = vector.load %arg9[%c0_388, %c1_389, %c0_390] : memref<4x18x18xf32, #tpu.memory_space<vmem>>, vector<1x16x16xf32>
    %767 = vector.shape_cast %766 : vector<1x16x16xf32> to vector<16x16xf32>
    %768 = vector.broadcast %765 : f32 to vector<16x16xf32>
    %769 = arith.mulf %768, %767 : vector<16x16xf32>
    %770 = arith.addf %764, %769 : vector<16x16xf32>
    %c112 = arith.constant 112 : index
    %771 = memref.load %arg2[%c112] : memref<144xf32, #tpu.memory_space<smem>>
    %c0_391 = arith.constant 0 : index
    %c1_392 = arith.constant 1 : index
    %c1_393 = arith.constant 1 : index
    %772 = vector.load %arg9[%c0_391, %c1_392, %c1_393] : memref<4x18x18xf32, #tpu.memory_space<vmem>>, vector<1x16x16xf32>
    %773 = vector.shape_cast %772 : vector<1x16x16xf32> to vector<16x16xf32>
    %774 = vector.broadcast %771 : f32 to vector<16x16xf32>
    %775 = arith.mulf %774, %773 : vector<16x16xf32>
    %776 = arith.addf %770, %775 : vector<16x16xf32>
    %c113 = arith.constant 113 : index
    %777 = memref.load %arg2[%c113] : memref<144xf32, #tpu.memory_space<smem>>
    %c0_394 = arith.constant 0 : index
    %c1_395 = arith.constant 1 : index
    %c2_396 = arith.constant 2 : index
    %778 = vector.load %arg9[%c0_394, %c1_395, %c2_396] : memref<4x18x18xf32, #tpu.memory_space<vmem>>, vector<1x16x16xf32>
    %779 = vector.shape_cast %778 : vector<1x16x16xf32> to vector<16x16xf32>
    %780 = vector.broadcast %777 : f32 to vector<16x16xf32>
    %781 = arith.mulf %780, %779 : vector<16x16xf32>
    %782 = arith.addf %776, %781 : vector<16x16xf32>
    %c114 = arith.constant 114 : index
    %783 = memref.load %arg2[%c114] : memref<144xf32, #tpu.memory_space<smem>>
    %c0_397 = arith.constant 0 : index
    %c2_398 = arith.constant 2 : index
    %c0_399 = arith.constant 0 : index
    %784 = vector.load %arg9[%c0_397, %c2_398, %c0_399] : memref<4x18x18xf32, #tpu.memory_space<vmem>>, vector<1x16x16xf32>
    %785 = vector.shape_cast %784 : vector<1x16x16xf32> to vector<16x16xf32>
    %786 = vector.broadcast %783 : f32 to vector<16x16xf32>
    %787 = arith.mulf %786, %785 : vector<16x16xf32>
    %788 = arith.addf %782, %787 : vector<16x16xf32>
    %c115 = arith.constant 115 : index
    %789 = memref.load %arg2[%c115] : memref<144xf32, #tpu.memory_space<smem>>
    %c0_400 = arith.constant 0 : index
    %c2_401 = arith.constant 2 : index
    %c1_402 = arith.constant 1 : index
    %790 = vector.load %arg9[%c0_400, %c2_401, %c1_402] : memref<4x18x18xf32, #tpu.memory_space<vmem>>, vector<1x16x16xf32>
    %791 = vector.shape_cast %790 : vector<1x16x16xf32> to vector<16x16xf32>
    %792 = vector.broadcast %789 : f32 to vector<16x16xf32>
    %793 = arith.mulf %792, %791 : vector<16x16xf32>
    %794 = arith.addf %788, %793 : vector<16x16xf32>
    %c116 = arith.constant 116 : index
    %795 = memref.load %arg2[%c116] : memref<144xf32, #tpu.memory_space<smem>>
    %c0_403 = arith.constant 0 : index
    %c2_404 = arith.constant 2 : index
    %c2_405 = arith.constant 2 : index
    %796 = vector.load %arg9[%c0_403, %c2_404, %c2_405] : memref<4x18x18xf32, #tpu.memory_space<vmem>>, vector<1x16x16xf32>
    %797 = vector.shape_cast %796 : vector<1x16x16xf32> to vector<16x16xf32>
    %798 = vector.broadcast %795 : f32 to vector<16x16xf32>
    %799 = arith.mulf %798, %797 : vector<16x16xf32>
    %800 = arith.addf %794, %799 : vector<16x16xf32>
    %c117 = arith.constant 117 : index
    %801 = memref.load %arg2[%c117] : memref<144xf32, #tpu.memory_space<smem>>
    %c1_406 = arith.constant 1 : index
    %c0_407 = arith.constant 0 : index
    %c0_408 = arith.constant 0 : index
    %802 = vector.load %arg9[%c1_406, %c0_407, %c0_408] : memref<4x18x18xf32, #tpu.memory_space<vmem>>, vector<1x16x16xf32>
    %803 = vector.shape_cast %802 : vector<1x16x16xf32> to vector<16x16xf32>
    %804 = vector.broadcast %801 : f32 to vector<16x16xf32>
    %805 = arith.mulf %804, %803 : vector<16x16xf32>
    %806 = arith.addf %800, %805 : vector<16x16xf32>
    %c118 = arith.constant 118 : index
    %807 = memref.load %arg2[%c118] : memref<144xf32, #tpu.memory_space<smem>>
    %c1_409 = arith.constant 1 : index
    %c0_410 = arith.constant 0 : index
    %c1_411 = arith.constant 1 : index
    %808 = vector.load %arg9[%c1_409, %c0_410, %c1_411] : memref<4x18x18xf32, #tpu.memory_space<vmem>>, vector<1x16x16xf32>
    %809 = vector.shape_cast %808 : vector<1x16x16xf32> to vector<16x16xf32>
    %810 = vector.broadcast %807 : f32 to vector<16x16xf32>
    %811 = arith.mulf %810, %809 : vector<16x16xf32>
    %812 = arith.addf %806, %811 : vector<16x16xf32>
    %c119 = arith.constant 119 : index
    %813 = memref.load %arg2[%c119] : memref<144xf32, #tpu.memory_space<smem>>
    %c1_412 = arith.constant 1 : index
    %c0_413 = arith.constant 0 : index
    %c2_414 = arith.constant 2 : index
    %814 = vector.load %arg9[%c1_412, %c0_413, %c2_414] : memref<4x18x18xf32, #tpu.memory_space<vmem>>, vector<1x16x16xf32>
    %815 = vector.shape_cast %814 : vector<1x16x16xf32> to vector<16x16xf32>
    %816 = vector.broadcast %813 : f32 to vector<16x16xf32>
    %817 = arith.mulf %816, %815 : vector<16x16xf32>
    %818 = arith.addf %812, %817 : vector<16x16xf32>
    %c120 = arith.constant 120 : index
    %819 = memref.load %arg2[%c120] : memref<144xf32, #tpu.memory_space<smem>>
    %c1_415 = arith.constant 1 : index
    %c1_416 = arith.constant 1 : index
    %c0_417 = arith.constant 0 : index
    %820 = vector.load %arg9[%c1_415, %c1_416, %c0_417] : memref<4x18x18xf32, #tpu.memory_space<vmem>>, vector<1x16x16xf32>
    %821 = vector.shape_cast %820 : vector<1x16x16xf32> to vector<16x16xf32>
    %822 = vector.broadcast %819 : f32 to vector<16x16xf32>
    %823 = arith.mulf %822, %821 : vector<16x16xf32>
    %824 = arith.addf %818, %823 : vector<16x16xf32>
    %c121 = arith.constant 121 : index
    %825 = memref.load %arg2[%c121] : memref<144xf32, #tpu.memory_space<smem>>
    %c1_418 = arith.constant 1 : index
    %c1_419 = arith.constant 1 : index
    %c1_420 = arith.constant 1 : index
    %826 = vector.load %arg9[%c1_418, %c1_419, %c1_420] : memref<4x18x18xf32, #tpu.memory_space<vmem>>, vector<1x16x16xf32>
    %827 = vector.shape_cast %826 : vector<1x16x16xf32> to vector<16x16xf32>
    %828 = vector.broadcast %825 : f32 to vector<16x16xf32>
    %829 = arith.mulf %828, %827 : vector<16x16xf32>
    %830 = arith.addf %824, %829 : vector<16x16xf32>
    %c122 = arith.constant 122 : index
    %831 = memref.load %arg2[%c122] : memref<144xf32, #tpu.memory_space<smem>>
    %c1_421 = arith.constant 1 : index
    %c1_422 = arith.constant 1 : index
    %c2_423 = arith.constant 2 : index
    %832 = vector.load %arg9[%c1_421, %c1_422, %c2_423] : memref<4x18x18xf32, #tpu.memory_space<vmem>>, vector<1x16x16xf32>
    %833 = vector.shape_cast %832 : vector<1x16x16xf32> to vector<16x16xf32>
    %834 = vector.broadcast %831 : f32 to vector<16x16xf32>
    %835 = arith.mulf %834, %833 : vector<16x16xf32>
    %836 = arith.addf %830, %835 : vector<16x16xf32>
    %c123 = arith.constant 123 : index
    %837 = memref.load %arg2[%c123] : memref<144xf32, #tpu.memory_space<smem>>
    %c1_424 = arith.constant 1 : index
    %c2_425 = arith.constant 2 : index
    %c0_426 = arith.constant 0 : index
    %838 = vector.load %arg9[%c1_424, %c2_425, %c0_426] : memref<4x18x18xf32, #tpu.memory_space<vmem>>, vector<1x16x16xf32>
    %839 = vector.shape_cast %838 : vector<1x16x16xf32> to vector<16x16xf32>
    %840 = vector.broadcast %837 : f32 to vector<16x16xf32>
    %841 = arith.mulf %840, %839 : vector<16x16xf32>
    %842 = arith.addf %836, %841 : vector<16x16xf32>
    %c124 = arith.constant 124 : index
    %843 = memref.load %arg2[%c124] : memref<144xf32, #tpu.memory_space<smem>>
    %c1_427 = arith.constant 1 : index
    %c2_428 = arith.constant 2 : index
    %c1_429 = arith.constant 1 : index
    %844 = vector.load %arg9[%c1_427, %c2_428, %c1_429] : memref<4x18x18xf32, #tpu.memory_space<vmem>>, vector<1x16x16xf32>
    %845 = vector.shape_cast %844 : vector<1x16x16xf32> to vector<16x16xf32>
    %846 = vector.broadcast %843 : f32 to vector<16x16xf32>
    %847 = arith.mulf %846, %845 : vector<16x16xf32>
    %848 = arith.addf %842, %847 : vector<16x16xf32>
    %c125 = arith.constant 125 : index
    %849 = memref.load %arg2[%c125] : memref<144xf32, #tpu.memory_space<smem>>
    %c1_430 = arith.constant 1 : index
    %c2_431 = arith.constant 2 : index
    %c2_432 = arith.constant 2 : index
    %850 = vector.load %arg9[%c1_430, %c2_431, %c2_432] : memref<4x18x18xf32, #tpu.memory_space<vmem>>, vector<1x16x16xf32>
    %851 = vector.shape_cast %850 : vector<1x16x16xf32> to vector<16x16xf32>
    %852 = vector.broadcast %849 : f32 to vector<16x16xf32>
    %853 = arith.mulf %852, %851 : vector<16x16xf32>
    %854 = arith.addf %848, %853 : vector<16x16xf32>
    %c126 = arith.constant 126 : index
    %855 = memref.load %arg2[%c126] : memref<144xf32, #tpu.memory_space<smem>>
    %c2_433 = arith.constant 2 : index
    %c0_434 = arith.constant 0 : index
    %c0_435 = arith.constant 0 : index
    %856 = vector.load %arg9[%c2_433, %c0_434, %c0_435] : memref<4x18x18xf32, #tpu.memory_space<vmem>>, vector<1x16x16xf32>
    %857 = vector.shape_cast %856 : vector<1x16x16xf32> to vector<16x16xf32>
    %858 = vector.broadcast %855 : f32 to vector<16x16xf32>
    %859 = arith.mulf %858, %857 : vector<16x16xf32>
    %860 = arith.addf %854, %859 : vector<16x16xf32>
    %c127 = arith.constant 127 : index
    %861 = memref.load %arg2[%c127] : memref<144xf32, #tpu.memory_space<smem>>
    %c2_436 = arith.constant 2 : index
    %c0_437 = arith.constant 0 : index
    %c1_438 = arith.constant 1 : index
    %862 = vector.load %arg9[%c2_436, %c0_437, %c1_438] : memref<4x18x18xf32, #tpu.memory_space<vmem>>, vector<1x16x16xf32>
    %863 = vector.shape_cast %862 : vector<1x16x16xf32> to vector<16x16xf32>
    %864 = vector.broadcast %861 : f32 to vector<16x16xf32>
    %865 = arith.mulf %864, %863 : vector<16x16xf32>
    %866 = arith.addf %860, %865 : vector<16x16xf32>
    %c128 = arith.constant 128 : index
    %867 = memref.load %arg2[%c128] : memref<144xf32, #tpu.memory_space<smem>>
    %c2_439 = arith.constant 2 : index
    %c0_440 = arith.constant 0 : index
    %c2_441 = arith.constant 2 : index
    %868 = vector.load %arg9[%c2_439, %c0_440, %c2_441] : memref<4x18x18xf32, #tpu.memory_space<vmem>>, vector<1x16x16xf32>
    %869 = vector.shape_cast %868 : vector<1x16x16xf32> to vector<16x16xf32>
    %870 = vector.broadcast %867 : f32 to vector<16x16xf32>
    %871 = arith.mulf %870, %869 : vector<16x16xf32>
    %872 = arith.addf %866, %871 : vector<16x16xf32>
    %c129 = arith.constant 129 : index
    %873 = memref.load %arg2[%c129] : memref<144xf32, #tpu.memory_space<smem>>
    %c2_442 = arith.constant 2 : index
    %c1_443 = arith.constant 1 : index
    %c0_444 = arith.constant 0 : index
    %874 = vector.load %arg9[%c2_442, %c1_443, %c0_444] : memref<4x18x18xf32, #tpu.memory_space<vmem>>, vector<1x16x16xf32>
    %875 = vector.shape_cast %874 : vector<1x16x16xf32> to vector<16x16xf32>
    %876 = vector.broadcast %873 : f32 to vector<16x16xf32>
    %877 = arith.mulf %876, %875 : vector<16x16xf32>
    %878 = arith.addf %872, %877 : vector<16x16xf32>
    %c130 = arith.constant 130 : index
    %879 = memref.load %arg2[%c130] : memref<144xf32, #tpu.memory_space<smem>>
    %c2_445 = arith.constant 2 : index
    %c1_446 = arith.constant 1 : index
    %c1_447 = arith.constant 1 : index
    %880 = vector.load %arg9[%c2_445, %c1_446, %c1_447] : memref<4x18x18xf32, #tpu.memory_space<vmem>>, vector<1x16x16xf32>
    %881 = vector.shape_cast %880 : vector<1x16x16xf32> to vector<16x16xf32>
    %882 = vector.broadcast %879 : f32 to vector<16x16xf32>
    %883 = arith.mulf %882, %881 : vector<16x16xf32>
    %884 = arith.addf %878, %883 : vector<16x16xf32>
    %c131 = arith.constant 131 : index
    %885 = memref.load %arg2[%c131] : memref<144xf32, #tpu.memory_space<smem>>
    %c2_448 = arith.constant 2 : index
    %c1_449 = arith.constant 1 : index
    %c2_450 = arith.constant 2 : index
    %886 = vector.load %arg9[%c2_448, %c1_449, %c2_450] : memref<4x18x18xf32, #tpu.memory_space<vmem>>, vector<1x16x16xf32>
    %887 = vector.shape_cast %886 : vector<1x16x16xf32> to vector<16x16xf32>
    %888 = vector.broadcast %885 : f32 to vector<16x16xf32>
    %889 = arith.mulf %888, %887 : vector<16x16xf32>
    %890 = arith.addf %884, %889 : vector<16x16xf32>
    %c132 = arith.constant 132 : index
    %891 = memref.load %arg2[%c132] : memref<144xf32, #tpu.memory_space<smem>>
    %c2_451 = arith.constant 2 : index
    %c2_452 = arith.constant 2 : index
    %c0_453 = arith.constant 0 : index
    %892 = vector.load %arg9[%c2_451, %c2_452, %c0_453] : memref<4x18x18xf32, #tpu.memory_space<vmem>>, vector<1x16x16xf32>
    %893 = vector.shape_cast %892 : vector<1x16x16xf32> to vector<16x16xf32>
    %894 = vector.broadcast %891 : f32 to vector<16x16xf32>
    %895 = arith.mulf %894, %893 : vector<16x16xf32>
    %896 = arith.addf %890, %895 : vector<16x16xf32>
    %c133 = arith.constant 133 : index
    %897 = memref.load %arg2[%c133] : memref<144xf32, #tpu.memory_space<smem>>
    %c2_454 = arith.constant 2 : index
    %c2_455 = arith.constant 2 : index
    %c1_456 = arith.constant 1 : index
    %898 = vector.load %arg9[%c2_454, %c2_455, %c1_456] : memref<4x18x18xf32, #tpu.memory_space<vmem>>, vector<1x16x16xf32>
    %899 = vector.shape_cast %898 : vector<1x16x16xf32> to vector<16x16xf32>
    %900 = vector.broadcast %897 : f32 to vector<16x16xf32>
    %901 = arith.mulf %900, %899 : vector<16x16xf32>
    %902 = arith.addf %896, %901 : vector<16x16xf32>
    %c134 = arith.constant 134 : index
    %903 = memref.load %arg2[%c134] : memref<144xf32, #tpu.memory_space<smem>>
    %c2_457 = arith.constant 2 : index
    %c2_458 = arith.constant 2 : index
    %c2_459 = arith.constant 2 : index
    %904 = vector.load %arg9[%c2_457, %c2_458, %c2_459] : memref<4x18x18xf32, #tpu.memory_space<vmem>>, vector<1x16x16xf32>
    %905 = vector.shape_cast %904 : vector<1x16x16xf32> to vector<16x16xf32>
    %906 = vector.broadcast %903 : f32 to vector<16x16xf32>
    %907 = arith.mulf %906, %905 : vector<16x16xf32>
    %908 = arith.addf %902, %907 : vector<16x16xf32>
    %c135 = arith.constant 135 : index
    %909 = memref.load %arg2[%c135] : memref<144xf32, #tpu.memory_space<smem>>
    %c3_460 = arith.constant 3 : index
    %c0_461 = arith.constant 0 : index
    %c0_462 = arith.constant 0 : index
    %910 = vector.load %arg9[%c3_460, %c0_461, %c0_462] : memref<4x18x18xf32, #tpu.memory_space<vmem>>, vector<1x16x16xf32>
    %911 = vector.shape_cast %910 : vector<1x16x16xf32> to vector<16x16xf32>
    %912 = vector.broadcast %909 : f32 to vector<16x16xf32>
    %913 = arith.mulf %912, %911 : vector<16x16xf32>
    %914 = arith.addf %908, %913 : vector<16x16xf32>
    %c136 = arith.constant 136 : index
    %915 = memref.load %arg2[%c136] : memref<144xf32, #tpu.memory_space<smem>>
    %c3_463 = arith.constant 3 : index
    %c0_464 = arith.constant 0 : index
    %c1_465 = arith.constant 1 : index
    %916 = vector.load %arg9[%c3_463, %c0_464, %c1_465] : memref<4x18x18xf32, #tpu.memory_space<vmem>>, vector<1x16x16xf32>
    %917 = vector.shape_cast %916 : vector<1x16x16xf32> to vector<16x16xf32>
    %918 = vector.broadcast %915 : f32 to vector<16x16xf32>
    %919 = arith.mulf %918, %917 : vector<16x16xf32>
    %920 = arith.addf %914, %919 : vector<16x16xf32>
    %c137 = arith.constant 137 : index
    %921 = memref.load %arg2[%c137] : memref<144xf32, #tpu.memory_space<smem>>
    %c3_466 = arith.constant 3 : index
    %c0_467 = arith.constant 0 : index
    %c2_468 = arith.constant 2 : index
    %922 = vector.load %arg9[%c3_466, %c0_467, %c2_468] : memref<4x18x18xf32, #tpu.memory_space<vmem>>, vector<1x16x16xf32>
    %923 = vector.shape_cast %922 : vector<1x16x16xf32> to vector<16x16xf32>
    %924 = vector.broadcast %921 : f32 to vector<16x16xf32>
    %925 = arith.mulf %924, %923 : vector<16x16xf32>
    %926 = arith.addf %920, %925 : vector<16x16xf32>
    %c138 = arith.constant 138 : index
    %927 = memref.load %arg2[%c138] : memref<144xf32, #tpu.memory_space<smem>>
    %c3_469 = arith.constant 3 : index
    %c1_470 = arith.constant 1 : index
    %c0_471 = arith.constant 0 : index
    %928 = vector.load %arg9[%c3_469, %c1_470, %c0_471] : memref<4x18x18xf32, #tpu.memory_space<vmem>>, vector<1x16x16xf32>
    %929 = vector.shape_cast %928 : vector<1x16x16xf32> to vector<16x16xf32>
    %930 = vector.broadcast %927 : f32 to vector<16x16xf32>
    %931 = arith.mulf %930, %929 : vector<16x16xf32>
    %932 = arith.addf %926, %931 : vector<16x16xf32>
    %c139 = arith.constant 139 : index
    %933 = memref.load %arg2[%c139] : memref<144xf32, #tpu.memory_space<smem>>
    %c3_472 = arith.constant 3 : index
    %c1_473 = arith.constant 1 : index
    %c1_474 = arith.constant 1 : index
    %934 = vector.load %arg9[%c3_472, %c1_473, %c1_474] : memref<4x18x18xf32, #tpu.memory_space<vmem>>, vector<1x16x16xf32>
    %935 = vector.shape_cast %934 : vector<1x16x16xf32> to vector<16x16xf32>
    %936 = vector.broadcast %933 : f32 to vector<16x16xf32>
    %937 = arith.mulf %936, %935 : vector<16x16xf32>
    %938 = arith.addf %932, %937 : vector<16x16xf32>
    %c140 = arith.constant 140 : index
    %939 = memref.load %arg2[%c140] : memref<144xf32, #tpu.memory_space<smem>>
    %c3_475 = arith.constant 3 : index
    %c1_476 = arith.constant 1 : index
    %c2_477 = arith.constant 2 : index
    %940 = vector.load %arg9[%c3_475, %c1_476, %c2_477] : memref<4x18x18xf32, #tpu.memory_space<vmem>>, vector<1x16x16xf32>
    %941 = vector.shape_cast %940 : vector<1x16x16xf32> to vector<16x16xf32>
    %942 = vector.broadcast %939 : f32 to vector<16x16xf32>
    %943 = arith.mulf %942, %941 : vector<16x16xf32>
    %944 = arith.addf %938, %943 : vector<16x16xf32>
    %c141 = arith.constant 141 : index
    %945 = memref.load %arg2[%c141] : memref<144xf32, #tpu.memory_space<smem>>
    %c3_478 = arith.constant 3 : index
    %c2_479 = arith.constant 2 : index
    %c0_480 = arith.constant 0 : index
    %946 = vector.load %arg9[%c3_478, %c2_479, %c0_480] : memref<4x18x18xf32, #tpu.memory_space<vmem>>, vector<1x16x16xf32>
    %947 = vector.shape_cast %946 : vector<1x16x16xf32> to vector<16x16xf32>
    %948 = vector.broadcast %945 : f32 to vector<16x16xf32>
    %949 = arith.mulf %948, %947 : vector<16x16xf32>
    %950 = arith.addf %944, %949 : vector<16x16xf32>
    %c142 = arith.constant 142 : index
    %951 = memref.load %arg2[%c142] : memref<144xf32, #tpu.memory_space<smem>>
    %c3_481 = arith.constant 3 : index
    %c2_482 = arith.constant 2 : index
    %c1_483 = arith.constant 1 : index
    %952 = vector.load %arg9[%c3_481, %c2_482, %c1_483] : memref<4x18x18xf32, #tpu.memory_space<vmem>>, vector<1x16x16xf32>
    %953 = vector.shape_cast %952 : vector<1x16x16xf32> to vector<16x16xf32>
    %954 = vector.broadcast %951 : f32 to vector<16x16xf32>
    %955 = arith.mulf %954, %953 : vector<16x16xf32>
    %956 = arith.addf %950, %955 : vector<16x16xf32>
    %c143 = arith.constant 143 : index
    %957 = memref.load %arg2[%c143] : memref<144xf32, #tpu.memory_space<smem>>
    %c3_484 = arith.constant 3 : index
    %c2_485 = arith.constant 2 : index
    %c2_486 = arith.constant 2 : index
    %958 = vector.load %arg9[%c3_484, %c2_485, %c2_486] : memref<4x18x18xf32, #tpu.memory_space<vmem>>, vector<1x16x16xf32>
    %959 = vector.shape_cast %958 : vector<1x16x16xf32> to vector<16x16xf32>
    %960 = vector.broadcast %957 : f32 to vector<16x16xf32>
    %961 = arith.mulf %960, %959 : vector<16x16xf32>
    %962 = arith.addf %956, %961 : vector<16x16xf32>
    %cst_487 = arith.constant 0.000000e+00 : f32
    %963 = vector.broadcast %cst_487 : f32 to vector<16x16xf32>
    %964 = arith.cmpf oge, %962, %963 : vector<16x16xf32>
    %cst_488 = arith.constant 2.000000e-01 : f32
    %965 = vector.broadcast %cst_488 : f32 to vector<16x16xf32>
    %966 = arith.mulf %965, %962 : vector<16x16xf32>
    %967 = arith.select %964, %962, %966 : vector<16x16xi1>, vector<16x16xf32>
    %c3_489 = arith.constant 3 : index
    %c1_490 = arith.constant 1 : index
    %c1_491 = arith.constant 1 : index
    %968 = vector.load %arg10[%c3_489, %c1_490, %c1_491] : memref<4x18x18xf32, #tpu.memory_space<vmem>>, vector<1x16x16xf32>
    %969 = vector.shape_cast %968 : vector<1x16x16xf32> to vector<16x16xf32>
    %970 = vector.shape_cast %967 : vector<16x16xf32> to vector<1x16x16xf32>
    tpu.vector_store %arg10[%c3_489, %c1_490, %c1_491], %970 {strides = array<i32>} : memref<4x18x18xf32, #tpu.memory_space<vmem>>, vector<1x16x16xf32>,
    %cst_492 = arith.constant 0.000000e+00 : f32
    %971 = vector.broadcast %cst_492 : f32 to vector<16x16xf32>
    %c0_493 = arith.constant 0 : index
    %972 = memref.load %arg7[%c0_493] : memref<4xf32, #tpu.memory_space<smem>>
    %973 = vector.broadcast %972 : f32 to vector<16x16xf32>
    %974 = arith.addf %971, %973 : vector<16x16xf32>
    %c0_494 = arith.constant 0 : index
    %975 = memref.load %arg6[%c0_494] : memref<144xf32, #tpu.memory_space<smem>>
    %c0_495 = arith.constant 0 : index
    %c0_496 = arith.constant 0 : index
    %c0_497 = arith.constant 0 : index
    %976 = vector.load %arg10[%c0_495, %c0_496, %c0_497] : memref<4x18x18xf32, #tpu.memory_space<vmem>>, vector<1x16x16xf32>
    %977 = vector.shape_cast %976 : vector<1x16x16xf32> to vector<16x16xf32>
    %978 = vector.broadcast %975 : f32 to vector<16x16xf32>
    %979 = arith.mulf %978, %977 : vector<16x16xf32>
    %980 = arith.addf %974, %979 : vector<16x16xf32>
    %c1_498 = arith.constant 1 : index
    %981 = memref.load %arg6[%c1_498] : memref<144xf32, #tpu.memory_space<smem>>
    %c0_499 = arith.constant 0 : index
    %c0_500 = arith.constant 0 : index
    %c1_501 = arith.constant 1 : index
    %982 = vector.load %arg10[%c0_499, %c0_500, %c1_501] : memref<4x18x18xf32, #tpu.memory_space<vmem>>, vector<1x16x16xf32>
    %983 = vector.shape_cast %982 : vector<1x16x16xf32> to vector<16x16xf32>
    %984 = vector.broadcast %981 : f32 to vector<16x16xf32>
    %985 = arith.mulf %984, %983 : vector<16x16xf32>
    %986 = arith.addf %980, %985 : vector<16x16xf32>
    %c2_502 = arith.constant 2 : index
    %987 = memref.load %arg6[%c2_502] : memref<144xf32, #tpu.memory_space<smem>>
    %c0_503 = arith.constant 0 : index
    %c0_504 = arith.constant 0 : index
    %c2_505 = arith.constant 2 : index
    %988 = vector.load %arg10[%c0_503, %c0_504, %c2_505] : memref<4x18x18xf32, #tpu.memory_space<vmem>>, vector<1x16x16xf32>
    %989 = vector.shape_cast %988 : vector<1x16x16xf32> to vector<16x16xf32>
    %990 = vector.broadcast %987 : f32 to vector<16x16xf32>
    %991 = arith.mulf %990, %989 : vector<16x16xf32>
    %992 = arith.addf %986, %991 : vector<16x16xf32>
    %c3_506 = arith.constant 3 : index
    %993 = memref.load %arg6[%c3_506] : memref<144xf32, #tpu.memory_space<smem>>
    %c0_507 = arith.constant 0 : index
    %c1_508 = arith.constant 1 : index
    %c0_509 = arith.constant 0 : index
    %994 = vector.load %arg10[%c0_507, %c1_508, %c0_509] : memref<4x18x18xf32, #tpu.memory_space<vmem>>, vector<1x16x16xf32>
    %995 = vector.shape_cast %994 : vector<1x16x16xf32> to vector<16x16xf32>
    %996 = vector.broadcast %993 : f32 to vector<16x16xf32>
    %997 = arith.mulf %996, %995 : vector<16x16xf32>
    %998 = arith.addf %992, %997 : vector<16x16xf32>
    %c4_510 = arith.constant 4 : index
    %999 = memref.load %arg6[%c4_510] : memref<144xf32, #tpu.memory_space<smem>>
    %c0_511 = arith.constant 0 : index
    %c1_512 = arith.constant 1 : index
    %c1_513 = arith.constant 1 : index
    %1000 = vector.load %arg10[%c0_511, %c1_512, %c1_513] : memref<4x18x18xf32, #tpu.memory_space<vmem>>, vector<1x16x16xf32>
    %1001 = vector.shape_cast %1000 : vector<1x16x16xf32> to vector<16x16xf32>
    %1002 = vector.broadcast %999 : f32 to vector<16x16xf32>
    %1003 = arith.mulf %1002, %1001 : vector<16x16xf32>
    %1004 = arith.addf %998, %1003 : vector<16x16xf32>
    %c5_514 = arith.constant 5 : index
    %1005 = memref.load %arg6[%c5_514] : memref<144xf32, #tpu.memory_space<smem>>
    %c0_515 = arith.constant 0 : index
    %c1_516 = arith.constant 1 : index
    %c2_517 = arith.constant 2 : index
    %1006 = vector.load %arg10[%c0_515, %c1_516, %c2_517] : memref<4x18x18xf32, #tpu.memory_space<vmem>>, vector<1x16x16xf32>
    %1007 = vector.shape_cast %1006 : vector<1x16x16xf32> to vector<16x16xf32>
    %1008 = vector.broadcast %1005 : f32 to vector<16x16xf32>
    %1009 = arith.mulf %1008, %1007 : vector<16x16xf32>
    %1010 = arith.addf %1004, %1009 : vector<16x16xf32>
    %c6_518 = arith.constant 6 : index
    %1011 = memref.load %arg6[%c6_518] : memref<144xf32, #tpu.memory_space<smem>>
    %c0_519 = arith.constant 0 : index
    %c2_520 = arith.constant 2 : index
    %c0_521 = arith.constant 0 : index
    %1012 = vector.load %arg10[%c0_519, %c2_520, %c0_521] : memref<4x18x18xf32, #tpu.memory_space<vmem>>, vector<1x16x16xf32>
    %1013 = vector.shape_cast %1012 : vector<1x16x16xf32> to vector<16x16xf32>
    %1014 = vector.broadcast %1011 : f32 to vector<16x16xf32>
    %1015 = arith.mulf %1014, %1013 : vector<16x16xf32>
    %1016 = arith.addf %1010, %1015 : vector<16x16xf32>
    %c7_522 = arith.constant 7 : index
    %1017 = memref.load %arg6[%c7_522] : memref<144xf32, #tpu.memory_space<smem>>
    %c0_523 = arith.constant 0 : index
    %c2_524 = arith.constant 2 : index
    %c1_525 = arith.constant 1 : index
    %1018 = vector.load %arg10[%c0_523, %c2_524, %c1_525] : memref<4x18x18xf32, #tpu.memory_space<vmem>>, vector<1x16x16xf32>
    %1019 = vector.shape_cast %1018 : vector<1x16x16xf32> to vector<16x16xf32>
    %1020 = vector.broadcast %1017 : f32 to vector<16x16xf32>
    %1021 = arith.mulf %1020, %1019 : vector<16x16xf32>
    %1022 = arith.addf %1016, %1021 : vector<16x16xf32>
    %c8_526 = arith.constant 8 : index
    %1023 = memref.load %arg6[%c8_526] : memref<144xf32, #tpu.memory_space<smem>>
    %c0_527 = arith.constant 0 : index
    %c2_528 = arith.constant 2 : index
    %c2_529 = arith.constant 2 : index
    %1024 = vector.load %arg10[%c0_527, %c2_528, %c2_529] : memref<4x18x18xf32, #tpu.memory_space<vmem>>, vector<1x16x16xf32>
    %1025 = vector.shape_cast %1024 : vector<1x16x16xf32> to vector<16x16xf32>
    %1026 = vector.broadcast %1023 : f32 to vector<16x16xf32>
    %1027 = arith.mulf %1026, %1025 : vector<16x16xf32>
    %1028 = arith.addf %1022, %1027 : vector<16x16xf32>
    %c9_530 = arith.constant 9 : index
    %1029 = memref.load %arg6[%c9_530] : memref<144xf32, #tpu.memory_space<smem>>
    %c1_531 = arith.constant 1 : index
    %c0_532 = arith.constant 0 : index
    %c0_533 = arith.constant 0 : index
    %1030 = vector.load %arg10[%c1_531, %c0_532, %c0_533] : memref<4x18x18xf32, #tpu.memory_space<vmem>>, vector<1x16x16xf32>
    %1031 = vector.shape_cast %1030 : vector<1x16x16xf32> to vector<16x16xf32>
    %1032 = vector.broadcast %1029 : f32 to vector<16x16xf32>
    %1033 = arith.mulf %1032, %1031 : vector<16x16xf32>
    %1034 = arith.addf %1028, %1033 : vector<16x16xf32>
    %c10_534 = arith.constant 10 : index
    %1035 = memref.load %arg6[%c10_534] : memref<144xf32, #tpu.memory_space<smem>>
    %c1_535 = arith.constant 1 : index
    %c0_536 = arith.constant 0 : index
    %c1_537 = arith.constant 1 : index
    %1036 = vector.load %arg10[%c1_535, %c0_536, %c1_537] : memref<4x18x18xf32, #tpu.memory_space<vmem>>, vector<1x16x16xf32>
    %1037 = vector.shape_cast %1036 : vector<1x16x16xf32> to vector<16x16xf32>
    %1038 = vector.broadcast %1035 : f32 to vector<16x16xf32>
    %1039 = arith.mulf %1038, %1037 : vector<16x16xf32>
    %1040 = arith.addf %1034, %1039 : vector<16x16xf32>
    %c11_538 = arith.constant 11 : index
    %1041 = memref.load %arg6[%c11_538] : memref<144xf32, #tpu.memory_space<smem>>
    %c1_539 = arith.constant 1 : index
    %c0_540 = arith.constant 0 : index
    %c2_541 = arith.constant 2 : index
    %1042 = vector.load %arg10[%c1_539, %c0_540, %c2_541] : memref<4x18x18xf32, #tpu.memory_space<vmem>>, vector<1x16x16xf32>
    %1043 = vector.shape_cast %1042 : vector<1x16x16xf32> to vector<16x16xf32>
    %1044 = vector.broadcast %1041 : f32 to vector<16x16xf32>
    %1045 = arith.mulf %1044, %1043 : vector<16x16xf32>
    %1046 = arith.addf %1040, %1045 : vector<16x16xf32>
    %c12_542 = arith.constant 12 : index
    %1047 = memref.load %arg6[%c12_542] : memref<144xf32, #tpu.memory_space<smem>>
    %c1_543 = arith.constant 1 : index
    %c1_544 = arith.constant 1 : index
    %c0_545 = arith.constant 0 : index
    %1048 = vector.load %arg10[%c1_543, %c1_544, %c0_545] : memref<4x18x18xf32, #tpu.memory_space<vmem>>, vector<1x16x16xf32>
    %1049 = vector.shape_cast %1048 : vector<1x16x16xf32> to vector<16x16xf32>
    %1050 = vector.broadcast %1047 : f32 to vector<16x16xf32>
    %1051 = arith.mulf %1050, %1049 : vector<16x16xf32>
    %1052 = arith.addf %1046, %1051 : vector<16x16xf32>
    %c13_546 = arith.constant 13 : index
    %1053 = memref.load %arg6[%c13_546] : memref<144xf32, #tpu.memory_space<smem>>
    %c1_547 = arith.constant 1 : index
    %c1_548 = arith.constant 1 : index
    %c1_549 = arith.constant 1 : index
    %1054 = vector.load %arg10[%c1_547, %c1_548, %c1_549] : memref<4x18x18xf32, #tpu.memory_space<vmem>>, vector<1x16x16xf32>
    %1055 = vector.shape_cast %1054 : vector<1x16x16xf32> to vector<16x16xf32>
    %1056 = vector.broadcast %1053 : f32 to vector<16x16xf32>
    %1057 = arith.mulf %1056, %1055 : vector<16x16xf32>
    %1058 = arith.addf %1052, %1057 : vector<16x16xf32>
    %c14_550 = arith.constant 14 : index
    %1059 = memref.load %arg6[%c14_550] : memref<144xf32, #tpu.memory_space<smem>>
    %c1_551 = arith.constant 1 : index
    %c1_552 = arith.constant 1 : index
    %c2_553 = arith.constant 2 : index
    %1060 = vector.load %arg10[%c1_551, %c1_552, %c2_553] : memref<4x18x18xf32, #tpu.memory_space<vmem>>, vector<1x16x16xf32>
    %1061 = vector.shape_cast %1060 : vector<1x16x16xf32> to vector<16x16xf32>
    %1062 = vector.broadcast %1059 : f32 to vector<16x16xf32>
    %1063 = arith.mulf %1062, %1061 : vector<16x16xf32>
    %1064 = arith.addf %1058, %1063 : vector<16x16xf32>
    %c15_554 = arith.constant 15 : index
    %1065 = memref.load %arg6[%c15_554] : memref<144xf32, #tpu.memory_space<smem>>
    %c1_555 = arith.constant 1 : index
    %c2_556 = arith.constant 2 : index
    %c0_557 = arith.constant 0 : index
    %1066 = vector.load %arg10[%c1_555, %c2_556, %c0_557] : memref<4x18x18xf32, #tpu.memory_space<vmem>>, vector<1x16x16xf32>
    %1067 = vector.shape_cast %1066 : vector<1x16x16xf32> to vector<16x16xf32>
    %1068 = vector.broadcast %1065 : f32 to vector<16x16xf32>
    %1069 = arith.mulf %1068, %1067 : vector<16x16xf32>
    %1070 = arith.addf %1064, %1069 : vector<16x16xf32>
    %c16_558 = arith.constant 16 : index
    %1071 = memref.load %arg6[%c16_558] : memref<144xf32, #tpu.memory_space<smem>>
    %c1_559 = arith.constant 1 : index
    %c2_560 = arith.constant 2 : index
    %c1_561 = arith.constant 1 : index
    %1072 = vector.load %arg10[%c1_559, %c2_560, %c1_561] : memref<4x18x18xf32, #tpu.memory_space<vmem>>, vector<1x16x16xf32>
    %1073 = vector.shape_cast %1072 : vector<1x16x16xf32> to vector<16x16xf32>
    %1074 = vector.broadcast %1071 : f32 to vector<16x16xf32>
    %1075 = arith.mulf %1074, %1073 : vector<16x16xf32>
    %1076 = arith.addf %1070, %1075 : vector<16x16xf32>
    %c17_562 = arith.constant 17 : index
    %1077 = memref.load %arg6[%c17_562] : memref<144xf32, #tpu.memory_space<smem>>
    %c1_563 = arith.constant 1 : index
    %c2_564 = arith.constant 2 : index
    %c2_565 = arith.constant 2 : index
    %1078 = vector.load %arg10[%c1_563, %c2_564, %c2_565] : memref<4x18x18xf32, #tpu.memory_space<vmem>>, vector<1x16x16xf32>
    %1079 = vector.shape_cast %1078 : vector<1x16x16xf32> to vector<16x16xf32>
    %1080 = vector.broadcast %1077 : f32 to vector<16x16xf32>
    %1081 = arith.mulf %1080, %1079 : vector<16x16xf32>
    %1082 = arith.addf %1076, %1081 : vector<16x16xf32>
    %c18_566 = arith.constant 18 : index
    %1083 = memref.load %arg6[%c18_566] : memref<144xf32, #tpu.memory_space<smem>>
    %c2_567 = arith.constant 2 : index
    %c0_568 = arith.constant 0 : index
    %c0_569 = arith.constant 0 : index
    %1084 = vector.load %arg10[%c2_567, %c0_568, %c0_569] : memref<4x18x18xf32, #tpu.memory_space<vmem>>, vector<1x16x16xf32>
    %1085 = vector.shape_cast %1084 : vector<1x16x16xf32> to vector<16x16xf32>
    %1086 = vector.broadcast %1083 : f32 to vector<16x16xf32>
    %1087 = arith.mulf %1086, %1085 : vector<16x16xf32>
    %1088 = arith.addf %1082, %1087 : vector<16x16xf32>
    %c19_570 = arith.constant 19 : index
    %1089 = memref.load %arg6[%c19_570] : memref<144xf32, #tpu.memory_space<smem>>
    %c2_571 = arith.constant 2 : index
    %c0_572 = arith.constant 0 : index
    %c1_573 = arith.constant 1 : index
    %1090 = vector.load %arg10[%c2_571, %c0_572, %c1_573] : memref<4x18x18xf32, #tpu.memory_space<vmem>>, vector<1x16x16xf32>
    %1091 = vector.shape_cast %1090 : vector<1x16x16xf32> to vector<16x16xf32>
    %1092 = vector.broadcast %1089 : f32 to vector<16x16xf32>
    %1093 = arith.mulf %1092, %1091 : vector<16x16xf32>
    %1094 = arith.addf %1088, %1093 : vector<16x16xf32>
    %c20_574 = arith.constant 20 : index
    %1095 = memref.load %arg6[%c20_574] : memref<144xf32, #tpu.memory_space<smem>>
    %c2_575 = arith.constant 2 : index
    %c0_576 = arith.constant 0 : index
    %c2_577 = arith.constant 2 : index
    %1096 = vector.load %arg10[%c2_575, %c0_576, %c2_577] : memref<4x18x18xf32, #tpu.memory_space<vmem>>, vector<1x16x16xf32>
    %1097 = vector.shape_cast %1096 : vector<1x16x16xf32> to vector<16x16xf32>
    %1098 = vector.broadcast %1095 : f32 to vector<16x16xf32>
    %1099 = arith.mulf %1098, %1097 : vector<16x16xf32>
    %1100 = arith.addf %1094, %1099 : vector<16x16xf32>
    %c21_578 = arith.constant 21 : index
    %1101 = memref.load %arg6[%c21_578] : memref<144xf32, #tpu.memory_space<smem>>
    %c2_579 = arith.constant 2 : index
    %c1_580 = arith.constant 1 : index
    %c0_581 = arith.constant 0 : index
    %1102 = vector.load %arg10[%c2_579, %c1_580, %c0_581] : memref<4x18x18xf32, #tpu.memory_space<vmem>>, vector<1x16x16xf32>
    %1103 = vector.shape_cast %1102 : vector<1x16x16xf32> to vector<16x16xf32>
    %1104 = vector.broadcast %1101 : f32 to vector<16x16xf32>
    %1105 = arith.mulf %1104, %1103 : vector<16x16xf32>
    %1106 = arith.addf %1100, %1105 : vector<16x16xf32>
    %c22_582 = arith.constant 22 : index
    %1107 = memref.load %arg6[%c22_582] : memref<144xf32, #tpu.memory_space<smem>>
    %c2_583 = arith.constant 2 : index
    %c1_584 = arith.constant 1 : index
    %c1_585 = arith.constant 1 : index
    %1108 = vector.load %arg10[%c2_583, %c1_584, %c1_585] : memref<4x18x18xf32, #tpu.memory_space<vmem>>, vector<1x16x16xf32>
    %1109 = vector.shape_cast %1108 : vector<1x16x16xf32> to vector<16x16xf32>
    %1110 = vector.broadcast %1107 : f32 to vector<16x16xf32>
    %1111 = arith.mulf %1110, %1109 : vector<16x16xf32>
    %1112 = arith.addf %1106, %1111 : vector<16x16xf32>
    %c23_586 = arith.constant 23 : index
    %1113 = memref.load %arg6[%c23_586] : memref<144xf32, #tpu.memory_space<smem>>
    %c2_587 = arith.constant 2 : index
    %c1_588 = arith.constant 1 : index
    %c2_589 = arith.constant 2 : index
    %1114 = vector.load %arg10[%c2_587, %c1_588, %c2_589] : memref<4x18x18xf32, #tpu.memory_space<vmem>>, vector<1x16x16xf32>
    %1115 = vector.shape_cast %1114 : vector<1x16x16xf32> to vector<16x16xf32>
    %1116 = vector.broadcast %1113 : f32 to vector<16x16xf32>
    %1117 = arith.mulf %1116, %1115 : vector<16x16xf32>
    %1118 = arith.addf %1112, %1117 : vector<16x16xf32>
    %c24_590 = arith.constant 24 : index
    %1119 = memref.load %arg6[%c24_590] : memref<144xf32, #tpu.memory_space<smem>>
    %c2_591 = arith.constant 2 : index
    %c2_592 = arith.constant 2 : index
    %c0_593 = arith.constant 0 : index
    %1120 = vector.load %arg10[%c2_591, %c2_592, %c0_593] : memref<4x18x18xf32, #tpu.memory_space<vmem>>, vector<1x16x16xf32>
    %1121 = vector.shape_cast %1120 : vector<1x16x16xf32> to vector<16x16xf32>
    %1122 = vector.broadcast %1119 : f32 to vector<16x16xf32>
    %1123 = arith.mulf %1122, %1121 : vector<16x16xf32>
    %1124 = arith.addf %1118, %1123 : vector<16x16xf32>
    %c25_594 = arith.constant 25 : index
    %1125 = memref.load %arg6[%c25_594] : memref<144xf32, #tpu.memory_space<smem>>
    %c2_595 = arith.constant 2 : index
    %c2_596 = arith.constant 2 : index
    %c1_597 = arith.constant 1 : index
    %1126 = vector.load %arg10[%c2_595, %c2_596, %c1_597] : memref<4x18x18xf32, #tpu.memory_space<vmem>>, vector<1x16x16xf32>
    %1127 = vector.shape_cast %1126 : vector<1x16x16xf32> to vector<16x16xf32>
    %1128 = vector.broadcast %1125 : f32 to vector<16x16xf32>
    %1129 = arith.mulf %1128, %1127 : vector<16x16xf32>
    %1130 = arith.addf %1124, %1129 : vector<16x16xf32>
    %c26_598 = arith.constant 26 : index
    %1131 = memref.load %arg6[%c26_598] : memref<144xf32, #tpu.memory_space<smem>>
    %c2_599 = arith.constant 2 : index
    %c2_600 = arith.constant 2 : index
    %c2_601 = arith.constant 2 : index
    %1132 = vector.load %arg10[%c2_599, %c2_600, %c2_601] : memref<4x18x18xf32, #tpu.memory_space<vmem>>, vector<1x16x16xf32>
    %1133 = vector.shape_cast %1132 : vector<1x16x16xf32> to vector<16x16xf32>
    %1134 = vector.broadcast %1131 : f32 to vector<16x16xf32>
    %1135 = arith.mulf %1134, %1133 : vector<16x16xf32>
    %1136 = arith.addf %1130, %1135 : vector<16x16xf32>
    %c27_602 = arith.constant 27 : index
    %1137 = memref.load %arg6[%c27_602] : memref<144xf32, #tpu.memory_space<smem>>
    %c3_603 = arith.constant 3 : index
    %c0_604 = arith.constant 0 : index
    %c0_605 = arith.constant 0 : index
    %1138 = vector.load %arg10[%c3_603, %c0_604, %c0_605] : memref<4x18x18xf32, #tpu.memory_space<vmem>>, vector<1x16x16xf32>
    %1139 = vector.shape_cast %1138 : vector<1x16x16xf32> to vector<16x16xf32>
    %1140 = vector.broadcast %1137 : f32 to vector<16x16xf32>
    %1141 = arith.mulf %1140, %1139 : vector<16x16xf32>
    %1142 = arith.addf %1136, %1141 : vector<16x16xf32>
    %c28_606 = arith.constant 28 : index
    %1143 = memref.load %arg6[%c28_606] : memref<144xf32, #tpu.memory_space<smem>>
    %c3_607 = arith.constant 3 : index
    %c0_608 = arith.constant 0 : index
    %c1_609 = arith.constant 1 : index
    %1144 = vector.load %arg10[%c3_607, %c0_608, %c1_609] : memref<4x18x18xf32, #tpu.memory_space<vmem>>, vector<1x16x16xf32>
    %1145 = vector.shape_cast %1144 : vector<1x16x16xf32> to vector<16x16xf32>
    %1146 = vector.broadcast %1143 : f32 to vector<16x16xf32>
    %1147 = arith.mulf %1146, %1145 : vector<16x16xf32>
    %1148 = arith.addf %1142, %1147 : vector<16x16xf32>
    %c29_610 = arith.constant 29 : index
    %1149 = memref.load %arg6[%c29_610] : memref<144xf32, #tpu.memory_space<smem>>
    %c3_611 = arith.constant 3 : index
    %c0_612 = arith.constant 0 : index
    %c2_613 = arith.constant 2 : index
    %1150 = vector.load %arg10[%c3_611, %c0_612, %c2_613] : memref<4x18x18xf32, #tpu.memory_space<vmem>>, vector<1x16x16xf32>
    %1151 = vector.shape_cast %1150 : vector<1x16x16xf32> to vector<16x16xf32>
    %1152 = vector.broadcast %1149 : f32 to vector<16x16xf32>
    %1153 = arith.mulf %1152, %1151 : vector<16x16xf32>
    %1154 = arith.addf %1148, %1153 : vector<16x16xf32>
    %c30_614 = arith.constant 30 : index
    %1155 = memref.load %arg6[%c30_614] : memref<144xf32, #tpu.memory_space<smem>>
    %c3_615 = arith.constant 3 : index
    %c1_616 = arith.constant 1 : index
    %c0_617 = arith.constant 0 : index
    %1156 = vector.load %arg10[%c3_615, %c1_616, %c0_617] : memref<4x18x18xf32, #tpu.memory_space<vmem>>, vector<1x16x16xf32>
    %1157 = vector.shape_cast %1156 : vector<1x16x16xf32> to vector<16x16xf32>
    %1158 = vector.broadcast %1155 : f32 to vector<16x16xf32>
    %1159 = arith.mulf %1158, %1157 : vector<16x16xf32>
    %1160 = arith.addf %1154, %1159 : vector<16x16xf32>
    %c31_618 = arith.constant 31 : index
    %1161 = memref.load %arg6[%c31_618] : memref<144xf32, #tpu.memory_space<smem>>
    %c3_619 = arith.constant 3 : index
    %c1_620 = arith.constant 1 : index
    %c1_621 = arith.constant 1 : index
    %1162 = vector.load %arg10[%c3_619, %c1_620, %c1_621] : memref<4x18x18xf32, #tpu.memory_space<vmem>>, vector<1x16x16xf32>
    %1163 = vector.shape_cast %1162 : vector<1x16x16xf32> to vector<16x16xf32>
    %1164 = vector.broadcast %1161 : f32 to vector<16x16xf32>
    %1165 = arith.mulf %1164, %1163 : vector<16x16xf32>
    %1166 = arith.addf %1160, %1165 : vector<16x16xf32>
    %c32_622 = arith.constant 32 : index
    %1167 = memref.load %arg6[%c32_622] : memref<144xf32, #tpu.memory_space<smem>>
    %c3_623 = arith.constant 3 : index
    %c1_624 = arith.constant 1 : index
    %c2_625 = arith.constant 2 : index
    %1168 = vector.load %arg10[%c3_623, %c1_624, %c2_625] : memref<4x18x18xf32, #tpu.memory_space<vmem>>, vector<1x16x16xf32>
    %1169 = vector.shape_cast %1168 : vector<1x16x16xf32> to vector<16x16xf32>
    %1170 = vector.broadcast %1167 : f32 to vector<16x16xf32>
    %1171 = arith.mulf %1170, %1169 : vector<16x16xf32>
    %1172 = arith.addf %1166, %1171 : vector<16x16xf32>
    %c33_626 = arith.constant 33 : index
    %1173 = memref.load %arg6[%c33_626] : memref<144xf32, #tpu.memory_space<smem>>
    %c3_627 = arith.constant 3 : index
    %c2_628 = arith.constant 2 : index
    %c0_629 = arith.constant 0 : index
    %1174 = vector.load %arg10[%c3_627, %c2_628, %c0_629] : memref<4x18x18xf32, #tpu.memory_space<vmem>>, vector<1x16x16xf32>
    %1175 = vector.shape_cast %1174 : vector<1x16x16xf32> to vector<16x16xf32>
    %1176 = vector.broadcast %1173 : f32 to vector<16x16xf32>
    %1177 = arith.mulf %1176, %1175 : vector<16x16xf32>
    %1178 = arith.addf %1172, %1177 : vector<16x16xf32>
    %c34_630 = arith.constant 34 : index
    %1179 = memref.load %arg6[%c34_630] : memref<144xf32, #tpu.memory_space<smem>>
    %c3_631 = arith.constant 3 : index
    %c2_632 = arith.constant 2 : index
    %c1_633 = arith.constant 1 : index
    %1180 = vector.load %arg10[%c3_631, %c2_632, %c1_633] : memref<4x18x18xf32, #tpu.memory_space<vmem>>, vector<1x16x16xf32>
    %1181 = vector.shape_cast %1180 : vector<1x16x16xf32> to vector<16x16xf32>
    %1182 = vector.broadcast %1179 : f32 to vector<16x16xf32>
    %1183 = arith.mulf %1182, %1181 : vector<16x16xf32>
    %1184 = arith.addf %1178, %1183 : vector<16x16xf32>
    %c35_634 = arith.constant 35 : index
    %1185 = memref.load %arg6[%c35_634] : memref<144xf32, #tpu.memory_space<smem>>
    %c3_635 = arith.constant 3 : index
    %c2_636 = arith.constant 2 : index
    %c2_637 = arith.constant 2 : index
    %1186 = vector.load %arg10[%c3_635, %c2_636, %c2_637] : memref<4x18x18xf32, #tpu.memory_space<vmem>>, vector<1x16x16xf32>
    %1187 = vector.shape_cast %1186 : vector<1x16x16xf32> to vector<16x16xf32>
    %1188 = vector.broadcast %1185 : f32 to vector<16x16xf32>
    %1189 = arith.mulf %1188, %1187 : vector<16x16xf32>
    %1190 = arith.addf %1184, %1189 : vector<16x16xf32>
    %cst_638 = arith.constant 0.000000e+00 : f32
    %1191 = vector.broadcast %cst_638 : f32 to vector<16x16xf32>
    %1192 = arith.cmpf oge, %1190, %1191 : vector<16x16xf32>
    %cst_639 = arith.constant 2.000000e-01 : f32
    %1193 = vector.broadcast %cst_639 : f32 to vector<16x16xf32>
    %1194 = arith.mulf %1193, %1190 : vector<16x16xf32>
    %1195 = arith.select %1192, %1190, %1194 : vector<16x16xi1>, vector<16x16xf32>
    %c0_640 = arith.constant 0 : index
    %c0_641 = arith.constant 0 : index
    %c0_642 = arith.constant 0 : index
    %c0_643 = arith.constant 0 : index
    %1196 = vector.load %arg1[%c0_640, %c0_641, %c0_642, %c0_643] : memref<1x4x16x16xf32, #tpu.memory_space<vmem>>, vector<1x1x16x16xf32>
    %1197 = vector.shape_cast %1196 : vector<1x1x16x16xf32> to vector<16x16xf32>
    %1198 = arith.addf %1197, %1195 : vector<16x16xf32>
    %c0_644 = arith.constant 0 : index
    %c0_645 = arith.constant 0 : index
    %c0_646 = arith.constant 0 : index
    %c0_647 = arith.constant 0 : index
    %1199 = vector.load %arg8[%c0_644, %c0_645, %c0_646, %c0_647] : memref<1x4x16x16xf32, #tpu.memory_space<vmem>>, vector<1x1x16x16xf32>
    %1200 = vector.shape_cast %1199 : vector<1x1x16x16xf32> to vector<16x16xf32>
    %1201 = vector.shape_cast %1198 : vector<16x16xf32> to vector<1x1x16x16xf32>
    tpu.vector_store %arg8[%c0_644, %c0_645, %c0_646, %c0_647], %1201 {strides = array<i32>} : memref<1x4x16x16xf32, #tpu.memory_space<vmem>>, vector<1x1x16x16xf32>,
    %cst_648 = arith.constant 0.000000e+00 : f32
    %1202 = vector.broadcast %cst_648 : f32 to vector<16x16xf32>
    %c1_649 = arith.constant 1 : index
    %1203 = memref.load %arg7[%c1_649] : memref<4xf32, #tpu.memory_space<smem>>
    %1204 = vector.broadcast %1203 : f32 to vector<16x16xf32>
    %1205 = arith.addf %1202, %1204 : vector<16x16xf32>
    %c36_650 = arith.constant 36 : index
    %1206 = memref.load %arg6[%c36_650] : memref<144xf32, #tpu.memory_space<smem>>
    %c0_651 = arith.constant 0 : index
    %c0_652 = arith.constant 0 : index
    %c0_653 = arith.constant 0 : index
    %1207 = vector.load %arg10[%c0_651, %c0_652, %c0_653] : memref<4x18x18xf32, #tpu.memory_space<vmem>>, vector<1x16x16xf32>
    %1208 = vector.shape_cast %1207 : vector<1x16x16xf32> to vector<16x16xf32>
    %1209 = vector.broadcast %1206 : f32 to vector<16x16xf32>
    %1210 = arith.mulf %1209, %1208 : vector<16x16xf32>
    %1211 = arith.addf %1205, %1210 : vector<16x16xf32>
    %c37_654 = arith.constant 37 : index
    %1212 = memref.load %arg6[%c37_654] : memref<144xf32, #tpu.memory_space<smem>>
    %c0_655 = arith.constant 0 : index
    %c0_656 = arith.constant 0 : index
    %c1_657 = arith.constant 1 : index
    %1213 = vector.load %arg10[%c0_655, %c0_656, %c1_657] : memref<4x18x18xf32, #tpu.memory_space<vmem>>, vector<1x16x16xf32>
    %1214 = vector.shape_cast %1213 : vector<1x16x16xf32> to vector<16x16xf32>
    %1215 = vector.broadcast %1212 : f32 to vector<16x16xf32>
    %1216 = arith.mulf %1215, %1214 : vector<16x16xf32>
    %1217 = arith.addf %1211, %1216 : vector<16x16xf32>
    %c38_658 = arith.constant 38 : index
    %1218 = memref.load %arg6[%c38_658] : memref<144xf32, #tpu.memory_space<smem>>
    %c0_659 = arith.constant 0 : index
    %c0_660 = arith.constant 0 : index
    %c2_661 = arith.constant 2 : index
    %1219 = vector.load %arg10[%c0_659, %c0_660, %c2_661] : memref<4x18x18xf32, #tpu.memory_space<vmem>>, vector<1x16x16xf32>
    %1220 = vector.shape_cast %1219 : vector<1x16x16xf32> to vector<16x16xf32>
    %1221 = vector.broadcast %1218 : f32 to vector<16x16xf32>
    %1222 = arith.mulf %1221, %1220 : vector<16x16xf32>
    %1223 = arith.addf %1217, %1222 : vector<16x16xf32>
    %c39_662 = arith.constant 39 : index
    %1224 = memref.load %arg6[%c39_662] : memref<144xf32, #tpu.memory_space<smem>>
    %c0_663 = arith.constant 0 : index
    %c1_664 = arith.constant 1 : index
    %c0_665 = arith.constant 0 : index
    %1225 = vector.load %arg10[%c0_663, %c1_664, %c0_665] : memref<4x18x18xf32, #tpu.memory_space<vmem>>, vector<1x16x16xf32>
    %1226 = vector.shape_cast %1225 : vector<1x16x16xf32> to vector<16x16xf32>
    %1227 = vector.broadcast %1224 : f32 to vector<16x16xf32>
    %1228 = arith.mulf %1227, %1226 : vector<16x16xf32>
    %1229 = arith.addf %1223, %1228 : vector<16x16xf32>
    %c40_666 = arith.constant 40 : index
    %1230 = memref.load %arg6[%c40_666] : memref<144xf32, #tpu.memory_space<smem>>
    %c0_667 = arith.constant 0 : index
    %c1_668 = arith.constant 1 : index
    %c1_669 = arith.constant 1 : index
    %1231 = vector.load %arg10[%c0_667, %c1_668, %c1_669] : memref<4x18x18xf32, #tpu.memory_space<vmem>>, vector<1x16x16xf32>
    %1232 = vector.shape_cast %1231 : vector<1x16x16xf32> to vector<16x16xf32>
    %1233 = vector.broadcast %1230 : f32 to vector<16x16xf32>
    %1234 = arith.mulf %1233, %1232 : vector<16x16xf32>
    %1235 = arith.addf %1229, %1234 : vector<16x16xf32>
    %c41_670 = arith.constant 41 : index
    %1236 = memref.load %arg6[%c41_670] : memref<144xf32, #tpu.memory_space<smem>>
    %c0_671 = arith.constant 0 : index
    %c1_672 = arith.constant 1 : index
    %c2_673 = arith.constant 2 : index
    %1237 = vector.load %arg10[%c0_671, %c1_672, %c2_673] : memref<4x18x18xf32, #tpu.memory_space<vmem>>, vector<1x16x16xf32>
    %1238 = vector.shape_cast %1237 : vector<1x16x16xf32> to vector<16x16xf32>
    %1239 = vector.broadcast %1236 : f32 to vector<16x16xf32>
    %1240 = arith.mulf %1239, %1238 : vector<16x16xf32>
    %1241 = arith.addf %1235, %1240 : vector<16x16xf32>
    %c42_674 = arith.constant 42 : index
    %1242 = memref.load %arg6[%c42_674] : memref<144xf32, #tpu.memory_space<smem>>
    %c0_675 = arith.constant 0 : index
    %c2_676 = arith.constant 2 : index
    %c0_677 = arith.constant 0 : index
    %1243 = vector.load %arg10[%c0_675, %c2_676, %c0_677] : memref<4x18x18xf32, #tpu.memory_space<vmem>>, vector<1x16x16xf32>
    %1244 = vector.shape_cast %1243 : vector<1x16x16xf32> to vector<16x16xf32>
    %1245 = vector.broadcast %1242 : f32 to vector<16x16xf32>
    %1246 = arith.mulf %1245, %1244 : vector<16x16xf32>
    %1247 = arith.addf %1241, %1246 : vector<16x16xf32>
    %c43_678 = arith.constant 43 : index
    %1248 = memref.load %arg6[%c43_678] : memref<144xf32, #tpu.memory_space<smem>>
    %c0_679 = arith.constant 0 : index
    %c2_680 = arith.constant 2 : index
    %c1_681 = arith.constant 1 : index
    %1249 = vector.load %arg10[%c0_679, %c2_680, %c1_681] : memref<4x18x18xf32, #tpu.memory_space<vmem>>, vector<1x16x16xf32>
    %1250 = vector.shape_cast %1249 : vector<1x16x16xf32> to vector<16x16xf32>
    %1251 = vector.broadcast %1248 : f32 to vector<16x16xf32>
    %1252 = arith.mulf %1251, %1250 : vector<16x16xf32>
    %1253 = arith.addf %1247, %1252 : vector<16x16xf32>
    %c44_682 = arith.constant 44 : index
    %1254 = memref.load %arg6[%c44_682] : memref<144xf32, #tpu.memory_space<smem>>
    %c0_683 = arith.constant 0 : index
    %c2_684 = arith.constant 2 : index
    %c2_685 = arith.constant 2 : index
    %1255 = vector.load %arg10[%c0_683, %c2_684, %c2_685] : memref<4x18x18xf32, #tpu.memory_space<vmem>>, vector<1x16x16xf32>
    %1256 = vector.shape_cast %1255 : vector<1x16x16xf32> to vector<16x16xf32>
    %1257 = vector.broadcast %1254 : f32 to vector<16x16xf32>
    %1258 = arith.mulf %1257, %1256 : vector<16x16xf32>
    %1259 = arith.addf %1253, %1258 : vector<16x16xf32>
    %c45_686 = arith.constant 45 : index
    %1260 = memref.load %arg6[%c45_686] : memref<144xf32, #tpu.memory_space<smem>>
    %c1_687 = arith.constant 1 : index
    %c0_688 = arith.constant 0 : index
    %c0_689 = arith.constant 0 : index
    %1261 = vector.load %arg10[%c1_687, %c0_688, %c0_689] : memref<4x18x18xf32, #tpu.memory_space<vmem>>, vector<1x16x16xf32>
    %1262 = vector.shape_cast %1261 : vector<1x16x16xf32> to vector<16x16xf32>
    %1263 = vector.broadcast %1260 : f32 to vector<16x16xf32>
    %1264 = arith.mulf %1263, %1262 : vector<16x16xf32>
    %1265 = arith.addf %1259, %1264 : vector<16x16xf32>
    %c46_690 = arith.constant 46 : index
    %1266 = memref.load %arg6[%c46_690] : memref<144xf32, #tpu.memory_space<smem>>
    %c1_691 = arith.constant 1 : index
    %c0_692 = arith.constant 0 : index
    %c1_693 = arith.constant 1 : index
    %1267 = vector.load %arg10[%c1_691, %c0_692, %c1_693] : memref<4x18x18xf32, #tpu.memory_space<vmem>>, vector<1x16x16xf32>
    %1268 = vector.shape_cast %1267 : vector<1x16x16xf32> to vector<16x16xf32>
    %1269 = vector.broadcast %1266 : f32 to vector<16x16xf32>
    %1270 = arith.mulf %1269, %1268 : vector<16x16xf32>
    %1271 = arith.addf %1265, %1270 : vector<16x16xf32>
    %c47_694 = arith.constant 47 : index
    %1272 = memref.load %arg6[%c47_694] : memref<144xf32, #tpu.memory_space<smem>>
    %c1_695 = arith.constant 1 : index
    %c0_696 = arith.constant 0 : index
    %c2_697 = arith.constant 2 : index
    %1273 = vector.load %arg10[%c1_695, %c0_696, %c2_697] : memref<4x18x18xf32, #tpu.memory_space<vmem>>, vector<1x16x16xf32>
    %1274 = vector.shape_cast %1273 : vector<1x16x16xf32> to vector<16x16xf32>
    %1275 = vector.broadcast %1272 : f32 to vector<16x16xf32>
    %1276 = arith.mulf %1275, %1274 : vector<16x16xf32>
    %1277 = arith.addf %1271, %1276 : vector<16x16xf32>
    %c48_698 = arith.constant 48 : index
    %1278 = memref.load %arg6[%c48_698] : memref<144xf32, #tpu.memory_space<smem>>
    %c1_699 = arith.constant 1 : index
    %c1_700 = arith.constant 1 : index
    %c0_701 = arith.constant 0 : index
    %1279 = vector.load %arg10[%c1_699, %c1_700, %c0_701] : memref<4x18x18xf32, #tpu.memory_space<vmem>>, vector<1x16x16xf32>
    %1280 = vector.shape_cast %1279 : vector<1x16x16xf32> to vector<16x16xf32>
    %1281 = vector.broadcast %1278 : f32 to vector<16x16xf32>
    %1282 = arith.mulf %1281, %1280 : vector<16x16xf32>
    %1283 = arith.addf %1277, %1282 : vector<16x16xf32>
    %c49_702 = arith.constant 49 : index
    %1284 = memref.load %arg6[%c49_702] : memref<144xf32, #tpu.memory_space<smem>>
    %c1_703 = arith.constant 1 : index
    %c1_704 = arith.constant 1 : index
    %c1_705 = arith.constant 1 : index
    %1285 = vector.load %arg10[%c1_703, %c1_704, %c1_705] : memref<4x18x18xf32, #tpu.memory_space<vmem>>, vector<1x16x16xf32>
    %1286 = vector.shape_cast %1285 : vector<1x16x16xf32> to vector<16x16xf32>
    %1287 = vector.broadcast %1284 : f32 to vector<16x16xf32>
    %1288 = arith.mulf %1287, %1286 : vector<16x16xf32>
    %1289 = arith.addf %1283, %1288 : vector<16x16xf32>
    %c50_706 = arith.constant 50 : index
    %1290 = memref.load %arg6[%c50_706] : memref<144xf32, #tpu.memory_space<smem>>
    %c1_707 = arith.constant 1 : index
    %c1_708 = arith.constant 1 : index
    %c2_709 = arith.constant 2 : index
    %1291 = vector.load %arg10[%c1_707, %c1_708, %c2_709] : memref<4x18x18xf32, #tpu.memory_space<vmem>>, vector<1x16x16xf32>
    %1292 = vector.shape_cast %1291 : vector<1x16x16xf32> to vector<16x16xf32>
    %1293 = vector.broadcast %1290 : f32 to vector<16x16xf32>
    %1294 = arith.mulf %1293, %1292 : vector<16x16xf32>
    %1295 = arith.addf %1289, %1294 : vector<16x16xf32>
    %c51_710 = arith.constant 51 : index
    %1296 = memref.load %arg6[%c51_710] : memref<144xf32, #tpu.memory_space<smem>>
    %c1_711 = arith.constant 1 : index
    %c2_712 = arith.constant 2 : index
    %c0_713 = arith.constant 0 : index
    %1297 = vector.load %arg10[%c1_711, %c2_712, %c0_713] : memref<4x18x18xf32, #tpu.memory_space<vmem>>, vector<1x16x16xf32>
    %1298 = vector.shape_cast %1297 : vector<1x16x16xf32> to vector<16x16xf32>
    %1299 = vector.broadcast %1296 : f32 to vector<16x16xf32>
    %1300 = arith.mulf %1299, %1298 : vector<16x16xf32>
    %1301 = arith.addf %1295, %1300 : vector<16x16xf32>
    %c52_714 = arith.constant 52 : index
    %1302 = memref.load %arg6[%c52_714] : memref<144xf32, #tpu.memory_space<smem>>
    %c1_715 = arith.constant 1 : index
    %c2_716 = arith.constant 2 : index
    %c1_717 = arith.constant 1 : index
    %1303 = vector.load %arg10[%c1_715, %c2_716, %c1_717] : memref<4x18x18xf32, #tpu.memory_space<vmem>>, vector<1x16x16xf32>
    %1304 = vector.shape_cast %1303 : vector<1x16x16xf32> to vector<16x16xf32>
    %1305 = vector.broadcast %1302 : f32 to vector<16x16xf32>
    %1306 = arith.mulf %1305, %1304 : vector<16x16xf32>
    %1307 = arith.addf %1301, %1306 : vector<16x16xf32>
    %c53_718 = arith.constant 53 : index
    %1308 = memref.load %arg6[%c53_718] : memref<144xf32, #tpu.memory_space<smem>>
    %c1_719 = arith.constant 1 : index
    %c2_720 = arith.constant 2 : index
    %c2_721 = arith.constant 2 : index
    %1309 = vector.load %arg10[%c1_719, %c2_720, %c2_721] : memref<4x18x18xf32, #tpu.memory_space<vmem>>, vector<1x16x16xf32>
    %1310 = vector.shape_cast %1309 : vector<1x16x16xf32> to vector<16x16xf32>
    %1311 = vector.broadcast %1308 : f32 to vector<16x16xf32>
    %1312 = arith.mulf %1311, %1310 : vector<16x16xf32>
    %1313 = arith.addf %1307, %1312 : vector<16x16xf32>
    %c54_722 = arith.constant 54 : index
    %1314 = memref.load %arg6[%c54_722] : memref<144xf32, #tpu.memory_space<smem>>
    %c2_723 = arith.constant 2 : index
    %c0_724 = arith.constant 0 : index
    %c0_725 = arith.constant 0 : index
    %1315 = vector.load %arg10[%c2_723, %c0_724, %c0_725] : memref<4x18x18xf32, #tpu.memory_space<vmem>>, vector<1x16x16xf32>
    %1316 = vector.shape_cast %1315 : vector<1x16x16xf32> to vector<16x16xf32>
    %1317 = vector.broadcast %1314 : f32 to vector<16x16xf32>
    %1318 = arith.mulf %1317, %1316 : vector<16x16xf32>
    %1319 = arith.addf %1313, %1318 : vector<16x16xf32>
    %c55_726 = arith.constant 55 : index
    %1320 = memref.load %arg6[%c55_726] : memref<144xf32, #tpu.memory_space<smem>>
    %c2_727 = arith.constant 2 : index
    %c0_728 = arith.constant 0 : index
    %c1_729 = arith.constant 1 : index
    %1321 = vector.load %arg10[%c2_727, %c0_728, %c1_729] : memref<4x18x18xf32, #tpu.memory_space<vmem>>, vector<1x16x16xf32>
    %1322 = vector.shape_cast %1321 : vector<1x16x16xf32> to vector<16x16xf32>
    %1323 = vector.broadcast %1320 : f32 to vector<16x16xf32>
    %1324 = arith.mulf %1323, %1322 : vector<16x16xf32>
    %1325 = arith.addf %1319, %1324 : vector<16x16xf32>
    %c56_730 = arith.constant 56 : index
    %1326 = memref.load %arg6[%c56_730] : memref<144xf32, #tpu.memory_space<smem>>
    %c2_731 = arith.constant 2 : index
    %c0_732 = arith.constant 0 : index
    %c2_733 = arith.constant 2 : index
    %1327 = vector.load %arg10[%c2_731, %c0_732, %c2_733] : memref<4x18x18xf32, #tpu.memory_space<vmem>>, vector<1x16x16xf32>
    %1328 = vector.shape_cast %1327 : vector<1x16x16xf32> to vector<16x16xf32>
    %1329 = vector.broadcast %1326 : f32 to vector<16x16xf32>
    %1330 = arith.mulf %1329, %1328 : vector<16x16xf32>
    %1331 = arith.addf %1325, %1330 : vector<16x16xf32>
    %c57_734 = arith.constant 57 : index
    %1332 = memref.load %arg6[%c57_734] : memref<144xf32, #tpu.memory_space<smem>>
    %c2_735 = arith.constant 2 : index
    %c1_736 = arith.constant 1 : index
    %c0_737 = arith.constant 0 : index
    %1333 = vector.load %arg10[%c2_735, %c1_736, %c0_737] : memref<4x18x18xf32, #tpu.memory_space<vmem>>, vector<1x16x16xf32>
    %1334 = vector.shape_cast %1333 : vector<1x16x16xf32> to vector<16x16xf32>
    %1335 = vector.broadcast %1332 : f32 to vector<16x16xf32>
    %1336 = arith.mulf %1335, %1334 : vector<16x16xf32>
    %1337 = arith.addf %1331, %1336 : vector<16x16xf32>
    %c58_738 = arith.constant 58 : index
    %1338 = memref.load %arg6[%c58_738] : memref<144xf32, #tpu.memory_space<smem>>
    %c2_739 = arith.constant 2 : index
    %c1_740 = arith.constant 1 : index
    %c1_741 = arith.constant 1 : index
    %1339 = vector.load %arg10[%c2_739, %c1_740, %c1_741] : memref<4x18x18xf32, #tpu.memory_space<vmem>>, vector<1x16x16xf32>
    %1340 = vector.shape_cast %1339 : vector<1x16x16xf32> to vector<16x16xf32>
    %1341 = vector.broadcast %1338 : f32 to vector<16x16xf32>
    %1342 = arith.mulf %1341, %1340 : vector<16x16xf32>
    %1343 = arith.addf %1337, %1342 : vector<16x16xf32>
    %c59_742 = arith.constant 59 : index
    %1344 = memref.load %arg6[%c59_742] : memref<144xf32, #tpu.memory_space<smem>>
    %c2_743 = arith.constant 2 : index
    %c1_744 = arith.constant 1 : index
    %c2_745 = arith.constant 2 : index
    %1345 = vector.load %arg10[%c2_743, %c1_744, %c2_745] : memref<4x18x18xf32, #tpu.memory_space<vmem>>, vector<1x16x16xf32>
    %1346 = vector.shape_cast %1345 : vector<1x16x16xf32> to vector<16x16xf32>
    %1347 = vector.broadcast %1344 : f32 to vector<16x16xf32>
    %1348 = arith.mulf %1347, %1346 : vector<16x16xf32>
    %1349 = arith.addf %1343, %1348 : vector<16x16xf32>
    %c60_746 = arith.constant 60 : index
    %1350 = memref.load %arg6[%c60_746] : memref<144xf32, #tpu.memory_space<smem>>
    %c2_747 = arith.constant 2 : index
    %c2_748 = arith.constant 2 : index
    %c0_749 = arith.constant 0 : index
    %1351 = vector.load %arg10[%c2_747, %c2_748, %c0_749] : memref<4x18x18xf32, #tpu.memory_space<vmem>>, vector<1x16x16xf32>
    %1352 = vector.shape_cast %1351 : vector<1x16x16xf32> to vector<16x16xf32>
    %1353 = vector.broadcast %1350 : f32 to vector<16x16xf32>
    %1354 = arith.mulf %1353, %1352 : vector<16x16xf32>
    %1355 = arith.addf %1349, %1354 : vector<16x16xf32>
    %c61_750 = arith.constant 61 : index
    %1356 = memref.load %arg6[%c61_750] : memref<144xf32, #tpu.memory_space<smem>>
    %c2_751 = arith.constant 2 : index
    %c2_752 = arith.constant 2 : index
    %c1_753 = arith.constant 1 : index
    %1357 = vector.load %arg10[%c2_751, %c2_752, %c1_753] : memref<4x18x18xf32, #tpu.memory_space<vmem>>, vector<1x16x16xf32>
    %1358 = vector.shape_cast %1357 : vector<1x16x16xf32> to vector<16x16xf32>
    %1359 = vector.broadcast %1356 : f32 to vector<16x16xf32>
    %1360 = arith.mulf %1359, %1358 : vector<16x16xf32>
    %1361 = arith.addf %1355, %1360 : vector<16x16xf32>
    %c62_754 = arith.constant 62 : index
    %1362 = memref.load %arg6[%c62_754] : memref<144xf32, #tpu.memory_space<smem>>
    %c2_755 = arith.constant 2 : index
    %c2_756 = arith.constant 2 : index
    %c2_757 = arith.constant 2 : index
    %1363 = vector.load %arg10[%c2_755, %c2_756, %c2_757] : memref<4x18x18xf32, #tpu.memory_space<vmem>>, vector<1x16x16xf32>
    %1364 = vector.shape_cast %1363 : vector<1x16x16xf32> to vector<16x16xf32>
    %1365 = vector.broadcast %1362 : f32 to vector<16x16xf32>
    %1366 = arith.mulf %1365, %1364 : vector<16x16xf32>
    %1367 = arith.addf %1361, %1366 : vector<16x16xf32>
    %c63_758 = arith.constant 63 : index
    %1368 = memref.load %arg6[%c63_758] : memref<144xf32, #tpu.memory_space<smem>>
    %c3_759 = arith.constant 3 : index
    %c0_760 = arith.constant 0 : index
    %c0_761 = arith.constant 0 : index
    %1369 = vector.load %arg10[%c3_759, %c0_760, %c0_761] : memref<4x18x18xf32, #tpu.memory_space<vmem>>, vector<1x16x16xf32>
    %1370 = vector.shape_cast %1369 : vector<1x16x16xf32> to vector<16x16xf32>
    %1371 = vector.broadcast %1368 : f32 to vector<16x16xf32>
    %1372 = arith.mulf %1371, %1370 : vector<16x16xf32>
    %1373 = arith.addf %1367, %1372 : vector<16x16xf32>
    %c64_762 = arith.constant 64 : index
    %1374 = memref.load %arg6[%c64_762] : memref<144xf32, #tpu.memory_space<smem>>
    %c3_763 = arith.constant 3 : index
    %c0_764 = arith.constant 0 : index
    %c1_765 = arith.constant 1 : index
    %1375 = vector.load %arg10[%c3_763, %c0_764, %c1_765] : memref<4x18x18xf32, #tpu.memory_space<vmem>>, vector<1x16x16xf32>
    %1376 = vector.shape_cast %1375 : vector<1x16x16xf32> to vector<16x16xf32>
    %1377 = vector.broadcast %1374 : f32 to vector<16x16xf32>
    %1378 = arith.mulf %1377, %1376 : vector<16x16xf32>
    %1379 = arith.addf %1373, %1378 : vector<16x16xf32>
    %c65_766 = arith.constant 65 : index
    %1380 = memref.load %arg6[%c65_766] : memref<144xf32, #tpu.memory_space<smem>>
    %c3_767 = arith.constant 3 : index
    %c0_768 = arith.constant 0 : index
    %c2_769 = arith.constant 2 : index
    %1381 = vector.load %arg10[%c3_767, %c0_768, %c2_769] : memref<4x18x18xf32, #tpu.memory_space<vmem>>, vector<1x16x16xf32>
    %1382 = vector.shape_cast %1381 : vector<1x16x16xf32> to vector<16x16xf32>
    %1383 = vector.broadcast %1380 : f32 to vector<16x16xf32>
    %1384 = arith.mulf %1383, %1382 : vector<16x16xf32>
    %1385 = arith.addf %1379, %1384 : vector<16x16xf32>
    %c66_770 = arith.constant 66 : index
    %1386 = memref.load %arg6[%c66_770] : memref<144xf32, #tpu.memory_space<smem>>
    %c3_771 = arith.constant 3 : index
    %c1_772 = arith.constant 1 : index
    %c0_773 = arith.constant 0 : index
    %1387 = vector.load %arg10[%c3_771, %c1_772, %c0_773] : memref<4x18x18xf32, #tpu.memory_space<vmem>>, vector<1x16x16xf32>
    %1388 = vector.shape_cast %1387 : vector<1x16x16xf32> to vector<16x16xf32>
    %1389 = vector.broadcast %1386 : f32 to vector<16x16xf32>
    %1390 = arith.mulf %1389, %1388 : vector<16x16xf32>
    %1391 = arith.addf %1385, %1390 : vector<16x16xf32>
    %c67_774 = arith.constant 67 : index
    %1392 = memref.load %arg6[%c67_774] : memref<144xf32, #tpu.memory_space<smem>>
    %c3_775 = arith.constant 3 : index
    %c1_776 = arith.constant 1 : index
    %c1_777 = arith.constant 1 : index
    %1393 = vector.load %arg10[%c3_775, %c1_776, %c1_777] : memref<4x18x18xf32, #tpu.memory_space<vmem>>, vector<1x16x16xf32>
    %1394 = vector.shape_cast %1393 : vector<1x16x16xf32> to vector<16x16xf32>
    %1395 = vector.broadcast %1392 : f32 to vector<16x16xf32>
    %1396 = arith.mulf %1395, %1394 : vector<16x16xf32>
    %1397 = arith.addf %1391, %1396 : vector<16x16xf32>
    %c68_778 = arith.constant 68 : index
    %1398 = memref.load %arg6[%c68_778] : memref<144xf32, #tpu.memory_space<smem>>
    %c3_779 = arith.constant 3 : index
    %c1_780 = arith.constant 1 : index
    %c2_781 = arith.constant 2 : index
    %1399 = vector.load %arg10[%c3_779, %c1_780, %c2_781] : memref<4x18x18xf32, #tpu.memory_space<vmem>>, vector<1x16x16xf32>
    %1400 = vector.shape_cast %1399 : vector<1x16x16xf32> to vector<16x16xf32>
    %1401 = vector.broadcast %1398 : f32 to vector<16x16xf32>
    %1402 = arith.mulf %1401, %1400 : vector<16x16xf32>
    %1403 = arith.addf %1397, %1402 : vector<16x16xf32>
    %c69_782 = arith.constant 69 : index
    %1404 = memref.load %arg6[%c69_782] : memref<144xf32, #tpu.memory_space<smem>>
    %c3_783 = arith.constant 3 : index
    %c2_784 = arith.constant 2 : index
    %c0_785 = arith.constant 0 : index
    %1405 = vector.load %arg10[%c3_783, %c2_784, %c0_785] : memref<4x18x18xf32, #tpu.memory_space<vmem>>, vector<1x16x16xf32>
    %1406 = vector.shape_cast %1405 : vector<1x16x16xf32> to vector<16x16xf32>
    %1407 = vector.broadcast %1404 : f32 to vector<16x16xf32>
    %1408 = arith.mulf %1407, %1406 : vector<16x16xf32>
    %1409 = arith.addf %1403, %1408 : vector<16x16xf32>
    %c70_786 = arith.constant 70 : index
    %1410 = memref.load %arg6[%c70_786] : memref<144xf32, #tpu.memory_space<smem>>
    %c3_787 = arith.constant 3 : index
    %c2_788 = arith.constant 2 : index
    %c1_789 = arith.constant 1 : index
    %1411 = vector.load %arg10[%c3_787, %c2_788, %c1_789] : memref<4x18x18xf32, #tpu.memory_space<vmem>>, vector<1x16x16xf32>
    %1412 = vector.shape_cast %1411 : vector<1x16x16xf32> to vector<16x16xf32>
    %1413 = vector.broadcast %1410 : f32 to vector<16x16xf32>
    %1414 = arith.mulf %1413, %1412 : vector<16x16xf32>
    %1415 = arith.addf %1409, %1414 : vector<16x16xf32>
    %c71_790 = arith.constant 71 : index
    %1416 = memref.load %arg6[%c71_790] : memref<144xf32, #tpu.memory_space<smem>>
    %c3_791 = arith.constant 3 : index
    %c2_792 = arith.constant 2 : index
    %c2_793 = arith.constant 2 : index
    %1417 = vector.load %arg10[%c3_791, %c2_792, %c2_793] : memref<4x18x18xf32, #tpu.memory_space<vmem>>, vector<1x16x16xf32>
    %1418 = vector.shape_cast %1417 : vector<1x16x16xf32> to vector<16x16xf32>
    %1419 = vector.broadcast %1416 : f32 to vector<16x16xf32>
    %1420 = arith.mulf %1419, %1418 : vector<16x16xf32>
    %1421 = arith.addf %1415, %1420 : vector<16x16xf32>
    %cst_794 = arith.constant 0.000000e+00 : f32
    %1422 = vector.broadcast %cst_794 : f32 to vector<16x16xf32>
    %1423 = arith.cmpf oge, %1421, %1422 : vector<16x16xf32>
    %cst_795 = arith.constant 2.000000e-01 : f32
    %1424 = vector.broadcast %cst_795 : f32 to vector<16x16xf32>
    %1425 = arith.mulf %1424, %1421 : vector<16x16xf32>
    %1426 = arith.select %1423, %1421, %1425 : vector<16x16xi1>, vector<16x16xf32>
    %c0_796 = arith.constant 0 : index
    %c1_797 = arith.constant 1 : index
    %c0_798 = arith.constant 0 : index
    %c0_799 = arith.constant 0 : index
    %1427 = vector.load %arg1[%c0_796, %c1_797, %c0_798, %c0_799] : memref<1x4x16x16xf32, #tpu.memory_space<vmem>>, vector<1x1x16x16xf32>
    %1428 = vector.shape_cast %1427 : vector<1x1x16x16xf32> to vector<16x16xf32>
    %1429 = arith.addf %1428, %1426 : vector<16x16xf32>
    %c0_800 = arith.constant 0 : index
    %c1_801 = arith.constant 1 : index
    %c0_802 = arith.constant 0 : index
    %c0_803 = arith.constant 0 : index
    %1430 = vector.load %arg8[%c0_800, %c1_801, %c0_802, %c0_803] : memref<1x4x16x16xf32, #tpu.memory_space<vmem>>, vector<1x1x16x16xf32>
    %1431 = vector.shape_cast %1430 : vector<1x1x16x16xf32> to vector<16x16xf32>
    %1432 = vector.shape_cast %1429 : vector<16x16xf32> to vector<1x1x16x16xf32>
    tpu.vector_store %arg8[%c0_800, %c1_801, %c0_802, %c0_803], %1432 {strides = array<i32>} : memref<1x4x16x16xf32, #tpu.memory_space<vmem>>, vector<1x1x16x16xf32>,
    %cst_804 = arith.constant 0.000000e+00 : f32
    %1433 = vector.broadcast %cst_804 : f32 to vector<16x16xf32>
    %c2_805 = arith.constant 2 : index
    %1434 = memref.load %arg7[%c2_805] : memref<4xf32, #tpu.memory_space<smem>>
    %1435 = vector.broadcast %1434 : f32 to vector<16x16xf32>
    %1436 = arith.addf %1433, %1435 : vector<16x16xf32>
    %c72_806 = arith.constant 72 : index
    %1437 = memref.load %arg6[%c72_806] : memref<144xf32, #tpu.memory_space<smem>>
    %c0_807 = arith.constant 0 : index
    %c0_808 = arith.constant 0 : index
    %c0_809 = arith.constant 0 : index
    %1438 = vector.load %arg10[%c0_807, %c0_808, %c0_809] : memref<4x18x18xf32, #tpu.memory_space<vmem>>, vector<1x16x16xf32>
    %1439 = vector.shape_cast %1438 : vector<1x16x16xf32> to vector<16x16xf32>
    %1440 = vector.broadcast %1437 : f32 to vector<16x16xf32>
    %1441 = arith.mulf %1440, %1439 : vector<16x16xf32>
    %1442 = arith.addf %1436, %1441 : vector<16x16xf32>
    %c73_810 = arith.constant 73 : index
    %1443 = memref.load %arg6[%c73_810] : memref<144xf32, #tpu.memory_space<smem>>
    %c0_811 = arith.constant 0 : index
    %c0_812 = arith.constant 0 : index
    %c1_813 = arith.constant 1 : index
    %1444 = vector.load %arg10[%c0_811, %c0_812, %c1_813] : memref<4x18x18xf32, #tpu.memory_space<vmem>>, vector<1x16x16xf32>
    %1445 = vector.shape_cast %1444 : vector<1x16x16xf32> to vector<16x16xf32>
    %1446 = vector.broadcast %1443 : f32 to vector<16x16xf32>
    %1447 = arith.mulf %1446, %1445 : vector<16x16xf32>
    %1448 = arith.addf %1442, %1447 : vector<16x16xf32>
    %c74_814 = arith.constant 74 : index
    %1449 = memref.load %arg6[%c74_814] : memref<144xf32, #tpu.memory_space<smem>>
    %c0_815 = arith.constant 0 : index
    %c0_816 = arith.constant 0 : index
    %c2_817 = arith.constant 2 : index
    %1450 = vector.load %arg10[%c0_815, %c0_816, %c2_817] : memref<4x18x18xf32, #tpu.memory_space<vmem>>, vector<1x16x16xf32>
    %1451 = vector.shape_cast %1450 : vector<1x16x16xf32> to vector<16x16xf32>
    %1452 = vector.broadcast %1449 : f32 to vector<16x16xf32>
    %1453 = arith.mulf %1452, %1451 : vector<16x16xf32>
    %1454 = arith.addf %1448, %1453 : vector<16x16xf32>
    %c75_818 = arith.constant 75 : index
    %1455 = memref.load %arg6[%c75_818] : memref<144xf32, #tpu.memory_space<smem>>
    %c0_819 = arith.constant 0 : index
    %c1_820 = arith.constant 1 : index
    %c0_821 = arith.constant 0 : index
    %1456 = vector.load %arg10[%c0_819, %c1_820, %c0_821] : memref<4x18x18xf32, #tpu.memory_space<vmem>>, vector<1x16x16xf32>
    %1457 = vector.shape_cast %1456 : vector<1x16x16xf32> to vector<16x16xf32>
    %1458 = vector.broadcast %1455 : f32 to vector<16x16xf32>
    %1459 = arith.mulf %1458, %1457 : vector<16x16xf32>
    %1460 = arith.addf %1454, %1459 : vector<16x16xf32>
    %c76_822 = arith.constant 76 : index
    %1461 = memref.load %arg6[%c76_822] : memref<144xf32, #tpu.memory_space<smem>>
    %c0_823 = arith.constant 0 : index
    %c1_824 = arith.constant 1 : index
    %c1_825 = arith.constant 1 : index
    %1462 = vector.load %arg10[%c0_823, %c1_824, %c1_825] : memref<4x18x18xf32, #tpu.memory_space<vmem>>, vector<1x16x16xf32>
    %1463 = vector.shape_cast %1462 : vector<1x16x16xf32> to vector<16x16xf32>
    %1464 = vector.broadcast %1461 : f32 to vector<16x16xf32>
    %1465 = arith.mulf %1464, %1463 : vector<16x16xf32>
    %1466 = arith.addf %1460, %1465 : vector<16x16xf32>
    %c77_826 = arith.constant 77 : index
    %1467 = memref.load %arg6[%c77_826] : memref<144xf32, #tpu.memory_space<smem>>
    %c0_827 = arith.constant 0 : index
    %c1_828 = arith.constant 1 : index
    %c2_829 = arith.constant 2 : index
    %1468 = vector.load %arg10[%c0_827, %c1_828, %c2_829] : memref<4x18x18xf32, #tpu.memory_space<vmem>>, vector<1x16x16xf32>
    %1469 = vector.shape_cast %1468 : vector<1x16x16xf32> to vector<16x16xf32>
    %1470 = vector.broadcast %1467 : f32 to vector<16x16xf32>
    %1471 = arith.mulf %1470, %1469 : vector<16x16xf32>
    %1472 = arith.addf %1466, %1471 : vector<16x16xf32>
    %c78_830 = arith.constant 78 : index
    %1473 = memref.load %arg6[%c78_830] : memref<144xf32, #tpu.memory_space<smem>>
    %c0_831 = arith.constant 0 : index
    %c2_832 = arith.constant 2 : index
    %c0_833 = arith.constant 0 : index
    %1474 = vector.load %arg10[%c0_831, %c2_832, %c0_833] : memref<4x18x18xf32, #tpu.memory_space<vmem>>, vector<1x16x16xf32>
    %1475 = vector.shape_cast %1474 : vector<1x16x16xf32> to vector<16x16xf32>
    %1476 = vector.broadcast %1473 : f32 to vector<16x16xf32>
    %1477 = arith.mulf %1476, %1475 : vector<16x16xf32>
    %1478 = arith.addf %1472, %1477 : vector<16x16xf32>
    %c79_834 = arith.constant 79 : index
    %1479 = memref.load %arg6[%c79_834] : memref<144xf32, #tpu.memory_space<smem>>
    %c0_835 = arith.constant 0 : index
    %c2_836 = arith.constant 2 : index
    %c1_837 = arith.constant 1 : index
    %1480 = vector.load %arg10[%c0_835, %c2_836, %c1_837] : memref<4x18x18xf32, #tpu.memory_space<vmem>>, vector<1x16x16xf32>
    %1481 = vector.shape_cast %1480 : vector<1x16x16xf32> to vector<16x16xf32>
    %1482 = vector.broadcast %1479 : f32 to vector<16x16xf32>
    %1483 = arith.mulf %1482, %1481 : vector<16x16xf32>
    %1484 = arith.addf %1478, %1483 : vector<16x16xf32>
    %c80_838 = arith.constant 80 : index
    %1485 = memref.load %arg6[%c80_838] : memref<144xf32, #tpu.memory_space<smem>>
    %c0_839 = arith.constant 0 : index
    %c2_840 = arith.constant 2 : index
    %c2_841 = arith.constant 2 : index
    %1486 = vector.load %arg10[%c0_839, %c2_840, %c2_841] : memref<4x18x18xf32, #tpu.memory_space<vmem>>, vector<1x16x16xf32>
    %1487 = vector.shape_cast %1486 : vector<1x16x16xf32> to vector<16x16xf32>
    %1488 = vector.broadcast %1485 : f32 to vector<16x16xf32>
    %1489 = arith.mulf %1488, %1487 : vector<16x16xf32>
    %1490 = arith.addf %1484, %1489 : vector<16x16xf32>
    %c81_842 = arith.constant 81 : index
    %1491 = memref.load %arg6[%c81_842] : memref<144xf32, #tpu.memory_space<smem>>
    %c1_843 = arith.constant 1 : index
    %c0_844 = arith.constant 0 : index
    %c0_845 = arith.constant 0 : index
    %1492 = vector.load %arg10[%c1_843, %c0_844, %c0_845] : memref<4x18x18xf32, #tpu.memory_space<vmem>>, vector<1x16x16xf32>
    %1493 = vector.shape_cast %1492 : vector<1x16x16xf32> to vector<16x16xf32>
    %1494 = vector.broadcast %1491 : f32 to vector<16x16xf32>
    %1495 = arith.mulf %1494, %1493 : vector<16x16xf32>
    %1496 = arith.addf %1490, %1495 : vector<16x16xf32>
    %c82_846 = arith.constant 82 : index
    %1497 = memref.load %arg6[%c82_846] : memref<144xf32, #tpu.memory_space<smem>>
    %c1_847 = arith.constant 1 : index
    %c0_848 = arith.constant 0 : index
    %c1_849 = arith.constant 1 : index
    %1498 = vector.load %arg10[%c1_847, %c0_848, %c1_849] : memref<4x18x18xf32, #tpu.memory_space<vmem>>, vector<1x16x16xf32>
    %1499 = vector.shape_cast %1498 : vector<1x16x16xf32> to vector<16x16xf32>
    %1500 = vector.broadcast %1497 : f32 to vector<16x16xf32>
    %1501 = arith.mulf %1500, %1499 : vector<16x16xf32>
    %1502 = arith.addf %1496, %1501 : vector<16x16xf32>
    %c83_850 = arith.constant 83 : index
    %1503 = memref.load %arg6[%c83_850] : memref<144xf32, #tpu.memory_space<smem>>
    %c1_851 = arith.constant 1 : index
    %c0_852 = arith.constant 0 : index
    %c2_853 = arith.constant 2 : index
    %1504 = vector.load %arg10[%c1_851, %c0_852, %c2_853] : memref<4x18x18xf32, #tpu.memory_space<vmem>>, vector<1x16x16xf32>
    %1505 = vector.shape_cast %1504 : vector<1x16x16xf32> to vector<16x16xf32>
    %1506 = vector.broadcast %1503 : f32 to vector<16x16xf32>
    %1507 = arith.mulf %1506, %1505 : vector<16x16xf32>
    %1508 = arith.addf %1502, %1507 : vector<16x16xf32>
    %c84_854 = arith.constant 84 : index
    %1509 = memref.load %arg6[%c84_854] : memref<144xf32, #tpu.memory_space<smem>>
    %c1_855 = arith.constant 1 : index
    %c1_856 = arith.constant 1 : index
    %c0_857 = arith.constant 0 : index
    %1510 = vector.load %arg10[%c1_855, %c1_856, %c0_857] : memref<4x18x18xf32, #tpu.memory_space<vmem>>, vector<1x16x16xf32>
    %1511 = vector.shape_cast %1510 : vector<1x16x16xf32> to vector<16x16xf32>
    %1512 = vector.broadcast %1509 : f32 to vector<16x16xf32>
    %1513 = arith.mulf %1512, %1511 : vector<16x16xf32>
    %1514 = arith.addf %1508, %1513 : vector<16x16xf32>
    %c85_858 = arith.constant 85 : index
    %1515 = memref.load %arg6[%c85_858] : memref<144xf32, #tpu.memory_space<smem>>
    %c1_859 = arith.constant 1 : index
    %c1_860 = arith.constant 1 : index
    %c1_861 = arith.constant 1 : index
    %1516 = vector.load %arg10[%c1_859, %c1_860, %c1_861] : memref<4x18x18xf32, #tpu.memory_space<vmem>>, vector<1x16x16xf32>
    %1517 = vector.shape_cast %1516 : vector<1x16x16xf32> to vector<16x16xf32>
    %1518 = vector.broadcast %1515 : f32 to vector<16x16xf32>
    %1519 = arith.mulf %1518, %1517 : vector<16x16xf32>
    %1520 = arith.addf %1514, %1519 : vector<16x16xf32>
    %c86_862 = arith.constant 86 : index
    %1521 = memref.load %arg6[%c86_862] : memref<144xf32, #tpu.memory_space<smem>>
    %c1_863 = arith.constant 1 : index
    %c1_864 = arith.constant 1 : index
    %c2_865 = arith.constant 2 : index
    %1522 = vector.load %arg10[%c1_863, %c1_864, %c2_865] : memref<4x18x18xf32, #tpu.memory_space<vmem>>, vector<1x16x16xf32>
    %1523 = vector.shape_cast %1522 : vector<1x16x16xf32> to vector<16x16xf32>
    %1524 = vector.broadcast %1521 : f32 to vector<16x16xf32>
    %1525 = arith.mulf %1524, %1523 : vector<16x16xf32>
    %1526 = arith.addf %1520, %1525 : vector<16x16xf32>
    %c87_866 = arith.constant 87 : index
    %1527 = memref.load %arg6[%c87_866] : memref<144xf32, #tpu.memory_space<smem>>
    %c1_867 = arith.constant 1 : index
    %c2_868 = arith.constant 2 : index
    %c0_869 = arith.constant 0 : index
    %1528 = vector.load %arg10[%c1_867, %c2_868, %c0_869] : memref<4x18x18xf32, #tpu.memory_space<vmem>>, vector<1x16x16xf32>
    %1529 = vector.shape_cast %1528 : vector<1x16x16xf32> to vector<16x16xf32>
    %1530 = vector.broadcast %1527 : f32 to vector<16x16xf32>
    %1531 = arith.mulf %1530, %1529 : vector<16x16xf32>
    %1532 = arith.addf %1526, %1531 : vector<16x16xf32>
    %c88_870 = arith.constant 88 : index
    %1533 = memref.load %arg6[%c88_870] : memref<144xf32, #tpu.memory_space<smem>>
    %c1_871 = arith.constant 1 : index
    %c2_872 = arith.constant 2 : index
    %c1_873 = arith.constant 1 : index
    %1534 = vector.load %arg10[%c1_871, %c2_872, %c1_873] : memref<4x18x18xf32, #tpu.memory_space<vmem>>, vector<1x16x16xf32>
    %1535 = vector.shape_cast %1534 : vector<1x16x16xf32> to vector<16x16xf32>
    %1536 = vector.broadcast %1533 : f32 to vector<16x16xf32>
    %1537 = arith.mulf %1536, %1535 : vector<16x16xf32>
    %1538 = arith.addf %1532, %1537 : vector<16x16xf32>
    %c89_874 = arith.constant 89 : index
    %1539 = memref.load %arg6[%c89_874] : memref<144xf32, #tpu.memory_space<smem>>
    %c1_875 = arith.constant 1 : index
    %c2_876 = arith.constant 2 : index
    %c2_877 = arith.constant 2 : index
    %1540 = vector.load %arg10[%c1_875, %c2_876, %c2_877] : memref<4x18x18xf32, #tpu.memory_space<vmem>>, vector<1x16x16xf32>
    %1541 = vector.shape_cast %1540 : vector<1x16x16xf32> to vector<16x16xf32>
    %1542 = vector.broadcast %1539 : f32 to vector<16x16xf32>
    %1543 = arith.mulf %1542, %1541 : vector<16x16xf32>
    %1544 = arith.addf %1538, %1543 : vector<16x16xf32>
    %c90_878 = arith.constant 90 : index
    %1545 = memref.load %arg6[%c90_878] : memref<144xf32, #tpu.memory_space<smem>>
    %c2_879 = arith.constant 2 : index
    %c0_880 = arith.constant 0 : index
    %c0_881 = arith.constant 0 : index
    %1546 = vector.load %arg10[%c2_879, %c0_880, %c0_881] : memref<4x18x18xf32, #tpu.memory_space<vmem>>, vector<1x16x16xf32>
    %1547 = vector.shape_cast %1546 : vector<1x16x16xf32> to vector<16x16xf32>
    %1548 = vector.broadcast %1545 : f32 to vector<16x16xf32>
    %1549 = arith.mulf %1548, %1547 : vector<16x16xf32>
    %1550 = arith.addf %1544, %1549 : vector<16x16xf32>
    %c91_882 = arith.constant 91 : index
    %1551 = memref.load %arg6[%c91_882] : memref<144xf32, #tpu.memory_space<smem>>
    %c2_883 = arith.constant 2 : index
    %c0_884 = arith.constant 0 : index
    %c1_885 = arith.constant 1 : index
    %1552 = vector.load %arg10[%c2_883, %c0_884, %c1_885] : memref<4x18x18xf32, #tpu.memory_space<vmem>>, vector<1x16x16xf32>
    %1553 = vector.shape_cast %1552 : vector<1x16x16xf32> to vector<16x16xf32>
    %1554 = vector.broadcast %1551 : f32 to vector<16x16xf32>
    %1555 = arith.mulf %1554, %1553 : vector<16x16xf32>
    %1556 = arith.addf %1550, %1555 : vector<16x16xf32>
    %c92_886 = arith.constant 92 : index
    %1557 = memref.load %arg6[%c92_886] : memref<144xf32, #tpu.memory_space<smem>>
    %c2_887 = arith.constant 2 : index
    %c0_888 = arith.constant 0 : index
    %c2_889 = arith.constant 2 : index
    %1558 = vector.load %arg10[%c2_887, %c0_888, %c2_889] : memref<4x18x18xf32, #tpu.memory_space<vmem>>, vector<1x16x16xf32>
    %1559 = vector.shape_cast %1558 : vector<1x16x16xf32> to vector<16x16xf32>
    %1560 = vector.broadcast %1557 : f32 to vector<16x16xf32>
    %1561 = arith.mulf %1560, %1559 : vector<16x16xf32>
    %1562 = arith.addf %1556, %1561 : vector<16x16xf32>
    %c93_890 = arith.constant 93 : index
    %1563 = memref.load %arg6[%c93_890] : memref<144xf32, #tpu.memory_space<smem>>
    %c2_891 = arith.constant 2 : index
    %c1_892 = arith.constant 1 : index
    %c0_893 = arith.constant 0 : index
    %1564 = vector.load %arg10[%c2_891, %c1_892, %c0_893] : memref<4x18x18xf32, #tpu.memory_space<vmem>>, vector<1x16x16xf32>
    %1565 = vector.shape_cast %1564 : vector<1x16x16xf32> to vector<16x16xf32>
    %1566 = vector.broadcast %1563 : f32 to vector<16x16xf32>
    %1567 = arith.mulf %1566, %1565 : vector<16x16xf32>
    %1568 = arith.addf %1562, %1567 : vector<16x16xf32>
    %c94_894 = arith.constant 94 : index
    %1569 = memref.load %arg6[%c94_894] : memref<144xf32, #tpu.memory_space<smem>>
    %c2_895 = arith.constant 2 : index
    %c1_896 = arith.constant 1 : index
    %c1_897 = arith.constant 1 : index
    %1570 = vector.load %arg10[%c2_895, %c1_896, %c1_897] : memref<4x18x18xf32, #tpu.memory_space<vmem>>, vector<1x16x16xf32>
    %1571 = vector.shape_cast %1570 : vector<1x16x16xf32> to vector<16x16xf32>
    %1572 = vector.broadcast %1569 : f32 to vector<16x16xf32>
    %1573 = arith.mulf %1572, %1571 : vector<16x16xf32>
    %1574 = arith.addf %1568, %1573 : vector<16x16xf32>
    %c95_898 = arith.constant 95 : index
    %1575 = memref.load %arg6[%c95_898] : memref<144xf32, #tpu.memory_space<smem>>
    %c2_899 = arith.constant 2 : index
    %c1_900 = arith.constant 1 : index
    %c2_901 = arith.constant 2 : index
    %1576 = vector.load %arg10[%c2_899, %c1_900, %c2_901] : memref<4x18x18xf32, #tpu.memory_space<vmem>>, vector<1x16x16xf32>
    %1577 = vector.shape_cast %1576 : vector<1x16x16xf32> to vector<16x16xf32>
    %1578 = vector.broadcast %1575 : f32 to vector<16x16xf32>
    %1579 = arith.mulf %1578, %1577 : vector<16x16xf32>
    %1580 = arith.addf %1574, %1579 : vector<16x16xf32>
    %c96_902 = arith.constant 96 : index
    %1581 = memref.load %arg6[%c96_902] : memref<144xf32, #tpu.memory_space<smem>>
    %c2_903 = arith.constant 2 : index
    %c2_904 = arith.constant 2 : index
    %c0_905 = arith.constant 0 : index
    %1582 = vector.load %arg10[%c2_903, %c2_904, %c0_905] : memref<4x18x18xf32, #tpu.memory_space<vmem>>, vector<1x16x16xf32>
    %1583 = vector.shape_cast %1582 : vector<1x16x16xf32> to vector<16x16xf32>
    %1584 = vector.broadcast %1581 : f32 to vector<16x16xf32>
    %1585 = arith.mulf %1584, %1583 : vector<16x16xf32>
    %1586 = arith.addf %1580, %1585 : vector<16x16xf32>
    %c97_906 = arith.constant 97 : index
    %1587 = memref.load %arg6[%c97_906] : memref<144xf32, #tpu.memory_space<smem>>
    %c2_907 = arith.constant 2 : index
    %c2_908 = arith.constant 2 : index
    %c1_909 = arith.constant 1 : index
    %1588 = vector.load %arg10[%c2_907, %c2_908, %c1_909] : memref<4x18x18xf32, #tpu.memory_space<vmem>>, vector<1x16x16xf32>
    %1589 = vector.shape_cast %1588 : vector<1x16x16xf32> to vector<16x16xf32>
    %1590 = vector.broadcast %1587 : f32 to vector<16x16xf32>
    %1591 = arith.mulf %1590, %1589 : vector<16x16xf32>
    %1592 = arith.addf %1586, %1591 : vector<16x16xf32>
    %c98_910 = arith.constant 98 : index
    %1593 = memref.load %arg6[%c98_910] : memref<144xf32, #tpu.memory_space<smem>>
    %c2_911 = arith.constant 2 : index
    %c2_912 = arith.constant 2 : index
    %c2_913 = arith.constant 2 : index
    %1594 = vector.load %arg10[%c2_911, %c2_912, %c2_913] : memref<4x18x18xf32, #tpu.memory_space<vmem>>, vector<1x16x16xf32>
    %1595 = vector.shape_cast %1594 : vector<1x16x16xf32> to vector<16x16xf32>
    %1596 = vector.broadcast %1593 : f32 to vector<16x16xf32>
    %1597 = arith.mulf %1596, %1595 : vector<16x16xf32>
    %1598 = arith.addf %1592, %1597 : vector<16x16xf32>
    %c99_914 = arith.constant 99 : index
    %1599 = memref.load %arg6[%c99_914] : memref<144xf32, #tpu.memory_space<smem>>
    %c3_915 = arith.constant 3 : index
    %c0_916 = arith.constant 0 : index
    %c0_917 = arith.constant 0 : index
    %1600 = vector.load %arg10[%c3_915, %c0_916, %c0_917] : memref<4x18x18xf32, #tpu.memory_space<vmem>>, vector<1x16x16xf32>
    %1601 = vector.shape_cast %1600 : vector<1x16x16xf32> to vector<16x16xf32>
    %1602 = vector.broadcast %1599 : f32 to vector<16x16xf32>
    %1603 = arith.mulf %1602, %1601 : vector<16x16xf32>
    %1604 = arith.addf %1598, %1603 : vector<16x16xf32>
    %c100_918 = arith.constant 100 : index
    %1605 = memref.load %arg6[%c100_918] : memref<144xf32, #tpu.memory_space<smem>>
    %c3_919 = arith.constant 3 : index
    %c0_920 = arith.constant 0 : index
    %c1_921 = arith.constant 1 : index
    %1606 = vector.load %arg10[%c3_919, %c0_920, %c1_921] : memref<4x18x18xf32, #tpu.memory_space<vmem>>, vector<1x16x16xf32>
    %1607 = vector.shape_cast %1606 : vector<1x16x16xf32> to vector<16x16xf32>
    %1608 = vector.broadcast %1605 : f32 to vector<16x16xf32>
    %1609 = arith.mulf %1608, %1607 : vector<16x16xf32>
    %1610 = arith.addf %1604, %1609 : vector<16x16xf32>
    %c101_922 = arith.constant 101 : index
    %1611 = memref.load %arg6[%c101_922] : memref<144xf32, #tpu.memory_space<smem>>
    %c3_923 = arith.constant 3 : index
    %c0_924 = arith.constant 0 : index
    %c2_925 = arith.constant 2 : index
    %1612 = vector.load %arg10[%c3_923, %c0_924, %c2_925] : memref<4x18x18xf32, #tpu.memory_space<vmem>>, vector<1x16x16xf32>
    %1613 = vector.shape_cast %1612 : vector<1x16x16xf32> to vector<16x16xf32>
    %1614 = vector.broadcast %1611 : f32 to vector<16x16xf32>
    %1615 = arith.mulf %1614, %1613 : vector<16x16xf32>
    %1616 = arith.addf %1610, %1615 : vector<16x16xf32>
    %c102_926 = arith.constant 102 : index
    %1617 = memref.load %arg6[%c102_926] : memref<144xf32, #tpu.memory_space<smem>>
    %c3_927 = arith.constant 3 : index
    %c1_928 = arith.constant 1 : index
    %c0_929 = arith.constant 0 : index
    %1618 = vector.load %arg10[%c3_927, %c1_928, %c0_929] : memref<4x18x18xf32, #tpu.memory_space<vmem>>, vector<1x16x16xf32>
    %1619 = vector.shape_cast %1618 : vector<1x16x16xf32> to vector<16x16xf32>
    %1620 = vector.broadcast %1617 : f32 to vector<16x16xf32>
    %1621 = arith.mulf %1620, %1619 : vector<16x16xf32>
    %1622 = arith.addf %1616, %1621 : vector<16x16xf32>
    %c103_930 = arith.constant 103 : index
    %1623 = memref.load %arg6[%c103_930] : memref<144xf32, #tpu.memory_space<smem>>
    %c3_931 = arith.constant 3 : index
    %c1_932 = arith.constant 1 : index
    %c1_933 = arith.constant 1 : index
    %1624 = vector.load %arg10[%c3_931, %c1_932, %c1_933] : memref<4x18x18xf32, #tpu.memory_space<vmem>>, vector<1x16x16xf32>
    %1625 = vector.shape_cast %1624 : vector<1x16x16xf32> to vector<16x16xf32>
    %1626 = vector.broadcast %1623 : f32 to vector<16x16xf32>
    %1627 = arith.mulf %1626, %1625 : vector<16x16xf32>
    %1628 = arith.addf %1622, %1627 : vector<16x16xf32>
    %c104_934 = arith.constant 104 : index
    %1629 = memref.load %arg6[%c104_934] : memref<144xf32, #tpu.memory_space<smem>>
    %c3_935 = arith.constant 3 : index
    %c1_936 = arith.constant 1 : index
    %c2_937 = arith.constant 2 : index
    %1630 = vector.load %arg10[%c3_935, %c1_936, %c2_937] : memref<4x18x18xf32, #tpu.memory_space<vmem>>, vector<1x16x16xf32>
    %1631 = vector.shape_cast %1630 : vector<1x16x16xf32> to vector<16x16xf32>
    %1632 = vector.broadcast %1629 : f32 to vector<16x16xf32>
    %1633 = arith.mulf %1632, %1631 : vector<16x16xf32>
    %1634 = arith.addf %1628, %1633 : vector<16x16xf32>
    %c105_938 = arith.constant 105 : index
    %1635 = memref.load %arg6[%c105_938] : memref<144xf32, #tpu.memory_space<smem>>
    %c3_939 = arith.constant 3 : index
    %c2_940 = arith.constant 2 : index
    %c0_941 = arith.constant 0 : index
    %1636 = vector.load %arg10[%c3_939, %c2_940, %c0_941] : memref<4x18x18xf32, #tpu.memory_space<vmem>>, vector<1x16x16xf32>
    %1637 = vector.shape_cast %1636 : vector<1x16x16xf32> to vector<16x16xf32>
    %1638 = vector.broadcast %1635 : f32 to vector<16x16xf32>
    %1639 = arith.mulf %1638, %1637 : vector<16x16xf32>
    %1640 = arith.addf %1634, %1639 : vector<16x16xf32>
    %c106_942 = arith.constant 106 : index
    %1641 = memref.load %arg6[%c106_942] : memref<144xf32, #tpu.memory_space<smem>>
    %c3_943 = arith.constant 3 : index
    %c2_944 = arith.constant 2 : index
    %c1_945 = arith.constant 1 : index
    %1642 = vector.load %arg10[%c3_943, %c2_944, %c1_945] : memref<4x18x18xf32, #tpu.memory_space<vmem>>, vector<1x16x16xf32>
    %1643 = vector.shape_cast %1642 : vector<1x16x16xf32> to vector<16x16xf32>
    %1644 = vector.broadcast %1641 : f32 to vector<16x16xf32>
    %1645 = arith.mulf %1644, %1643 : vector<16x16xf32>
    %1646 = arith.addf %1640, %1645 : vector<16x16xf32>
    %c107_946 = arith.constant 107 : index
    %1647 = memref.load %arg6[%c107_946] : memref<144xf32, #tpu.memory_space<smem>>
    %c3_947 = arith.constant 3 : index
    %c2_948 = arith.constant 2 : index
    %c2_949 = arith.constant 2 : index
    %1648 = vector.load %arg10[%c3_947, %c2_948, %c2_949] : memref<4x18x18xf32, #tpu.memory_space<vmem>>, vector<1x16x16xf32>
    %1649 = vector.shape_cast %1648 : vector<1x16x16xf32> to vector<16x16xf32>
    %1650 = vector.broadcast %1647 : f32 to vector<16x16xf32>
    %1651 = arith.mulf %1650, %1649 : vector<16x16xf32>
    %1652 = arith.addf %1646, %1651 : vector<16x16xf32>
    %cst_950 = arith.constant 0.000000e+00 : f32
    %1653 = vector.broadcast %cst_950 : f32 to vector<16x16xf32>
    %1654 = arith.cmpf oge, %1652, %1653 : vector<16x16xf32>
    %cst_951 = arith.constant 2.000000e-01 : f32
    %1655 = vector.broadcast %cst_951 : f32 to vector<16x16xf32>
    %1656 = arith.mulf %1655, %1652 : vector<16x16xf32>
    %1657 = arith.select %1654, %1652, %1656 : vector<16x16xi1>, vector<16x16xf32>
    %c0_952 = arith.constant 0 : index
    %c2_953 = arith.constant 2 : index
    %c0_954 = arith.constant 0 : index
    %c0_955 = arith.constant 0 : index
    %1658 = vector.load %arg1[%c0_952, %c2_953, %c0_954, %c0_955] : memref<1x4x16x16xf32, #tpu.memory_space<vmem>>, vector<1x1x16x16xf32>
    %1659 = vector.shape_cast %1658 : vector<1x1x16x16xf32> to vector<16x16xf32>
    %1660 = arith.addf %1659, %1657 : vector<16x16xf32>
    %c0_956 = arith.constant 0 : index
    %c2_957 = arith.constant 2 : index
    %c0_958 = arith.constant 0 : index
    %c0_959 = arith.constant 0 : index
    %1661 = vector.load %arg8[%c0_956, %c2_957, %c0_958, %c0_959] : memref<1x4x16x16xf32, #tpu.memory_space<vmem>>, vector<1x1x16x16xf32>
    %1662 = vector.shape_cast %1661 : vector<1x1x16x16xf32> to vector<16x16xf32>
    %1663 = vector.shape_cast %1660 : vector<16x16xf32> to vector<1x1x16x16xf32>
    tpu.vector_store %arg8[%c0_956, %c2_957, %c0_958, %c0_959], %1663 {strides = array<i32>} : memref<1x4x16x16xf32, #tpu.memory_space<vmem>>, vector<1x1x16x16xf32>,
    %cst_960 = arith.constant 0.000000e+00 : f32
    %1664 = vector.broadcast %cst_960 : f32 to vector<16x16xf32>
    %c3_961 = arith.constant 3 : index
    %1665 = memref.load %arg7[%c3_961] : memref<4xf32, #tpu.memory_space<smem>>
    %1666 = vector.broadcast %1665 : f32 to vector<16x16xf32>
    %1667 = arith.addf %1664, %1666 : vector<16x16xf32>
    %c108_962 = arith.constant 108 : index
    %1668 = memref.load %arg6[%c108_962] : memref<144xf32, #tpu.memory_space<smem>>
    %c0_963 = arith.constant 0 : index
    %c0_964 = arith.constant 0 : index
    %c0_965 = arith.constant 0 : index
    %1669 = vector.load %arg10[%c0_963, %c0_964, %c0_965] : memref<4x18x18xf32, #tpu.memory_space<vmem>>, vector<1x16x16xf32>
    %1670 = vector.shape_cast %1669 : vector<1x16x16xf32> to vector<16x16xf32>
    %1671 = vector.broadcast %1668 : f32 to vector<16x16xf32>
    %1672 = arith.mulf %1671, %1670 : vector<16x16xf32>
    %1673 = arith.addf %1667, %1672 : vector<16x16xf32>
    %c109_966 = arith.constant 109 : index
    %1674 = memref.load %arg6[%c109_966] : memref<144xf32, #tpu.memory_space<smem>>
    %c0_967 = arith.constant 0 : index
    %c0_968 = arith.constant 0 : index
    %c1_969 = arith.constant 1 : index
    %1675 = vector.load %arg10[%c0_967, %c0_968, %c1_969] : memref<4x18x18xf32, #tpu.memory_space<vmem>>, vector<1x16x16xf32>
    %1676 = vector.shape_cast %1675 : vector<1x16x16xf32> to vector<16x16xf32>
    %1677 = vector.broadcast %1674 : f32 to vector<16x16xf32>
    %1678 = arith.mulf %1677, %1676 : vector<16x16xf32>
    %1679 = arith.addf %1673, %1678 : vector<16x16xf32>
    %c110_970 = arith.constant 110 : index
    %1680 = memref.load %arg6[%c110_970] : memref<144xf32, #tpu.memory_space<smem>>
    %c0_971 = arith.constant 0 : index
    %c0_972 = arith.constant 0 : index
    %c2_973 = arith.constant 2 : index
    %1681 = vector.load %arg10[%c0_971, %c0_972, %c2_973] : memref<4x18x18xf32, #tpu.memory_space<vmem>>, vector<1x16x16xf32>
    %1682 = vector.shape_cast %1681 : vector<1x16x16xf32> to vector<16x16xf32>
    %1683 = vector.broadcast %1680 : f32 to vector<16x16xf32>
    %1684 = arith.mulf %1683, %1682 : vector<16x16xf32>
    %1685 = arith.addf %1679, %1684 : vector<16x16xf32>
    %c111_974 = arith.constant 111 : index
    %1686 = memref.load %arg6[%c111_974] : memref<144xf32, #tpu.memory_space<smem>>
    %c0_975 = arith.constant 0 : index
    %c1_976 = arith.constant 1 : index
    %c0_977 = arith.constant 0 : index
    %1687 = vector.load %arg10[%c0_975, %c1_976, %c0_977] : memref<4x18x18xf32, #tpu.memory_space<vmem>>, vector<1x16x16xf32>
    %1688 = vector.shape_cast %1687 : vector<1x16x16xf32> to vector<16x16xf32>
    %1689 = vector.broadcast %1686 : f32 to vector<16x16xf32>
    %1690 = arith.mulf %1689, %1688 : vector<16x16xf32>
    %1691 = arith.addf %1685, %1690 : vector<16x16xf32>
    %c112_978 = arith.constant 112 : index
    %1692 = memref.load %arg6[%c112_978] : memref<144xf32, #tpu.memory_space<smem>>
    %c0_979 = arith.constant 0 : index
    %c1_980 = arith.constant 1 : index
    %c1_981 = arith.constant 1 : index
    %1693 = vector.load %arg10[%c0_979, %c1_980, %c1_981] : memref<4x18x18xf32, #tpu.memory_space<vmem>>, vector<1x16x16xf32>
    %1694 = vector.shape_cast %1693 : vector<1x16x16xf32> to vector<16x16xf32>
    %1695 = vector.broadcast %1692 : f32 to vector<16x16xf32>
    %1696 = arith.mulf %1695, %1694 : vector<16x16xf32>
    %1697 = arith.addf %1691, %1696 : vector<16x16xf32>
    %c113_982 = arith.constant 113 : index
    %1698 = memref.load %arg6[%c113_982] : memref<144xf32, #tpu.memory_space<smem>>
    %c0_983 = arith.constant 0 : index
    %c1_984 = arith.constant 1 : index
    %c2_985 = arith.constant 2 : index
    %1699 = vector.load %arg10[%c0_983, %c1_984, %c2_985] : memref<4x18x18xf32, #tpu.memory_space<vmem>>, vector<1x16x16xf32>
    %1700 = vector.shape_cast %1699 : vector<1x16x16xf32> to vector<16x16xf32>
    %1701 = vector.broadcast %1698 : f32 to vector<16x16xf32>
    %1702 = arith.mulf %1701, %1700 : vector<16x16xf32>
    %1703 = arith.addf %1697, %1702 : vector<16x16xf32>
    %c114_986 = arith.constant 114 : index
    %1704 = memref.load %arg6[%c114_986] : memref<144xf32, #tpu.memory_space<smem>>
    %c0_987 = arith.constant 0 : index
    %c2_988 = arith.constant 2 : index
    %c0_989 = arith.constant 0 : index
    %1705 = vector.load %arg10[%c0_987, %c2_988, %c0_989] : memref<4x18x18xf32, #tpu.memory_space<vmem>>, vector<1x16x16xf32>
    %1706 = vector.shape_cast %1705 : vector<1x16x16xf32> to vector<16x16xf32>
    %1707 = vector.broadcast %1704 : f32 to vector<16x16xf32>
    %1708 = arith.mulf %1707, %1706 : vector<16x16xf32>
    %1709 = arith.addf %1703, %1708 : vector<16x16xf32>
    %c115_990 = arith.constant 115 : index
    %1710 = memref.load %arg6[%c115_990] : memref<144xf32, #tpu.memory_space<smem>>
    %c0_991 = arith.constant 0 : index
    %c2_992 = arith.constant 2 : index
    %c1_993 = arith.constant 1 : index
    %1711 = vector.load %arg10[%c0_991, %c2_992, %c1_993] : memref<4x18x18xf32, #tpu.memory_space<vmem>>, vector<1x16x16xf32>
    %1712 = vector.shape_cast %1711 : vector<1x16x16xf32> to vector<16x16xf32>
    %1713 = vector.broadcast %1710 : f32 to vector<16x16xf32>
    %1714 = arith.mulf %1713, %1712 : vector<16x16xf32>
    %1715 = arith.addf %1709, %1714 : vector<16x16xf32>
    %c116_994 = arith.constant 116 : index
    %1716 = memref.load %arg6[%c116_994] : memref<144xf32, #tpu.memory_space<smem>>
    %c0_995 = arith.constant 0 : index
    %c2_996 = arith.constant 2 : index
    %c2_997 = arith.constant 2 : index
    %1717 = vector.load %arg10[%c0_995, %c2_996, %c2_997] : memref<4x18x18xf32, #tpu.memory_space<vmem>>, vector<1x16x16xf32>
    %1718 = vector.shape_cast %1717 : vector<1x16x16xf32> to vector<16x16xf32>
    %1719 = vector.broadcast %1716 : f32 to vector<16x16xf32>
    %1720 = arith.mulf %1719, %1718 : vector<16x16xf32>
    %1721 = arith.addf %1715, %1720 : vector<16x16xf32>
    %c117_998 = arith.constant 117 : index
    %1722 = memref.load %arg6[%c117_998] : memref<144xf32, #tpu.memory_space<smem>>
    %c1_999 = arith.constant 1 : index
    %c0_1000 = arith.constant 0 : index
    %c0_1001 = arith.constant 0 : index
    %1723 = vector.load %arg10[%c1_999, %c0_1000, %c0_1001] : memref<4x18x18xf32, #tpu.memory_space<vmem>>, vector<1x16x16xf32>
    %1724 = vector.shape_cast %1723 : vector<1x16x16xf32> to vector<16x16xf32>
    %1725 = vector.broadcast %1722 : f32 to vector<16x16xf32>
    %1726 = arith.mulf %1725, %1724 : vector<16x16xf32>
    %1727 = arith.addf %1721, %1726 : vector<16x16xf32>
    %c118_1002 = arith.constant 118 : index
    %1728 = memref.load %arg6[%c118_1002] : memref<144xf32, #tpu.memory_space<smem>>
    %c1_1003 = arith.constant 1 : index
    %c0_1004 = arith.constant 0 : index
    %c1_1005 = arith.constant 1 : index
    %1729 = vector.load %arg10[%c1_1003, %c0_1004, %c1_1005] : memref<4x18x18xf32, #tpu.memory_space<vmem>>, vector<1x16x16xf32>
    %1730 = vector.shape_cast %1729 : vector<1x16x16xf32> to vector<16x16xf32>
    %1731 = vector.broadcast %1728 : f32 to vector<16x16xf32>
    %1732 = arith.mulf %1731, %1730 : vector<16x16xf32>
    %1733 = arith.addf %1727, %1732 : vector<16x16xf32>
    %c119_1006 = arith.constant 119 : index
    %1734 = memref.load %arg6[%c119_1006] : memref<144xf32, #tpu.memory_space<smem>>
    %c1_1007 = arith.constant 1 : index
    %c0_1008 = arith.constant 0 : index
    %c2_1009 = arith.constant 2 : index
    %1735 = vector.load %arg10[%c1_1007, %c0_1008, %c2_1009] : memref<4x18x18xf32, #tpu.memory_space<vmem>>, vector<1x16x16xf32>
    %1736 = vector.shape_cast %1735 : vector<1x16x16xf32> to vector<16x16xf32>
    %1737 = vector.broadcast %1734 : f32 to vector<16x16xf32>
    %1738 = arith.mulf %1737, %1736 : vector<16x16xf32>
    %1739 = arith.addf %1733, %1738 : vector<16x16xf32>
    %c120_1010 = arith.constant 120 : index
    %1740 = memref.load %arg6[%c120_1010] : memref<144xf32, #tpu.memory_space<smem>>
    %c1_1011 = arith.constant 1 : index
    %c1_1012 = arith.constant 1 : index
    %c0_1013 = arith.constant 0 : index
    %1741 = vector.load %arg10[%c1_1011, %c1_1012, %c0_1013] : memref<4x18x18xf32, #tpu.memory_space<vmem>>, vector<1x16x16xf32>
    %1742 = vector.shape_cast %1741 : vector<1x16x16xf32> to vector<16x16xf32>
    %1743 = vector.broadcast %1740 : f32 to vector<16x16xf32>
    %1744 = arith.mulf %1743, %1742 : vector<16x16xf32>
    %1745 = arith.addf %1739, %1744 : vector<16x16xf32>
    %c121_1014 = arith.constant 121 : index
    %1746 = memref.load %arg6[%c121_1014] : memref<144xf32, #tpu.memory_space<smem>>
    %c1_1015 = arith.constant 1 : index
    %c1_1016 = arith.constant 1 : index
    %c1_1017 = arith.constant 1 : index
    %1747 = vector.load %arg10[%c1_1015, %c1_1016, %c1_1017] : memref<4x18x18xf32, #tpu.memory_space<vmem>>, vector<1x16x16xf32>
    %1748 = vector.shape_cast %1747 : vector<1x16x16xf32> to vector<16x16xf32>
    %1749 = vector.broadcast %1746 : f32 to vector<16x16xf32>
    %1750 = arith.mulf %1749, %1748 : vector<16x16xf32>
    %1751 = arith.addf %1745, %1750 : vector<16x16xf32>
    %c122_1018 = arith.constant 122 : index
    %1752 = memref.load %arg6[%c122_1018] : memref<144xf32, #tpu.memory_space<smem>>
    %c1_1019 = arith.constant 1 : index
    %c1_1020 = arith.constant 1 : index
    %c2_1021 = arith.constant 2 : index
    %1753 = vector.load %arg10[%c1_1019, %c1_1020, %c2_1021] : memref<4x18x18xf32, #tpu.memory_space<vmem>>, vector<1x16x16xf32>
    %1754 = vector.shape_cast %1753 : vector<1x16x16xf32> to vector<16x16xf32>
    %1755 = vector.broadcast %1752 : f32 to vector<16x16xf32>
    %1756 = arith.mulf %1755, %1754 : vector<16x16xf32>
    %1757 = arith.addf %1751, %1756 : vector<16x16xf32>
    %c123_1022 = arith.constant 123 : index
    %1758 = memref.load %arg6[%c123_1022] : memref<144xf32, #tpu.memory_space<smem>>
    %c1_1023 = arith.constant 1 : index
    %c2_1024 = arith.constant 2 : index
    %c0_1025 = arith.constant 0 : index
    %1759 = vector.load %arg10[%c1_1023, %c2_1024, %c0_1025] : memref<4x18x18xf32, #tpu.memory_space<vmem>>, vector<1x16x16xf32>
    %1760 = vector.shape_cast %1759 : vector<1x16x16xf32> to vector<16x16xf32>
    %1761 = vector.broadcast %1758 : f32 to vector<16x16xf32>
    %1762 = arith.mulf %1761, %1760 : vector<16x16xf32>
    %1763 = arith.addf %1757, %1762 : vector<16x16xf32>
    %c124_1026 = arith.constant 124 : index
    %1764 = memref.load %arg6[%c124_1026] : memref<144xf32, #tpu.memory_space<smem>>
    %c1_1027 = arith.constant 1 : index
    %c2_1028 = arith.constant 2 : index
    %c1_1029 = arith.constant 1 : index
    %1765 = vector.load %arg10[%c1_1027, %c2_1028, %c1_1029] : memref<4x18x18xf32, #tpu.memory_space<vmem>>, vector<1x16x16xf32>
    %1766 = vector.shape_cast %1765 : vector<1x16x16xf32> to vector<16x16xf32>
    %1767 = vector.broadcast %1764 : f32 to vector<16x16xf32>
    %1768 = arith.mulf %1767, %1766 : vector<16x16xf32>
    %1769 = arith.addf %1763, %1768 : vector<16x16xf32>
    %c125_1030 = arith.constant 125 : index
    %1770 = memref.load %arg6[%c125_1030] : memref<144xf32, #tpu.memory_space<smem>>
    %c1_1031 = arith.constant 1 : index
    %c2_1032 = arith.constant 2 : index
    %c2_1033 = arith.constant 2 : index
    %1771 = vector.load %arg10[%c1_1031, %c2_1032, %c2_1033] : memref<4x18x18xf32, #tpu.memory_space<vmem>>, vector<1x16x16xf32>
    %1772 = vector.shape_cast %1771 : vector<1x16x16xf32> to vector<16x16xf32>
    %1773 = vector.broadcast %1770 : f32 to vector<16x16xf32>
    %1774 = arith.mulf %1773, %1772 : vector<16x16xf32>
    %1775 = arith.addf %1769, %1774 : vector<16x16xf32>
    %c126_1034 = arith.constant 126 : index
    %1776 = memref.load %arg6[%c126_1034] : memref<144xf32, #tpu.memory_space<smem>>
    %c2_1035 = arith.constant 2 : index
    %c0_1036 = arith.constant 0 : index
    %c0_1037 = arith.constant 0 : index
    %1777 = vector.load %arg10[%c2_1035, %c0_1036, %c0_1037] : memref<4x18x18xf32, #tpu.memory_space<vmem>>, vector<1x16x16xf32>
    %1778 = vector.shape_cast %1777 : vector<1x16x16xf32> to vector<16x16xf32>
    %1779 = vector.broadcast %1776 : f32 to vector<16x16xf32>
    %1780 = arith.mulf %1779, %1778 : vector<16x16xf32>
    %1781 = arith.addf %1775, %1780 : vector<16x16xf32>
    %c127_1038 = arith.constant 127 : index
    %1782 = memref.load %arg6[%c127_1038] : memref<144xf32, #tpu.memory_space<smem>>
    %c2_1039 = arith.constant 2 : index
    %c0_1040 = arith.constant 0 : index
    %c1_1041 = arith.constant 1 : index
    %1783 = vector.load %arg10[%c2_1039, %c0_1040, %c1_1041] : memref<4x18x18xf32, #tpu.memory_space<vmem>>, vector<1x16x16xf32>
    %1784 = vector.shape_cast %1783 : vector<1x16x16xf32> to vector<16x16xf32>
    %1785 = vector.broadcast %1782 : f32 to vector<16x16xf32>
    %1786 = arith.mulf %1785, %1784 : vector<16x16xf32>
    %1787 = arith.addf %1781, %1786 : vector<16x16xf32>
    %c128_1042 = arith.constant 128 : index
    %1788 = memref.load %arg6[%c128_1042] : memref<144xf32, #tpu.memory_space<smem>>
    %c2_1043 = arith.constant 2 : index
    %c0_1044 = arith.constant 0 : index
    %c2_1045 = arith.constant 2 : index
    %1789 = vector.load %arg10[%c2_1043, %c0_1044, %c2_1045] : memref<4x18x18xf32, #tpu.memory_space<vmem>>, vector<1x16x16xf32>
    %1790 = vector.shape_cast %1789 : vector<1x16x16xf32> to vector<16x16xf32>
    %1791 = vector.broadcast %1788 : f32 to vector<16x16xf32>
    %1792 = arith.mulf %1791, %1790 : vector<16x16xf32>
    %1793 = arith.addf %1787, %1792 : vector<16x16xf32>
    %c129_1046 = arith.constant 129 : index
    %1794 = memref.load %arg6[%c129_1046] : memref<144xf32, #tpu.memory_space<smem>>
    %c2_1047 = arith.constant 2 : index
    %c1_1048 = arith.constant 1 : index
    %c0_1049 = arith.constant 0 : index
    %1795 = vector.load %arg10[%c2_1047, %c1_1048, %c0_1049] : memref<4x18x18xf32, #tpu.memory_space<vmem>>, vector<1x16x16xf32>
    %1796 = vector.shape_cast %1795 : vector<1x16x16xf32> to vector<16x16xf32>
    %1797 = vector.broadcast %1794 : f32 to vector<16x16xf32>
    %1798 = arith.mulf %1797, %1796 : vector<16x16xf32>
    %1799 = arith.addf %1793, %1798 : vector<16x16xf32>
    %c130_1050 = arith.constant 130 : index
    %1800 = memref.load %arg6[%c130_1050] : memref<144xf32, #tpu.memory_space<smem>>
    %c2_1051 = arith.constant 2 : index
    %c1_1052 = arith.constant 1 : index
    %c1_1053 = arith.constant 1 : index
    %1801 = vector.load %arg10[%c2_1051, %c1_1052, %c1_1053] : memref<4x18x18xf32, #tpu.memory_space<vmem>>, vector<1x16x16xf32>
    %1802 = vector.shape_cast %1801 : vector<1x16x16xf32> to vector<16x16xf32>
    %1803 = vector.broadcast %1800 : f32 to vector<16x16xf32>
    %1804 = arith.mulf %1803, %1802 : vector<16x16xf32>
    %1805 = arith.addf %1799, %1804 : vector<16x16xf32>
    %c131_1054 = arith.constant 131 : index
    %1806 = memref.load %arg6[%c131_1054] : memref<144xf32, #tpu.memory_space<smem>>
    %c2_1055 = arith.constant 2 : index
    %c1_1056 = arith.constant 1 : index
    %c2_1057 = arith.constant 2 : index
    %1807 = vector.load %arg10[%c2_1055, %c1_1056, %c2_1057] : memref<4x18x18xf32, #tpu.memory_space<vmem>>, vector<1x16x16xf32>
    %1808 = vector.shape_cast %1807 : vector<1x16x16xf32> to vector<16x16xf32>
    %1809 = vector.broadcast %1806 : f32 to vector<16x16xf32>
    %1810 = arith.mulf %1809, %1808 : vector<16x16xf32>
    %1811 = arith.addf %1805, %1810 : vector<16x16xf32>
    %c132_1058 = arith.constant 132 : index
    %1812 = memref.load %arg6[%c132_1058] : memref<144xf32, #tpu.memory_space<smem>>
    %c2_1059 = arith.constant 2 : index
    %c2_1060 = arith.constant 2 : index
    %c0_1061 = arith.constant 0 : index
    %1813 = vector.load %arg10[%c2_1059, %c2_1060, %c0_1061] : memref<4x18x18xf32, #tpu.memory_space<vmem>>, vector<1x16x16xf32>
    %1814 = vector.shape_cast %1813 : vector<1x16x16xf32> to vector<16x16xf32>
    %1815 = vector.broadcast %1812 : f32 to vector<16x16xf32>
    %1816 = arith.mulf %1815, %1814 : vector<16x16xf32>
    %1817 = arith.addf %1811, %1816 : vector<16x16xf32>
    %c133_1062 = arith.constant 133 : index
    %1818 = memref.load %arg6[%c133_1062] : memref<144xf32, #tpu.memory_space<smem>>
    %c2_1063 = arith.constant 2 : index
    %c2_1064 = arith.constant 2 : index
    %c1_1065 = arith.constant 1 : index
    %1819 = vector.load %arg10[%c2_1063, %c2_1064, %c1_1065] : memref<4x18x18xf32, #tpu.memory_space<vmem>>, vector<1x16x16xf32>
    %1820 = vector.shape_cast %1819 : vector<1x16x16xf32> to vector<16x16xf32>
    %1821 = vector.broadcast %1818 : f32 to vector<16x16xf32>
    %1822 = arith.mulf %1821, %1820 : vector<16x16xf32>
    %1823 = arith.addf %1817, %1822 : vector<16x16xf32>
    %c134_1066 = arith.constant 134 : index
    %1824 = memref.load %arg6[%c134_1066] : memref<144xf32, #tpu.memory_space<smem>>
    %c2_1067 = arith.constant 2 : index
    %c2_1068 = arith.constant 2 : index
    %c2_1069 = arith.constant 2 : index
    %1825 = vector.load %arg10[%c2_1067, %c2_1068, %c2_1069] : memref<4x18x18xf32, #tpu.memory_space<vmem>>, vector<1x16x16xf32>
    %1826 = vector.shape_cast %1825 : vector<1x16x16xf32> to vector<16x16xf32>
    %1827 = vector.broadcast %1824 : f32 to vector<16x16xf32>
    %1828 = arith.mulf %1827, %1826 : vector<16x16xf32>
    %1829 = arith.addf %1823, %1828 : vector<16x16xf32>
    %c135_1070 = arith.constant 135 : index
    %1830 = memref.load %arg6[%c135_1070] : memref<144xf32, #tpu.memory_space<smem>>
    %c3_1071 = arith.constant 3 : index
    %c0_1072 = arith.constant 0 : index
    %c0_1073 = arith.constant 0 : index
    %1831 = vector.load %arg10[%c3_1071, %c0_1072, %c0_1073] : memref<4x18x18xf32, #tpu.memory_space<vmem>>, vector<1x16x16xf32>
    %1832 = vector.shape_cast %1831 : vector<1x16x16xf32> to vector<16x16xf32>
    %1833 = vector.broadcast %1830 : f32 to vector<16x16xf32>
    %1834 = arith.mulf %1833, %1832 : vector<16x16xf32>
    %1835 = arith.addf %1829, %1834 : vector<16x16xf32>
    %c136_1074 = arith.constant 136 : index
    %1836 = memref.load %arg6[%c136_1074] : memref<144xf32, #tpu.memory_space<smem>>
    %c3_1075 = arith.constant 3 : index
    %c0_1076 = arith.constant 0 : index
    %c1_1077 = arith.constant 1 : index
    %1837 = vector.load %arg10[%c3_1075, %c0_1076, %c1_1077] : memref<4x18x18xf32, #tpu.memory_space<vmem>>, vector<1x16x16xf32>
    %1838 = vector.shape_cast %1837 : vector<1x16x16xf32> to vector<16x16xf32>
    %1839 = vector.broadcast %1836 : f32 to vector<16x16xf32>
    %1840 = arith.mulf %1839, %1838 : vector<16x16xf32>
    %1841 = arith.addf %1835, %1840 : vector<16x16xf32>
    %c137_1078 = arith.constant 137 : index
    %1842 = memref.load %arg6[%c137_1078] : memref<144xf32, #tpu.memory_space<smem>>
    %c3_1079 = arith.constant 3 : index
    %c0_1080 = arith.constant 0 : index
    %c2_1081 = arith.constant 2 : index
    %1843 = vector.load %arg10[%c3_1079, %c0_1080, %c2_1081] : memref<4x18x18xf32, #tpu.memory_space<vmem>>, vector<1x16x16xf32>
    %1844 = vector.shape_cast %1843 : vector<1x16x16xf32> to vector<16x16xf32>
    %1845 = vector.broadcast %1842 : f32 to vector<16x16xf32>
    %1846 = arith.mulf %1845, %1844 : vector<16x16xf32>
    %1847 = arith.addf %1841, %1846 : vector<16x16xf32>
    %c138_1082 = arith.constant 138 : index
    %1848 = memref.load %arg6[%c138_1082] : memref<144xf32, #tpu.memory_space<smem>>
    %c3_1083 = arith.constant 3 : index
    %c1_1084 = arith.constant 1 : index
    %c0_1085 = arith.constant 0 : index
    %1849 = vector.load %arg10[%c3_1083, %c1_1084, %c0_1085] : memref<4x18x18xf32, #tpu.memory_space<vmem>>, vector<1x16x16xf32>
    %1850 = vector.shape_cast %1849 : vector<1x16x16xf32> to vector<16x16xf32>
    %1851 = vector.broadcast %1848 : f32 to vector<16x16xf32>
    %1852 = arith.mulf %1851, %1850 : vector<16x16xf32>
    %1853 = arith.addf %1847, %1852 : vector<16x16xf32>
    %c139_1086 = arith.constant 139 : index
    %1854 = memref.load %arg6[%c139_1086] : memref<144xf32, #tpu.memory_space<smem>>
    %c3_1087 = arith.constant 3 : index
    %c1_1088 = arith.constant 1 : index
    %c1_1089 = arith.constant 1 : index
    %1855 = vector.load %arg10[%c3_1087, %c1_1088, %c1_1089] : memref<4x18x18xf32, #tpu.memory_space<vmem>>, vector<1x16x16xf32>
    %1856 = vector.shape_cast %1855 : vector<1x16x16xf32> to vector<16x16xf32>
    %1857 = vector.broadcast %1854 : f32 to vector<16x16xf32>
    %1858 = arith.mulf %1857, %1856 : vector<16x16xf32>
    %1859 = arith.addf %1853, %1858 : vector<16x16xf32>
    %c140_1090 = arith.constant 140 : index
    %1860 = memref.load %arg6[%c140_1090] : memref<144xf32, #tpu.memory_space<smem>>
    %c3_1091 = arith.constant 3 : index
    %c1_1092 = arith.constant 1 : index
    %c2_1093 = arith.constant 2 : index
    %1861 = vector.load %arg10[%c3_1091, %c1_1092, %c2_1093] : memref<4x18x18xf32, #tpu.memory_space<vmem>>, vector<1x16x16xf32>
    %1862 = vector.shape_cast %1861 : vector<1x16x16xf32> to vector<16x16xf32>
    %1863 = vector.broadcast %1860 : f32 to vector<16x16xf32>
    %1864 = arith.mulf %1863, %1862 : vector<16x16xf32>
    %1865 = arith.addf %1859, %1864 : vector<16x16xf32>
    %c141_1094 = arith.constant 141 : index
    %1866 = memref.load %arg6[%c141_1094] : memref<144xf32, #tpu.memory_space<smem>>
    %c3_1095 = arith.constant 3 : index
    %c2_1096 = arith.constant 2 : index
    %c0_1097 = arith.constant 0 : index
    %1867 = vector.load %arg10[%c3_1095, %c2_1096, %c0_1097] : memref<4x18x18xf32, #tpu.memory_space<vmem>>, vector<1x16x16xf32>
    %1868 = vector.shape_cast %1867 : vector<1x16x16xf32> to vector<16x16xf32>
    %1869 = vector.broadcast %1866 : f32 to vector<16x16xf32>
    %1870 = arith.mulf %1869, %1868 : vector<16x16xf32>
    %1871 = arith.addf %1865, %1870 : vector<16x16xf32>
    %c142_1098 = arith.constant 142 : index
    %1872 = memref.load %arg6[%c142_1098] : memref<144xf32, #tpu.memory_space<smem>>
    %c3_1099 = arith.constant 3 : index
    %c2_1100 = arith.constant 2 : index
    %c1_1101 = arith.constant 1 : index
    %1873 = vector.load %arg10[%c3_1099, %c2_1100, %c1_1101] : memref<4x18x18xf32, #tpu.memory_space<vmem>>, vector<1x16x16xf32>
    %1874 = vector.shape_cast %1873 : vector<1x16x16xf32> to vector<16x16xf32>
    %1875 = vector.broadcast %1872 : f32 to vector<16x16xf32>
    %1876 = arith.mulf %1875, %1874 : vector<16x16xf32>
    %1877 = arith.addf %1871, %1876 : vector<16x16xf32>
    %c143_1102 = arith.constant 143 : index
    %1878 = memref.load %arg6[%c143_1102] : memref<144xf32, #tpu.memory_space<smem>>
    %c3_1103 = arith.constant 3 : index
    %c2_1104 = arith.constant 2 : index
    %c2_1105 = arith.constant 2 : index
    %1879 = vector.load %arg10[%c3_1103, %c2_1104, %c2_1105] : memref<4x18x18xf32, #tpu.memory_space<vmem>>, vector<1x16x16xf32>
    %1880 = vector.shape_cast %1879 : vector<1x16x16xf32> to vector<16x16xf32>
    %1881 = vector.broadcast %1878 : f32 to vector<16x16xf32>
    %1882 = arith.mulf %1881, %1880 : vector<16x16xf32>
    %1883 = arith.addf %1877, %1882 : vector<16x16xf32>
    %cst_1106 = arith.constant 0.000000e+00 : f32
    %1884 = vector.broadcast %cst_1106 : f32 to vector<16x16xf32>
    %1885 = arith.cmpf oge, %1883, %1884 : vector<16x16xf32>
    %cst_1107 = arith.constant 2.000000e-01 : f32
    %1886 = vector.broadcast %cst_1107 : f32 to vector<16x16xf32>
    %1887 = arith.mulf %1886, %1883 : vector<16x16xf32>
    %1888 = arith.select %1885, %1883, %1887 : vector<16x16xi1>, vector<16x16xf32>
    %c0_1108 = arith.constant 0 : index
    %c3_1109 = arith.constant 3 : index
    %c0_1110 = arith.constant 0 : index
    %c0_1111 = arith.constant 0 : index
    %1889 = vector.load %arg1[%c0_1108, %c3_1109, %c0_1110, %c0_1111] : memref<1x4x16x16xf32, #tpu.memory_space<vmem>>, vector<1x1x16x16xf32>
    %1890 = vector.shape_cast %1889 : vector<1x1x16x16xf32> to vector<16x16xf32>
    %1891 = arith.addf %1890, %1888 : vector<16x16xf32>
    %c0_1112 = arith.constant 0 : index
    %c3_1113 = arith.constant 3 : index
    %c0_1114 = arith.constant 0 : index
    %c0_1115 = arith.constant 0 : index
    %1892 = vector.load %arg8[%c0_1112, %c3_1113, %c0_1114, %c0_1115] : memref<1x4x16x16xf32, #tpu.memory_space<vmem>>, vector<1x1x16x16xf32>
    %1893 = vector.shape_cast %1892 : vector<1x1x16x16xf32> to vector<16x16xf32>
    %1894 = vector.shape_cast %1891 : vector<16x16xf32> to vector<1x1x16x16xf32>
    tpu.vector_store %arg8[%c0_1112, %c3_1113, %c0_1114, %c0_1115], %1894 {strides = array<i32>} : memref<1x4x16x16xf32, #tpu.memory_space<vmem>>, vector<1x1x16x16xf32>,
    return
  }
  func.func @transform_0(%arg0: i32) -> (i32, i32, i32, i32) {
    %c0_i32 = arith.constant 0 : i32
    %c0_i32_0 = arith.constant 0 : i32
    %c0_i32_1 = arith.constant 0 : i32
    %c0_i32_2 = arith.constant 0 : i32
    return %arg0, %c0_i32, %c0_i32_0, %c0_i32_1 : i32, i32, i32, i32
  }
  func.func @transform_1(%arg0: i32) -> i32 {
    %c0_i32 = arith.constant 0 : i32
    %c0_i32_0 = arith.constant 0 : i32
    return %c0_i32 : i32
  }
  func.func @transform_2(%arg0: i32) -> i32 {
    %c0_i32 = arith.constant 0 : i32
    %c0_i32_0 = arith.constant 0 : i32
    return %c0_i32 : i32
  }
  func.func @transform_3(%arg0: i32) -> i32 {
    %c0_i32 = arith.constant 0 : i32
    %c0_i32_0 = arith.constant 0 : i32
    return %c0_i32 : i32
  }
  func.func @transform_4(%arg0: i32) -> i32 {
    %c0_i32 = arith.constant 0 : i32
    %c0_i32_0 = arith.constant 0 : i32
    return %c0_i32 : i32
  }
  func.func @transform_5(%arg0: i32) -> i32 {
    %c0_i32 = arith.constant 0 : i32
    %c0_i32_0 = arith.constant 0 : i32
    return %c0_i32 : i32
  }
  func.func @transform_6(%arg0: i32) -> i32 {
    %c0_i32 = arith.constant 0 : i32
    %c0_i32_0 = arith.constant 0 : i32
    return %c0_i32 : i32
  }
  func.func @transform_7(%arg0: i32) -> (i32, i32, i32, i32) {
    %c0_i32 = arith.constant 0 : i32
    %c0_i32_0 = arith.constant 0 : i32
    %c0_i32_1 = arith.constant 0 : i32
    %c0_i32_2 = arith.constant 0 : i32
    return %arg0, %c0_i32, %c0_i32_0, %c0_i32_1 : i32, i32, i32, i32
  }
}

</mosaic_0001>

<bundles_post_ra>
// kernel: hin_res_block.1
= control target key start
LH: loop header
LB: loop body
LE: loop exit
PB: predicated region body
PF: predicated region fallthrough
CT: control target
= control target key end

     0   :  { %s7444_s0 = inlined_call_operand.vmem [shape: f32[2,4,16,16], index: 0, kind: input, shape index: {}]   ;;  %s7445_s1 = inlined_call_operand.vmem [shape: f32[144], index: 1, kind: input, shape index: {}]   ;;  %s7446_s2 = inlined_call_operand.vmem [shape: f32[4], index: 2, kind: input, shape index: {}]   ;;  %s7447_s3 = inlined_call_operand.vmem [shape: f32[2], index: 3, kind: input, shape index: {}]   ;;  %s7448_s4 = inlined_call_operand.vmem [shape: f32[2], index: 4, kind: input, shape index: {}]   ;;  %s7449_s5 = inlined_call_operand.vmem [shape: f32[144], index: 5, kind: input, shape index: {}]   ;;  %s7450_s6 = inlined_call_operand.vmem [shape: f32[4], index: 6, kind: input, shape index: {}]   ;;  %s7451_s7 = inlined_call_operand.hbm [shape: f32[2,4,16,16], index: 7, kind: output, shape index: {}]  }
   0x1   :  { %7483 = sst [smem:[#allocation27_spill]] %s7444_s0 }
   0x2   :  { %7484 = sst [smem:[#allocation28_spill]] %s7445_s1 }
   0x3   :  { %7485 = sst [smem:[#allocation29_spill]] %s7446_s2 }
   0x4   :  { %7486 = sst [smem:[#allocation30_spill]] %s7447_s3 }
   0x5   :  { %7487 = sst [smem:[#allocation31_spill]] %s7448_s4 }
   0x6   :  { %7488 = sst [smem:[#allocation32_spill]] %s7449_s5 }
   0x7   :  { %7489 = sst [smem:[#allocation33_spill]] %s7450_s6 }
   0x8   :  { %12 = vsyncpa [#allocation6], 0 }
   0x9   :  { %13 = vsyncpa [#allocation8], 0 }
   0xa   :  { %14 = vsyncpa [#allocation11], 0 }
   0xb   :  { %15 = vsyncpa [#allocation14], 0 }
   0xc   :  { %16 = vsyncpa [#allocation5], 0 }
   0xd   :  { %18 = vsyncpa [#allocation5 + $0x1], 0  ;;  %s5037_s24 = smov 0   ;;  %s5039_s25 = smov 0  }
   0xe   :  { %s5041_s26 = smov 0   ;;  %s5043_s27 = smov 0  }
   0xf LB: > { %7490 = sst [smem:[#allocation21_spill]] %s4971_s24  ;;  %s5058_s28 = sadd.s32 4294967295, %s4983_s27   ;;  %s4983_s27 = sphi %s5043_s27, %s7532_s27   ;;  %s4979_s26 = sphi %s5041_s26, %s7534_s26   ;;  %s4975_s25 = sphi %s5039_s25, %s7536_s25   ;;  %s4971_s24 = sphi %s5037_s24, %s7535_s24  }
  0x10   : > { %7491 = sst [smem:[#allocation22_spill]] %s4979_s26  ;;  %s4278_s29 = sadd.s32 4294967294, %s4983_s27  }
  0x11   : > { %7492 = sst [smem:[#allocation23_spill]] %s4983_s27  ;;  %s5062_s30 = sadd.s32 1, %s4983_s27  }
  0x12   : > { %7493 = sst [smem:[#allocation24_spill]] %s5062_s30  ;;  %s183_s8 = sadd.s32 1, %s4979_s26 }
  0x13   : > { %s180_s9 = ssub.s32 %s4983_s27, %s5062_s30  ;;  %p193_p0 = scmp.ne.s32.totalorder %s4979_s26, %s4975_s25 }
  0x14   : > { %p181_p1 = scmp.eq.s32.totalorder %s180_s9, 0  ;;  %p194_p2 = scmp.eq.s32.totalorder %s5058_s28, 1 }
  0x15   : > { %p199_p3 = scmp.ne.s32.totalorder %s4975_s25, %s4971_s24  ;;  %p200_p4 = scmp.eq.s32.totalorder %s4278_s29, 1 }
  0x16   : > { %s5073_s10 = scalar_select %p181_p1, %s4979_s26, %s183_s8  }
  0x17   : > { %p5075_p5 = por %p194_p2, %p193_p0  ;;  %p5079_p6 = por %p200_p4, %p199_p3 }
  0x18   : > { %7494 = sst [smem:[#allocation25_spill]] %s5073_s10  ;;  %p4279_p7 = scmp.ge.s32.totalorder %s4983_s27, 1 }
  0x19   : > { %s7496_s12 = scalar_select %p5079_p6, 1, 0 }
  0x1a   : > { %p207_p8 = scmp.lt.s32.totalorder %s4983_s27, 3  ;;  %p4659_p9 = scmp.eq.s32.totalorder %s5058_s28, 0 }
  0x1b   : > { %7497 = sst [smem:[#allocation26_spill]] %s7496_s12  ;;  %s4985_s14 = smov [#allocation7]  }
  0x1c   : > { %p5086_p10 = pnand %p4279_p7, %p207_p8  ;;  %s7499_s2 = sld [smem:[#allocation29_spill]] }
  0x1d   : > { %s7500_s4 = sld [smem:[#allocation31_spill]]  ;;  %s4986_s15 = smov [#allocation10]  }
  0x1e   : > { %p4636_p11 = pneg %p5086_p10  ;;  %s7502_s1 = sld [smem:[#allocation28_spill]] }
  0x1f   : > { %s7503_s3 = sld [smem:[#allocation30_spill]]  ;;  %s4987_s17 = smov [#allocation4]  }
  0x20   : > { %p5100_p12 = pnand %p4659_p9, %p4636_p11  ;;  %s4988_s18 = smov [#allocation9]  }
  0x21   : > { %s7504_s5 = sld [smem:[#allocation32_spill]] }
  0x22   : > { %s229_s16 = sshll.u32 %s7499_s2, 4  ;;  %s7505_s6 = sld [smem:[#allocation33_spill]]  ;;  %s230_s16 = int_to_ptr.vmem [resolvable:$true] %s229_s16 }
  0x23   : > { %s249_s19 = sshll.u32 %s7500_s4, 4  ;;  %s250_s19 = int_to_ptr.vmem [resolvable:$true] %s249_s19 }
  0x24   : > { %s219_s23 = sshll.u32 %s7502_s1, 4  ;;  %s220_s23 = int_to_ptr.vmem [resolvable:$true] %s219_s23 }
  0x25   : > { %s239_s9 = sshll.u32 %s7503_s3, 4  ;;  %s240_s9 = int_to_ptr.vmem [resolvable:$true] %s239_s9 }
  0x26   : > { %4642 = dma.vmem_to_smem (!%p5100_p12), %s230_s16, 16, %s4985_s14, [#allocation8]  }
  0x27   : > { %4648 = dma.vmem_to_smem (!%p5100_p12), %s250_s19, 16, %s4986_s15, [#allocation11]  }
  0x28   : > { %4639 = dma.vmem_to_smem (!%p5100_p12), %s220_s23, 32, %s4987_s17, [#allocation6]  }
  0x29   : > { %4645 = dma.vmem_to_smem (!%p5100_p12), %s240_s9, 16, %s4988_s18, [#allocation8]  }
  0x2a   : > { %s259_s1 = sshll.u32 %s7504_s5, 4  ;;  %s269_s2 = sshll.u32 %s7505_s6, 4  ;;  %s260_s1 = int_to_ptr.vmem [resolvable:$true] %s259_s1  ;;  %s270_s2 = int_to_ptr.vmem [resolvable:$true] %s269_s2 }
  0x2b   : > { %s4989_s16 = smov [#allocation12]   ;;  %s4990_s19 = smov [#allocation13]  }
  0x2c   : > { %4651 = dma.vmem_to_smem (!%p5100_p12), %s260_s1, 32, %s4989_s16, [#allocation11]  }
  0x2d   : > { %4654 = dma.vmem_to_smem (!%p5100_p12), %s270_s2, 16, %s4990_s19, [#allocation14]  }
  0x2e   : > { %290 = sbr.rel (%p5086_p10) target bundleno = 1833 (0x729), region = 48 }
  0x33   : > { %4950 = dma.done.wait (%p4659_p9), [#allocation6], 32  }
  0x34   : > { %4952 = vsyncadd (%p4659_p9), [#allocation6], 4294967264 }
  0x35   : > { %4954 = dma.done.wait (%p4659_p9), [#allocation8], 32  }
  0x36   : > { %4956 = vsyncadd (%p4659_p9), [#allocation8], 4294967264 }
  0x37   : > { %4958 = dma.done.wait (%p4659_p9), [#allocation11], 48  }
  0x38   : > { %4960 = vsyncadd (%p4659_p9), [#allocation11], 4294967248 }
  0x39   : > { %4962 = dma.done.wait (%p4659_p9), [#allocation14], 16  }
  0x3a   : > { %4964 = vsyncadd (%p4659_p9), [#allocation14], 4294967280 }
  0x3b   : > { %322 = sfence }
  0x3c   : > { %p349_p13 = scmp.lt.s32.totalorder %s5058_s28, 1  ;;  %vm354_vm0 = vcmask 146432   ;;  %v4991_v0 = vmov 0.0   ;;  %s7506_s0 = sld [smem:[#allocation27_spill]]  ;;  %vm357_vm1 = vcmask 140288   ;;  %vm420_vm2 = vcmask 138248  }
  0x3d   : > { %355 = vst.msk [vmem:[#allocation2] sm:$0xff] %vm354_vm0, %v4991_v0  ;;  %s7452_s9 = smov 1   ;;  %s4298_s14 = sld [smem:[#allocation4 + $0x2]]  ;;  %vm873_vm4 = vcmask 130048  }
  0x3e   : > { %s350_s1 = scalar_select %p349_p13, %s5058_s28, 1  ;;  %356 = vst.msk [vmem:[#allocation2 + $0x8] sm:$0xff] %vm354_vm0, %v4991_v0 }
  0x3f   : > { %359 = vst.msk [vmem:[#allocation2 + $0x18] sm:$0xff] %vm354_vm0, %v4991_v0  ;;  %s4297_s15 = sld [smem:[#allocation4 + $0x1]]  ;;  %s7454_s18 = smov 126  }
  0x40   : > { %s4608_s2 = sshll.u32 %s350_s1, 6  ;;  %360 = vst.msk [vmem:[#allocation2 + $0x20] sm:$0xff] %vm354_vm0, %v4991_v0  ;;  %s5189_s17 = sld [smem:[#allocation4 + $0x4]] }
  0x41   : > { %362 = vst.msk [vmem:[#allocation2 + $0x30] sm:$0xff] %vm354_vm0, %v4991_v0  ;;  %s7458_s21 = smov 127   ;;  %s5197_s22 = sld [smem:[#allocation4 + $0x7]] }
  0x42   : > { %s5155_s23 = scalar_lea.vmem %s7506_s0, %s4608_s2  ;;  %363 = vst.msk [vmem:[#allocation2 + $0x38] sm:$0xff] %vm354_vm0, %v4991_v0  ;;  %s5199_s29 = sld [smem:[#allocation4 + $0x5]] }
  0x43   : > { %v380_v1 = vld [vmem:[%s5155_s23] sm:$0xff]  ;;  %v382_v2 = vld [vmem:[%s5155_s23 + $0x10] sm:$0xff]  ;;  %365 = vst.msk [vmem:[#allocation2 + $0x48] sm:$0xff] %vm354_vm0, %v4991_v0  ;;  %v381_v4 = vld [vmem:[%s5155_s23 + $0x8] sm:$0xff]  ;;  %v455_v11 = vstv %s4298_s14  ;;  %s5219_s8 = sld [smem:[#allocation4 + $0x8]]  ;;  %s7508_s26 = smov 127  }
  0x44   : > { %396 = vrot.lane.b32.xlu0 %v380_v1, %s7452_s9  ;;  %400 = vrot.lane.b32.xlu1 %v382_v2, %s7452_s9  ;;  %v384_v3 = vld [vmem:[%s5155_s23 + $0x20] sm:$0xff]  ;;  %366 = vst.msk [vmem:[#allocation2 + $0x50] sm:$0xff] %vm354_vm0, %v4991_v0  ;;  %v383_v5 = vld [vmem:[%s5155_s23 + $0x18] sm:$0xff]  ;;  %s5223_s16 = sld [smem:[#allocation4 + $0x4f]] }
  0x45   : > { %404 = vrot.lane.b32.xlu2 %v384_v3, %s7452_s9  ;;  %368 = vst.msk [vmem:[#allocation3] sm:$0xff] %vm354_vm0, %v4991_v0  ;;  %v385_v6 = vld [vmem:[%s5155_s23 + $0x28] sm:$0xff]  ;;  %v386_v7 = vld [vmem:[%s5155_s23 + $0x30] sm:$0xff]  ;;  %v387_v8 = vld [vmem:[%s5155_s23 + $0x38] sm:$0xff]  ;;  %s5226_s19 = sld [smem:[#allocation4 + $0x50]] }
  0x46   : > { %369 = vst.msk [vmem:[#allocation3 + $0x8] sm:$0xff] %vm354_vm0, %v4991_v0  ;;  %v441_v12 = vstv %s4297_s15  ;;  %v477_v19 = vstv %s5189_s17  ;;  %s5230_s1 = sld [smem:[#allocation4 + $0xb]] }
  0x47   : > { %371 = vst.msk [vmem:[#allocation3 + $0x18] sm:$0xff] %vm354_vm0, %v4991_v0  ;;  %v513_v26 = vstv %s5197_s22  ;;  %s5233_s2 = sld [smem:[#allocation4 + $0xa]] }
  0x48   : > { %372 = vst.msk [vmem:[#allocation3 + $0x20] sm:$0xff] %vm354_vm0, %v4991_v0  ;;  %v491_v28 = vstv %s5199_s29  ;;  %s4309_s13 = sld [smem:[#allocation4 + $0xd]] }
  0x49   : > { %374 = vst.msk [vmem:[#allocation3 + $0x30] sm:$0xff] %vm354_vm0, %v4991_v0  ;;  %v527_v34 = vstv %s5219_s8  ;;  %s5267_s20 = sld [smem:[#allocation4 + $0x10]] }
  0x4a   : > { %375 = vst.msk [vmem:[#allocation3 + $0x38] sm:$0xff] %vm354_vm0, %v4991_v0  ;;  %v1526_v37 = vstv %s5223_s16  ;;  %s5271_s14 = sld [smem:[#allocation4 + $0xe]] }
  0x4b   : > { %377 = vst.msk [vmem:[#allocation3 + $0x48] sm:$0xff] %vm354_vm0, %v4991_v0  ;;  %v7478_v41 = vstv %s5226_s19  ;;  %s5276_s15 = sld [smem:[#allocation4 + $0x6e]] }
  0x4c   : > { %398 = vrot.lane.b32.xlu0 %v381_v4, %s7452_s9  ;;  %402 = vrot.lane.b32.xlu1 %v383_v5, %s7452_s9  ;;  %378 = vst.msk [vmem:[#allocation3 + $0x50] sm:$0xff] %vm354_vm0, %v4991_v0  ;;  %v564_v43 = vstv %s5230_s1  ;;  %s5280_s17 = sld [smem:[#allocation4 + $0x6d]] }
  0x4d   : > { %406 = vrot.lane.b32.xlu2 %v385_v6, %s7452_s9  ;;  %358 = vst.msk [vmem:[#allocation2 + $0x10] sm:$0x3] %vm357_vm1, %v4991_v0  ;;  %v550_v44 = vstv %s5233_s2  ;;  %s5283_s22 = sld [smem:[#allocation4 + $0x77]] }
  0x4e   : > { %361 = vst.msk [vmem:[#allocation2 + $0x28] sm:$0x3] %vm357_vm1, %v4991_v0  ;;  %v586_v51 = vstv %s4309_s13  ;;  %s5285_s29 = sld [smem:[#allocation4 + $0x76]] }
  0x4f   : > { %364 = vst.msk [vmem:[#allocation2 + $0x40] sm:$0x3] %vm357_vm1, %v4991_v0  ;;  %v622_v57 = vstv %s5267_s20  ;;  %s5293_s8 = sld [smem:[#allocation4 + $0x11]] }
  0x50   : > { %367 = vst.msk [vmem:[#allocation2 + $0x58] sm:$0x3] %vm357_vm1, %v4991_v0  ;;  %v600_v59 = vstv %s5271_s14  ;;  %s5301_s1 = sld [smem:[#allocation4 + $0x14]] }
  0x51   : > { %370 = vst.msk [vmem:[#allocation3 + $0x10] sm:$0x3] %vm357_vm1, %v4991_v0  ;;  %v7467_v1 = vstv %s5276_s15  ;;  %s5304_s2 = sld [smem:[#allocation4 + $0x13]] }
  0x52   : > { %373 = vst.msk [vmem:[#allocation3 + $0x28] sm:$0x3] %vm357_vm1, %v4991_v0  ;;  %v7468_v4 = vstv %s5280_s17  ;;  %s5309_s13 = sld [smem:[#allocation4 + $0x5b]] }
  0x53   : > { %376 = vst.msk [vmem:[#allocation3 + $0x40] sm:$0x3] %vm357_vm1, %v4991_v0  ;;  %v7463_v5 = vstv %s5283_s22  ;;  %s5322_s20 = sld [smem:[#allocation4 + $0x5c]] }
  0x54   : > { %408 = vrot.lane.b32.xlu0 %v386_v7, %s7452_s9  ;;  %410 = vrot.lane.b32.xlu1 %v387_v8, %s7452_s9  ;;  %379 = vst.msk [vmem:[#allocation3 + $0x58] sm:$0x3] %vm357_vm1, %v4991_v0  ;;  %v7464_v7 = vstv %s5285_s29  ;;  %s5343_s14 = sld [smem:[#allocation4 + $0x16]] }
  0x55   : > { %s5381_s9 = sld [smem:[#allocation4 + $0x85]] }
  0x56   : > { %s5389_s0 = sld [smem:[#allocation4 + $0x1a]] }
  0x57   : > { %s5406_s3 = sld [smem:[#allocation4 + $0x83]] }
  0x58   : > { %s5426_s4 = sld [smem:[#allocation4 + $0x64]] }
  0x59   : > { %s5435_s5 = sld [smem:[#allocation4 + $0x1f]] }
  0x5a   : > { %s5465_s6 = sld [smem:[#allocation4 + $0x20]] }
  0x5b   : > { %s5485_s10 = sld [smem:[#allocation4 + $0x3]] }
  0x5c   : > { %s5519_s30 = sld [smem:[#allocation4 + $0x26]] }
  0x5d   : > { %s5555_s12 = sld [smem:[#allocation4 + $0x28]] }
  0x5e   : > { %s5599_s24 = sld [smem:[#allocation4 + $0xc]] }
  0x5f   : > { %s5790_s27 = sld [smem:[#allocation7 + $0x1]] }
  0x60   : > { %s5882_s16 = sld [smem:[#allocation4 + $0x42]] }
  0x9f   : > { %v405_v24 = vpop.permute.xlu2 %404 }
  0xa0   : > { %425 = vst.msk [vmem:[#allocation2 + $0x31] sm:$0xff] %vm420_vm2, %v405_v24 }
  0xa7   : > { %v407_v32 = vpop.permute.xlu2 %406  ;;  %v1662_v24 = vld [vmem:[#allocation2 + $0x30] sm:$0xff] }
  0xa8   : > { %426 = vst.msk [vmem:[#allocation2 + $0x39] sm:$0xff] %vm420_vm2, %v407_v32 }
  0xb6   : > { %v397_v9 = vpop.permute.xlu0 %396  ;;  %v401_v10 = vpop.permute.xlu1 %400 }
  0xb7   : > { %421 = vst.msk [vmem:[#allocation2 + $0x1] sm:$0xff] %vm420_vm2, %v397_v9 }
  0xb8   : > { %423 = vst.msk [vmem:[#allocation2 + $0x19] sm:$0xff] %vm420_vm2, %v401_v10 }
  0xbe   : > { %v399_v13 = vpop.permute.xlu0 %398  ;;  %v5187_v14 = vld [vmem:[#allocation2] sm:$0xff]  ;;  %v403_v15 = vpop.permute.xlu1 %402 }
  0xbf   : > { %422 = vst.msk [vmem:[#allocation2 + $0x9] sm:$0xff] %vm420_vm2, %v399_v13  ;;  %v456_v16 = vmul.f32 %v455_v11, %v5187_v14  ;;  %v442_v17 = vmul.f32 %v441_v12, %v5187_v14  ;;  %v5216_v27 = vld [vmem:[#allocation2 + $0x1] sm:$0xff]  ;;  %v5247_v42 = vld [vmem:[#allocation2 + $0x18] sm:$0xff] }
  0xc0   : > { %424 = vst.msk [vmem:[#allocation2 + $0x21] sm:$0xff] %vm420_vm2, %v403_v15  ;;  %v492_v30 = vmul.f32 %v491_v28, %v5216_v27  ;;  %v478_v31 = vmul.f32 %v477_v19, %v5216_v27  ;;  %v565_v47 = vmul.f32 %v564_v43, %v5247_v42  ;;  %v551_v48 = vmul.f32 %v550_v44, %v5247_v42  ;;  %v5290_v58 = vld [vmem:[#allocation2 + $0x19] sm:$0xff] }
  0xc1   : > { %460 = vrot.lane.b32.xlu1 %v456_v16, %s7454_s18  ;;  %446 = vrot.lane.b32.xlu2 %v442_v17, %s7458_s21  ;;  %v601_v61 = vmul.f32 %v600_v59, %v5290_v58  ;;  %v587_v62 = vmul.f32 %v586_v51, %v5290_v58  ;;  %v1446_v63 = vld [vmem:[#allocation2] sm:$0xff]  ;;  %v1554_v3 = vld [vmem:[#allocation2 + $0x18] sm:$0xff] }
  0xc2   : > { %v5314_v8 = vmul.f32 %v7467_v1, %v1446_v63 }
  0xc6   : > { %v5201_v18 = vld [vmem:[#allocation2 + $0x9] sm:$0xff]  ;;  %v409_v2 = vpop.permute.xlu0 %408 }
  0xc7   : > { %v5204_v20 = vld [vmem:[#allocation2 + $0x8] sm:$0xff]  ;;  %v479_v21 = vmul.f32 %v477_v19, %v5201_v18  ;;  %v493_v39 = vmul.f32 %v491_v28, %v5201_v18  ;;  %v5269_v52 = vld [vmem:[#allocation2 + $0x20] sm:$0xff]  ;;  %427 = vst.msk [vmem:[#allocation2 + $0x49] sm:$0xff] %vm420_vm2, %v409_v2  ;;  %v5339_v19 = vld [vmem:[#allocation2 + $0x30] sm:$0xff] }
  0xc8   : > { %v457_v22 = vmul.f32 %v455_v11, %v5204_v20  ;;  %v443_v23 = vmul.f32 %v441_v12, %v5204_v20  ;;  %v5213_v25 = vld [vmem:[#allocation2 + $0x2] sm:$0xff]  ;;  %v5236_v33 = vld [vmem:[#allocation2 + $0xa] sm:$0xff]  ;;  %v566_v54 = vmul.f32 %v564_v43, %v5269_v52  ;;  %v552_v55 = vmul.f32 %v550_v44, %v5269_v52  ;;  %v5287_v56 = vld [vmem:[#allocation2 + $0x1a] sm:$0xff] }
  0xc9   : > { %484 = vrot.lane.b32.xlu1 %v479_v21, %s7458_s21  ;;  %v514_v29 = vmul.f32 %v513_v26, %v5213_v25  ;;  %v529_v35 = vmul.f32 %v527_v34, %v5236_v33  ;;  %v515_v36 = vmul.f32 %v513_v26, %v5236_v33  ;;  %v1519_v38 = vld [vmem:[#allocation2 + $0xa] sm:$0xff]  ;;  %v1518_v40 = vld [vmem:[#allocation2 + $0x2] sm:$0xff]  ;;  %v528_v49 = vmul.f32 %v527_v34, %v5213_v25  ;;  %v1663_v28 = vld [vmem:[#allocation2 + $0x38] sm:$0xff] }
  0xca   : > { %462 = vrot.lane.b32.xlu2 %v457_v22, %s7454_s18  ;;  %448 = vrot.lane.b32.xlu0 %v443_v23, %s7458_s21  ;;  %v5253_v45 = vmul.f32 %v1526_v37, %v1519_v38  ;;  %v5257_v46 = vmul.f32 %v7478_v41, %v1518_v40  ;;  %v5265_v50 = vld [vmem:[#allocation2 + $0x21] sm:$0xff]  ;;  %v623_v60 = vmul.f32 %v622_v57, %v5287_v56  ;;  %v636_v12 = vstv %s5293_s8  ;;  %v411_v23 = vpop.permute.xlu1 %410  ;;  %s5364_s8 = sld [smem:[#allocation4 + $0x19]] }
  0xcb   : > { %v588_v53 = vmul.f32 %v586_v51, %v5265_v50  ;;  %v1447_v0 = vld [vmem:[#allocation2 + $0x8] sm:$0xff]  ;;  %v1555_v6 = vld [vmem:[#allocation2 + $0x20] sm:$0xff]  ;;  %v5326_v11 = vmul.f32 %v7463_v5, %v1554_v3  ;;  %v602_v17 = vmul.f32 %v600_v59, %v5265_v50  ;;  %v673_v21 = vstv %s5301_s1  ;;  %428 = vst.msk [vmem:[#allocation2 + $0x51] sm:$0xff] %vm420_vm2, %v411_v23  ;;  %s5369_s1 = sld [smem:[#allocation4 + $0x17]] }
  0xcc   : > { %v5318_v9 = vmul.f32 %v7468_v4, %v1447_v0  ;;  %v5320_v10 = vld [vmem:[#allocation2 + $0x22] sm:$0xff]  ;;  %v5331_v13 = vmul.f32 %v7464_v7, %v1555_v6  ;;  %v659_v22 = vstv %s5304_s2  ;;  %v7474_v26 = vstv %s5309_s13  ;;  %s5376_s2 = sld [smem:[#allocation4 + $0x7f]] }
  0xcd   : > { %v638_v15 = vmul.f32 %v636_v12, %v5320_v10  ;;  %v624_v16 = vmul.f32 %v622_v57, %v5320_v10  ;;  %v5356_v34 = vmul.f32 %v7474_v26, %v1663_v28  ;;  %v695_v38 = vstv %s5343_s14  ;;  %s5379_s14 = sld [smem:[#allocation4 + $0x80]]  ;;  %v1734_v57 = vld [vmem:[#allocation2 + $0x32] sm:$0xff] }
  0xce   : > { %v745_v3 = vstv %s5389_s0  ;;  %s5433_s0 = sld [smem:[#allocation4 + $0x65]] }
  0xd1   : > { %518 = vrot.lane.b32.xlu1 %v514_v29, %s7458_s21  ;;  %v7471_v29 = vstv %s5322_s20  ;;  %v709_v51 = vstv %s5369_s1  ;;  %s5400_s1 = sld [smem:[#allocation4 + $0x1c]] }
  0xd2   : > { %496 = vrot.lane.b32.xlu2 %v492_v30, %s7454_s18  ;;  %482 = vrot.lane.b32.xlu0 %v478_v31, %s7458_s21  ;;  %v674_v30 = vmul.f32 %v673_v21, %v5339_v19  ;;  %v660_v31 = vmul.f32 %v659_v22, %v5339_v19  ;;  %v5352_v32 = vmul.f32 %v7471_v29, %v1662_v24  ;;  %v7462_v59 = vstv %s5376_s2  ;;  %v5517_v7 = vld [vmem:[#allocation2 + $0x52] sm:$0xff] }
  0xd3   : > { %v5414_v0 = vmul.f32 %v7462_v59, %v1663_v28 }
  0xd9   : > { %534 = vrot.lane.b32.xlu1 %v529_v35, %s7454_s18  ;;  %v637_v35 = vmul.f32 %v636_v12, %v5287_v56 }
  0xda   : > { %520 = vrot.lane.b32.xlu2 %v515_v36, %s7458_s21  ;;  %498 = vrot.lane.b32.xlu0 %v493_v39, %s7454_s18  ;;  %v5362_v36 = vld [vmem:[#allocation2 + $0x39] sm:$0xff] }
  0xdb   : > { %v5367_v39 = vld [vmem:[#allocation2 + $0x38] sm:$0xff]  ;;  %v697_v40 = vmul.f32 %v695_v38, %v5362_v36 }
  0xdc   : > { %v675_v43 = vmul.f32 %v673_v21, %v5367_v39  ;;  %v661_v44 = vmul.f32 %v659_v22, %v5367_v39  ;;  %v768_v21 = vstv %s5400_s1  ;;  %v1699_v22 = vld [vmem:[#allocation2 + $0x39] sm:$0xff]  ;;  %s5460_s1 = sld [smem:[#allocation4 + $0x22]] }
  0xe1   : > { %569 = vrot.lane.b32.xlu1 %v565_v47, %s7454_s18  ;;  %v5383_v47 = vld [vmem:[#allocation2 + $0x32] sm:$0xff] }
  0xe2   : > { %555 = vrot.lane.b32.xlu2 %v551_v48, %s7458_s21  ;;  %532 = vrot.lane.b32.xlu0 %v528_v49, %s7454_s18  ;;  %v731_v48 = vstv %s5364_s8  ;;  %v5386_v49 = vld [vmem:[#allocation2 + $0x31] sm:$0xff]  ;;  %s5396_s8 = sld [smem:[#allocation4 + $0x1d]] }
  0xe9   : > { %593 = vrot.lane.b32.xlu1 %v588_v53, %s7458_s21  ;;  %v732_v53 = vmul.f32 %v731_v48, %v5383_v47 }
  0xea   : > { %571 = vrot.lane.b32.xlu2 %v566_v54, %s7454_s18  ;;  %557 = vrot.lane.b32.xlu0 %v552_v55, %s7458_s21  ;;  %v710_v54 = vmul.f32 %v709_v51, %v5386_v49  ;;  %v696_v55 = vmul.f32 %v695_v38, %v5386_v49  ;;  %v5450_v38 = vld [vmem:[#allocation2 + $0x51] sm:$0xff] }
  0xf1   : > { %627 = vrot.lane.b32.xlu1 %v623_v60, %s7458_s21  ;;  %v7461_v60 = vstv %s5379_s14 }
  0xf2   : > { %605 = vrot.lane.b32.xlu2 %v601_v61, %s7454_s18  ;;  %591 = vrot.lane.b32.xlu0 %v587_v62, %s7458_s21  ;;  %v7456_v61 = vstv %s5381_s9  ;;  %v5404_v62 = vld [vmem:[#allocation2 + $0x3a] sm:$0xff]  ;;  %v5410_v63 = vmul.f32 %v7461_v60, %v1662_v24  ;;  %v7457_v24 = vstv %s5406_s3 }
  0xf3   : > { %v5418_v2 = vmul.f32 %v7456_v61, %v1734_v57  ;;  %v747_v6 = vmul.f32 %v745_v3, %v5404_v62  ;;  %v733_v12 = vmul.f32 %v731_v48, %v5404_v62  ;;  %v7469_v48 = vstv %s5433_s0 }
  0xf4   : > { %v471_v60 = vstv %s5485_s10  ;;  %s5534_s10 = sld [smem:[#allocation4 + $0x6]] }
  0xf5   : > { %v473_v26 = vmul.f32 %v471_v60, %v5201_v18 }
  0xf9   : > { %643 = vrot.lane.b32.xlu1 %v638_v15, %s7454_s18  ;;  %v711_v15 = vmul.f32 %v709_v51, %v5362_v36 }
  0xfa   : > { %629 = vrot.lane.b32.xlu2 %v624_v16, %s7458_s21  ;;  %607 = vrot.lane.b32.xlu0 %v602_v17, %s7454_s18  ;;  %v5429_v16 = vld [vmem:[#allocation2 + $0x48] sm:$0xff]  ;;  %v782_v17 = vstv %s5396_s8  ;;  %s5445_s8 = sld [smem:[#allocation4]] }
  0xfb   : > { %v783_v28 = vmul.f32 %v782_v17, %v5429_v16 }
 0x101   : > { %678 = vrot.lane.b32.xlu1 %v674_v30, %s7454_s18  ;;  %v769_v30 = vmul.f32 %v768_v21, %v5429_v16 }
 0x102   : > { %664 = vrot.lane.b32.xlu2 %v660_v31, %s7458_s21  ;;  %641 = vrot.lane.b32.xlu0 %v637_v35, %s7454_s18  ;;  %v5442_v31 = vmul.f32 %v7457_v24, %v1699_v22  ;;  %v746_v35 = vmul.f32 %v745_v3, %v5383_v47 }
 0x109   : > { %702 = vrot.lane.b32.xlu1 %v697_v40, %s7458_s21  ;;  %v5452_v40 = vld [vmem:[#allocation2 + $0x48] sm:$0xff] }
 0x10a   : > { %680 = vrot.lane.b32.xlu2 %v675_v43, %s7454_s18  ;;  %666 = vrot.lane.b32.xlu0 %v661_v44, %s7458_s21  ;;  %v7470_v43 = vstv %s5426_s4  ;;  %v5455_v44 = vld [vmem:[#allocation2 + $0x50] sm:$0xff]  ;;  %v5473_v57 = vmul.f32 %v7469_v48, %v5452_v40 }
 0x10b   : > { %v5478_v3 = vmul.f32 %v7470_v43, %v5455_v44 }
 0x111   : > { %736 = vrot.lane.b32.xlu1 %v732_v53, %s7458_s21  ;;  %v5462_v53 = vld [vmem:[#allocation2 + $0x50] sm:$0xff] }
 0x112   : > { %714 = vrot.lane.b32.xlu2 %v710_v54, %s7454_s18  ;;  %700 = vrot.lane.b32.xlu0 %v696_v55, %s7458_s21  ;;  %v804_v54 = vstv %s5435_s5  ;;  %s7507_s5 = smov 126  }
 0x113   : > { %v806_v55 = vmul.f32 %v804_v54, %v5450_v38 }
 0x119   : > { %752 = vrot.lane.b32.xlu1 %v747_v6, %s7454_s18  ;;  %v784_v6 = vmul.f32 %v782_v17, %v5462_v53  ;;  %v840_v17 = vstv %s5460_s1  ;;  %s5508_s1 = sld [smem:[#allocation4 + $0x89]] }
 0x11a   : > { %738 = vrot.lane.b32.xlu2 %v733_v12, %s7458_s21  ;;  %716 = vrot.lane.b32.xlu0 %v711_v15, %s7454_s18  ;;  %v770_v12 = vmul.f32 %v768_v21, %v5462_v53  ;;  %v435_v15 = vstv %s5445_s8  ;;  %v818_v21 = vstv %s5465_s6  ;;  %s5498_s8 = sld [smem:[#allocation4 + $0x23]] }
 0x11b   : > { %v447_v23 = vpop.permute.xlu2 %446  ;;  %s5511_s6 = sld [smem:[#allocation4 + $0x25]]  ;;  %v437_v1 = vmul.f32 %v435_v15, %v5204_v20 }
 0x121   : > { %787 = vrot.lane.b32.xlu1 %v783_v28, %s7454_s18  ;;  %v436_v28 = vmul.f32 %v435_v15, %v5187_v14  ;;  %v949_v43 = vstv %s5511_s6  ;;  %s5570_s6 = sld [smem:[#allocation4 + $0x2b]] }
 0x122   : > { %773 = vrot.lane.b32.xlu2 %v769_v30, %s7458_s21  ;;  %750 = vrot.lane.b32.xlu0 %v746_v35, %s7454_s18  ;;  %s5467_s18 = sld [smem:[#allocation7]]  ;;  %v5491_v30 = vld [vmem:[#allocation2 + $0x49] sm:$0xff] }
 0x123   : > { %v5493_v35 = vld [vmem:[#allocation2 + $0x4a] sm:$0xff] }
 0x124   : > { %v5458_v51 = vpop.permute.xlu2 %462 }
 0x128   : > { %v430_v61 = vstv %s5467_s18  ;;  %s5515_s18 = sld [smem:[#allocation4 + $0x8e]] }
 0x129   : > { %811 = vrot.lane.b32.xlu1 %v806_v55, %s7458_s21  ;;  %v841_v55 = vmul.f32 %v840_v17, %v5493_v35  ;;  %v438_v24 = vadd.f32 %v436_v28, %v430_v61 }
 0x12a   : > { %789 = vrot.lane.b32.xlu2 %v784_v6, %s7507_s5  ;;  %775 = vrot.lane.b32.xlu0 %v770_v12, %s7458_s21  ;;  %v819_v6 = vmul.f32 %v818_v21, %v5491_v30  ;;  %v805_v12 = vmul.f32 %v804_v54, %v5491_v30  ;;  %s5503_s21 = sld [smem:[#allocation4 + $0x88]] }
 0x12b   : > { %v452_v59 = vadd.f32 %v447_v23, %v438_v24 }
 0x12c   : > { %v5488_v22 = vpop.permute.xlu2 %496 }
 0x12e   : > { %v7475_v15 = vstv %s5515_s18 }
 0x130   : > { %v7476_v4 = vstv %s5503_s21 }
 0x131   : > { %845 = vrot.lane.b32.xlu1 %v841_v55, %s7508_s26  ;;  %v472_v55 = vmul.f32 %v471_v60, %v5216_v27 }
 0x132   : > { %823 = vrot.lane.b32.xlu2 %v819_v6, %s7507_s5  ;;  %809 = vrot.lane.b32.xlu0 %v805_v12, %s7508_s26  ;;  %v854_v6 = vstv %s5498_s8  ;;  %v842_v12 = vmul.f32 %v840_v17, %v5517_v7  ;;  %v439_v17 = vadd.f32 %v437_v1, %v430_v61  ;;  %s5544_s8 = sld [smem:[#allocation4 + $0x8c]] }
 0x133   : > { %v461_v5 = vpop.permute.xlu1 %460  ;;  %v856_v24 = vmul.f32 %v854_v6, %v5517_v7 }
 0x134   : > { %v5513_v28 = vpop.permute.xlu2 %520  ;;  %v466_v54 = vadd.f32 %v461_v5, %v452_v59  ;;  %v820_v5 = vmul.f32 %v818_v21, %v5450_v38  ;;  %v1842_v59 = vld [vmem:[#allocation2 + $0x4a] sm:$0xff] }
 0x135   : > { %v5548_v29 = vmul.f32 %v7475_v15, %v1842_v59  ;;  %v855_v59 = vmul.f32 %v854_v6, %v5493_v35 }
 0x136   : > { %v474_v23 = vadd.f32 %v472_v55, %v466_v54  ;;  %v7473_v54 = vstv %s5508_s1 }
 0x137   : > { %v5540_v21 = vmul.f32 %v7473_v54, %v5452_v40  ;;  %v950_v40 = vmul.f32 %v949_v43, %v5187_v14 }
 0x138   : > { %v7477_v60 = vstv %s5544_s8 }
 0x139   : > { %861 = vrot.lane.b32.xlu1 %v856_v24, %s7507_s5 }
 0x13a   : > { %847 = vrot.lane.b32.xlu2 %v842_v12, %s7508_s26  ;;  %825 = vrot.lane.b32.xlu0 %v820_v5, %s7507_s5  ;;  %v963_v12 = vstv %s5519_s30  ;;  %v5553_v5 = vmul.f32 %v7476_v4, %v5455_v44  ;;  %s5567_s30 = sld [smem:[#allocation4 + $0x29]]  ;;  %v951_v4 = vmul.f32 %v949_v43, %v5204_v20 }
 0x13b   : > { %v485_v55 = vpop.permute.xlu1 %484  ;;  %v964_v54 = vmul.f32 %v963_v12, %v5187_v14 }
 0x13c   : > { %v5532_v48 = vpop.permute.xlu2 %555  ;;  %v449_v24 = vpop.permute.xlu0 %448 }
 0x13d   : > { %v453_v1 = vadd.f32 %v449_v24, %v439_v17  ;;  %v1807_v17 = vld [vmem:[#allocation2 + $0x51] sm:$0xff] }
 0x13e   : > { %v5575_v6 = vmul.f32 %v7477_v60, %v1807_v17  ;;  %v1021_v60 = vstv %s5570_s6  ;;  %s5611_s6 = sld [smem:[#allocation4 + $0x2f]] }
 0x13f   : > { %v467_v61 = vadd.f32 %v5458_v51, %v453_v1  ;;  %v507_v1 = vstv %s5534_s10  ;;  %s5583_s10 = sld [smem:[#allocation4 + $0x9]] }
 0x141   : > { %954 = vrot.lane.b32.xlu1 %v950_v40, %s7508_s26  ;;  %v475_v44 = vadd.f32 %v473_v26, %v467_v61  ;;  %v965_v61 = vmul.f32 %v963_v12, %v5204_v20  ;;  %v509_v20 = vmul.f32 %v507_v1, %v5236_v33 }
 0x142   : > { %968 = vrot.lane.b32.xlu2 %v964_v54, %s7507_s5  ;;  %859 = vrot.lane.b32.xlu0 %v855_v59, %s7507_s5  ;;  %v985_v54 = vstv %s5555_s12  ;;  %v508_v59 = vmul.f32 %v507_v1, %v5213_v25  ;;  %s5592_s12 = sld [smem:[#allocation4 + $0x2c]] }
 0x143   : > { %v519_v51 = vpop.permute.xlu1 %518  ;;  %v987_v40 = vmul.f32 %v985_v54, %v5201_v18 }
 0x144   : > { %v5565_v24 = vpop.permute.xlu2 %571  ;;  %v483_v14 = vpop.permute.xlu0 %482 }
 0x145   : > { %v488_v15 = vadd.f32 %v483_v14, %v474_v23  ;;  %v999_v14 = vstv %s5567_s30  ;;  %s5608_s30 = sld [smem:[#allocation4 + $0x2e]] }
 0x147   : > { %v502_v26 = vadd.f32 %v5488_v22, %v488_v15  ;;  %v489_v15 = vadd.f32 %v485_v55, %v475_v44 }
 0x149   : > { %970 = vrot.lane.b32.xlu1 %v965_v61, %s7507_s5  ;;  %v510_v23 = vadd.f32 %v508_v59, %v502_v26  ;;  %v1000_v61 = vmul.f32 %v999_v14, %v5216_v27  ;;  %v1022_v26 = vmul.f32 %v1021_v60, %v5213_v25 }
 0x14a   : > { %992 = vrot.lane.b32.xlu2 %v987_v40, %s7508_s26  ;;  %956 = vrot.lane.b32.xlu0 %v951_v4, %s7508_s26  ;;  %v986_v4 = vmul.f32 %v985_v54, %v5216_v27  ;;  %v544_v40 = vstv %s5583_s10  ;;  %v1035_v54 = vstv %s5592_s12  ;;  %s5627_s10 = sld [smem:[#allocation4 + $0xf]] }
 0x14b   : > { %v535_v17 = vpop.permute.xlu1 %534  ;;  %v524_v59 = vadd.f32 %v519_v51, %v510_v23  ;;  %v1037_v51 = vmul.f32 %v1035_v54, %v5236_v33  ;;  %v1001_v23 = vmul.f32 %v999_v14, %v5201_v18  ;;  %s5641_s12 = sld [smem:[#allocation4 + $0x32]] }
 0x14c   : > { %v5588_v22 = vpop.permute.xlu2 %605  ;;  %v499_v12 = vpop.permute.xlu0 %498 }
 0x14d   : > { %v503_v43 = vadd.f32 %v499_v12, %v489_v15  ;;  %v546_v12 = vmul.f32 %v544_v40, %v5269_v52 }
 0x14f   : > { %v511_v41 = vadd.f32 %v509_v20, %v503_v43 }
 0x151   : > { %v525_v55 = vadd.f32 %v5513_v28, %v511_v41  ;;  %1004 = vrot.lane.b32.xlu1 %v1000_v61, %s7507_s5  ;;  %v545_v41 = vmul.f32 %v544_v40, %v5247_v42  ;;  %v1023_v61 = vmul.f32 %v1021_v60, %v5236_v33  ;;  %v1071_v33 = vstv %s5611_s6  ;;  %s5652_s6 = sld [smem:[#allocation4 + $0x12]] }
 0x152   : > { %1026 = vrot.lane.b32.xlu2 %v1022_v26, %s7508_s26  ;;  %990 = vrot.lane.b32.xlu0 %v986_v4, %s7508_s26 }
 0x153   : > { %v570_v44 = vpop.permute.xlu1 %569  ;;  %v539_v15 = vadd.f32 %v535_v17, %v525_v55  ;;  %v580_v17 = vstv %s5599_s24  ;;  %s5629_s24 = sld [smem:[#allocation4 + $0x31]] }
 0x154   : > { %v5605_v1 = vpop.permute.xlu2 %629  ;;  %v533_v27 = vpop.permute.xlu0 %532 }
 0x155   : > { %v538_v28 = vadd.f32 %v533_v27, %v524_v59  ;;  %v548_v20 = vadd.f32 %v546_v12, %v539_v15  ;;  %v581_v59 = vmul.f32 %v580_v17, %v5290_v58  ;;  %v1057_v15 = vstv %s5608_s30  ;;  %s5644_s30 = sld [smem:[#allocation4 + $0x34]] }
 0x156   : > { %v1058_v12 = vmul.f32 %v1057_v15, %v5247_v42  ;;  %v1072_v27 = vmul.f32 %v1071_v33, %v5247_v42 }
 0x157   : > { %v547_v43 = vadd.f32 %v545_v41, %v538_v28  ;;  %v1036_v41 = vmul.f32 %v1035_v54, %v5213_v25  ;;  %v1073_v54 = vmul.f32 %v1071_v33, %v5269_v52 }
 0x159   : > { %v561_v26 = vadd.f32 %v5532_v48, %v547_v43  ;;  %1028 = vrot.lane.b32.xlu1 %v1023_v61, %s7508_s26  ;;  %v616_v61 = vstv %s5627_s10  ;;  %s5662_s10 = sld [smem:[#allocation4 + $0x35]] }
 0x15a   : > { %1042 = vrot.lane.b32.xlu2 %v1037_v51, %s7507_s5  ;;  %1006 = vrot.lane.b32.xlu0 %v1001_v23, %s7507_s5  ;;  %v1093_v51 = vstv %s5629_s24  ;;  %s5668_s24 = sld [smem:[#allocation4 + $0x15]] }
 0x15b   : > { %v594_v4 = vpop.permute.xlu1 %593  ;;  %v575_v55 = vadd.f32 %v570_v44, %v561_v26  ;;  %v582_v44 = vmul.f32 %v580_v17, %v5265_v50  ;;  %v1095_v23 = vmul.f32 %v1093_v51, %v5265_v50  ;;  %v617_v17 = vmul.f32 %v616_v61, %v5287_v56 }
 0x15c   : > { %v5622_v40 = vpop.permute.xlu2 %664  ;;  %v558_v60 = vpop.permute.xlu0 %557  ;;  %v1059_v26 = vmul.f32 %v1057_v15, %v5269_v52 }
 0x15d   : > { %v562_v18 = vadd.f32 %v558_v60, %v548_v20  ;;  %v583_v48 = vadd.f32 %v581_v59, %v575_v55 }
 0x15f   : > { %v576_v14 = vadd.f32 %v5565_v24, %v562_v18  ;;  %v1107_v18 = vstv %s5641_s12  ;;  %s5677_s12 = sld [smem:[#allocation4 + $0x37]] }
 0x161   : > { %1062 = vrot.lane.b32.xlu1 %v1058_v12, %s7508_s26  ;;  %v584_v28 = vadd.f32 %v582_v44, %v576_v14  ;;  %v618_v14 = vmul.f32 %v616_v61, %v5320_v10  ;;  %v1108_v12 = vmul.f32 %v1107_v18, %v5290_v58  ;;  %v1094_v44 = vmul.f32 %v1093_v51, %v5290_v58 }
 0x162   : > { %1076 = vrot.lane.b32.xlu2 %v1072_v27, %s7507_s5  ;;  %1040 = vrot.lane.b32.xlu0 %v1036_v41, %s7507_s5  ;;  %v653_v41 = vstv %s5652_s6  ;;  %s5696_s6 = sld [smem:[#allocation4 + $0x18]] }
 0x163   : > { %v628_v20 = vpop.permute.xlu1 %627  ;;  %v598_v60 = vadd.f32 %v594_v4, %v584_v28  ;;  %v655_v58 = vmul.f32 %v653_v41, %v5367_v39 }
 0x164   : > { %v5639_v43 = vpop.permute.xlu2 %680  ;;  %v592_v24 = vpop.permute.xlu0 %591 }
 0x165   : > { %v597_v42 = vadd.f32 %v592_v24, %v583_v48  ;;  %v1129_v48 = vstv %s5644_s30  ;;  %s5679_s30 = sld [smem:[#allocation4 + $0x38]] }
 0x166   : > { %v1130_v27 = vmul.f32 %v1129_v48, %v5287_v56 }
 0x167   : > { %v611_v25 = vadd.f32 %v5588_v22, %v597_v42 }
 0x169   : > { %1078 = vrot.lane.b32.xlu1 %v1073_v54, %s7507_s5  ;;  %v619_v55 = vadd.f32 %v617_v17, %v611_v25 }
 0x16a   : > { %1100 = vrot.lane.b32.xlu2 %v1095_v23, %s7508_s26  ;;  %1064 = vrot.lane.b32.xlu0 %v1059_v26, %s7508_s26  ;;  %v1143_v23 = vstv %s5662_s10  ;;  %v1131_v26 = vmul.f32 %v1129_v48, %v5320_v10  ;;  %s5698_s10 = sld [smem:[#allocation4 + $0x3a]] }
 0x16b   : > { %v644_v59 = vpop.permute.xlu1 %643  ;;  %v633_v61 = vadd.f32 %v628_v20, %v619_v55  ;;  %v1145_v20 = vmul.f32 %v1143_v23, %v5320_v10  ;;  %v1109_v55 = vmul.f32 %v1107_v18, %v5265_v50  ;;  %v1179_v10 = vstv %s5679_s30  ;;  %s5721_s30 = sld [smem:[#allocation4 + $0x1b]] }
 0x16c   : > { %v5657_v22 = vpop.permute.xlu2 %714  ;;  %v608_v33 = vpop.permute.xlu0 %607 }
 0x16d   : > { %v612_v52 = vadd.f32 %v608_v33, %v598_v60 }
 0x16f   : > { %v620_v15 = vadd.f32 %v618_v14, %v612_v52 }
 0x171   : > { %v634_v4 = vadd.f32 %v5605_v1, %v620_v15  ;;  %1112 = vrot.lane.b32.xlu1 %v1108_v12, %s7507_s5  ;;  %v654_v1 = vmul.f32 %v653_v41, %v5339_v19  ;;  %v1165_v12 = vstv %s5677_s12  ;;  %s5713_s12 = sld [smem:[#allocation4 + $0x3d]] }
 0x172   : > { %1134 = vrot.lane.b32.xlu2 %v1130_v27, %s7508_s26  ;;  %1098 = vrot.lane.b32.xlu0 %v1094_v44, %s7508_s26  ;;  %v1166_v27 = vmul.f32 %v1165_v12, %v5339_v19  ;;  %v1180_v44 = vmul.f32 %v1179_v10, %v5339_v19 }
 0x173   : > { %v679_v28 = vpop.permute.xlu1 %678  ;;  %v648_v42 = vadd.f32 %v644_v59, %v634_v4  ;;  %v689_v59 = vstv %s5668_s24  ;;  %v1144_v4 = vmul.f32 %v1143_v23, %v5287_v56  ;;  %s5710_s24 = sld [smem:[#allocation4 + $0x3b]]  ;;  %v1167_v23 = vmul.f32 %v1165_v12, %v5367_v39 }
 0x174   : > { %v5674_v24 = vpop.permute.xlu2 %738  ;;  %v642_v51 = vpop.permute.xlu0 %641  ;;  %v690_v15 = vmul.f32 %v689_v59, %v5386_v49  ;;  %v691_v41 = vmul.f32 %v689_v59, %v5362_v36 }
 0x175   : > { %v647_v25 = vadd.f32 %v642_v51, %v633_v61  ;;  %v657_v54 = vadd.f32 %v655_v58, %v648_v42  ;;  %v725_v58 = vstv %s5696_s6  ;;  %v1201_v51 = vstv %s5698_s10  ;;  %s5731_s6 = sld [smem:[#allocation4 + $0x3e]] }
 0x176   : > { %s5737_s10 = sld [smem:[#allocation4 + $0x1e]] }
 0x177   : > { %v656_v17 = vadd.f32 %v654_v1, %v647_v25  ;;  %v1181_v1 = vmul.f32 %v1179_v10, %v5367_v39  ;;  %v1203_v25 = vmul.f32 %v1201_v51, %v5362_v36  ;;  %v1202_v10 = vmul.f32 %v1201_v51, %v5386_v49 }
 0x179   : > { %v670_v60 = vadd.f32 %v5622_v40, %v656_v17  ;;  %1136 = vrot.lane.b32.xlu1 %v1131_v26, %s7508_s26  ;;  %v1215_v59 = vstv %s5710_s24  ;;  %s5746_s24 = sld [smem:[#allocation4 + $0x40]] }
 0x17a   : > { %1150 = vrot.lane.b32.xlu2 %v1145_v20, %s7507_s5  ;;  %1114 = vrot.lane.b32.xlu0 %v1109_v55, %s7507_s5  ;;  %v1217_v51 = vmul.f32 %v1215_v59, %v5362_v36 }
 0x17b   : > { %v703_v33 = vpop.permute.xlu1 %702  ;;  %v684_v52 = vadd.f32 %v679_v28, %v670_v60  ;;  %v1237_v60 = vstv %s5713_s12  ;;  %s5748_s12 = sld [smem:[#allocation4 + $0x41]] }
 0x17c   : > { %v5691_v14 = vpop.permute.xlu2 %773  ;;  %v667_v48 = vpop.permute.xlu0 %666  ;;  %v1238_v12 = vmul.f32 %v1237_v60, %v5383_v47 }
 0x17d   : > { %v671_v50 = vadd.f32 %v667_v48, %v657_v54  ;;  %v692_v40 = vadd.f32 %v690_v15, %v684_v52  ;;  %v726_v54 = vmul.f32 %v725_v58, %v5383_v47  ;;  %v727_v52 = vmul.f32 %v725_v58, %v5404_v62 }
 0x17e   : > { %v1216_v48 = vmul.f32 %v1215_v59, %v5386_v49 }
 0x17f   : > { %v685_v18 = vadd.f32 %v5639_v43, %v671_v50  ;;  %v762_v50 = vstv %s5721_s30  ;;  %s5763_s30 = sld [smem:[#allocation4 + $0x21]] }
 0x180   : > { %v764_v49 = vmul.f32 %v762_v50, %v5462_v53 }
 0x181   : > { %1170 = vrot.lane.b32.xlu1 %v1166_v27, %s7508_s26  ;;  %v693_v28 = vadd.f32 %v691_v41, %v685_v18 }
 0x182   : > { %1184 = vrot.lane.b32.xlu2 %v1180_v44, %s7507_s5  ;;  %1148 = vrot.lane.b32.xlu0 %v1144_v4, %s7507_s5 }
 0x183   : > { %v737_v61 = vpop.permute.xlu1 %736  ;;  %v707_v20 = vadd.f32 %v703_v33, %v693_v28 }
 0x184   : > { %v5708_v42 = vpop.permute.xlu2 %789  ;;  %v701_v43 = vpop.permute.xlu0 %700 }
 0x185   : > { %v706_v19 = vadd.f32 %v701_v43, %v692_v40  ;;  %v1251_v43 = vstv %s5731_s6  ;;  %s5765_s6 = sld [smem:[#allocation4 + $0x43]] }
 0x187   : > { %v720_v56 = vadd.f32 %v5657_v22, %v706_v19  ;;  %v1239_v19 = vmul.f32 %v1237_v60, %v5404_v62 }
 0x189   : > { %1186 = vrot.lane.b32.xlu1 %v1181_v1, %s7507_s5  ;;  %v728_v17 = vadd.f32 %v726_v54, %v720_v56  ;;  %v798_v56 = vstv %s5737_s10  ;;  %s5775_s10 = sld [smem:[#allocation4 + $0x24]] }
 0x18a   : > { %1208 = vrot.lane.b32.xlu2 %v1203_v25, %s7508_s26  ;;  %1172 = vrot.lane.b32.xlu0 %v1167_v23, %s7508_s26  ;;  %v799_v23 = vmul.f32 %v798_v56, %v5491_v30 }
 0x18b   : > { %v753_v26 = vpop.permute.xlu1 %752  ;;  %v742_v27 = vadd.f32 %v737_v61, %v728_v17  ;;  %v1253_v61 = vmul.f32 %v1251_v43, %v5404_v62 }
 0x18c   : > { %v5726_v22 = vpop.permute.xlu2 %823  ;;  %v717_v55 = vpop.permute.xlu0 %716 }
 0x18d   : > { %v721_v39 = vadd.f32 %v717_v55, %v707_v20  ;;  %v1273_v20 = vstv %s5746_s24  ;;  %v1287_v55 = vstv %s5748_s12  ;;  %s5779_s24 = sld [smem:[#allocation4 + $0x44]] }
 0x18e   : > { %v1274_v59 = vmul.f32 %v1273_v20, %v5429_v16  ;;  %v1288_v60 = vmul.f32 %v1287_v55, %v5429_v16  ;;  %s5782_s12 = sld [smem:[#allocation4 + $0x46]] }
 0x18f   : > { %v729_v15 = vadd.f32 %v727_v52, %v721_v39  ;;  %v800_v52 = vmul.f32 %v798_v56, %v5450_v38  ;;  %v1252_v39 = vmul.f32 %v1251_v43, %v5383_v47 }
 0x191   : > { %v743_v33 = vadd.f32 %v5674_v24, %v729_v15  ;;  %1220 = vrot.lane.b32.xlu1 %v1216_v48, %s7507_s5  ;;  %v763_v24 = vmul.f32 %v762_v50, %v5429_v16 }
 0x192   : > { %1242 = vrot.lane.b32.xlu2 %v1238_v12, %s7508_s26  ;;  %1206 = vrot.lane.b32.xlu0 %v1202_v10, %s7508_s26  ;;  %v834_v12 = vstv %s5763_s30  ;;  %v1309_v10 = vstv %s5765_s6  ;;  %s5802_s30 = sld [smem:[#allocation4 + $0x27]] }
 0x193   : > { %v788_v40 = vpop.permute.xlu1 %787  ;;  %v757_v44 = vadd.f32 %v753_v26, %v743_v33  ;;  %v1289_v33 = vmul.f32 %v1287_v55, %v5462_v53  ;;  %s5807_s6 = sld [smem:[#allocation4 + $0x47]] }
 0x194   : > { %v5743_v18 = vpop.permute.xlu2 %847  ;;  %v751_v41 = vpop.permute.xlu0 %750  ;;  %v1345_v43 = vstv %s5782_s12  ;;  %s5836_s12 = sld [smem:[#allocation4 + $0x33]] }
 0x195   : > { %v756_v4 = vadd.f32 %v751_v41, %v742_v27  ;;  %v766_v28 = vadd.f32 %v764_v49, %v757_v44  ;;  %v835_v27 = vmul.f32 %v834_v12, %v5493_v35  ;;  %v1275_v44 = vmul.f32 %v1273_v20, %v5462_v53 }
 0x196   : > { %v836_v53 = vmul.f32 %v834_v12, %v5517_v7 }
 0x197   : > { %v765_v58 = vadd.f32 %v763_v24, %v756_v4  ;;  %v943_v24 = vstv %s5775_s10  ;;  %s4342_s10 = sld [smem:[#allocation4 + $0x2d]] }
 0x198   : > { %v979_v55 = vstv %s5802_s30  ;;  %s4351_s30 = sld [smem:[#allocation4 + $0x36]] }
 0x199   : > { %v779_v1 = vadd.f32 %v5691_v14, %v765_v58  ;;  %1244 = vrot.lane.b32.xlu1 %v1239_v19, %s7508_s26  ;;  %v4720_v19 = vld [vmem:[#allocation2] sm:$0xff] }
 0x19a   : > { %1258 = vrot.lane.b32.xlu2 %v1253_v61, %s7507_s5  ;;  %1222 = vrot.lane.b32.xlu0 %v1217_v51, %s7507_s5  ;;  %v944_v61 = vmul.f32 %v4720_v19, %v943_v24 }
 0x19b   : > { %v812_v25 = vpop.permute.xlu1 %811  ;;  %v793_v54 = vadd.f32 %v788_v40, %v779_v1  ;;  %v1311_v40 = vmul.f32 %v1309_v10, %v5450_v38  ;;  %v1346_v1 = vmul.f32 %v1345_v43, %v5493_v35 }
 0x19c   : > { %v969_v17 = vpop.permute.xlu2 %968  ;;  %v776_v26 = vpop.permute.xlu0 %775 }
 0x19d   : > { %v780_v36 = vadd.f32 %v776_v26, %v766_v28  ;;  %v801_v62 = vadd.f32 %v799_v23, %v793_v54  ;;  %v1323_v28 = vstv %s5779_s24  ;;  %v1310_v23 = vmul.f32 %v1309_v10, %v5491_v30  ;;  %s5829_s24 = sld [smem:[#allocation4 + $0x30]] }
 0x19e   : > { %v1324_v56 = vmul.f32 %v1323_v28, %v5491_v30 }
 0x19f   : > { %v794_v14 = vadd.f32 %v5708_v42, %v780_v36 }
 0x1a1   : > { %1278 = vrot.lane.b32.xlu1 %v1274_v59, %s7508_s26  ;;  %v802_v15 = vadd.f32 %v800_v52, %v794_v14  ;;  %v1359_v59 = vstv %s5807_s6  ;;  %s5848_s6 = sld [smem:[#allocation4 + $0x4a]] }
 0x1a2   : > { %1292 = vrot.lane.b32.xlu2 %v1288_v60, %s7507_s5  ;;  %1256 = vrot.lane.b32.xlu0 %v1252_v39, %s7507_s5  ;;  %v4721_v60 = vld [vmem:[#allocation2 + $0x1] sm:$0xff]  ;;  %v1347_v39 = vmul.f32 %v1345_v43, %v5517_v7 }
 0x1a3   : > { %v5777_v48 = vpop.permute.xlu1 %845  ;;  %v816_v41 = vadd.f32 %v812_v25, %v802_v15  ;;  %v938_v25 = vstv %s5790_s27  ;;  %v980_v52 = vmul.f32 %v4721_v60, %v979_v55  ;;  %v1361_v15 = vmul.f32 %v1359_v59, %v5517_v7  ;;  %s4339_s27 = sld [smem:[#allocation4 + $0x2a]] }
 0x1a4   : > { %v810_v42 = vpop.permute.xlu0 %809  ;;  %v5784_v47 = vpop.permute.xlu2 %992  ;;  %v946_v26 = vadd.f32 %v944_v61, %v938_v25  ;;  %v4724_v61 = vld [vmem:[#allocation2 + $0x2] sm:$0xff] }
 0x1a5   : > { %v815_v16 = vadd.f32 %v810_v42, %v801_v62  ;;  %v4722_v42 = vld [vmem:[#allocation2 + $0x8] sm:$0xff] }
 0x1a6   : > { %v945_v12 = vmul.f32 %v4722_v42, %v943_v24  ;;  %v1360_v24 = vmul.f32 %v1359_v59, %v5493_v35  ;;  %v1051_v59 = vstv %s4342_s10  ;;  %v4726_v42 = vld [vmem:[#allocation2 + $0x20] sm:$0xff]  ;;  %s5853_s10 = sld [smem:[#allocation4 + $0x4c]] }
 0x1a7   : > { %v829_v50 = vadd.f32 %v5726_v22, %v815_v16  ;;  %v1325_v16 = vmul.f32 %v1323_v28, %v5450_v38 }
 0x1a9   : > { %1294 = vrot.lane.b32.xlu1 %v1289_v33, %s7507_s5  ;;  %v5796_v49 = vadd.f32 %v835_v27, %v829_v50  ;;  %v947_v33 = vadd.f32 %v945_v12, %v938_v25  ;;  %v1053_v12 = vmul.f32 %v4726_v42, %v1051_v59 }
 0x1aa   : > { %1316 = vrot.lane.b32.xlu2 %v1311_v40, %s7508_s26  ;;  %1280 = vrot.lane.b32.xlu0 %v1275_v44, %s7508_s26 }
 0x1ab   : > { %v5799_v22 = vpop.permute.xlu1 %861 }
 0x1ac   : > { %v826_v4 = vpop.permute.xlu0 %825  ;;  %v1027_v54 = vpop.permute.xlu2 %1026 }
 0x1ad   : > { %v830_v58 = vadd.f32 %v826_v4, %v816_v41  ;;  %v4723_v41 = vld [vmem:[#allocation2 + $0x9] sm:$0xff] }
 0x1ae   : > { %v981_v7 = vmul.f32 %v4723_v41, %v979_v55 }
 0x1af   : > { %v5809_v51 = vadd.f32 %v836_v53, %v830_v58  ;;  %v1015_v53 = vstv %s4339_s27  ;;  %s5850_s27 = sld [smem:[#allocation4 + $0x39]] }
 0x1b1   : > { %1328 = vrot.lane.b32.xlu1 %v1324_v56, %s7507_s5  ;;  %v1016_v56 = vmul.f32 %v4724_v61, %v1015_v53  ;;  %v4729_v61 = vld [vmem:[#allocation2 + $0x21] sm:$0xff] }
 0x1b2   : > { %1350 = vrot.lane.b32.xlu2 %v1346_v1, %s7508_s26  ;;  %1314 = vrot.lane.b32.xlu0 %v1310_v23, %s7508_s26 }
 0x1b3   : > { %v955_v20 = vpop.permute.xlu1 %954 }
 0x1b4   : > { %v960_v36 = vadd.f32 %v955_v20, %v946_v26  ;;  %v860_v62 = vpop.permute.xlu0 %859  ;;  %v1043_v50 = vpop.permute.xlu2 %1042  ;;  %v4725_v20 = vld [vmem:[#allocation2 + $0xa] sm:$0xff] }
 0x1b5   : > { %v1017_v55 = vmul.f32 %v4725_v20, %v1015_v53  ;;  %v852_v53 = vadd.f32 %v5743_v18, %v5809_v51  ;;  %v1123_v20 = vstv %s5836_s12  ;;  %s4360_s12 = sld [smem:[#allocation4 + $0x3f]] }
 0x1b6   : > { %v974_v14 = vadd.f32 %v969_v17, %v960_v36 }
 0x1b8   : > { %v982_v10 = vadd.f32 %v980_v52, %v974_v14 }
 0x1b9   : > { %1352 = vrot.lane.b32.xlu1 %v1347_v39, %s7508_s26 }
 0x1ba   : > { %1366 = vrot.lane.b32.xlu2 %v1361_v15, %s7507_s5  ;;  %1330 = vrot.lane.b32.xlu0 %v1325_v16, %s7507_s5  ;;  %v851_v16 = vadd.f32 %v5777_v48, %v5796_v49 }
 0x1bb   : > { %v971_v17 = vpop.permute.xlu1 %970 }
 0x1bc   : > { %v957_v40 = vpop.permute.xlu0 %956  ;;  %v1077_v28 = vpop.permute.xlu2 %1076 }
 0x1bd   : > { %v961_v27 = vadd.f32 %v957_v40, %v947_v33 }
 0x1bf   : > { %v975_v44 = vadd.f32 %v971_v17, %v961_v27  ;;  %v865_v27 = vadd.f32 %v860_v62, %v851_v16  ;;  %v4731_v16 = vld [vmem:[#allocation2 + $0x22] sm:$0xff] }
 0x1c1   : > { %v983_v4 = vadd.f32 %v981_v7, %v975_v44  ;;  %v1087_v7 = vstv %s5829_s24  ;;  %vm867_vm3 = vcmp.ge.f32.partialorder %v865_v27, 0.0  ;;  %s4357_s24 = sld [smem:[#allocation4 + $0x3c]] }
 0x1c2   : > { %1364 = vrot.lane.b32.xlu0 %v1360_v24, %s7507_s5 }
 0x1c3   : > { %v1005_v38 = vpop.permute.xlu1 %1004  ;;  %v997_v23 = vadd.f32 %v5784_v47, %v983_v4  ;;  %v869_v4 = vmul.f32 0.2, %v865_v27 }
 0x1c4   : > { %v991_v43 = vpop.permute.xlu0 %990  ;;  %v1101_v36 = vpop.permute.xlu2 %1100 }
 0x1c5   : > { %v996_v58 = vadd.f32 %v991_v43, %v982_v10  ;;  %v4727_v10 = vld [vmem:[#allocation2 + $0x18] sm:$0xff]  ;;  %v5838_v62 = vsel %vm867_vm3, %v865_v27, %v869_v4 }
 0x1c6   : > { %v1052_v17 = vmul.f32 %v4727_v10, %v1051_v59 }
 0x1c7   : > { %v1010_v19 = vadd.f32 %v1005_v38, %v996_v58 }
 0x1c9   : > { %v1018_v1 = vadd.f32 %v1016_v56, %v1010_v19  ;;  %v1089_v56 = vmul.f32 %v4729_v61, %v1087_v7 }
 0x1cb   : > { %v1029_v25 = vpop.permute.xlu1 %1028  ;;  %v1032_v39 = vadd.f32 %v1027_v54, %v1018_v1  ;;  %v866_v1 = vadd.f32 %v5799_v22, %v852_v53 }
 0x1cc   : > { %v1007_v26 = vpop.permute.xlu0 %1006  ;;  %v1135_v41 = vpop.permute.xlu2 %1134 }
 0x1cd   : > { %v1011_v35 = vadd.f32 %v1007_v26, %v997_v23  ;;  %v870_v26 = vmul.f32 0.2, %v866_v1  ;;  %vm868_vm5 = vcmp.ge.f32.partialorder %v866_v1, 0.0 }
 0x1cf   : > { %v1019_v14 = vadd.f32 %v1017_v55, %v1011_v35 }
 0x1d1   : > { %v1033_v60 = vadd.f32 %v1029_v25, %v1019_v14  ;;  %v4730_v14 = vld [vmem:[#allocation2 + $0x1a] sm:$0xff] }
 0x1d2   : > { %v1124_v59 = vmul.f32 %v4730_v14, %v1123_v20 }
 0x1d3   : > { %v1063_v52 = vpop.permute.xlu1 %1062  ;;  %v1047_v15 = vadd.f32 %v1043_v50, %v1033_v60  ;;  %v4728_v50 = vld [vmem:[#allocation2 + $0x19] sm:$0xff]  ;;  %v5844_v60 = vsel %vm868_vm5, %v866_v1, %v870_v26 }
 0x1d4   : > { %v1041_v47 = vpop.permute.xlu0 %1040  ;;  %v1088_v43 = vmul.f32 %v4728_v50, %v1087_v7  ;;  %v1151_v23 = vpop.permute.xlu2 %1150 }
 0x1d5   : > { %v1046_v33 = vadd.f32 %v1041_v47, %v1032_v39  ;;  %v1055_v40 = vadd.f32 %v1053_v12, %v1047_v15  ;;  %v877_v39 = vsel %vm873_vm4, %v5844_v60, 0.0  ;;  %v1125_v47 = vmul.f32 %v4731_v16, %v1123_v20 }
 0x1d7   : > { %v1054_v44 = vadd.f32 %v1052_v17, %v1046_v33  ;;  %v1159_v33 = vstv %s4351_s30  ;;  %s5875_s30 = sld [smem:[#allocation4 + $0x53]] }
 0x1d9   : > { %v1068_v24 = vadd.f32 %v1063_v52, %v1054_v44 }
 0x1db   : > { %v1079_v38 = vpop.permute.xlu1 %1078  ;;  %v1082_v54 = vadd.f32 %v1077_v28, %v1068_v24  ;;  %v874_v28 = vsel %vm873_vm4, %v5838_v62, 0.0 }
 0x1dc   : > { %v1065_v48 = vpop.permute.xlu0 %1064  ;;  %v1185_v42 = vpop.permute.xlu2 %1184 }
 0x1dd   : > { %v1069_v49 = vadd.f32 %v1065_v48, %v1055_v40  ;;  %v1090_v58 = vadd.f32 %v1088_v43, %v1082_v54  ;;  %v1468_v43 = vstv %s5848_s6  ;;  %s4382_s6 = sld [smem:[#allocation4 + $0x52]] }
 0x1df   : > { %v1083_v19 = vadd.f32 %v1079_v38, %v1069_v49  ;;  %v4733_v38 = vld [vmem:[#allocation2 + $0x30] sm:$0xff] }
 0x1e0   : > { %v1160_v54 = vmul.f32 %v4733_v38, %v1159_v33 }
 0x1e1   : > { %v1091_v25 = vadd.f32 %v1089_v56, %v1083_v19 }
 0x1e3   : > { %875 = vadd.xlane.f32.xlu2 %v874_v28  ;;  %v1113_v18 = vpop.permute.xlu1 %1112  ;;  %v1105_v15 = vadd.f32 %v1101_v36, %v1091_v25  ;;  %v4732_v36 = vld [vmem:[#allocation2 + $0x38] sm:$0xff] }
 0x1e4   : > { %v1099_v51 = vpop.permute.xlu0 %1098  ;;  %v1161_v24 = vmul.f32 %v4732_v36, %v1159_v33  ;;  %v1209_v48 = vpop.permute.xlu2 %1208  ;;  %v4735_v28 = vld [vmem:[#allocation2 + $0x31] sm:$0xff] }
 0x1e5   : > { %v1104_v55 = vadd.f32 %v1099_v51, %v1090_v58  ;;  %v5855_v58 = vld [vmem:[#allocation2] sm:$0xff]  ;;  %v5862_v51 = vld [vmem:[#allocation2 + $0x9] sm:$0xff] }
 0x1e6   : > { %v1469_v19 = vmul.f32 %v5855_v58, %v1468_v43 }
 0x1e7   : > { %v1118_v35 = vadd.f32 %v1113_v18, %v1104_v55  ;;  %v1490_v55 = vstv %s5853_s10  ;;  %s4386_s10 = sld [smem:[#allocation4 + $0x56]] }
 0x1e9   : > { %v1126_v52 = vadd.f32 %v1124_v59, %v1118_v35  ;;  %v4736_v35 = vld [vmem:[#allocation2 + $0x39] sm:$0xff] }
 0x1eb   : > { %v1137_v22 = vpop.permute.xlu1 %1136  ;;  %v1140_v44 = vadd.f32 %v1135_v41, %v1126_v52  ;;  %v1195_v41 = vstv %s5850_s27  ;;  %v1492_v52 = vmul.f32 %v1490_v55, %v5862_v51  ;;  %s4366_s27 = sld [smem:[#allocation4 + $0x45]] }
 0x1ec   : > { %878 = vadd.xlane.f32.xlu0 %v877_v39  ;;  %v1115_v12 = vpop.permute.xlu0 %1114  ;;  %v1196_v25 = vmul.f32 %v4735_v28, %v1195_v41  ;;  %v1197_v14 = vmul.f32 %v4736_v35, %v1195_v41  ;;  %v1243_v59 = vpop.permute.xlu2 %1242 }
 0x1ed   : > { %v1119_v10 = vadd.f32 %v1115_v12, %v1105_v15 }
 0x1ef   : > { %v1127_v17 = vadd.f32 %v1125_v47, %v1119_v10  ;;  %v4737_v47 = vld [vmem:[#allocation2 + $0x32] sm:$0xff] }
 0x1f1   : > { %v1141_v40 = vadd.f32 %v1137_v22, %v1127_v17  ;;  %v5869_v17 = vld [vmem:[#allocation2 + $0x2] sm:$0xff] }
 0x1f2   : > { %v1527_v33 = vmul.f32 %v5869_v17, %v1526_v37 }
 0x1f3   : > { %v1171_v27 = vpop.permute.xlu1 %1170  ;;  %v1155_v7 = vadd.f32 %v1151_v23, %v1141_v40 }
 0x1f4   : > { %v1149_v4 = vpop.permute.xlu0 %1148 }
 0x1f5   : > { %v1154_v50 = vadd.f32 %v1149_v4, %v1140_v44  ;;  %v1163_v53 = vadd.f32 %v1161_v24, %v1155_v7  ;;  %v4739_v24 = vld [vmem:[#allocation2 + $0x3a] sm:$0xff] }
 0x1f7   : > { %v1162_v49 = vadd.f32 %v1160_v54, %v1154_v50  ;;  %v5877_v50 = vld [vmem:[#allocation2 + $0xa] sm:$0xff] }
 0x1f9   : > { %v1176_v61 = vadd.f32 %v1171_v27, %v1162_v49  ;;  %v1259_v27 = vpop.permute.xlu2 %1258  ;;  %v1267_v49 = vstv %s4360_s12  ;;  %s4373_s12 = sld [smem:[#allocation4 + $0x49]] }
 0x1fb   : > { %1473 = vrot.lane.b32.xlu2 %v1469_v19, %s7507_s5  ;;  %v1187_v56 = vpop.permute.xlu1 %1186  ;;  %v1190_v1 = vadd.f32 %v1185_v42, %v1176_v61  ;;  %v1231_v42 = vstv %s4357_s24  ;;  %s5898_s24 = sld [smem:[#allocation4 + $0x58]] }
 0x1fc   : > { %v1173_v23 = vpop.permute.xlu0 %1172  ;;  %v1232_v10 = vmul.f32 %v4737_v47, %v1231_v42  ;;  %v1233_v4 = vmul.f32 %v4739_v24, %v1231_v42 }
 0x1fd   : > { %v1177_v18 = vadd.f32 %v1173_v23, %v1163_v53  ;;  %v1198_v26 = vadd.f32 %v1196_v25, %v1190_v1  ;;  %v7509_v53 = vstv %s5226_s19  ;;  %v4742_v23 = vld [vmem:[#allocation2 + $0x48] sm:$0xff]  ;;  %s5886_s19 = sld [smem:[#allocation4 + $0x55]] }
 0x1fe   : > { %v1542_v37 = vmul.f32 %v5877_v50, %v7509_v53  ;;  %v5905_v53 = vld [vmem:[#allocation2 + $0x1a] sm:$0xff] }
 0x1ff   : > { %v1191_v20 = vadd.f32 %v1187_v56, %v1177_v18  ;;  %v4741_v56 = vld [vmem:[#allocation2 + $0x50] sm:$0xff]  ;;  %v1268_v18 = vmul.f32 %v4742_v23, %v1267_v49 }
 0x200   : > { %v1269_v1 = vmul.f32 %v4741_v56, %v1267_v49  ;;  %v4746_v23 = vld [vmem:[#allocation2 + $0x52] sm:$0xff] }
 0x201   : > { %v1199_v22 = vadd.f32 %v1197_v14, %v1191_v20  ;;  %v1293_v28 = vpop.permute.xlu2 %1292  ;;  %v1576_v20 = vstv %s5875_s30  ;;  %s5982_s30 = sld [smem:[#allocation4 + $0x5f]] }
 0x203   : > { %1497 = vrot.lane.b32.xlu2 %v1492_v52, %s7508_s26  ;;  %v1221_v39 = vpop.permute.xlu1 %1220  ;;  %v1213_v7 = vadd.f32 %v1209_v48, %v1199_v22  ;;  %v5888_v52 = vld [vmem:[#allocation2 + $0x18] sm:$0xff] }
 0x204   : > { %v1207_v15 = vpop.permute.xlu0 %1206  ;;  %v1577_v22 = vmul.f32 %v5888_v52, %v1576_v20 }
 0x205   : > { %v1212_v12 = vadd.f32 %v1207_v15, %v1198_v26 }
 0x207   : > { %v1226_v16 = vadd.f32 %v1221_v39, %v1212_v12 }
 0x209   : > { %v1234_v40 = vadd.f32 %v1232_v10, %v1226_v16  ;;  %v5896_v10 = vld [vmem:[#allocation2 + $0x21] sm:$0xff] }
 0x20b   : > { %1531 = vrot.lane.b32.xlu2 %v1527_v33, %s7508_s26  ;;  %v1245_v44 = vpop.permute.xlu1 %1244  ;;  %v1248_v41 = vadd.f32 %v1243_v59, %v1234_v40  ;;  %v1303_v59 = vstv %s5882_s16  ;;  %v1317_v40 = vpop.permute.xlu2 %1316  ;;  %s4377_s16 = sld [smem:[#allocation4 + $0x4d]] }
 0x20c   : > { %v1223_v36 = vpop.permute.xlu0 %1222  ;;  %v1304_v42 = vmul.f32 %v1303_v59, %v5491_v30 }
 0x20d   : > { %v1227_v38 = vadd.f32 %v1223_v36, %v1213_v7  ;;  %v4744_v7 = vld [vmem:[#allocation2 + $0x51] sm:$0xff] }
 0x20e   : > { %v1305_v36 = vmul.f32 %v4744_v7, %v1303_v59 }
 0x20f   : > { %v1235_v54 = vadd.f32 %v1233_v4, %v1227_v38  ;;  %v1339_v38 = vstv %s4366_s27  ;;  %s6029_s27 = sld [smem:[#allocation4 + $0x6a]] }
 0x211   : > { %v1249_v19 = vadd.f32 %v1245_v44, %v1235_v54  ;;  %v1598_v44 = vstv %s5886_s19  ;;  %s4371_s19 = sld [smem:[#allocation7 + $0x2]] }
 0x212   : > { %v1600_v24 = vmul.f32 %v1598_v44, %v5896_v10 }
 0x213   : > { %1547 = vrot.lane.b32.xlu2 %v1542_v37, %s7507_s5  ;;  %v1279_v48 = vpop.permute.xlu1 %1278  ;;  %v1263_v61 = vadd.f32 %v1259_v27, %v1249_v19  ;;  %v1634_v37 = vstv %s5898_s24  ;;  %s4378_s24 = sld [smem:[#allocation4 + $0x4e]] }
 0x214   : > { %v1257_v25 = vpop.permute.xlu0 %1256  ;;  %v1635_v56 = vmul.f32 %v1634_v37, %v5905_v53 }
 0x215   : > { %v1262_v26 = vadd.f32 %v1257_v25, %v1248_v41  ;;  %v1271_v35 = vadd.f32 %v1269_v1, %v1263_v61  ;;  %v1351_v61 = vpop.permute.xlu2 %1350 }
 0x217   : > { %v1270_v14 = vadd.f32 %v1268_v18, %v1262_v26  ;;  %v1341_v18 = vmul.f32 %v4746_v23, %v1339_v38  ;;  %v1562_v23 = vstv %s4382_s6  ;;  %s4384_s6 = sld [smem:[#allocation4 + $0x54]] }
 0x219   : > { %v1284_v39 = vadd.f32 %v1279_v48, %v1270_v14  ;;  %v4745_v48 = vld [vmem:[#allocation2 + $0x4a] sm:$0xff] }
 0x21a   : > { %v1340_v41 = vmul.f32 %v4745_v48, %v1339_v38 }
 0x21b   : > { %1581 = vrot.lane.b32.xlu2 %v1577_v22, %s7507_s5  ;;  %v1298_v15 = vadd.f32 %v1293_v28, %v1284_v39  ;;  %v1295_v12 = vpop.permute.xlu1 %1294 }
 0x21c   : > { %v1281_v16 = vpop.permute.xlu0 %1280 }
 0x21d   : > { %v1285_v47 = vadd.f32 %v1281_v16, %v1271_v35  ;;  %v1306_v33 = vadd.f32 %v1304_v42, %v1298_v15  ;;  %v1367_v59 = vpop.permute.xlu2 %1366 }
 0x21f   : > { %v1299_v27 = vadd.f32 %v1295_v12, %v1285_v47 }
 0x221   : > { %v1307_v30 = vadd.f32 %v1305_v36, %v1299_v27  ;;  %v1454_v36 = vstv %s4373_s12  ;;  %s4389_s12 = sld [smem:[#allocation4 + $0x59]] }
 0x223   : > { %1605 = vrot.lane.b32.xlu2 %v1600_v24, %s7508_s26  ;;  %v1329_v49 = vpop.permute.xlu1 %1328  ;;  %v1321_v28 = vadd.f32 %v1317_v40, %v1307_v30  ;;  %v5920_v24 = vld [vmem:[#allocation2 + $0x8] sm:$0xff] }
 0x224   : > { %v1315_v4 = vpop.permute.xlu0 %1314  ;;  %v1456_v30 = vmul.f32 %v5920_v24, %v1454_v36  ;;  %v1470_v38 = vmul.f32 %v5920_v24, %v1468_v43 }
 0x225   : > { %v1320_v54 = vadd.f32 %v1315_v4, %v1306_v33  ;;  %v1455_v4 = vmul.f32 %v5855_v58, %v1454_v36 }
 0x227   : > { %v1334_v19 = vadd.f32 %v1329_v49, %v1320_v54  ;;  %v5930_v54 = vld [vmem:[#allocation2 + $0x1] sm:$0xff]  ;;  %v1504_v49 = vstv %s4377_s16  ;;  %s4381_s16 = sld [smem:[#allocation4 + $0x51]] }
 0x228   : > { %v1505_v48 = vmul.f32 %v1504_v49, %v5930_v54 }
 0x229   : > { %v1342_v1 = vadd.f32 %v1340_v41, %v1334_v19  ;;  %v1491_v19 = vmul.f32 %v1490_v55, %v5930_v54 }
 0x22b   : > { %1639 = vrot.lane.b32.xlu2 %v1635_v56, %s7508_s26  ;;  %v1353_v14 = vpop.permute.xlu1 %1352  ;;  %v1356_v39 = vadd.f32 %v1351_v61, %v1342_v1  ;;  %v1506_v1 = vmul.f32 %v1504_v49, %v5862_v51  ;;  %v1720_v49 = vstv %s5982_s30  ;;  %s4403_s30 = sld [smem:[#allocation4 + $0x67]] }
 0x22c   : > { %v1331_v25 = vpop.permute.xlu0 %1330 }
 0x22d   : > { %v1335_v26 = vadd.f32 %v1331_v25, %v1321_v28 }
 0x22f   : > { %v1343_v35 = vadd.f32 %v1341_v18, %v1335_v26  ;;  %v1563_v26 = vmul.f32 %v5888_v52, %v1562_v23 }
 0x231   : > { %v1357_v22 = vadd.f32 %v1353_v14, %v1343_v35 }
 0x233   : > { %v1371_v15 = vadd.f32 %v1367_v59, %v1357_v22  ;;  %v5949_v59 = vld [vmem:[#allocation2 + $0x20] sm:$0xff] }
 0x234   : > { %v1365_v42 = vpop.permute.xlu0 %1364 }
 0x235   : > { %v1370_v12 = vadd.f32 %v1365_v42, %v1356_v39  ;;  %vm1373_vm6 = vcmp.ge.f32.partialorder %v1371_v15, 0.0  ;;  %v1375_v16 = vmul.f32 0.2, %v1371_v15  ;;  %v1612_v42 = vstv %s4386_s10  ;;  %s4394_s10 = sld [smem:[#allocation4 + $0x5e]] }
 0x237   : > { %v5912_v47 = vsel %vm1373_vm6, %v1371_v15, %v1375_v16  ;;  %vm1372_vm7 = vcmp.ge.f32.partialorder %v1370_v12, 0.0  ;;  %v1374_v33 = vmul.f32 0.2, %v1370_v12 }
 0x238   : > { %v1381_v40 = vsel %vm873_vm4, %v5912_v47, 0.0 }
 0x239   : > { %1382 = vadd.xlane.f32.xlu0 %v1381_v40  ;;  %v5916_v27 = vsel %vm1372_vm7, %v1370_v12, %v1374_v33  ;;  %v1614_v33 = vmul.f32 %v1612_v42, %v5896_v10 }
 0x23a   : > { %v1378_v7 = vsel %vm873_vm4, %v5916_v27, 0.0 }
 0x23b   : > { %1379 = vadd.xlane.f32.xlu1 %v1378_v7  ;;  %v5976_v7 = vld [vmem:[#allocation2 + $0x30] sm:$0xff] }
 0x24d   : > { %1461 = vrot.lane.b32.xlu0 %v1456_v30, %s7508_s26  ;;  %v5984_v30 = vld [vmem:[#allocation2 + $0x38] sm:$0xff] }
 0x254   : > { %1459 = vrot.lane.b32.xlu1 %v1455_v4, %s7508_s26  ;;  %v7511_v4 = vstv %s5322_s20  ;;  %s6018_s20 = sld [smem:[#allocation4 + $0x68]] }
 0x255   : > { %1475 = vrot.lane.b32.xlu0 %v1470_v38, %s7507_s5  ;;  %v5990_v38 = vld [vmem:[#allocation2 + $0x31] sm:$0xff] }
 0x256   : > { %v876_v41 = vpop.xlane.xlu2 %875 }
 0x25c   : > { %1495 = vrot.lane.b32.xlu1 %v1491_v19, %s7508_s26  ;;  %v1721_v19 = vmul.f32 %v1720_v49, %v5990_v38 }
 0x25d   : > { %1509 = vrot.lane.b32.xlu0 %v1505_v48, %s7507_s5  ;;  %v5999_v48 = vld [vmem:[#allocation2 + $0x3a] sm:$0xff] }
 0x25f   : > { %v879_v61 = vpop.xlane.xlu0 %878 }
 0x260   : > { %v880_v56 = vadd.f32 %v879_v61, %v876_v41 }
 0x262   : > { %v881_v43 = vrot.slane %v880_v56, 4 }
 0x264   : > { %v882_v28 = vadd.f32 %v881_v43, %v880_v56  ;;  %1511 = vrot.lane.b32.xlu1 %v1506_v1, %s7507_s5  ;;  %v6011_v1 = vld [vmem:[#allocation2 + $0x48] sm:$0xff] }
 0x265   : > { %1533 = vrot.lane.b32.xlu0 %v5253_v45, %s7508_s26  ;;  %v1564_v45 = vmul.f32 %v5949_v59, %v1562_v23 }
 0x266   : > { %v883_v55 = vrot.slane %v882_v28, 2 }
 0x268   : > { %v884_v25 = vadd.f32 %v883_v55, %v882_v28  ;;  %v7512_v28 = vstv %s5426_s4  ;;  %s4372_s4 = sld [smem:[#allocation4 + $0x48]] }
 0x269   : > { %v1779_v55 = vmul.f32 %v6011_v1, %v7512_v28  ;;  %v6042_v28 = vld [vmem:[#allocation2 + $0x52] sm:$0xff] }
 0x26a   : > { %v885_v18 = vrot.slane %v884_v25, 1 }
 0x26c   : > { %1545 = vrot.lane.b32.xlu1 %v5257_v46, %s7507_s5  ;;  %v886_v35 = vadd.f32 %v885_v18, %v884_v25  ;;  %v1578_v46 = vmul.f32 %v5949_v59, %v1576_v20  ;;  %v5968_v20 = vld [vmem:[#allocation2 + $0x22] sm:$0xff] }
 0x26d   : > { %1567 = vrot.lane.b32.xlu0 %v1563_v26, %s7508_s26  ;;  %v1636_v40 = vmul.f32 %v1634_v37, %v5968_v20  ;;  %v1686_v37 = vmul.f32 %v5984_v30, %v7511_v4 }
 0x26e   : > { %v887_v14 = vmul.f32 0.00390625, %v886_v35  ;;  %v1448_v4 = vstv %s4372_s4  ;;  %s4387_s4 = sld [smem:[#allocation4 + $0x57]] }
 0x270   : > { %v5947_v22 = vsub.f32 %v5844_v60, %v887_v14  ;;  %v5960_v60 = vld [vmem:[#allocation2 + $0x19] sm:$0xff]  ;;  %v6007_v56 = vsub.f32 %v5838_v62, %v887_v14  ;;  %v6020_v14 = vld [vmem:[#allocation2 + $0x50] sm:$0xff] }
 0x271   : > { %v1599_v12 = vmul.f32 %v1598_v44, %v5960_v60  ;;  %v1613_v16 = vmul.f32 %v1612_v42, %v5960_v60  ;;  %v7510_v44 = vstv %s5309_s13  ;;  %s5993_s13 = sld [smem:[#allocation4 + $0x61]]  ;;  %v6026_v42 = vld [vmem:[#allocation2 + $0x49] sm:$0xff] }
 0x272   : > { %v891_v39 = vmul.f32 %v5947_v22, %v5947_v22  ;;  %v1671_v36 = vmul.f32 %v5976_v7, %v7510_v44  ;;  %v890_v43 = vmul.f32 %v6007_v56, %v6007_v56  ;;  %v1474_v44 = vpop.permute.xlu2 %1473 }
 0x274   : > { %1569 = vrot.lane.b32.xlu1 %v1564_v45, %s7508_s26  ;;  %v895_v15 = vsel %vm873_vm4, %v891_v39, 0.0  ;;  %v892_v25 = vsel %vm873_vm4, %v890_v43, 0.0  ;;  %v7513_v45 = vstv %s5433_s0  ;;  %s4375_s0 = sld [smem:[#allocation4 + $0x4b]]  ;;  %v1450_v43 = vmul.f32 %v5920_v24, %v1448_v4 }
 0x275   : > { %1583 = vrot.lane.b32.xlu0 %v1578_v46, %s7507_s5  ;;  %896 = vadd.xlane.f32.xlu2 %v895_v15  ;;  %v1794_v39 = vmul.f32 %v6020_v14, %v7513_v45 }
 0x277   : > { %v1742_v41 = vstv %s5993_s13  ;;  %s4407_s13 = sld [smem:[#allocation4 + $0x6b]] }
 0x278   : > { %v1744_v61 = vmul.f32 %v1742_v41, %v5999_v48 }
 0x27c   : > { %1603 = vrot.lane.b32.xlu1 %v1599_v12, %s7508_s26  ;;  %v7481_v12 = vstv %s6018_s20 }
 0x27d   : > { %1617 = vrot.lane.b32.xlu0 %v1613_v16, %s7507_s5 }
 0x284   : > { %1619 = vrot.lane.b32.xlu1 %v1614_v33, %s7507_s5  ;;  %v1829_v33 = vmul.f32 %v7481_v12, %v6026_v42 }
 0x285   : > { %1641 = vrot.lane.b32.xlu0 %v1636_v40, %s7508_s26 }
 0x28d   : > { %1675 = vrot.lane.b32.xlu0 %v1671_v36, %s7508_s26 }
 0x295   : > { %1691 = vrot.lane.b32.xlu0 %v1686_v37, %s7507_s5 }
 0x29d   : > { %1725 = vrot.lane.b32.xlu0 %v1721_v19, %s7507_s5 }
 0x2a5   : > { %1749 = vrot.lane.b32.xlu0 %v1744_v61, %s7508_s26 }
 0x2ac   : > { %v1383_v23 = vpop.xlane.xlu0 %1382 }
 0x2ad   : > { %1783 = vrot.lane.b32.xlu0 %v1779_v55, %s7508_s26 }
 0x2ae   : > { %v1380_v18 = vpop.xlane.xlu1 %1379  ;;  %893 = vadd.xlane.f32.xlu1 %v892_v25 }
 0x2af   : > { %v1384_v26 = vadd.f32 %v1383_v23, %v1380_v18  ;;  %v1449_v23 = vmul.f32 %v5855_v58, %v1448_v4  ;;  %v1443_v18 = vstv %s4371_s19  ;;  %s4398_s19 = sld [smem:[#allocation4 + $0x62]] }
 0x2b1   : > { %v1385_v62 = vrot.slane %v1384_v26, 4  ;;  %v1451_v45 = vadd.f32 %v1449_v23, %v1443_v18 }
 0x2b3   : > { %v1386_v35 = vadd.f32 %v1385_v62, %v1384_v26  ;;  %v7482_v26 = vstv %s6029_s27 }
 0x2b5   : > { %v1387_v46 = vrot.slane %v1386_v35, 2  ;;  %1799 = vrot.lane.b32.xlu0 %v1794_v39, %s7507_s5  ;;  %v1498_v39 = vpop.permute.xlu2 %1497 }
 0x2b7   : > { %v1388_v15 = vadd.f32 %v1387_v46, %v1386_v35  ;;  %v1452_v35 = vadd.f32 %v1450_v43, %v1443_v18 }
 0x2b9   : > { %v1389_v16 = vrot.slane %v1388_v15, 1 }
 0x2bb   : > { %v1390_v40 = vadd.f32 %v1389_v16, %v1388_v15  ;;  %v1484_v16 = vstv %s4375_s0  ;;  %s6155_s0 = sld [smem:[#allocation4 + $0x5d]] }
 0x2bd   : > { %1833 = vrot.lane.b32.xlu0 %v1829_v33, %s7507_s5  ;;  %v1391_v36 = vmul.f32 0.00390625, %v1390_v40  ;;  %v1532_v23 = vpop.permute.xlu2 %1531 }
 0x2bf   : > { %v1462_v37 = vpop.permute.xlu0 %1461  ;;  %v6036_v19 = vsub.f32 %v5912_v47, %v1391_v36  ;;  %v6039_v61 = vsub.f32 %v5916_v27, %v1391_v36  ;;  %v1852_v27 = vmul.f32 %v7482_v26, %v6042_v28  ;;  %v1486_v36 = vmul.f32 %v1484_v16, %v5862_v51 }
 0x2c0   : > { %v1466_v46 = vadd.f32 %v1462_v37, %v1452_v35 }
 0x2c1   : > { %v1395_v55 = vmul.f32 %v6036_v19, %v6036_v19  ;;  %v1394_v25 = vmul.f32 %v6039_v61, %v6039_v61 }
 0x2c3   : > { %v1399_v47 = vsel %vm873_vm4, %v1395_v55, 0.0  ;;  %v1396_v62 = vsel %vm873_vm4, %v1394_v25, 0.0  ;;  %v1485_v25 = vmul.f32 %v1484_v16, %v5930_v54  ;;  %v1648_v16 = vstv %s4389_s12  ;;  %s6176_s12 = sld [smem:[#allocation4 + $0x60]] }
 0x2c4   : > { %1400 = vadd.xlane.f32.xlu1 %v1399_v47  ;;  %1397 = vadd.xlane.f32.xlu2 %v1396_v62  ;;  %v1520_v62 = vstv %s4378_s24  ;;  %s6173_s24 = sld [smem:[#allocation10]] }
 0x2c5   : > { %1857 = vrot.lane.b32.xlu0 %v1852_v27, %s7508_s26  ;;  %v1521_v37 = vmul.f32 %v5869_v17, %v1520_v62 }
 0x2c6   : > { %v1460_v15 = vpop.permute.xlu1 %1459 }
 0x2c7   : > { %v1465_v33 = vadd.f32 %v1460_v15, %v1451_v45  ;;  %v1476_v40 = vpop.permute.xlu0 %1475 }
 0x2c8   : > { %v1480_v4 = vadd.f32 %v1476_v40, %v1466_v46  ;;  %v1548_v40 = vpop.permute.xlu2 %1547 }
 0x2c9   : > { %v1479_v55 = vadd.f32 %v1474_v44, %v1465_v33  ;;  %v1522_v44 = vmul.f32 %v5877_v50, %v1520_v62 }
 0x2ca   : > { %v1488_v12 = vadd.f32 %v1486_v36, %v1480_v4  ;;  %v1650_v36 = vmul.f32 %v1648_v16, %v5968_v20  ;;  %v1556_v4 = vstv %s4381_s16  ;;  %s6195_s16 = sld [smem:[#allocation4 + $0x63]] }
 0x2cb   : > { %v1487_v43 = vadd.f32 %v1485_v25, %v1479_v55  ;;  %v1649_v25 = vmul.f32 %v1648_v16, %v5905_v53 }
 0x2cc   : > { %v1502_v45 = vadd.f32 %v1498_v39, %v1488_v12 }
 0x2ce   : > { %v1496_v47 = vpop.permute.xlu1 %1495 }
 0x2cf   : > { %v1501_v26 = vadd.f32 %v1496_v47, %v1487_v43  ;;  %v1510_v27 = vpop.permute.xlu0 %1509  ;;  %v1557_v47 = vmul.f32 %v5888_v52, %v1556_v4 }
 0x2d1   : > { %v1515_v18 = vadd.f32 %v1510_v27, %v1501_v26  ;;  %v1558_v26 = vmul.f32 %v5949_v59, %v1556_v4  ;;  %v6072_v4 = vld [vmem:[#allocation2 + $0x39] sm:$0xff] }
 0x2d3   : > { %v1523_v35 = vadd.f32 %v1521_v37, %v1515_v18  ;;  %v1592_v18 = vstv %s4384_s6  ;;  %s6198_s6 = sld [smem:[#allocation9 + $0x1]] }
 0x2d5   : > { %v1537_v12 = vadd.f32 %v1532_v23, %v1523_v35  ;;  %v1593_v23 = vmul.f32 %v1592_v18, %v5960_v60 }
 0x2d6   : > { %v1512_v15 = vpop.permute.xlu1 %1511 }
 0x2d7   : > { %v1516_v51 = vadd.f32 %v1512_v15, %v1502_v45  ;;  %v1534_v46 = vpop.permute.xlu0 %1533  ;;  %v1582_v15 = vpop.permute.xlu2 %1581 }
 0x2d9   : > { %v1524_v33 = vadd.f32 %v1522_v44, %v1516_v51 }
 0x2db   : > { %v1538_v55 = vadd.f32 %v1534_v46, %v1524_v33  ;;  %v1706_v33 = vstv %s4394_s10  ;;  %s6209_s10 = sld [smem:[#allocation4 + $0x66]] }
 0x2dc   : > { %1655 = vrot.lane.b32.xlu2 %v1650_v36, %s7507_s5 }
 0x2dd   : > { %v1552_v17 = vadd.f32 %v1548_v40, %v1538_v55  ;;  %1653 = vrot.lane.b32.xlu1 %v1649_v25, %s7507_s5  ;;  %v1594_v40 = vmul.f32 %v1592_v18, %v5896_v10 }
 0x2de   : > { %v1546_v39 = vpop.permute.xlu1 %1545 }
 0x2df   : > { %v1551_v43 = vadd.f32 %v1546_v39, %v1537_v12  ;;  %v1568_v62 = vpop.permute.xlu0 %1567  ;;  %v1560_v27 = vadd.f32 %v1558_v26, %v1552_v17  ;;  %v1628_v17 = vstv %s4387_s4  ;;  %s4405_s4 = sld [smem:[#allocation4 + $0x69]] }
 0x2e0   : > { %v1629_v10 = vmul.f32 %v1628_v17, %v5905_v53  ;;  %v1630_v53 = vmul.f32 %v1628_v17, %v5968_v20 }
 0x2e1   : > { %v1559_v37 = vadd.f32 %v1557_v47, %v1551_v43  ;;  %v6079_v43 = vld [vmem:[#allocation2 + $0x32] sm:$0xff] }
 0x2e2   : > { %v1743_v47 = vmul.f32 %v6079_v43, %v1742_v41 }
 0x2e3   : > { %v1573_v45 = vadd.f32 %v1568_v62, %v1559_v37  ;;  %v1606_v37 = vpop.permute.xlu2 %1605 }
 0x2e4   : > { %1689 = vrot.lane.b32.xlu2 %v5352_v32, %s7507_s5  ;;  %v1708_v32 = vmul.f32 %v6072_v4, %v1706_v33 }
 0x2e5   : > { %v1587_v51 = vadd.f32 %v1582_v15, %v1573_v45  ;;  %1677 = vrot.lane.b32.xlu1 %v5356_v34, %s7508_s26  ;;  %v1707_v34 = vmul.f32 %v1706_v33, %v5990_v38  ;;  %v6106_v33 = vld [vmem:[#allocation2 + $0x4a] sm:$0xff] }
 0x2e6   : > { %v1570_v35 = vpop.permute.xlu1 %1569 }
 0x2e7   : > { %v1574_v44 = vadd.f32 %v1570_v35, %v1560_v27  ;;  %v1584_v46 = vpop.permute.xlu0 %1583  ;;  %v1595_v16 = vadd.f32 %v1593_v23, %v1587_v51  ;;  %v1722_v27 = vmul.f32 %v6072_v4, %v1720_v49  ;;  %v1756_v51 = vstv %s4398_s19  ;;  %s6341_s19 = sld [smem:[#allocation4 + $0x8b]] }
 0x2e8   : > { %v1758_v41 = vmul.f32 %v1756_v51, %v5999_v48  ;;  %v1757_v35 = vmul.f32 %v6079_v43, %v1756_v51  ;;  %v1814_v49 = vstv %s4403_s30  ;;  %s4409_s30 = sld [smem:[#allocation4 + $0x6c]] }
 0x2e9   : > { %v1588_v36 = vadd.f32 %v1584_v46, %v1574_v44  ;;  %v6100_v44 = vld [vmem:[#allocation2 + $0x51] sm:$0xff] }
 0x2ea   : > { %v1816_v46 = vmul.f32 %v6100_v44, %v1814_v49 }
 0x2eb   : > { %v1596_v55 = vadd.f32 %v1594_v40, %v1588_v36  ;;  %v7514_v40 = vstv %s6029_s27  ;;  %v7515_v36 = vstv %s6018_s20  ;;  %s6124_s20 = sld [smem:[#allocation4 + $0x71]] }
 0x2ec   : > { %1713 = vrot.lane.b32.xlu2 %v1708_v32, %s7508_s26  ;;  %v1864_v32 = vstv %s4407_s13  ;;  %s6137_s27 = sld [smem:[#allocation4 + $0x5a]] }
 0x2ed   : > { %1711 = vrot.lane.b32.xlu1 %v1707_v34, %s7508_s26  ;;  %v1610_v18 = vadd.f32 %v1606_v37, %v1596_v55  ;;  %v1640_v55 = vpop.permute.xlu2 %1639  ;;  %v1866_v34 = vmul.f32 %v1864_v32, %v6042_v28  ;;  %s4408_s13 = sld [smem:[#allocation7 + $0x3]] }
 0x2ee   : > { %v1604_v25 = vpop.permute.xlu1 %1603 }
 0x2ef   : > { %v1609_v12 = vadd.f32 %v1604_v25, %v1595_v16  ;;  %v1618_v26 = vpop.permute.xlu0 %1617  ;;  %v1815_v16 = vmul.f32 %v1814_v49, %v6026_v42  ;;  %v1865_v25 = vmul.f32 %v6106_v33, %v1864_v32 }
 0x2f1   : > { %v1623_v39 = vadd.f32 %v1618_v26, %v1609_v12 }
 0x2f3   : > { %v6084_v62 = vadd.f32 %v1629_v10, %v1623_v39  ;;  %v7516_v10 = vstv %s5280_s17  ;;  %s6131_s17 = sld [smem:[#allocation4 + $0x73]] }
 0x2f4   : > { %1747 = vrot.lane.b32.xlu2 %v1743_v47, %s7508_s26  ;;  %v1907_v39 = vmul.f32 %v5855_v58, %v7516_v10 }
 0x2f5   : > { %1727 = vrot.lane.b32.xlu1 %v1722_v27, %s7507_s5  ;;  %v897_v17 = vpop.xlane.xlu2 %896 }
 0x2f6   : > { %v1620_v45 = vpop.permute.xlu1 %1619 }
 0x2f7   : > { %v1624_v15 = vadd.f32 %v1620_v45, %v1610_v18  ;;  %v7517_v45 = vstv %s5276_s15  ;;  %s6150_s15 = sld [smem:[#allocation4 + $0x7a]] }
 0x2f9   : > { %v1632_v23 = vadd.f32 %v1630_v53, %v1624_v15  ;;  %v1922_v15 = vmul.f32 %v5920_v24, %v7517_v45 }
 0x2fc   : > { %1763 = vrot.lane.b32.xlu2 %v1758_v41, %s7507_s5  ;;  %v1956_v41 = vstv %s6124_s20  ;;  %s4412_s20 = sld [smem:[#allocation4 + $0x6f]] }
 0x2fd   : > { %1761 = vrot.lane.b32.xlu1 %v1757_v35, %s7507_s5  ;;  %v1957_v58 = vmul.f32 %v1956_v41, %v5930_v54 }
 0x304   : > { %1797 = vrot.lane.b32.xlu2 %v5473_v57, %s7507_s5  ;;  %v1851_v57 = vmul.f32 %v6106_v33, %v7514_v40 }
 0x305   : > { %1785 = vrot.lane.b32.xlu1 %v5478_v3, %s7508_s26  ;;  %v1830_v3 = vmul.f32 %v6100_v44, %v7515_v36 }
 0x30c   : > { %1821 = vrot.lane.b32.xlu2 %v1816_v46, %s7508_s26 }
 0x30d   : > { %1819 = vrot.lane.b32.xlu1 %v1815_v16, %s7508_s26  ;;  %v1978_v16 = vstv %s6131_s17  ;;  %s6354_s17 = sld [smem:[#allocation4 + $0x8f]] }
 0x314   : > { %1855 = vrot.lane.b32.xlu2 %v1851_v57, %s7508_s26  ;;  %v1642_v57 = vpop.permute.xlu0 %1641 }
 0x315   : > { %1835 = vrot.lane.b32.xlu1 %v1830_v3, %s7507_s5  ;;  %v1980_v3 = vmul.f32 %v5877_v50, %v1978_v16 }
 0x31c   : > { %1871 = vrot.lane.b32.xlu2 %v1866_v34, %s7507_s5  ;;  %v1664_v34 = vstv %s6137_s27  ;;  %v1676_v50 = vpop.permute.xlu0 %1675  ;;  %s6361_s27 = sld [smem:[#allocation12 + $0x13]] }
 0x31d   : > { %1869 = vrot.lane.b32.xlu1 %v1865_v25, %s7507_s5  ;;  %v1646_v25 = vadd.f32 %v1642_v57, %v1632_v23  ;;  %v1645_v57 = vadd.f32 %v1640_v55, %v6084_v62 }
 0x321   : > { %v894_v12 = vpop.xlane.xlu1 %893 }
 0x322   : > { %v898_v26 = vadd.f32 %v897_v17, %v894_v12 }
 0x324   : > { %v899_v47 = vrot.slane %v898_v26, 4  ;;  %1911 = vrot.lane.b32.xlu2 %v1907_v39, %s7508_s26  ;;  %v1666_v39 = vmul.f32 %v5984_v30, %v1664_v34 }
 0x326   : > { %v900_v27 = vadd.f32 %v899_v47, %v898_v26 }
 0x328   : > { %v901_v37 = vrot.slane %v900_v27, 2 }
 0x32a   : > { %v902_v18 = vadd.f32 %v901_v37, %v900_v27  ;;  %v7518_v37 = vstv %s5285_s29  ;;  %s6169_s29 = sld [smem:[#allocation9]] }
 0x32c   : > { %v903_v53 = vrot.slane %v902_v18, 1  ;;  %1927 = vrot.lane.b32.xlu2 %v1922_v15, %s7507_s5 }
 0x32e   : > { %v904_v51 = vadd.f32 %v903_v53, %v902_v18  ;;  %v2015_v18 = vmul.f32 %v5888_v52, %v7518_v37 }
 0x330   : > { %v905_v35 = vmul.f32 0.00390625, %v904_v51 }
 0x332   : > { %v906_v49 = vadd.f32 1e-05, %v905_v35  ;;  %v7519_v35 = vstv %s5283_s22  ;;  %s6164_s22 = sld [smem:[#allocation4 + $0x7c]] }
 0x334   : > { %1961 = vrot.lane.b32.xlu2 %v1957_v58, %s7507_s5  ;;  %4716 = vrsqrt.f32 %v906_v49  ;;  %vm913_vm9 = vweird.f32 %v906_v49 }
 0x337   : > { %v1401_v24 = vpop.xlane.xlu1 %1400  ;;  %v1398_v46 = vpop.xlane.xlu2 %1397 }
 0x338   : > { %v1402_v40 = vadd.f32 %v1401_v24, %v1398_v46  ;;  %v2030_v24 = vmul.f32 %v5949_v59, %v7519_v35  ;;  %v1665_v59 = vmul.f32 %v5976_v7, %v1664_v34  ;;  %v2086_v35 = vstv %s6164_s22  ;;  %s4418_s22 = sld [smem:[#allocation4 + $0x75]] }
 0x33a   : > { %v1403_v36 = vrot.slane %v1402_v40, 4  ;;  %v4717_v47 = vpop.eup %4716 }
 0x33b   : > { %v908_v15 = vmul.f32 %v4717_v47, %v906_v49  ;;  %vm914_vm8 = vweird.f32 %v4717_v47  ;;  %v2088_v49 = vmul.f32 %v2086_v35, %v5968_v20 }
 0x33c   : > { %v1404_v32 = vadd.f32 %v1403_v36, %v1402_v40  ;;  %1985 = vrot.lane.b32.xlu2 %v1980_v3, %s7508_s26  ;;  %v1692_v40 = vpop.permute.xlu0 %1691  ;;  %vm915_vm10 = vmor %vm913_vm9, %vm914_vm8 }
 0x33d   : > { %v909_v23 = vmul.f32 %v4717_v47, %v908_v15 }
 0x33e   : > { %v1405_v17 = vrot.slane %v1404_v32, 2 }
 0x33f   : > { %v1656_v12 = vpop.permute.xlu2 %1655  ;;  %v910_v46 = vmul.f32 0.5, %v909_v23 }
 0x340   : > { %v1406_v26 = vadd.f32 %v1405_v17, %v1404_v32  ;;  %v1660_v10 = vadd.f32 %v1656_v12, %v1646_v25  ;;  %v2064_v32 = vstv %s6150_s15  ;;  %s4415_s15 = sld [smem:[#allocation4 + $0x72]] }
 0x341   : > { %v911_v25 = vsub.f32 1.5, %v910_v46  ;;  %v920_v46 = vstv %s6169_s29  ;;  %s4421_s29 = sld [smem:[#allocation4 + $0x78]] }
 0x342   : > { %v1407_v27 = vrot.slane %v1406_v26, 1  ;;  %v1668_v45 = vadd.f32 %v1666_v39, %v1660_v10  ;;  %v1700_v10 = vstv %s6155_s0  ;;  %s6373_s0 = sld [smem:[#allocation12 + $0x1]] }
 0x343   : > { %v912_v55 = vmul.f32 %v4717_v47, %v911_v25  ;;  %v1701_v39 = vmul.f32 %v1700_v10, %v5990_v38 }
 0x344   : > { %v1408_v53 = vadd.f32 %v1407_v27, %v1406_v26  ;;  %2019 = vrot.lane.b32.xlu2 %v2015_v18, %s7508_s26  ;;  %v2065_v26 = vmul.f32 %v2064_v32, %v5960_v60 }
 0x345   : > { %v916_v23 = vsel %vm915_vm10, %v4717_v47, %v912_v55 }
 0x346   : > { %v1409_v58 = vmul.f32 0.00390625, %v1408_v53 }
 0x347   : > { %v1690_v51 = vpop.permute.xlu2 %1689 }
 0x348   : > { %v6157_v52 = vadd.f32 1e-05, %v1409_v58 }
 0x34a   : > { %4718 = vrsqrt.f32 %v6157_v52  ;;  %vm1417_vm12 = vweird.f32 %v6157_v52 }
 0x34c   : > { %2035 = vrot.lane.b32.xlu2 %v2030_v24, %s7507_s5 }
 0x34f   : > { %v1654_v36 = vpop.permute.xlu1 %1653  ;;  %v1714_v3 = vpop.permute.xlu2 %1713 }
 0x350   : > { %v1659_v17 = vadd.f32 %v1654_v36, %v1645_v57  ;;  %v4719_v34 = vpop.eup %4718  ;;  %v918_v57 = vmul.f32 %v916_v23, %v5947_v22 }
 0x351   : > { %v1412_v58 = vmul.f32 %v4719_v34, %v6157_v52  ;;  %vm1418_vm11 = vweird.f32 %v4719_v34 }
 0x352   : > { %v1667_v12 = vadd.f32 %v1665_v59, %v1659_v17  ;;  %v922_v59 = vmul.f32 %v920_v46, %v918_v57  ;;  %v7521_v57 = vstv %s5379_s14  ;;  %vm1419_vm13 = vmor %vm1417_vm12, %vm1418_vm11  ;;  %s7522_s14 = smov 1  }
 0x353   : > { %v1413_v25 = vmul.f32 %v4719_v34, %v1412_v58 }
 0x354   : > { %v1681_v62 = vadd.f32 %v1676_v50, %v1667_v12  ;;  %2069 = vrot.lane.b32.xlu2 %v2065_v26, %s7507_s5  ;;  %v1726_v50 = vpop.permute.xlu0 %1725  ;;  %v1736_v12 = vstv %s6176_s12  ;;  %s4427_s12 = sld [smem:[#allocation4 + $0x7e]] }
 0x355   : > { %v1737_v22 = vmul.f32 %v6079_v43, %v1736_v12 }
 0x356   : > { %v1695_v27 = vadd.f32 %v1690_v51, %v1681_v62  ;;  %v1702_v51 = vmul.f32 %v6072_v4, %v1700_v10  ;;  %v1414_v62 = vmul.f32 0.5, %v1413_v25  ;;  %v7520_v10 = vstv %s5376_s2  ;;  %s6201_s2 = sld [smem:[#allocation10 + $0x1]] }
 0x357   : > { %v1678_v37 = vpop.permute.xlu1 %1677  ;;  %v1748_v18 = vpop.permute.xlu2 %1747  ;;  %v2138_v25 = vmul.f32 %v5984_v30, %v7521_v57 }
 0x358   : > { %v1682_v15 = vadd.f32 %v1678_v37, %v1668_v45  ;;  %v1703_v53 = vadd.f32 %v1701_v39, %v1695_v27  ;;  %v924_v45 = vstv %s6173_s24  ;;  %v2123_v27 = vmul.f32 %v5976_v7, %v7520_v10  ;;  %s4424_s24 = sld [smem:[#allocation4 + $0x7b]] }
 0x359   : > { %v6189_v26 = vadd.f32 %v924_v45, %v922_v59  ;;  %v917_v59 = vmul.f32 %v916_v23, %v6007_v56  ;;  %v1424_v23 = vstv %s6198_s6  ;;  %s6401_s6 = sld [smem:[#allocation4 + $0x84]] }
 0x35a   : > { %v1696_v24 = vadd.f32 %v1692_v40, %v1682_v15  ;;  %v1415_v15 = vsub.f32 1.5, %v1414_v62 }
 0x35b   : > { %v921_v62 = vmul.f32 %v920_v46, %v917_v59 }
 0x35c   : > { %2093 = vrot.lane.b32.xlu2 %v2088_v49, %s7508_s26  ;;  %v1704_v36 = vadd.f32 %v1702_v51, %v1696_v24  ;;  %v1750_v55 = vpop.permute.xlu0 %1749  ;;  %v1416_v7 = vmul.f32 %v4719_v34, %v1415_v15 }
 0x35e   : > { %v1718_v58 = vadd.f32 %v1714_v3, %v1704_v36  ;;  %v1772_v3 = vstv %s6195_s16  ;;  %s4430_s16 = sld [smem:[#allocation4 + $0x81]] }
 0x35f   : > { %v1712_v47 = vpop.permute.xlu1 %1711  ;;  %v1764_v17 = vpop.permute.xlu2 %1763  ;;  %v1774_v30 = vmul.f32 %v6020_v14, %v1772_v3  ;;  %v1773_v52 = vmul.f32 %v6011_v1, %v1772_v3 }
 0x360   : > { %v1717_v40 = vadd.f32 %v1712_v47, %v1703_v53 }
 0x362   : > { %v1731_v39 = vadd.f32 %v1726_v50, %v1717_v40  ;;  %v1738_v50 = vmul.f32 %v1736_v12, %v5999_v48  ;;  %v1420_v12 = vsel %vm1419_vm13, %v4719_v34, %v1416_v7 }
 0x363   : > { %v1421_v15 = vmul.f32 %v1420_v12, %v6039_v61  ;;  %v1422_v34 = vmul.f32 %v1420_v12, %v6036_v19 }
 0x364   : > { %2127 = vrot.lane.b32.xlu2 %v2123_v27, %s7508_s26  ;;  %v1739_v37 = vadd.f32 %v1737_v22, %v1731_v39  ;;  %v1784_v36 = vpop.permute.xlu0 %1783 }
 0x366   : > { %v1753_v40 = vadd.f32 %v1748_v18, %v1739_v37  ;;  %v1425_v18 = vmul.f32 %v1424_v23, %v1421_v15  ;;  %v1808_v37 = vstv %s6209_s10  ;;  %s6410_s10 = sld [smem:[#allocation12 + $0x5]] }
 0x367   : > { %v1728_v24 = vpop.permute.xlu1 %1727  ;;  %v1798_v49 = vpop.permute.xlu2 %1797  ;;  %v1809_v7 = vmul.f32 %v1808_v37, %v6026_v42  ;;  %v1810_v3 = vmul.f32 %v6100_v44, %v1808_v37 }
 0x368   : > { %v1732_v53 = vadd.f32 %v1728_v24, %v1718_v58  ;;  %v1428_v58 = vstv %s6201_s2  ;;  %v925_v24 = vadd.f32 %v924_v45, %v921_v62  ;;  %s6407_s2 = sld [smem:[#allocation12 + $0x2]] }
 0x36a   : > { %v1740_v51 = vadd.f32 %v1738_v50, %v1732_v53  ;;  %v1426_v53 = vmul.f32 %v1424_v23, %v1422_v34  ;;  %v7524_v34 = vstv %s5381_s9  ;;  %s4417_s9 = sld [smem:[#allocation4 + $0x74]] }
 0x36c   : > { %v1754_v47 = vadd.f32 %v1750_v55, %v1740_v51  ;;  %2143 = vrot.lane.b32.xlu2 %v2138_v25, %s7507_s5  ;;  %v1800_v50 = vpop.permute.xlu0 %1799  ;;  %v1430_v19 = vadd.f32 %v1428_v58, %v1426_v53 }
 0x36e   : > { %v1768_v39 = vadd.f32 %v1764_v17, %v1754_v47  ;;  %v6220_v17 = vadd.f32 %v1428_v58, %v1425_v18  ;;  %v2196_v18 = vmul.f32 %v7524_v34, %v5999_v48 }
 0x36f   : > { %v1762_v10 = vpop.permute.xlu1 %1761  ;;  %v1822_v56 = vpop.permute.xlu2 %1821 }
 0x370   : > { %v1767_v27 = vadd.f32 %v1762_v10, %v1753_v40  ;;  %v1776_v22 = vadd.f32 %v1774_v30, %v1768_v39  ;;  %v1844_v40 = vstv %s4405_s4  ;;  %v7523_v39 = vstv %s5406_s3  ;;  %s4413_s3 = sld [smem:[#allocation4 + $0x70]] }
 0x371   : > { %v2173_v10 = vmul.f32 %v7523_v39, %v5990_v38  ;;  %v1845_v23 = vmul.f32 %v6106_v33, %v1844_v40  ;;  %v1846_v58 = vmul.f32 %v1844_v40, %v6042_v28  ;;  %s4436_s4 = sld [smem:[#allocation4 + $0x87]] }
 0x372   : > { %v1775_v55 = vadd.f32 %v1773_v52, %v1767_v27 }
 0x374   : > { %v1789_v46 = vadd.f32 %v1784_v36, %v1775_v55  ;;  %929 = vrot.lane.b32.xlu2 %v925_v24, %s7522_s14  ;;  %v1834_v30 = vpop.permute.xlu0 %1833 }
 0x376   : > { %v1803_v51 = vadd.f32 %v1798_v49, %v1789_v46  ;;  %v1942_v40 = vstv %s4413_s3  ;;  %s6423_s3 = sld [smem:[#allocation12 + $0x7]] }
 0x377   : > { %v1786_v57 = vpop.permute.xlu1 %1785  ;;  %v1856_v61 = vpop.permute.xlu2 %1855 }
 0x378   : > { %v1790_v25 = vadd.f32 %v1786_v57, %v1776_v22  ;;  %v1811_v45 = vadd.f32 %v1809_v7, %v1803_v51 }
 0x37a   : > { %v1804_v59 = vadd.f32 %v1800_v50, %v1790_v25 }
 0x37c   : > { %1435 = vrot.lane.b32.xlu2 %v1430_v19, %s7522_s14  ;;  %v1812_v36 = vadd.f32 %v1810_v3, %v1804_v59  ;;  %v1858_v37 = vpop.permute.xlu0 %1857  ;;  %v7525_v59 = vstv %s5503_s21  ;;  %s4422_s21 = sld [smem:[#allocation4 + $0x79]] }
 0x37d   : > { %v2231_v19 = vmul.f32 %v6011_v1, %v7525_v59  ;;  %v6255_v1 = vld [vmem:[#allocation2 + $0x9] sm:$0xff] }
 0x37e   : > { %v1826_v27 = vadd.f32 %v1822_v56, %v1812_v36  ;;  %v7526_v36 = vstv %s5508_s1  ;;  %s4426_s1 = sld [smem:[#allocation4 + $0x7d]] }
 0x37f   : > { %v1820_v47 = vpop.permute.xlu1 %1819  ;;  %v1872_v12 = vpop.permute.xlu2 %1871 }
 0x380   : > { %v1825_v62 = vadd.f32 %v1820_v47, %v1811_v45  ;;  %v2246_v47 = vmul.f32 %v6020_v14, %v7526_v36  ;;  %v7527_v14 = vstv %s5544_s8  ;;  %s4435_s8 = sld [smem:[#allocation4 + $0x86]] }
 0x382   : > { %v1839_v49 = vadd.f32 %v1834_v30, %v1825_v62  ;;  %v1944_v62 = vmul.f32 %v1942_v40, %v6255_v1  ;;  %v2281_v30 = vmul.f32 %v7527_v14, %v6026_v42  ;;  %v2050_v34 = vstv %s4422_s21  ;;  %s6434_s21 = sld [smem:[#allocation12 + $0xa]] }
 0x384   : > { %2177 = vrot.lane.b32.xlu2 %v2173_v10, %s7507_s5  ;;  %v1847_v52 = vadd.f32 %v1845_v23, %v1839_v49  ;;  %v7528_v10 = vstv %s5515_s18  ;;  %s4431_s18 = sld [smem:[#allocation4 + $0x82]] }
 0x385   : > { %v2304_v23 = vmul.f32 %v7528_v10, %v6042_v28 }
 0x386   : > { %v1861_v53 = vadd.f32 %v1856_v61, %v1847_v52  ;;  %v1992_v52 = vstv %s4417_s9  ;;  %s6429_s9 = sld [smem:[#allocation4 + $0x8a]] }
 0x387   : > { %v1836_v22 = vpop.permute.xlu1 %1835  ;;  %v6230_v15 = vpop.permute.xlu2 %1911 }
 0x388   : > { %v1840_v55 = vadd.f32 %v1836_v22, %v1826_v27  ;;  %v6285_v22 = vld [vmem:[#allocation2 + $0xa] sm:$0xff] }
 0x38a   : > { %v1848_v24 = vadd.f32 %v1846_v58, %v1840_v55  ;;  %v1994_v58 = vmul.f32 %v6285_v22, %v1992_v52 }
 0x38c   : > { %v1862_v46 = vadd.f32 %v1858_v37, %v1848_v24  ;;  %2201 = vrot.lane.b32.xlu2 %v2196_v18, %s7508_s26  ;;  %v2051_v37 = vmul.f32 %v2050_v34, %v5960_v60  ;;  %v2100_v60 = vstv %s4426_s1  ;;  %s4455_s1 = sld [smem:[#allocation12 + $0xb]] }
 0x38e   : > { %v1876_v50 = vadd.f32 %v1872_v12, %v1862_v46  ;;  %v6305_v46 = vld [vmem:[#allocation2 + $0x1a] sm:$0xff] }
 0x38f   : > { %v1870_v7 = vpop.permute.xlu1 %1869  ;;  %v6237_v56 = vpop.permute.xlu2 %1927 }
 0x390   : > { %v1875_v51 = vadd.f32 %v1870_v7, %v1861_v53  ;;  %vm1878_vm14 = vcmp.ge.f32.partialorder %v1876_v50, 0.0  ;;  %v1880_v57 = vmul.f32 0.2, %v1876_v50  ;;  %v2102_v7 = vmul.f32 %v2100_v60, %v5968_v20 }
 0x391   : > { %v2158_v20 = vstv %s4431_s18  ;;  %s4442_s18 = sld [smem:[#allocation4 + $0x8d]] }
 0x392   : > { %v1879_v25 = vmul.f32 0.2, %v1875_v51  ;;  %v1882_v45 = vsel %vm1878_vm14, %v1876_v50, %v1880_v57  ;;  %vm1877_vm15 = vcmp.ge.f32.partialorder %v1875_v51, 0.0 }
 0x393   : > { %1887 = vrot.lane.b32.xlu1 %v1882_v45, %s7522_s14  ;;  %v4758_v45 = vld [vmem:[#allocation2] sm:$0xff] }
 0x394   : > { %2235 = vrot.lane.b32.xlu2 %v2231_v19, %s7508_s26  ;;  %v1881_v3 = vsel %vm1877_vm15, %v1875_v51, %v1879_v25  ;;  %v2101_v51 = vmul.f32 %v2100_v60, %v6305_v46  ;;  %v2159_v25 = vmul.f32 %v2158_v20, %v5990_v38 }
 0x395   : > { %1885 = vrot.lane.b32.xlu0 %v1881_v3, %s7522_s14  ;;  %v4759_v3 = vld [vmem:[#allocation2 + $0x8] sm:$0xff] }
 0x397   : > { %v6245_v61 = vpop.permute.xlu2 %1961 }
 0x39b   : > { %1925 = vrot.lane.b32.xlu1 %v5314_v8, %s7507_s5  ;;  %v1943_v8 = vmul.f32 %v1942_v40, %v5930_v54  ;;  %v1958_v54 = vmul.f32 %v1956_v41, %v6255_v1  ;;  %v6297_v41 = vld [vmem:[#allocation2 + $0x21] sm:$0xff] }
 0x39c   : > { %2251 = vrot.lane.b32.xlu2 %v2246_v47, %s7507_s5  ;;  %v2052_v18 = vmul.f32 %v2050_v34, %v6297_v41  ;;  %v1936_v47 = vstv %s4412_s20  ;;  %s4448_s20 = sld [smem:[#allocation12 + $0x4]] }
 0x39d   : > { %1913 = vrot.lane.b32.xlu0 %v5318_v9, %s7508_s26  ;;  %v6267_v9 = vld [vmem:[#allocation2 + $0x2] sm:$0xff] }
 0x39e   : > { %v1979_v39 = vmul.f32 %v1978_v16, %v6267_v9  ;;  %v1993_v16 = vmul.f32 %v1992_v52, %v6267_v9 }
 0x39f   : > { %v6257_v12 = vpop.permute.xlu2 %1985 }
 0x3a3   : > { %1949 = vrot.lane.b32.xlu1 %v1944_v62, %s7508_s26 }
 0x3a4   : > { %2285 = vrot.lane.b32.xlu2 %v2281_v30, %s7507_s5 }
 0x3a5   : > { %1947 = vrot.lane.b32.xlu0 %v1943_v8, %s7508_s26  ;;  %v4760_v8 = vld [vmem:[#allocation2 + $0x1] sm:$0xff] }
 0x3a7   : > { %v6269_v49 = vpop.permute.xlu2 %2019 }
 0x3ab   : > { %1983 = vrot.lane.b32.xlu1 %v1979_v39, %s7508_s26  ;;  %v1937_v39 = vmul.f32 %v4760_v8, %v1936_v47 }
 0x3ac   : > { %2309 = vrot.lane.b32.xlu2 %v2304_v23, %s7508_s26 }
 0x3ad   : > { %1963 = vrot.lane.b32.xlu0 %v1958_v54, %s7507_s5  ;;  %v2316_v54 = vstv %s6354_s17  ;;  %s4452_s17 = sld [smem:[#allocation12 + $0x8]] }
 0x3ae   : > { %v2318_v52 = vmul.f32 %v2316_v54, %v6042_v28  ;;  %v1972_v28 = vstv %s4415_s15  ;;  %s4461_s15 = sld [smem:[#allocation12 + $0x11]] }
 0x3af   : > { %v6283_v27 = vpop.permute.xlu2 %2035 }
 0x3b3   : > { %1999 = vrot.lane.b32.xlu1 %v1994_v58, %s7507_s5 }
 0x3b5   : > { %1997 = vrot.lane.b32.xlu0 %v1993_v16, %s7507_s5 }
 0x3b7   : > { %v6291_v55 = vpop.permute.xlu2 %2069 }
 0x3bb   : > { %2033 = vrot.lane.b32.xlu1 %v5326_v11, %s7507_s5  ;;  %v2087_v11 = vmul.f32 %v2086_v35, %v6305_v46  ;;  %v2160_v35 = vmul.f32 %v6072_v4, %v2158_v20 }
 0x3bd   : > { %2021 = vrot.lane.b32.xlu0 %v5331_v13, %s7508_s26  ;;  %v2066_v13 = vmul.f32 %v2064_v32, %v6297_v41 }
 0x3bf   : > { %v6299_v24 = vpop.permute.xlu2 %2093 }
 0x3c3   : > { %2057 = vrot.lane.b32.xlu1 %v2052_v18, %s7508_s26 }
 0x3c5   : > { %2055 = vrot.lane.b32.xlu0 %v2051_v37, %s7508_s26  ;;  %v2574_v37 = vstv %s6361_s27  ;;  %s4457_s27 = sld [smem:[#allocation12 + $0xd]] }
 0x3c7   : > { %v6307_v50 = vpop.permute.xlu2 %2127 }
 0x3cb   : > { %2091 = vrot.lane.b32.xlu1 %v2087_v11, %s7508_s26 }
 0x3cd   : > { %2071 = vrot.lane.b32.xlu0 %v2066_v13, %s7507_s5 }
 0x3cf   : > { %v6317_v53 = vpop.permute.xlu2 %2143 }
 0x3d3   : > { %2107 = vrot.lane.b32.xlu1 %v2102_v7, %s7507_s5 }
 0x3d5   : > { %2105 = vrot.lane.b32.xlu0 %v2101_v51, %s7507_s5 }
 0x3d7   : > { %v930_v57 = vpop.permute.xlu2 %929 }
 0x3d8   : > { %935 = vst.msk [vmem:[#allocation3 + $0x1] sm:$0xff] %vm420_vm2, %v930_v57 }
 0x3db   : > { %2141 = vrot.lane.b32.xlu1 %v5410_v63, %s7507_s5  ;;  %v2208_v63 = vstv %s4435_s8  ;;  %s6449_s8 = sld [smem:[#allocation12 + $0xe]] }
 0x3dd   : > { %2129 = vrot.lane.b32.xlu0 %v5414_v0, %s7508_s26  ;;  %v2210_v0 = vmul.f32 %v2208_v63, %v5999_v48  ;;  %v1900_v48 = vstv %s4409_s30  ;;  %s4464_s30 = sld [smem:[#allocation12 + $0x14]] }
 0x3de   : > { %v1901_v59 = vmul.f32 %v4758_v45, %v1900_v48  ;;  %v1902_v36 = vmul.f32 %v4759_v3, %v1900_v48  ;;  %v4762_v45 = vld [vmem:[#allocation2 + $0x18] sm:$0xff]  ;;  %v2044_v3 = vstv %s4421_s29  ;;  %s6565_s29 = sld [smem:[#allocation12 + $0x1c]] }
 0x3df   : > { %v1436_v32 = vpop.permute.xlu2 %1435  ;;  %v6383_v57 = vld [vmem:[#allocation3] sm:$0xff] }
 0x3e0   : > { %1441 = vst.msk [vmem:[#allocation3 + $0x21] sm:$0xff] %vm420_vm2, %v1436_v32  ;;  %v2358_v32 = vstv %s6373_s0  ;;  %s4466_s0 = sld [smem:[#allocation12 + $0x16]] }
 0x3e3   : > { %2165 = vrot.lane.b32.xlu1 %v2160_v35, %s7508_s26  ;;  %v1974_v35 = vmul.f32 %v6285_v22, %v1972_v28 }
 0x3e5   : > { %2163 = vrot.lane.b32.xlu0 %v2159_v25, %s7508_s26 }
 0x3eb   : > { %2199 = vrot.lane.b32.xlu1 %v5418_v2, %s7508_s26  ;;  %v2266_v2 = vstv %s6341_s19  ;;  %s6456_s19 = sld [smem:[#allocation12 + $0x10]] }
 0x3ec   : > { %v2268_v38 = vmul.f32 %v6100_v44, %v2266_v2  ;;  %v2267_v58 = vmul.f32 %v2266_v2, %v6026_v42  ;;  %v1973_v42 = vmul.f32 %v1972_v28, %v6267_v9  ;;  %v4764_v28 = vld [vmem:[#allocation2 + $0x22] sm:$0xff] }
 0x3ed   : > { %931 = vrot.lane.b32.xlu0 %v6189_v26, %s7522_s14  ;;  %v2209_v26 = vmul.f32 %v6079_v43, %v2208_v63  ;;  %v2317_v63 = vmul.f32 %v6106_v33, %v2316_v54 }
 0x3f3   : > { %2215 = vrot.lane.b32.xlu1 %v2210_v0, %s7507_s5  ;;  %v2008_v0 = vstv %s4418_s22  ;;  %s4470_s22 = sld [smem:[#allocation12 + $0x1a]] }
 0x3f5   : > { %1433 = vrot.lane.b32.xlu0 %v6220_v17, %s7522_s14 }
 0x3fb   : > { %2249 = vrot.lane.b32.xlu1 %v5540_v21, %s7507_s5  ;;  %v1895_v21 = vstv %s4408_s13  ;;  %s6480_s13 = sld [smem:[#allocation12 + $0x17]] }
 0x3fc   : > { %v1904_v30 = vadd.f32 %v1902_v36, %v1895_v21 }
 0x3fd   : > { %2179 = vrot.lane.b32.xlu0 %v5442_v31, %s7507_s5  ;;  %v1903_v31 = vadd.f32 %v1901_v59, %v1895_v21  ;;  %v2009_v59 = vmul.f32 %v4762_v45, %v2008_v0 }
 0x3ff   : > { %v1917_v40 = vadd.f32 %v6230_v15, %v1903_v31 }
 0x403   : > { %2273 = vrot.lane.b32.xlu1 %v2268_v38, %s7508_s26 }
 0x405   : > { %2213 = vrot.lane.b32.xlu0 %v2209_v26, %s7507_s5  ;;  %v1888_v17 = vpop.permute.xlu1 %1887  ;;  %v4761_v26 = vld [vmem:[#allocation2 + $0x20] sm:$0xff] }
 0x406   : > { %1893 = vst.msk [vmem:[#allocation3 + $0x39] sm:$0xff] %vm420_vm2, %v1888_v17  ;;  %v2010_v22 = vmul.f32 %v4761_v26, %v2008_v0 }
 0x407   : > { %v1886_v19 = vpop.permute.xlu0 %1885 }
 0x408   : > { %1892 = vst.msk [vmem:[#allocation3 + $0x31] sm:$0xff] %vm420_vm2, %v1886_v19 }
 0x40b   : > { %2307 = vrot.lane.b32.xlu1 %v5548_v29, %s7508_s26 }
 0x40d   : > { %2237 = vrot.lane.b32.xlu0 %v5553_v5, %s7508_s26  ;;  %v1926_v62 = vpop.permute.xlu1 %1925  ;;  %v1938_v5 = vmul.f32 %v1936_v47, %v6255_v1 }
 0x40e   : > { %v1931_v14 = vadd.f32 %v1926_v62, %v1917_v40  ;;  %v4763_v62 = vld [vmem:[#allocation2 + $0x19] sm:$0xff] }
 0x40f   : > { %v1914_v10 = vpop.permute.xlu0 %1913  ;;  %v6370_v18 = vld [vmem:[#allocation3 + $0x30] sm:$0xff] }
 0x410   : > { %v1918_v23 = vadd.f32 %v1914_v10, %v1904_v30  ;;  %v1939_v29 = vadd.f32 %v1937_v39, %v1931_v14  ;;  %v2575_v1 = vmul.f32 %v2574_v37, %v6370_v18  ;;  %v2046_v10 = vmul.f32 %v2044_v3, %v6297_v41 }
 0x412   : > { %v1932_v15 = vadd.f32 %v6237_v56, %v1918_v23 }
 0x413   : > { %2323 = vrot.lane.b32.xlu1 %v2318_v52, %s7507_s5  ;;  %v2080_v52 = vstv %s4424_s24  ;;  %s6568_s24 = sld [smem:[#allocation12 + $0x1d]] }
 0x414   : > { %v1940_v16 = vadd.f32 %v1938_v5, %v1932_v15 }
 0x415   : > { %2271 = vrot.lane.b32.xlu0 %v2267_v58, %s7508_s26  ;;  %v1950_v34 = vpop.permute.xlu1 %1949 }
 0x416   : > { %v1954_v51 = vadd.f32 %v1950_v34, %v1940_v16 }
 0x417   : > { %v1948_v11 = vpop.permute.xlu0 %1947 }
 0x418   : > { %v1953_v56 = vadd.f32 %v1948_v11, %v1939_v29 }
 0x41a   : > { %v1967_v13 = vadd.f32 %v6245_v61, %v1953_v56  ;;  %v2359_v61 = vmul.f32 %v2358_v32, %v6383_v57  ;;  %v2082_v56 = vmul.f32 %v4764_v28, %v2080_v52  ;;  %v2430_v28 = vstv %s6423_s3  ;;  %s6619_s3 = sld [smem:[#allocation12 + $0x6]] }
 0x41b   : > { %2579 = vrot.lane.b32.xlu1 %v2575_v1, %s7508_s26 }
 0x41c   : > { %v1975_v60 = vadd.f32 %v1973_v42, %v1967_v13  ;;  %v2116_v13 = vstv %s4427_s12  ;;  %s6573_s12 = sld [smem:[#allocation12]] }
 0x41d   : > { %2287 = vrot.lane.b32.xlu0 %v5575_v6, %s7507_s5  ;;  %v1984_v7 = vpop.permute.xlu1 %1983 }
 0x41e   : > { %v1989_v38 = vadd.f32 %v1984_v7, %v1975_v60 }
 0x41f   : > { %v1964_v20 = vpop.permute.xlu0 %1963 }
 0x420   : > { %v1968_v25 = vadd.f32 %v1964_v20, %v1954_v51  ;;  %v4765_v51 = vld [vmem:[#allocation2 + $0x38] sm:$0xff] }
 0x422   : > { %v1976_v9 = vadd.f32 %v1974_v35, %v1968_v25 }
 0x423   : > { %2363 = vrot.lane.b32.xlu1 %v2359_v61, %s7508_s26 }
 0x424   : > { %v1990_v6 = vadd.f32 %v6257_v12, %v1976_v9  ;;  %v2045_v12 = vmul.f32 %v4763_v62, %v2044_v3  ;;  %v2178_v3 = vpop.permute.xlu2 %2177 }
 0x425   : > { %2321 = vrot.lane.b32.xlu0 %v2317_v63, %s7507_s5  ;;  %v2000_v2 = vpop.permute.xlu1 %1999  ;;  %v2152_v63 = vstv %s4430_s16  ;;  %s6578_s16 = sld [smem:[#allocation13]] }
 0x426   : > { %v2004_v48 = vadd.f32 %v2000_v2, %v1990_v6  ;;  %v2154_v45 = vmul.f32 %v6072_v4, %v2152_v63 }
 0x427   : > { %v1998_v17 = vpop.permute.xlu0 %1997 }
 0x428   : > { %v2003_v21 = vadd.f32 %v1998_v17, %v1989_v38  ;;  %v2012_v19 = vadd.f32 %v2010_v22, %v2004_v48  ;;  %v4767_v38 = vld [vmem:[#allocation2 + $0x31] sm:$0xff] }
 0x429   : > { %v2153_v48 = vmul.f32 %v4767_v38, %v2152_v63 }
 0x42a   : > { %v2011_v31 = vadd.f32 %v2009_v59, %v2003_v21 }
 0x42c   : > { %v2025_v36 = vadd.f32 %v6269_v49, %v2011_v31  ;;  %v2081_v49 = vmul.f32 %v2080_v52, %v6305_v46  ;;  %v4766_v46 = vld [vmem:[#allocation2 + $0x30] sm:$0xff] }
 0x42d   : > { %v2034_v47 = vpop.permute.xlu1 %2033  ;;  %v2117_v35 = vmul.f32 %v4766_v46, %v2116_v13 }
 0x42e   : > { %v2039_v40 = vadd.f32 %v2034_v47, %v2025_v36 }
 0x42f   : > { %v2022_v14 = vpop.permute.xlu0 %2021 }
 0x430   : > { %v2026_v30 = vadd.f32 %v2022_v14, %v2012_v19  ;;  %v2047_v8 = vadd.f32 %v2045_v12, %v2039_v40  ;;  %v2188_v19 = vstv %s6401_s6  ;;  %v2372_v14 = vstv %s6407_s2  ;;  %s6590_s6 = sld [smem:[#allocation12 + $0x3]] }
 0x431   : > { %v2189_v47 = vmul.f32 %v6079_v43, %v2188_v19  ;;  %s6598_s2 = sld [smem:[#allocation12 + $0x1f]] }
 0x432   : > { %v2040_v39 = vadd.f32 %v6283_v27, %v2026_v30  ;;  %v2202_v30 = vpop.permute.xlu2 %2201 }
 0x434   : > { %v2048_v23 = vadd.f32 %v2046_v10, %v2040_v39  ;;  %v6420_v39 = vld [vmem:[#allocation3 + $0x1] sm:$0xff]  ;;  %v2408_v10 = vstv %s6410_s10  ;;  %s6601_s10 = sld [smem:[#allocation12 + $0x22]] }
 0x435   : > { %v2058_v54 = vpop.permute.xlu1 %2057 }
 0x436   : > { %v2062_v34 = vadd.f32 %v2058_v54, %v2048_v23 }
 0x437   : > { %v2056_v29 = vpop.permute.xlu0 %2055 }
 0x438   : > { %v2061_v15 = vadd.f32 %v2056_v29, %v2047_v8  ;;  %v4768_v29 = vld [vmem:[#allocation2 + $0x3a] sm:$0xff] }
 0x439   : > { %v2190_v52 = vmul.f32 %v4768_v29, %v2188_v19  ;;  %v2480_v19 = vstv %s4455_s1  ;;  %v4772_v29 = vld [vmem:[#allocation2 + $0x52] sm:$0xff]  ;;  %s6642_s1 = sld [smem:[#allocation12 + $0x25]] }
 0x43a   : > { %v2075_v5 = vadd.f32 %v6291_v55, %v2061_v15  ;;  %v2118_v55 = vmul.f32 %v4765_v51, %v2116_v13 }
 0x43c   : > { %v2083_v58 = vadd.f32 %v2081_v49, %v2075_v5  ;;  %v2409_v5 = vmul.f32 %v2408_v10, %v6420_v39 }
 0x43d   : > { %v2092_v16 = vpop.permute.xlu1 %2091 }
 0x43e   : > { %v2097_v60 = vadd.f32 %v2092_v16, %v2083_v58  ;;  %v2224_v58 = vstv %s4436_s4  ;;  %s6603_s4 = sld [smem:[#allocation12 + $0x20]] }
 0x43f   : > { %v2072_v11 = vpop.permute.xlu0 %2071 }
 0x440   : > { %v2076_v1 = vadd.f32 %v2072_v11, %v2062_v34  ;;  %v2236_v34 = vpop.permute.xlu2 %2235 }
 0x442   : > { %v2084_v27 = vadd.f32 %v2082_v56, %v2076_v1 }
 0x444   : > { %v2098_v41 = vadd.f32 %v6299_v24, %v2084_v27  ;;  %v4769_v27 = vld [vmem:[#allocation2 + $0x50] sm:$0xff] }
 0x445   : > { %v2108_v42 = vpop.permute.xlu1 %2107  ;;  %v2226_v13 = vmul.f32 %v4769_v27, %v2224_v58 }
 0x446   : > { %v2112_v7 = vadd.f32 %v2108_v42, %v2098_v41 }
 0x447   : > { %v2106_v20 = vpop.permute.xlu0 %2105 }
 0x448   : > { %v2111_v25 = vadd.f32 %v2106_v20, %v2097_v60  ;;  %v2120_v61 = vadd.f32 %v2118_v55, %v2112_v7  ;;  %v4770_v60 = vld [vmem:[#allocation2 + $0x48] sm:$0xff] }
 0x449   : > { %v2225_v7 = vmul.f32 %v4770_v60, %v2224_v58 }
 0x44a   : > { %v2119_v9 = vadd.f32 %v2117_v35, %v2111_v25  ;;  %v2260_v35 = vstv %s6429_s9  ;;  %s6627_s9 = sld [smem:[#allocation12 + $0x23]] }
 0x44c   : > { %v2133_v0 = vadd.f32 %v6307_v50, %v2119_v9  ;;  %v2466_v9 = vstv %s6434_s21  ;;  %s6637_s21 = sld [smem:[#allocation12 + $0x26]] }
 0x44d   : > { %v2142_v6 = vpop.permute.xlu1 %2141 }
 0x44e   : > { %v2147_v2 = vadd.f32 %v2142_v6, %v2133_v0  ;;  %v4771_v0 = vld [vmem:[#allocation2 + $0x49] sm:$0xff] }
 0x44f   : > { %v2130_v26 = vpop.permute.xlu0 %2129  ;;  %v2261_v6 = vmul.f32 %v4771_v0, %v2260_v35  ;;  %v2624_v0 = vstv %s6480_s13  ;;  %s6668_s13 = sld [smem:[#allocation12 + $0x2b]] }
 0x450   : > { %v2134_v24 = vadd.f32 %v2130_v26, %v2120_v61  ;;  %v2155_v22 = vadd.f32 %v2153_v48, %v2147_v2  ;;  %v2252_v2 = vpop.permute.xlu2 %2251 }
 0x452   : > { %v2148_v17 = vadd.f32 %v6317_v53, %v2134_v24 }
 0x454   : > { %v2156_v59 = vadd.f32 %v2154_v45, %v2148_v17  ;;  %v2262_v45 = vmul.f32 %v6100_v44, %v2260_v35 }
 0x455   : > { %v2166_v50 = vpop.permute.xlu1 %2165 }
 0x456   : > { %v2170_v23 = vadd.f32 %v2166_v50, %v2156_v59 }
 0x457   : > { %v2164_v21 = vpop.permute.xlu0 %2163 }
 0x458   : > { %v2169_v31 = vadd.f32 %v2164_v21, %v2155_v22 }
 0x45a   : > { %v2183_v36 = vadd.f32 %v2178_v3, %v2169_v31  ;;  %v2296_v3 = vstv %s4442_s18  ;;  %s6645_s18 = sld [smem:[#allocation12 + $0x9]] }
 0x45c   : > { %v2191_v40 = vadd.f32 %v2189_v47, %v2183_v36  ;;  %v2286_v47 = vpop.permute.xlu2 %2285 }
 0x45d   : > { %v2200_v53 = vpop.permute.xlu1 %2199 }
 0x45e   : > { %v2205_v56 = vadd.f32 %v2200_v53, %v2191_v40 }
 0x45f   : > { %v932_v62 = vpop.permute.xlu0 %931 }
 0x460   : > { %936 = vst.msk [vmem:[#allocation3 + $0x9] sm:$0xff] %vm420_vm2, %v932_v62  ;;  %v2297_v62 = vmul.f32 %v6106_v33, %v2296_v3 }
 0x465   : > { %v2216_v8 = vpop.permute.xlu1 %2215 }
 0x467   : > { %v1434_v4 = vpop.permute.xlu0 %1433  ;;  %v6412_v12 = vld [vmem:[#allocation3 + $0x8] sm:$0xff] }
 0x468   : > { %1440 = vst.msk [vmem:[#allocation3 + $0x19] sm:$0xff] %vm420_vm2, %v1434_v4  ;;  %v2374_v43 = vmul.f32 %v2372_v14, %v6412_v12  ;;  %v6431_v11 = vld [vmem:[#allocation3 + $0xa] sm:$0xff] }
 0x469   : > { %v2432_v55 = vmul.f32 %v2430_v28, %v6431_v11 }
 0x46a   : > { %2379 = vrot.lane.b32.xlu1 %v2374_v43, %s7507_s5 }
 0x46d   : > { %v2250_v41 = vpop.permute.xlu1 %2249 }
 0x46f   : > { %v2180_v54 = vpop.permute.xlu0 %2179  ;;  %v6441_v61 = vld [vmem:[#allocation3 + $0x18] sm:$0xff]  ;;  %v6447_v21 = vld [vmem:[#allocation3 + $0x20] sm:$0xff] }
 0x470   : > { %v2184_v15 = vadd.f32 %v2180_v54, %v2170_v23  ;;  %v2467_v26 = vmul.f32 %v2466_v9, %v6441_v61  ;;  %v2482_v36 = vmul.f32 %v2480_v19, %v6447_v21  ;;  %v6454_v4 = vld [vmem:[#allocation3 + $0x19] sm:$0xff]  ;;  %v6459_v43 = vmul.f32 %v2480_v19, %v6441_v61 }
 0x471   : > { %v2516_v54 = vstv %s6449_s8  ;;  %v2444_v19 = vstv %s4452_s17  ;;  %s6657_s8 = sld [smem:[#allocation12 + $0x28]] }
 0x472   : > { %v2192_v49 = vadd.f32 %v2190_v52, %v2184_v15  ;;  %2413 = vrot.lane.b32.xlu1 %v2409_v5, %s7507_s5  ;;  %v2298_v52 = vmul.f32 %v4772_v29, %v2296_v3  ;;  %v2517_v15 = vmul.f32 %v2516_v54, %v6454_v4  ;;  %v6560_v29 = vld [vmem:[#allocation3 + $0x32] sm:$0xff]  ;;  %s6692_s17 = sld [smem:[#allocation12 + $0x2f]] }
 0x474   : > { %v2206_v16 = vadd.f32 %v2202_v30, %v2192_v49  ;;  %v6462_v30 = vmul.f32 %v2466_v9, %v6447_v21  ;;  %v2310_v49 = vpop.permute.xlu2 %2309 }
 0x475   : > { %v2274_v22 = vpop.permute.xlu1 %2273 }
 0x476   : > { %v2220_v1 = vadd.f32 %v2216_v8, %v2206_v16 }
 0x477   : > { %v2214_v42 = vpop.permute.xlu0 %2213 }
 0x478   : > { %v2219_v51 = vadd.f32 %v2214_v42, %v2205_v56  ;;  %v2228_v20 = vadd.f32 %v2226_v13, %v2220_v1  ;;  %v2538_v56 = vstv %s6456_s19  ;;  %s4456_s19 = sld [smem:[#allocation12 + $0xc]] }
 0x47a   : > { %v2227_v46 = vadd.f32 %v2225_v7, %v2219_v51  ;;  %2437 = vrot.lane.b32.xlu1 %v2432_v55, %s7508_s26 }
 0x47c   : > { %v2241_v25 = vadd.f32 %v2236_v34, %v2227_v46  ;;  %v6469_v34 = vld [vmem:[#allocation3 + $0x22] sm:$0xff]  ;;  %v2588_v46 = vstv %s4464_s30  ;;  %s6666_s30 = sld [smem:[#allocation12 + $0x29]] }
 0x47d   : > { %v2308_v44 = vpop.permute.xlu1 %2307  ;;  %v2540_v42 = vmul.f32 %v2538_v56, %v6469_v34 }
 0x47e   : > { %v2255_v63 = vadd.f32 %v2250_v41, %v2241_v25  ;;  %v2589_v25 = vmul.f32 %v2588_v46, %v6370_v18 }
 0x47f   : > { %v2238_v38 = vpop.permute.xlu0 %2237 }
 0x480   : > { %v2242_v48 = vadd.f32 %v2238_v38, %v2228_v20  ;;  %v2263_v24 = vadd.f32 %v2261_v6, %v2255_v63  ;;  %v6478_v20 = vld [vmem:[#allocation3 + $0x38] sm:$0xff] }
 0x481   : > { %v2590_v35 = vmul.f32 %v2588_v46, %v6478_v20  ;;  %v2576_v9 = vmul.f32 %v2574_v37, %v6478_v20  ;;  %v6490_v63 = vld [vmem:[#allocation3 + $0x31] sm:$0xff]  ;;  %v2360_v37 = vmul.f32 %v2358_v32, %v6412_v12  ;;  %v6505_v38 = vld [vmem:[#allocation3 + $0x3a] sm:$0xff]  ;;  %v6516_v32 = vld [vmem:[#allocation3 + $0x2] sm:$0xff] }
 0x482   : > { %v2256_v17 = vadd.f32 %v2252_v2, %v2242_v48  ;;  %2471 = vrot.lane.b32.xlu1 %v2467_v26, %s7508_s26  ;;  %v2625_v6 = vmul.f32 %v2624_v0, %v6490_v63  ;;  %v2373_v2 = vmul.f32 %v2372_v14, %v6383_v57  ;;  %v6508_v26 = vld [vmem:[#allocation3 + $0x9] sm:$0xff]  ;;  %v2445_v3 = vmul.f32 %v2444_v19, %v6516_v32 }
 0x484   : > { %v2264_v59 = vadd.f32 %v2262_v45, %v2256_v17  ;;  %v2431_v45 = vmul.f32 %v2430_v28, %v6516_v32  ;;  %v2502_v28 = vstv %s4457_s27  ;;  %s6696_s27 = sld [smem:[#allocation12 + $0x2e]] }
 0x485   : > { %v2324_v16 = vpop.permute.xlu1 %2323 }
 0x486   : > { %v2278_v8 = vadd.f32 %v2274_v22, %v2264_v59  ;;  %v2394_v22 = vstv %s4448_s20  ;;  %v2410_v59 = vmul.f32 %v2408_v10, %v6508_v26  ;;  %v6534_v10 = vld [vmem:[#allocation3 + $0x21] sm:$0xff]  ;;  %s6682_s20 = sld [smem:[#allocation12 + $0x2c]] }
 0x487   : > { %v2272_v31 = vpop.permute.xlu0 %2271  ;;  %v2396_v14 = vmul.f32 %v2394_v22, %v6508_v26  ;;  %v2395_v17 = vmul.f32 %v2394_v22, %v6420_v39 }
 0x488   : > { %v2277_v50 = vadd.f32 %v2272_v31, %v2263_v24  ;;  %v2446_v31 = vmul.f32 %v2444_v19, %v6431_v11 }
 0x48a   : > { %v2291_v40 = vadd.f32 %v2286_v47, %v2277_v50  ;;  %2487 = vrot.lane.b32.xlu1 %v2482_v36, %s7507_s5  ;;  %v2504_v50 = vmul.f32 %v2502_v28, %v6534_v10  ;;  %v2503_v36 = vmul.f32 %v2502_v28, %v6454_v4  ;;  %v6540_v47 = vld [vmem:[#allocation3 + $0x1a] sm:$0xff] }
 0x48c   : > { %v2299_v53 = vadd.f32 %v2297_v62, %v2291_v40  ;;  %v2539_v40 = vmul.f32 %v2538_v56, %v6540_v47  ;;  %v2518_v62 = vmul.f32 %v2516_v54, %v6534_v10  ;;  %v2682_v56 = vstv %s6565_s29  ;;  %s6723_s29 = sld [smem:[#allocation12 + $0x18]] }
 0x48e   : > { %v2313_v27 = vadd.f32 %v2308_v44, %v2299_v53  ;;  %v2552_v44 = vstv %s4461_s15  ;;  %s6699_s15 = sld [smem:[#allocation12 + $0x12]] }
 0x48f   : > { %v2288_v23 = vpop.permute.xlu0 %2287  ;;  %v2554_v53 = vmul.f32 %v2552_v44, %v6469_v34 }
 0x490   : > { %v2292_v33 = vadd.f32 %v2288_v23, %v2278_v8  ;;  %v2610_v8 = vstv %s4466_s0  ;;  %s6708_s0 = sld [smem:[#allocation12 + $0x31]] }
 0x491   : > { %v2611_v54 = vmul.f32 %v2610_v8, %v6490_v63 }
 0x492   : > { %v2300_v5 = vadd.f32 %v2298_v52, %v2292_v33  ;;  %2521 = vrot.lane.b32.xlu1 %v2517_v15, %s7507_s5  ;;  %v2660_v15 = vstv %s4470_s22  ;;  %s6713_s22 = sld [smem:[#allocation12 + $0x15]] }
 0x494   : > { %v2314_v58 = vadd.f32 %v2310_v49, %v2300_v5  ;;  %v6570_v5 = vpop.permute.xlu1 %2579 }
 0x496   : > { %v2328_v1 = vadd.f32 %v2324_v16, %v2314_v58  ;;  %v2662_v58 = vmul.f32 %v2660_v15, %v6505_v38  ;;  %v2661_v16 = vmul.f32 %v2660_v15, %v6560_v29 }
 0x497   : > { %v2322_v13 = vpop.permute.xlu0 %2321 }
 0x498   : > { %v2327_v41 = vadd.f32 %v2322_v13, %v2313_v27  ;;  %vm2330_vm0 = vcmp.ge.f32.partialorder %v2328_v1, 0.0  ;;  %v2332_v60 = vmul.f32 0.2, %v2328_v1 }
 0x49a   : > { %v2331_v7 = vmul.f32 0.2, %v2327_v41  ;;  %2545 = vrot.lane.b32.xlu1 %v2540_v42, %s7508_s26  ;;  %v2334_v51 = vsel %vm2330_vm0, %v2328_v1, %v2332_v60  ;;  %vm2329_vm1 = vcmp.ge.f32.partialorder %v2327_v41, 0.0  ;;  %v2696_v1 = vstv %s6568_s24  ;;  %s6726_s24 = sld [smem:[#allocation12 + $0x34]] }
 0x49b   : > { %2339 = vrot.lane.b32.xlu0 %v2334_v51, %s7522_s14  ;;  %v2352_v60 = vstv %s6573_s12  ;;  %s6731_s12 = sld [smem:[#allocation12 + $0x32]] }
 0x49c   : > { %v2333_v55 = vsel %vm2329_vm1, %v2327_v41, %v2331_v7  ;;  %v2364_v7 = vpop.permute.xlu1 %2363  ;;  %v2354_v51 = vmul.f32 %v2352_v60, %v6412_v12  ;;  %v2353_v19 = vmul.f32 %v2352_v60, %v6383_v57 }
 0x49d   : > { %2337 = vrot.lane.b32.xlu2 %v2333_v55, %s7522_s14  ;;  %s6492_s14 = sld [smem:[#allocation12 + $0x19]]  ;;  %v2347_v55 = vstv %s6578_s16 }
 0x49e   : > { %v2356_v46 = vadd.f32 %v2354_v51, %v2347_v55  ;;  %s6742_s16 = sld [smem:[#allocation12 + $0x35]] }
 0x4a2   : > { %2595 = vrot.lane.b32.xlu1 %v2590_v35, %s7507_s5 }
 0x4a3   : > { %2593 = vrot.lane.b32.xlu0 %v2589_v25, %s7507_s5  ;;  %v2646_v48 = vstv %s6492_s14  ;;  %s6679_s14 = sld [smem:[#allocation12 + $0xf]] }
 0x4a4   : > { %v2648_v24 = vmul.f32 %v2646_v48, %v6505_v38  ;;  %v2647_v52 = vmul.f32 %v2646_v48, %v6560_v29 }
 0x4a5   : > { %2581 = vrot.lane.b32.xlu2 %v2576_v9, %s7508_s26 }
 0x4aa   : > { %2629 = vrot.lane.b32.xlu1 %v2625_v6, %s7507_s5 }
 0x4ab   : > { %2377 = vrot.lane.b32.xlu0 %v2373_v2, %s7507_s5 }
 0x4ad   : > { %2365 = vrot.lane.b32.xlu2 %v2360_v37, %s7508_s26 }
 0x4b2   : > { %2653 = vrot.lane.b32.xlu1 %v2648_v24, %s7508_s26 }
 0x4b3   : > { %2401 = vrot.lane.b32.xlu0 %v2396_v14, %s7508_s26 }
 0x4b5   : > { %2399 = vrot.lane.b32.xlu2 %v2395_v17, %s7508_s26 }
 0x4bb   : > { %2435 = vrot.lane.b32.xlu0 %v2431_v45, %s7508_s26  ;;  %v2718_v45 = vstv %s6598_s2  ;;  %s6757_s2 = sld [smem:[#allocation12 + $0x38]] }
 0x4bd   : > { %2415 = vrot.lane.b32.xlu2 %v2410_v59, %s7507_s5 }
 0x4c3   : > { %2451 = vrot.lane.b32.xlu0 %v2446_v31, %s7507_s5 }
 0x4c5   : > { %2449 = vrot.lane.b32.xlu2 %v2445_v3, %s7507_s5 }
 0x4cb   : > { %2485 = vrot.lane.b32.xlu0 %v6459_v43, %s7507_s5  ;;  %v2553_v43 = vmul.f32 %v2552_v44, %v6540_v47 }
 0x4cd   : > { %2473 = vrot.lane.b32.xlu2 %v6462_v30, %s7508_s26  ;;  %v6554_v30 = vld [vmem:[#allocation3 + $0x39] sm:$0xff] }
 0x4ce   : > { %v2612_v23 = vmul.f32 %v2610_v8, %v6554_v30  ;;  %v2626_v33 = vmul.f32 %v2624_v0, %v6554_v30  ;;  %v2388_v0 = vstv %s6590_s6  ;;  %s6748_s6 = sld [smem:[#allocation12 + $0x1b]] }
 0x4cf   : > { %v2390_v2 = vmul.f32 %v2388_v0, %v6508_v26 }
 0x4d3   : > { %2509 = vrot.lane.b32.xlu0 %v2504_v50, %s7508_s26 }
 0x4d5   : > { %2507 = vrot.lane.b32.xlu2 %v2503_v36, %s7508_s26  ;;  %v2355_v36 = vadd.f32 %v2353_v19, %v2347_v55  ;;  %v2460_v19 = vstv %s6645_s18  ;;  %s6802_s18 = sld [smem:[#allocation12 + $0x41]] }
 0x4db   : > { %2543 = vrot.lane.b32.xlu0 %v2539_v40, %s7508_s26 }
 0x4dc   : > { %v2380_v9 = vpop.permute.xlu1 %2379 }
 0x4dd   : > { %2523 = vrot.lane.b32.xlu2 %v2518_v62, %s7507_s5  ;;  %v2754_v62 = vstv %s6601_s10  ;;  %s6760_s10 = sld [smem:[#allocation12 + $0x37]] }
 0x4e3   : > { %2559 = vrot.lane.b32.xlu0 %v2554_v53, %s7507_s5  ;;  %v2732_v53 = vstv %s6603_s4  ;;  %s6774_s4 = sld [smem:[#allocation12 + $0x3a]] }
 0x4e4   : > { %v2414_v22 = vpop.permute.xlu1 %2413 }
 0x4e5   : > { %2557 = vrot.lane.b32.xlu2 %v2553_v43, %s7507_s5  ;;  %v2369_v43 = vadd.f32 %v2364_v7, %v2355_v36 }
 0x4eb   : > { %2617 = vrot.lane.b32.xlu0 %v2612_v23, %s7508_s26  ;;  %v2389_v23 = vmul.f32 %v2388_v0, %v6420_v39 }
 0x4ec   : > { %v2438_v15 = vpop.permute.xlu1 %2437 }
 0x4ed   : > { %2615 = vrot.lane.b32.xlu2 %v2611_v54, %s7508_s26 }
 0x4f3   : > { %2651 = vrot.lane.b32.xlu0 %v2647_v52, %s7508_s26 }
 0x4f5   : > { %2631 = vrot.lane.b32.xlu2 %v2626_v33, %s7507_s5 }
 0x4f7   : > { %v2338_v49 = vpop.permute.xlu2 %2337 }
 0x4f8   : > { %2344 = vst.msk [vmem:[#allocation3 + $0x49] sm:$0xff] %vm420_vm2, %v2338_v49 }
 0x4fb   : > { %2667 = vrot.lane.b32.xlu0 %v2662_v58, %s7507_s5 }
 0x4fd   : > { %2665 = vrot.lane.b32.xlu2 %v2661_v16, %s7507_s5 }
 0x4ff   : > { %v6583_v27 = vpop.permute.xlu2 %2581  ;;  %v6585_v13 = vld [vmem:[#allocation3 + $0x48] sm:$0xff] }
 0x500   : > { %v2683_v41 = vmul.f32 %v2682_v56, %v6585_v13  ;;  %v2697_v42 = vmul.f32 %v2696_v1, %v6585_v13  ;;  %v6624_v44 = vld [vmem:[#allocation3 + $0x49] sm:$0xff] }
 0x501   : > { %v2733_v33 = vmul.f32 %v2732_v53, %v6624_v44  ;;  %v2719_v49 = vmul.f32 %v2718_v45, %v6624_v44 }
 0x502   : > { %2687 = vrot.lane.b32.xlu1 %v2683_v41, %s7508_s26 }
 0x503   : > { %2701 = vrot.lane.b32.xlu0 %v2697_v42, %s7507_s5  ;;  %v2768_v42 = vstv %s6627_s9  ;;  %s4506_s9 = sld [smem:[#allocation12 + $0x3d]] }
 0x507   : > { %v2366_v35 = vpop.permute.xlu2 %2365 }
 0x508   : > { %v2370_v25 = vadd.f32 %v2366_v35, %v2356_v46 }
 0x50a   : > { %v2384_v6 = vadd.f32 %v2380_v9, %v2370_v25 }
 0x50c   : > { %v2392_v37 = vadd.f32 %v2390_v2, %v2384_v6  ;;  %v2472_v2 = vpop.permute.xlu1 %2471 }
 0x50d   : > { %v2340_v48 = vpop.permute.xlu0 %2339 }
 0x50e   : > { %2345 = vst.msk [vmem:[#allocation3 + $0x51] sm:$0xff] %vm420_vm2, %v2340_v48 }
 0x50f   : > { %v2400_v24 = vpop.permute.xlu2 %2399 }
 0x515   : > { %v6605_v14 = vpop.permute.xlu0 %2593  ;;  %v6607_v17 = vld [vmem:[#allocation3 + $0x51] sm:$0xff] }
 0x516   : > { %v6610_v59 = vld [vmem:[#allocation3 + $0x50] sm:$0xff]  ;;  %v2720_v31 = vmul.f32 %v2718_v45, %v6607_v17  ;;  %v2734_v9 = vmul.f32 %v2732_v53, %v6607_v17 }
 0x517   : > { %v2698_v3 = vmul.f32 %v2696_v1, %v6610_v59  ;;  %v2684_v28 = vmul.f32 %v2682_v56, %v6610_v59  ;;  %v2416_v50 = vpop.permute.xlu2 %2415  ;;  %v6621_v40 = vld [vmem:[#allocation3 + $0x4a] sm:$0xff]  ;;  %v2424_v56 = vstv %s6619_s3  ;;  %v6639_v41 = vld [vmem:[#allocation3 + $0x52] sm:$0xff]  ;;  %s6776_s3 = sld [smem:[#allocation12 + $0x1e]] }
 0x518   : > { %2725 = vrot.lane.b32.xlu0 %v2720_v31, %s7508_s26  ;;  %v2755_v52 = vmul.f32 %v2754_v62, %v6621_v40  ;;  %v2425_v7 = vmul.f32 %v2424_v56, %v6516_v32  ;;  %v2770_v46 = vmul.f32 %v2768_v42, %v6639_v41  ;;  %v2756_v35 = vmul.f32 %v2754_v62, %v6639_v41 }
 0x519   : > { %2703 = vrot.lane.b32.xlu1 %v2698_v3, %s7507_s5  ;;  %2689 = vrot.lane.b32.xlu2 %v2684_v28, %s7508_s26  ;;  %v2426_v6 = vmul.f32 %v2424_v56, %v6431_v11  ;;  %v2461_v62 = vmul.f32 %v2460_v19, %v6441_v61 }
 0x51d   : > { %v2378_v8 = vpop.permute.xlu0 %2377 }
 0x51e   : > { %v2383_v54 = vadd.f32 %v2378_v8, %v2369_v43  ;;  %v2488_v43 = vpop.permute.xlu1 %2487 }
 0x51f   : > { %v2450_v16 = vpop.permute.xlu2 %2449 }
 0x520   : > { %v2391_v58 = vadd.f32 %v2389_v23, %v2383_v54  ;;  %2759 = vrot.lane.b32.xlu0 %v2755_v52, %s7508_s26  ;;  %v2841_v54 = vstv %s6657_s8  ;;  %v2462_v52 = vmul.f32 %v2460_v19, %v6447_v21  ;;  %s6805_s8 = sld [smem:[#allocation12 + $0x40]] }
 0x521   : > { %2737 = vrot.lane.b32.xlu1 %v2733_v33, %s7507_s5  ;;  %2723 = vrot.lane.b32.xlu2 %v2719_v49, %s7508_s26  ;;  %v2843_v49 = vmul.f32 %v2841_v54, %v6508_v26 }
 0x522   : > { %v2405_v1 = vadd.f32 %v2400_v24, %v2391_v58  ;;  %v2819_v24 = vstv %s6637_s21  ;;  %s4504_s21 = sld [smem:[#allocation12 + $0x3b]] }
 0x523   : > { %v2820_v3 = vmul.f32 %v2819_v24, %v6383_v57  ;;  %v2821_v58 = vmul.f32 %v2819_v24, %v6412_v12 }
 0x524   : > { %v2419_v60 = vadd.f32 %v2414_v22, %v2405_v1  ;;  %v2805_v22 = vstv %s6642_s1  ;;  %s6794_s1 = sld [smem:[#allocation12 + $0x3e]] }
 0x525   : > { %v2402_v51 = vpop.permute.xlu0 %2401  ;;  %v2806_v28 = vmul.f32 %v2805_v22, %v6383_v57 }
 0x526   : > { %v2406_v55 = vadd.f32 %v2402_v51, %v2392_v37  ;;  %v2427_v25 = vadd.f32 %v2425_v7, %v2419_v60  ;;  %v2877_v60 = vstv %s6668_s13  ;;  %s6827_s13 = sld [smem:[#allocation12 + $0x24]] }
 0x527   : > { %v2474_v37 = vpop.permute.xlu2 %2473 }
 0x528   : > { %v2420_v0 = vadd.f32 %v2416_v50, %v2406_v55  ;;  %2775 = vrot.lane.b32.xlu0 %v2770_v46, %s7507_s5  ;;  %v2769_v50 = vmul.f32 %v2768_v42, %v6621_v40  ;;  %v2855_v42 = vstv %s6666_s30  ;;  %s6818_s30 = sld [smem:[#allocation12 + $0x43]] }
 0x529   : > { %2761 = vrot.lane.b32.xlu1 %v2756_v35, %s7508_s26  ;;  %2739 = vrot.lane.b32.xlu2 %v2734_v9, %s7507_s5  ;;  %v2856_v35 = vmul.f32 %v2855_v42, %v6420_v39 }
 0x52a   : > { %v2428_v48 = vadd.f32 %v2426_v6, %v2420_v0  ;;  %v2878_v0 = vmul.f32 %v2877_v60, %v6516_v32 }
 0x52c   : > { %v2442_v57 = vadd.f32 %v2438_v15, %v2428_v48  ;;  %v2496_v15 = vstv %s4456_s19  ;;  %s6809_s19 = sld [smem:[#allocation12 + $0x21]] }
 0x52d   : > { %v2436_v45 = vpop.permute.xlu0 %2435  ;;  %v2498_v55 = vmul.f32 %v2496_v15, %v6534_v10 }
 0x52e   : > { %v2441_v31 = vadd.f32 %v2436_v45, %v2427_v25  ;;  %v2497_v25 = vmul.f32 %v2496_v15, %v6454_v4  ;;  %v2532_v45 = vstv %s6679_s14  ;;  %s6830_s14 = sld [smem:[#allocation12 + $0x44]] }
 0x52f   : > { %v2508_v8 = vpop.permute.xlu2 %2507 }
 0x530   : > { %v2455_v36 = vadd.f32 %v2450_v16, %v2441_v31  ;;  %2824 = vrot.lane.b32.xlu0 %v2820_v3, %s7507_s5  ;;  %v2807_v16 = vmul.f32 %v2805_v22, %v6412_v12  ;;  %v2522_v12 = vpop.permute.xlu1 %2521  ;;  %v2891_v22 = vstv %s6682_s20  ;;  %v2533_v31 = vmul.f32 %v2532_v45, %v6540_v47  ;;  %s6835_s20 = sld [smem:[#allocation12 + $0x46]] }
 0x531   : > { %2810 = vrot.lane.b32.xlu1 %v2806_v28, %s7508_s26  ;;  %2773 = vrot.lane.b32.xlu2 %v2769_v50, %s7507_s5  ;;  %v2893_v28 = vmul.f32 %v2891_v22, %v6431_v11  ;;  %v2879_v50 = vmul.f32 %v2877_v60, %v6431_v11  ;;  %v2913_v11 = vstv %s6696_s27  ;;  %s346_s27 = sand.u32 1, %s4975_s25  }
 0x532   : > { %v2463_v53 = vadd.f32 %v2461_v62, %v2455_v36 }
 0x534   : > { %v2477_v7 = vadd.f32 %v2472_v2, %v2463_v53  ;;  %v2857_v53 = vmul.f32 %v2855_v42, %v6508_v26 }
 0x535   : > { %v2452_v23 = vpop.permute.xlu0 %2451 }
 0x536   : > { %v2456_v33 = vadd.f32 %v2452_v23, %v2442_v57  ;;  %v2534_v57 = vmul.f32 %v2532_v45, %v6469_v34 }
 0x537   : > { %v2524_v48 = vpop.permute.xlu2 %2523 }
 0x538   : > { %v2464_v56 = vadd.f32 %v2462_v52, %v2456_v33  ;;  %2848 = vrot.lane.b32.xlu0 %v2843_v49, %s7508_s26  ;;  %v2546_v62 = vpop.permute.xlu1 %2545  ;;  %v2568_v52 = vstv %s6699_s15  ;;  %s4294_s15 = sshll.u32 %s346_s27, 6 }
 0x539   : > { %2826 = vrot.lane.b32.xlu1 %v2821_v58, %s7507_s5  ;;  %2812 = vrot.lane.b32.xlu2 %v2807_v16, %s7508_s26  ;;  %v2914_v16 = vmul.f32 %v2913_v11, %v6441_v61  ;;  %v2569_v15 = vmul.f32 %v2568_v52, %v6370_v18  ;;  %v2570_v18 = vmul.f32 %v2568_v52, %v6478_v20 }
 0x53a   : > { %v2478_v1 = vadd.f32 %v2474_v37, %v2464_v56  ;;  %v2842_v37 = vmul.f32 %v2841_v54, %v6420_v39  ;;  %v2927_v54 = vstv %s6692_s17  ;;  %v2892_v56 = vmul.f32 %v2891_v22, %v6516_v32  ;;  %s6838_s17 = sld [smem:[#allocation13 + $0x1]] }
 0x53b   : > { %v2928_v58 = vmul.f32 %v2927_v54, %v6441_v61  ;;  %v2640_v22 = vstv %s6723_s29  ;;  %s6864_s29 = scalar_lea.vmem [#allocation15], %s4294_s15  ;;  %s7007_s15 = sld [smem:[#allocation12 + $0x5b]] }
 0x53c   : > { %v2492_v51 = vadd.f32 %v2488_v43, %v2478_v1 }
 0x53d   : > { %v2486_v46 = vpop.permute.xlu0 %2485 }
 0x53e   : > { %v2491_v9 = vadd.f32 %v2486_v46, %v2477_v7  ;;  %v2500_v6 = vadd.f32 %v2498_v55, %v2492_v51  ;;  %v2949_v7 = vstv %s6708_s0  ;;  %s6851_s0 = sld [smem:[#allocation12 + $0x27]] }
 0x53f   : > { %v2951_v46 = vmul.f32 %v2949_v7, %v6534_v10 }
 0x540   : > { %v2499_v24 = vadd.f32 %v2497_v25, %v2491_v9  ;;  %2882 = vrot.lane.b32.xlu0 %v2878_v0, %s7508_s26  ;;  %v2596_v42 = vpop.permute.xlu1 %2595  ;;  %v2929_v0 = vmul.f32 %v2927_v54, %v6447_v21  ;;  %v2999_v54 = vstv %s6742_s16  ;;  %s6881_s16 = sld [smem:[#allocation12 + $0x2a]] }
 0x541   : > { %2860 = vrot.lane.b32.xlu1 %v2856_v35, %s7507_s5  ;;  %2846 = vrot.lane.b32.xlu2 %v2842_v37, %s7508_s26  ;;  %v2604_v35 = vstv %s6713_s22  ;;  %s6857_s22 = sld [smem:[#allocation12 + $0x47]] }
 0x542   : > { %v2513_v2 = vadd.f32 %v2508_v8, %v2499_v24  ;;  %v2558_v8 = vpop.permute.xlu2 %2557 }
 0x544   : > { %v2527_v19 = vadd.f32 %v2522_v12, %v2513_v2 }
 0x545   : > { %v2510_v3 = vpop.permute.xlu0 %2509 }
 0x546   : > { %v2514_v39 = vadd.f32 %v2510_v3, %v2500_v6  ;;  %v2535_v36 = vadd.f32 %v2533_v31, %v2527_v19  ;;  %v2605_v6 = vmul.f32 %v2604_v35, %v6490_v63  ;;  %v2641_v31 = vmul.f32 %v2640_v22, %v6560_v29 }
 0x548   : > { %v2528_v43 = vadd.f32 %v2524_v48, %v2514_v39  ;;  %2898 = vrot.lane.b32.xlu0 %v2893_v28, %s7507_s5  ;;  %v2630_v2 = vpop.permute.xlu1 %2629  ;;  %v2985_v28 = vstv %s6726_s24  ;;  %s6872_s24 = sld [smem:[#allocation12 + $0x4a]] }
 0x549   : > { %2884 = vrot.lane.b32.xlu1 %v2879_v50, %s7508_s26  ;;  %2862 = vrot.lane.b32.xlu2 %v2857_v53, %s7507_s5  ;;  %v2963_v50 = vstv %s6731_s12  ;;  %s6875_s12 = sld [smem:[#allocation12 + $0x49]] }
 0x54a   : > { %v2536_v23 = vadd.f32 %v2534_v57, %v2528_v43  ;;  %v2616_v51 = vpop.permute.xlu2 %2615  ;;  %v2950_v43 = vmul.f32 %v2949_v7, %v6454_v4  ;;  %v6770_v7 = vld [vmem:[#allocation3 + $0x30] sm:$0xff] }
 0x54c   : > { %v2550_v55 = vadd.f32 %v2546_v62, %v2536_v23  ;;  %v2964_v62 = vmul.f32 %v2963_v50, %v6454_v4  ;;  %v2642_v23 = vmul.f32 %v2640_v22, %v6505_v38  ;;  %v2676_v4 = vstv %s6748_s6  ;;  %s6893_s6 = sld [smem:[#allocation12 + $0x4c]] }
 0x54d   : > { %v2544_v33 = vpop.permute.xlu0 %2543 }
 0x54e   : > { %v2549_v49 = vadd.f32 %v2544_v33, %v2535_v36 }
 0x550   : > { %v2563_v1 = vadd.f32 %v2558_v8, %v2549_v49  ;;  %2932 = vrot.lane.b32.xlu0 %v2928_v58, %s7507_s5  ;;  %v3001_v49 = vmul.f32 %v2999_v54, %v6469_v34  ;;  %v2987_v58 = vmul.f32 %v2985_v28, %v6469_v34 }
 0x551   : > { %2918 = vrot.lane.b32.xlu1 %v2914_v16, %s7508_s26  ;;  %2896 = vrot.lane.b32.xlu2 %v2892_v56, %s7507_s5  ;;  %v2965_v56 = vmul.f32 %v2963_v50, %v6534_v10  ;;  %v3107_v50 = vstv %s6794_s1  ;;  %s6939_s1 = sld [smem:[#allocation12 + $0x52]] }
 0x552   : > { %v2571_v60 = vadd.f32 %v2569_v15, %v2563_v1  ;;  %v2632_v3 = vpop.permute.xlu2 %2631  ;;  %v2677_v1 = vmul.f32 %v2676_v4, %v6585_v13 }
 0x554   : > { %v2585_v61 = vadd.f32 %v6570_v5, %v2571_v60  ;;  %v2915_v5 = vmul.f32 %v2913_v11, %v6447_v21  ;;  %v2606_v21 = vmul.f32 %v2604_v35, %v6554_v30  ;;  %v2654_v60 = vpop.permute.xlu1 %2653  ;;  %v3000_v35 = vmul.f32 %v2999_v54, %v6540_v47 }
 0x555   : > { %v2560_v12 = vpop.permute.xlu0 %2559  ;;  %v3143_v54 = vstv %s6802_s18  ;;  %s6944_s18 = sld [smem:[#allocation12 + $0x33]] }
 0x556   : > { %v2599_v25 = vadd.f32 %v6605_v14, %v2585_v61  ;;  %v2564_v9 = vadd.f32 %v2560_v12, %v2550_v55  ;;  %v3021_v61 = vstv %s6760_s10  ;;  %s6905_s10 = sld [smem:[#allocation12 + $0x4d]] }
 0x557   : > { %v3022_v12 = vmul.f32 %v3021_v61, %v6770_v7 }
 0x558   : > { %v2572_v48 = vadd.f32 %v2570_v18, %v2564_v9  ;;  %2956 = vrot.lane.b32.xlu0 %v2951_v46, %s7508_s26  ;;  %v2607_v37 = vadd.f32 %v2605_v6, %v2599_v25  ;;  %v2678_v46 = vmul.f32 %v2676_v4, %v6610_v59  ;;  %v2748_v4 = vstv %s6809_s19  ;;  %s6961_s19 = sld [smem:[#allocation12 + $0x36]] }
 0x559   : > { %2934 = vrot.lane.b32.xlu1 %v2929_v0, %s7507_s5  ;;  %2920 = vrot.lane.b32.xlu2 %v2915_v5, %s7508_s26  ;;  %v3057_v0 = vstv %s6774_s4  ;;  %v2712_v5 = vstv %s6776_s3  ;;  %s6910_s4 = sld [smem:[#allocation12 + $0x4f]] }
 0x55a   : > { %v2586_v24 = vadd.f32 %v6583_v27, %v2572_v48  ;;  %v2621_v14 = vadd.f32 %v2616_v51, %v2607_v37  ;;  %v2986_v27 = vmul.f32 %v2985_v28, %v6540_v47  ;;  %v2666_v16 = vpop.permute.xlu2 %2665  ;;  %v3035_v51 = vstv %s6757_s2  ;;  %s6898_s2 = sld [smem:[#allocation12 + $0x2d]] }
 0x55b   : > { %v3036_v18 = vmul.f32 %v3035_v51, %v6770_v7  ;;  %v2713_v22 = vmul.f32 %v2712_v5, %v6624_v44  ;;  %s6924_s3 = sld [smem:[#allocation12 + $0x50]] }
 0x55c   : > { %v2600_v45 = vadd.f32 %v2596_v42, %v2586_v24  ;;  %v2635_v19 = vadd.f32 %v2630_v2, %v2621_v14  ;;  %v3059_v24 = vmul.f32 %v3057_v0, %v6554_v30  ;;  %v3037_v14 = vmul.f32 %v3035_v51, %v6478_v20 }
 0x55d   : > { %v2618_v39 = vpop.permute.xlu0 %2617  ;;  %v3023_v2 = vmul.f32 %v3021_v61, %v6478_v20  ;;  %v3058_v20 = vmul.f32 %v3057_v0, %v6490_v63  ;;  %v3165_v61 = vstv %s6818_s30  ;;  %v2787_v0 = vld [vmem:[%s5155_s23] sm:$0xff]  ;;  %s6974_s30 = sld [smem:[#allocation12 + $0x58]] }
 0x55e   : > { %v2608_v36 = vadd.f32 %v2606_v21, %v2600_v45  ;;  %v2643_v53 = vadd.f32 %v2641_v31, %v2635_v19  ;;  %v3093_v19 = vstv %s4506_s9  ;;  %v3071_v31 = vstv %s4504_s21  ;;  %s6926_s9 = sld [smem:[#allocation12 + $0x30]] }
 0x55f   : > { %s6934_s21 = sld [smem:[#allocation12 + $0x53]] }
 0x560   : > { %v2622_v57 = vadd.f32 %v2618_v39, %v2608_v36  ;;  %2990 = vrot.lane.b32.xlu0 %v2986_v27, %s7508_s26  ;;  %v3072_v39 = vmul.f32 %v3071_v31, %v6490_v63  ;;  %v3109_v36 = vmul.f32 %v3107_v50, %v6505_v38  ;;  %v3095_v27 = vmul.f32 %v3093_v19, %v6505_v38 }
 0x561   : > { %2968 = vrot.lane.b32.xlu1 %v2964_v62, %s7507_s5  ;;  %2954 = vrot.lane.b32.xlu2 %v2950_v43, %s7508_s26  ;;  %v3073_v63 = vmul.f32 %v3071_v31, %v6554_v30  ;;  %v3129_v38 = vstv %s6805_s8  ;;  %v3144_v30 = vmul.f32 %v3143_v54, %v6585_v13  ;;  %s6956_s8 = sld [smem:[#allocation12 + $0x55]] }
 0x562   : > { %v2636_v8 = vadd.f32 %v2632_v3, %v2622_v57  ;;  %v3094_v3 = vmul.f32 %v3093_v19, %v6560_v29  ;;  %v2788_v19 = vld [vmem:[%s5155_s23 + $0x8] sm:$0xff] }
 0x564   : > { %v2644_v11 = vadd.f32 %v2642_v23, %v2636_v8  ;;  %v2714_v23 = vmul.f32 %v2712_v5, %v6607_v17 }
 0x565   : > { %v2652_v52 = vpop.permute.xlu0 %2651 }
 0x566   : > { %v2657_v33 = vadd.f32 %v2652_v52, %v2643_v53  ;;  %v2658_v34 = vadd.f32 %v2654_v60, %v2644_v11  ;;  %v3130_v52 = vmul.f32 %v3129_v38, %v6585_v13 }
 0x568   : > { %v2671_v15 = vadd.f32 %v2666_v16, %v2657_v33  ;;  %3006 = vrot.lane.b32.xlu0 %v3001_v49, %s7507_s5  ;;  %v3108_v49 = vmul.f32 %v3107_v50, %v6560_v29 }
 0x569   : > { %2992 = vrot.lane.b32.xlu1 %v2987_v58, %s7508_s26  ;;  %2970 = vrot.lane.b32.xlu2 %v2965_v56, %s7507_s5  ;;  %v2750_v56 = vmul.f32 %v2748_v4, %v6639_v41 }
 0x56a   : > { %v2679_v42 = vadd.f32 %v2677_v1, %v2671_v15 }
 0x56d   : > { %v2668_v10 = vpop.permute.xlu0 %2667 }
 0x56e   : > { %v2672_v55 = vadd.f32 %v2668_v10, %v2658_v34  ;;  %v3167_v34 = vmul.f32 %v3165_v61, %v6607_v17  ;;  %v3145_v10 = vmul.f32 %v3143_v54, %v6610_v59 }
 0x570   : > { %3040 = vrot.lane.b32.xlu0 %v3036_v18, %s7507_s5  ;;  %v2680_v25 = vadd.f32 %v2678_v46, %v2672_v55  ;;  %v3131_v18 = vmul.f32 %v3129_v38, %v6610_v59  ;;  %v2799_v46 = vstv %s6827_s13  ;;  %s6976_s13 = sld [smem:[#allocation12 + $0x56]] }
 0x571   : > { %3026 = vrot.lane.b32.xlu1 %v3022_v12, %s7508_s26  ;;  %3004 = vrot.lane.b32.xlu2 %v3000_v35, %s7507_s5 }
 0x573   : > { %v2690_v9 = vpop.permute.xlu2 %2689 }
 0x574   : > { %v2688_v6 = vpop.permute.xlu1 %2687  ;;  %v2694_v62 = vadd.f32 %v2690_v9, %v2680_v25  ;;  %v3179_v9 = vstv %s6830_s14  ;;  %s6990_s14 = sld [smem:[#allocation12 + $0x59]] }
 0x575   : > { %v2693_v48 = vadd.f32 %v2688_v6, %v2679_v42  ;;  %v2702_v37 = vpop.permute.xlu0 %2701  ;;  %v2749_v42 = vmul.f32 %v2748_v4, %v6621_v40 }
 0x577   : > { %v2707_v47 = vadd.f32 %v2702_v37, %v2693_v48  ;;  %v3201_v48 = vstv %s6835_s20  ;;  %s6992_s20 = sld [smem:[#allocation12 + $0x39]] }
 0x578   : > { %3064 = vrot.lane.b32.xlu0 %v3059_v24, %s7508_s26  ;;  %v3203_v38 = vmul.f32 %v3201_v48, %v6639_v41 }
 0x579   : > { %3042 = vrot.lane.b32.xlu1 %v3037_v14, %s7507_s5  ;;  %3028 = vrot.lane.b32.xlu2 %v3023_v2, %s7508_s26  ;;  %v2715_v45 = vadd.f32 %v2713_v22, %v2707_v47  ;;  %v4773_v14 = vld [vmem:[#allocation3] sm:$0xff]  ;;  %v2794_v2 = vstv %s6838_s17  ;;  %s7002_s17 = sld [smem:[#allocation12 + $0x5c]] }
 0x57a   : > { %v2800_v47 = vmul.f32 %v4773_v14, %v2799_v46 }
 0x57b   : > { %v2724_v21 = vpop.permute.xlu2 %2723 }
 0x57c   : > { %v2729_v58 = vadd.f32 %v2724_v21, %v2715_v45  ;;  %v3202_v45 = vmul.f32 %v3201_v48, %v6621_v40  ;;  %v3180_v21 = vmul.f32 %v3179_v9, %v6624_v44  ;;  %v2907_v48 = vstv %s6898_s2  ;;  %s7053_s2 = sld [smem:[#allocation12 + $0x62]] }
 0x580   : > { %3098 = vrot.lane.b32.xlu0 %v3094_v3, %s7508_s26  ;;  %v3166_v3 = vmul.f32 %v3165_v61, %v6624_v44  ;;  %v4774_v44 = vld [vmem:[#allocation3 + $0x8] sm:$0xff] }
 0x581   : > { %3076 = vrot.lane.b32.xlu1 %v3072_v39, %s7507_s5  ;;  %3062 = vrot.lane.b32.xlu2 %v3058_v20, %s7508_s26  ;;  %v2802_v20 = vadd.f32 %v2800_v47, %v2794_v2  ;;  %v4777_v47 = vld [vmem:[#allocation3 + $0x18] sm:$0xff] }
 0x583   : > { %v2740_v28 = vpop.permute.xlu2 %2739 }
 0x588   : > { %3114 = vrot.lane.b32.xlu0 %v3109_v36, %s7507_s5  ;;  %v2835_v36 = vstv %s6851_s0  ;;  %s7012_s0 = sld [smem:[#allocation12 + $0x3c]] }
 0x589   : > { %3100 = vrot.lane.b32.xlu1 %v3095_v27, %s7508_s26  ;;  %3078 = vrot.lane.b32.xlu2 %v3073_v63, %s7507_s5  ;;  %v2801_v63 = vmul.f32 %v4774_v44, %v2799_v46 }
 0x58a   : > { %v2726_v43 = vpop.permute.xlu0 %2725 }
 0x58b   : > { %v2704_v53 = vpop.permute.xlu1 %2703  ;;  %v2774_v8 = vpop.permute.xlu2 %2773 }
 0x58c   : > { %v2708_v57 = vadd.f32 %v2704_v53, %v2694_v62 }
 0x58e   : > { %v2716_v11 = vadd.f32 %v2714_v23, %v2708_v57  ;;  %v4775_v57 = vld [vmem:[#allocation3 + $0x1] sm:$0xff] }
 0x590   : > { %v2730_v33 = vadd.f32 %v2726_v43, %v2716_v11  ;;  %3148 = vrot.lane.b32.xlu0 %v3144_v30, %s7507_s5  ;;  %v3215_v43 = vstv %s6857_s22  ;;  %v2803_v11 = vadd.f32 %v2801_v63, %v2794_v2  ;;  %v2908_v2 = vmul.f32 %v4777_v47, %v2907_v48  ;;  %v6972_v47 = vld [vmem:[#allocation3 + $0x20] sm:$0xff]  ;;  %s7020_s22 = sld [smem:[#allocation12 + $0x5e]] }
 0x591   : > { %3134 = vrot.lane.b32.xlu1 %v3130_v52, %s7508_s26  ;;  %3112 = vrot.lane.b32.xlu2 %v3108_v49, %s7507_s5  ;;  %v3217_v54 = vmul.f32 %v3215_v43, %v6639_v41  ;;  %v3181_v52 = vmul.f32 %v3179_v9, %v6607_v17 }
 0x592   : > { %v2744_v16 = vadd.f32 %v2740_v28, %v2730_v33  ;;  %v2760_v13 = vpop.permute.xlu0 %2759 }
 0x593   : > { %v2738_v15 = vpop.permute.xlu1 %2737  ;;  %v6832_v29 = vpop.permute.xlu2 %2812 }
 0x594   : > { %v2743_v1 = vadd.f32 %v2738_v15, %v2729_v58  ;;  %v2752_v60 = vadd.f32 %v2750_v56, %v2744_v16  ;;  %v2817_v4 = vadd.f32 %v6832_v29, %v2803_v11  ;;  %v2837_v16 = vmul.f32 %v2835_v36, %v6508_v26  ;;  %v6889_v56 = vld [vmem:[#allocation3] sm:$0xff] }
 0x595   : > { %v3268_v15 = vstv %s6872_s24  ;;  %v2871_v29 = vstv %s6881_s16  ;;  %s7025_s24 = sld [smem:[#allocation12 + $0x3f]] }
 0x596   : > { %v2751_v51 = vadd.f32 %v2749_v42, %v2743_v1  ;;  %v3269_v1 = vmul.f32 %v3268_v15, %v6889_v56  ;;  %s7038_s16 = sld [smem:[#allocation12 + $0x5f]] }
 0x598   : > { %v2765_v55 = vadd.f32 %v2760_v13, %v2751_v51  ;;  %3172 = vrot.lane.b32.xlu0 %v3167_v34, %s7508_s26  ;;  %v3254_v13 = vstv %s6875_s12  ;;  %v3216_v51 = vmul.f32 %v3215_v43, %v6621_v40  ;;  %v2872_v40 = vmul.f32 %v2871_v29, %v6516_v32  ;;  %s7036_s12 = sld [smem:[#allocation12 + $0x61]] }
 0x599   : > { %3150 = vrot.lane.b32.xlu1 %v3145_v10, %s7507_s5  ;;  %3136 = vrot.lane.b32.xlu2 %v3131_v18, %s7508_s26  ;;  %v3255_v42 = vmul.f32 %v3254_v13, %v6889_v56  ;;  %v4776_v10 = vld [vmem:[#allocation3 + $0xa] sm:$0xff] }
 0x59a   : > { %v2779_v12 = vadd.f32 %v2774_v8, %v2765_v55  ;;  %v2776_v25 = vpop.permute.xlu0 %2775  ;;  %v2836_v8 = vmul.f32 %v4775_v57, %v2835_v36  ;;  %v2873_v55 = vmul.f32 %v4776_v10, %v2871_v29  ;;  %v3376_v29 = vstv %s6934_s21  ;;  %s7092_s21 = sld [smem:[#allocation12 + $0x48]] }
 0x59b   : > { %v2762_v35 = vpop.permute.xlu1 %2761  ;;  %v6854_v5 = vpop.permute.xlu2 %2846  ;;  %v2979_v10 = vstv %s6944_s18  ;;  %s7102_s18 = sld [smem:[#allocation12 + $0x6a]] }
 0x59c   : > { %vm2781_vm2 = vcmp.ge.f32.partialorder %v2779_v12, 0.0  ;;  %v2783_v59 = vmul.f32 0.2, %v2779_v12  ;;  %v2766_v6 = vadd.f32 %v2762_v35, %v2752_v60 }
 0x59e   : > { %v2785_v37 = vsel %vm2781_vm2, %v2779_v12, %v2783_v59  ;;  %v2780_v24 = vadd.f32 %v2776_v25, %v2766_v6  ;;  %v6908_v25 = vld [vmem:[#allocation3 + $0x8] sm:$0xff]  ;;  %v3290_v59 = vstv %s6893_s6  ;;  %s7047_s6 = sld [smem:[#allocation12 + $0x42]] }
 0x59f   : > { %v2789_v22 = vadd.f32 %v2787_v0, %v2785_v37  ;;  %v3292_v6 = vmul.f32 %v3290_v59, %v6508_v26 }
 0x5a0   : > { %vm2782_vm3 = vcmp.ge.f32.partialorder %v2780_v24, 0.0  ;;  %v2784_v31 = vmul.f32 0.2, %v2780_v24  ;;  %3206 = vrot.lane.b32.xlu0 %v3202_v45, %s7508_s26 }
 0x5a1   : > { %2791 = vst.msk [vmem:[%s6864_s29] sm:$0xff] %vm873_vm4, %v2789_v22  ;;  %3184 = vrot.lane.b32.xlu1 %v3180_v21, %s7507_s5  ;;  %3170 = vrot.lane.b32.xlu2 %v3166_v3, %s7508_s26  ;;  %v3304_v3 = vstv %s6905_s10  ;;  %s7064_s10 = sld [smem:[#allocation12 + $0x65]] }
 0x5a2   : > { %v2786_v39 = vsel %vm2782_vm3, %v2780_v24, %v2784_v31  ;;  %v2825_v27 = vpop.permute.xlu0 %2824  ;;  %v3256_v24 = vmul.f32 %v3254_v13, %v6908_v25  ;;  %v6921_v31 = vld [vmem:[#allocation3 + $0x1] sm:$0xff] }
 0x5a3   : > { %v2790_v28 = vadd.f32 %v2788_v19, %v2786_v39  ;;  %v2811_v50 = vpop.permute.xlu1 %2810  ;;  %v2863_v53 = vpop.permute.xlu2 %2862  ;;  %v3326_v19 = vstv %s6910_s4  ;;  %v3291_v63 = vmul.f32 %v3290_v59, %v6921_v31  ;;  %s7069_s4 = sld [smem:[#allocation12 + $0x64]] }
 0x5a4   : > { %v2816_v62 = vadd.f32 %v2811_v50, %v2802_v20  ;;  %v4778_v20 = vld [vmem:[#allocation3 + $0x20] sm:$0xff]  ;;  %v3327_v36 = vmul.f32 %v3326_v19, %v6516_v32  ;;  %v3340_v32 = vstv %s6924_s3  ;;  %s7073_s3 = sld [smem:[#allocation12 + $0x45]] }
 0x5a5   : > { %2792 = vst.msk [vmem:[%s6864_s29 + $0x8] sm:$0xff] %vm873_vm4, %v2790_v28  ;;  %v2909_v28 = vmul.f32 %v4778_v20, %v2907_v48  ;;  %v4784_v48 = vld [vmem:[#allocation3 + $0x1a] sm:$0xff] }
 0x5a6   : > { %v2830_v23 = vadd.f32 %v2825_v27, %v2816_v62  ;;  %v3305_v27 = vmul.f32 %v3304_v3, %v6921_v31 }
 0x5a8   : > { %v2838_v30 = vadd.f32 %v2836_v8, %v2830_v23  ;;  %3222 = vrot.lane.b32.xlu0 %v3217_v54, %s7507_s5  ;;  %v6936_v8 = vld [vmem:[#allocation3 + $0xa] sm:$0xff]  ;;  %v2943_v23 = vstv %s6926_s9  ;;  %v4779_v54 = vld [vmem:[#allocation3 + $0x19] sm:$0xff]  ;;  %s7083_s9 = sld [smem:[#allocation12 + $0x67]] }
 0x5a9   : > { %3208 = vrot.lane.b32.xlu1 %v3203_v38, %s7508_s26  ;;  %3186 = vrot.lane.b32.xlu2 %v3181_v52, %s7507_s5  ;;  %v2944_v38 = vmul.f32 %v4779_v54, %v2943_v23  ;;  %v3328_v52 = vmul.f32 %v3326_v19, %v6936_v8 }
 0x5aa   : > { %v2849_v49 = vpop.permute.xlu0 %2848  ;;  %v2852_v34 = vadd.f32 %v6854_v5, %v2838_v30  ;;  %v3270_v5 = vmul.f32 %v3268_v15, %v6908_v25  ;;  %v3342_v30 = vmul.f32 %v3340_v32, %v6936_v8 }
 0x5ab   : > { %v2827_v33 = vpop.permute.xlu1 %2826  ;;  %v2897_v41 = vpop.permute.xlu2 %2896 }
 0x5ac   : > { %v2831_v58 = vadd.f32 %v2827_v33, %v2817_v4  ;;  %v6946_v33 = vld [vmem:[#allocation3 + $0x9] sm:$0xff] }
 0x5ae   : > { %v2839_v17 = vadd.f32 %v2837_v16, %v2831_v58 }
 0x5b0   : > { %v2853_v60 = vadd.f32 %v2849_v49, %v2839_v17  ;;  %3273 = vrot.lane.b32.xlu0 %v3269_v1, %s7507_s5  ;;  %v3306_v49 = vmul.f32 %v6946_v33, %v3304_v3  ;;  %v4781_v17 = vld [vmem:[#allocation3 + $0x21] sm:$0xff] }
 0x5b1   : > { %3259 = vrot.lane.b32.xlu1 %v3255_v42, %s7508_s26  ;;  %3220 = vrot.lane.b32.xlu2 %v3216_v51, %s7507_s5  ;;  %v2945_v1 = vmul.f32 %v4781_v17, %v2943_v23  ;;  %v6952_v42 = vld [vmem:[#allocation3 + $0x18] sm:$0xff]  ;;  %v3412_v23 = vstv %s6976_s13  ;;  %s7139_s13 = sld [smem:[#allocation12 + $0x6e]] }
 0x5b2   : > { %v2867_v61 = vadd.f32 %v2863_v53, %v2853_v60  ;;  %v2883_v12 = vpop.permute.xlu0 %2882  ;;  %v3362_v60 = vstv %s6939_s1  ;;  %s7094_s1 = sld [smem:[#allocation12 + $0x68]] }
 0x5b3   : > { %v2861_v18 = vpop.permute.xlu1 %2860  ;;  %v2921_v35 = vpop.permute.xlu2 %2920  ;;  %v3364_v3 = vmul.f32 %v3362_v60, %v6972_v47 }
 0x5b4   : > { %v2866_v46 = vadd.f32 %v2861_v18, %v2852_v34  ;;  %v2875_v9 = vadd.f32 %v2873_v55, %v2867_v61  ;;  %v3377_v61 = vmul.f32 %v3376_v29, %v6952_v42  ;;  %v3363_v34 = vmul.f32 %v3362_v60, %v6952_v42  ;;  %v6963_v18 = vld [vmem:[#allocation3 + $0x2] sm:$0xff] }
 0x5b6   : > { %v2874_v0 = vadd.f32 %v2872_v40, %v2866_v46  ;;  %v4783_v40 = vld [vmem:[#allocation3 + $0x22] sm:$0xff] }
 0x5b8   : > { %v2888_v37 = vadd.f32 %v2883_v12, %v2874_v0  ;;  %3297 = vrot.lane.b32.xlu0 %v3292_v6, %s7508_s26  ;;  %v3341_v12 = vmul.f32 %v6963_v18, %v3340_v32  ;;  %v3434_v32 = vstv %s6974_s30  ;;  %s7117_s30 = sld [smem:[#allocation12 + $0x6b]] }
 0x5b9   : > { %3275 = vrot.lane.b32.xlu1 %v3270_v5, %s7507_s5  ;;  %3261 = vrot.lane.b32.xlu2 %v3256_v24, %s7508_s26  ;;  %v6969_v24 = vld [vmem:[#allocation3 + $0x21] sm:$0xff] }
 0x5ba   : > { %v2902_v14 = vadd.f32 %v2897_v41, %v2888_v37  ;;  %v2899_v45 = vpop.permute.xlu0 %2898  ;;  %v2980_v37 = vmul.f32 %v4784_v48, %v2979_v10 }
 0x5bb   : > { %v2885_v22 = vpop.permute.xlu1 %2884  ;;  %v2955_v26 = vpop.permute.xlu2 %2954 }
 0x5bc   : > { %v2889_v21 = vadd.f32 %v2885_v22, %v2875_v9  ;;  %v2910_v39 = vadd.f32 %v2908_v2, %v2902_v14  ;;  %v2981_v9 = vmul.f32 %v4783_v40, %v2979_v10  ;;  %v3398_v14 = vstv %s6956_s8  ;;  %s7105_s8 = sld [smem:[#allocation13 + $0x2]] }
 0x5be   : > { %v2903_v50 = vadd.f32 %v2899_v45, %v2889_v21  ;;  %v3400_v45 = vmul.f32 %v3398_v14, %v6969_v24  ;;  %v3378_v21 = vmul.f32 %v3376_v29, %v6972_v47 }
 0x5c0   : > { %v2911_v44 = vadd.f32 %v2909_v28, %v2903_v50  ;;  %3331 = vrot.lane.b32.xlu0 %v3327_v36, %s7508_s26 }
 0x5c1   : > { %3309 = vrot.lane.b32.xlu1 %v3305_v27, %s7507_s5  ;;  %3295 = vrot.lane.b32.xlu2 %v3291_v63, %s7508_s26  ;;  %v6988_v63 = vld [vmem:[#allocation3 + $0x19] sm:$0xff] }
 0x5c2   : > { %v2933_v53 = vpop.permute.xlu0 %2932  ;;  %v2925_v58 = vadd.f32 %v2921_v35, %v2911_v44  ;;  %v6986_v44 = vld [vmem:[#allocation3 + $0x1a] sm:$0xff] }
 0x5c3   : > { %v2919_v62 = vpop.permute.xlu1 %2918  ;;  %v2971_v57 = vpop.permute.xlu2 %2970  ;;  %v3435_v54 = vmul.f32 %v3434_v32, %v6986_v44 }
 0x5c4   : > { %v2924_v43 = vadd.f32 %v2919_v62, %v2910_v39 }
 0x5c6   : > { %v2938_v11 = vadd.f32 %v2933_v53, %v2924_v43  ;;  %v4785_v53 = vld [vmem:[#allocation3 + $0x38] sm:$0xff] }
 0x5c8   : > { %v2946_v4 = vadd.f32 %v2944_v38, %v2938_v11  ;;  %3347 = vrot.lane.b32.xlu0 %v3342_v30, %s7507_s5  ;;  %v3413_v38 = vmul.f32 %v3412_v23, %v6988_v63  ;;  %v3399_v30 = vmul.f32 %v3398_v14, %v6988_v63 }
 0x5c9   : > { %3333 = vrot.lane.b32.xlu1 %v3328_v52, %s7508_s26  ;;  %3311 = vrot.lane.b32.xlu2 %v3306_v49, %s7507_s5 }
 0x5ca   : > { %v2957_v16 = vpop.permute.xlu0 %2956  ;;  %v2960_v35 = vadd.f32 %v2955_v26, %v2946_v4  ;;  %v3015_v26 = vstv %s6961_s19  ;;  %s7113_s19 = sld [smem:[#allocation12 + $0x4b]] }
 0x5cb   : > { %v2935_v41 = vpop.permute.xlu1 %2934  ;;  %v3005_v13 = vpop.permute.xlu2 %3004  ;;  %v3016_v20 = vmul.f32 %v3015_v26, %v6770_v7  ;;  %v3017_v43 = vmul.f32 %v4785_v53, %v3015_v26 }
 0x5cc   : > { %v2939_v15 = vadd.f32 %v2935_v41, %v2925_v58  ;;  %v7004_v41 = vld [vmem:[#allocation3 + $0x22] sm:$0xff] }
 0x5cd   : > { %v3436_v60 = vmul.f32 %v3434_v32, %v7004_v41 }
 0x5ce   : > { %v2947_v51 = vadd.f32 %v2945_v1, %v2939_v15  ;;  %v3051_v15 = vstv %s6992_s20  ;;  %s7152_s20 = sld [smem:[#allocation12 + $0x4e]] }
 0x5d0   : > { %v2961_v55 = vadd.f32 %v2957_v16, %v2947_v51  ;;  %3381 = vrot.lane.b32.xlu0 %v3377_v61, %s7507_s5  ;;  %v3448_v16 = vstv %s6990_s14  ;;  %v3414_v61 = vmul.f32 %v3412_v23, %v6969_v24  ;;  %s7145_s14 = sld [smem:[#allocation12 + $0x6d]] }
 0x5d1   : > { %3367 = vrot.lane.b32.xlu1 %v3363_v34, %s7508_s26  ;;  %3345 = vrot.lane.b32.xlu2 %v3341_v12, %s7507_s5  ;;  %v3450_v29 = vmul.f32 %v3448_v16, %v7004_v41 }
 0x5d2   : > { %v2975_v46 = vadd.f32 %v2971_v57, %v2961_v55  ;;  %v2991_v59 = vpop.permute.xlu0 %2990 }
 0x5d3   : > { %v2969_v0 = vpop.permute.xlu1 %2968  ;;  %v3029_v5 = vpop.permute.xlu2 %3028 }
 0x5d4   : > { %v2974_v6 = vadd.f32 %v2969_v0, %v2960_v35  ;;  %v2983_v2 = vadd.f32 %v2981_v9, %v2975_v46  ;;  %v4787_v35 = vld [vmem:[#allocation3 + $0x39] sm:$0xff]  ;;  %v3484_v9 = vstv %s7002_s17  ;;  %v3470_v0 = vstv %s7007_s15  ;;  %s7162_s17 = sld [smem:[#allocation12 + $0x70]] }
 0x5d5   : > { %v3053_v40 = vmul.f32 %v4787_v35, %v3051_v15  ;;  %v3471_v48 = vmul.f32 %v3470_v0, %v6770_v7  ;;  %s7167_s15 = sld [smem:[#allocation12 + $0x51]] }
 0x5d6   : > { %v2982_v22 = vadd.f32 %v2980_v37, %v2974_v6  ;;  %v3485_v6 = vmul.f32 %v3484_v9, %v6770_v7  ;;  %v3087_v37 = vstv %s7012_s0  ;;  %s7175_s0 = sld [smem:[#allocation12 + $0x71]] }
 0x5d8   : > { %v2996_v19 = vadd.f32 %v2991_v59, %v2982_v22  ;;  %3405 = vrot.lane.b32.xlu0 %v3400_v45, %s7508_s26  ;;  %v4788_v45 = vld [vmem:[#allocation3 + $0x3a] sm:$0xff] }
 0x5d9   : > { %3383 = vrot.lane.b32.xlu1 %v3378_v21, %s7507_s5  ;;  %3369 = vrot.lane.b32.xlu2 %v3364_v3, %s7508_s26  ;;  %v3089_v21 = vmul.f32 %v4788_v45, %v3087_v37 }
 0x5da   : > { %v3010_v39 = vadd.f32 %v3005_v13, %v2996_v19  ;;  %v3007_v50 = vpop.permute.xlu0 %3006  ;;  %v4786_v13 = vld [vmem:[#allocation3 + $0x31] sm:$0xff] }
 0x5db   : > { %v2993_v28 = vpop.permute.xlu1 %2992  ;;  %v3063_v27 = vpop.permute.xlu2 %3062  ;;  %v3052_v17 = vmul.f32 %v4786_v13, %v3051_v15  ;;  %v4791_v13 = vld [vmem:[#allocation3 + $0x50] sm:$0xff] }
 0x5dc   : > { %v2997_v36 = vadd.f32 %v2993_v28, %v2983_v2  ;;  %v3018_v62 = vadd.f32 %v3016_v20, %v3010_v39  ;;  %v4789_v39 = vld [vmem:[#allocation3 + $0x32] sm:$0xff] }
 0x5dd   : > { %v3088_v20 = vmul.f32 %v4789_v39, %v3087_v37  ;;  %v7031_v28 = vld [vmem:[#allocation3 + $0x39] sm:$0xff] }
 0x5de   : > { %v3011_v57 = vadd.f32 %v3007_v50, %v2997_v36  ;;  %v3506_v50 = vstv %s7020_s22  ;;  %v7034_v36 = vld [vmem:[#allocation3 + $0x38] sm:$0xff]  ;;  %s7180_s22 = sld [smem:[#allocation12 + $0x73]] }
 0x5df   : > { %v3472_v23 = vmul.f32 %v3470_v0, %v7034_v36  ;;  %v3556_v0 = vstv %s7053_s2  ;;  %s7215_s2 = sld [smem:[#allocation12 + $0x57]] }
 0x5e0   : > { %v3019_v11 = vadd.f32 %v3017_v43, %v3011_v57  ;;  %3439 = vrot.lane.b32.xlu0 %v3435_v54, %s7508_s26  ;;  %v3486_v43 = vmul.f32 %v3484_v9, %v7034_v36  ;;  %v3123_v57 = vstv %s7025_s24  ;;  %v7066_v9 = vld [vmem:[#allocation3 + $0x3a] sm:$0xff]  ;;  %s7195_s24 = sld [smem:[#allocation12 + $0x74]] }
 0x5e1   : > { %3417 = vrot.lane.b32.xlu1 %v3413_v38, %s7507_s5  ;;  %3403 = vrot.lane.b32.xlu2 %v3399_v30, %s7508_s26  ;;  %v4790_v38 = vld [vmem:[#allocation3 + $0x48] sm:$0xff]  ;;  %v3558_v37 = vmul.f32 %v3556_v0, %v7066_v9 }
 0x5e2   : > { %v3041_v4 = vpop.permute.xlu0 %3040  ;;  %v3033_v34 = vadd.f32 %v3029_v5, %v3019_v11  ;;  %v3449_v5 = vmul.f32 %v3448_v16, %v6986_v44  ;;  %v3124_v11 = vmul.f32 %v4790_v38, %v3123_v57  ;;  %v7051_v16 = vld [vmem:[#allocation3 + $0x31] sm:$0xff] }
 0x5e3   : > { %v3027_v52 = vpop.permute.xlu1 %3026  ;;  %v3079_v58 = vpop.permute.xlu2 %3078  ;;  %v4794_v38 = vld [vmem:[#allocation3 + $0x52] sm:$0xff] }
 0x5e4   : > { %v3032_v49 = vadd.f32 %v3027_v52, %v3018_v62 }
 0x5e6   : > { %v3046_v1 = vadd.f32 %v3041_v4, %v3032_v49 }
 0x5e8   : > { %v3054_v51 = vadd.f32 %v3052_v17, %v3046_v1  ;;  %3455 = vrot.lane.b32.xlu0 %v3450_v29, %s7507_s5  ;;  %v3125_v17 = vmul.f32 %v4791_v13, %v3123_v57  ;;  %v3542_v29 = vstv %s7036_s12  ;;  %v3195_v57 = vstv %s7073_s3  ;;  %v4795_v13 = vld [vmem:[#allocation3 + $0x4a] sm:$0xff]  ;;  %s7197_s12 = sld [smem:[#allocation12 + $0x54]] }
 0x5e9   : > { %3441 = vrot.lane.b32.xlu1 %v3436_v60, %s7508_s26  ;;  %3419 = vrot.lane.b32.xlu2 %v3414_v61, %s7507_s5  ;;  %v3520_v60 = vstv %s7038_s16  ;;  %s7206_s16 = sld [smem:[#allocation12 + $0x76]] }
 0x5ea   : > { %v3065_v55 = vpop.permute.xlu0 %3064  ;;  %v3068_v22 = vadd.f32 %v3063_v27, %v3054_v51  ;;  %v3508_v27 = vmul.f32 %v3506_v50, %v7031_v28  ;;  %v3521_v61 = vmul.f32 %v3520_v60, %v7051_v16  ;;  %s7238_s3 = sld [smem:[#allocation12 + $0x7a]] }
 0x5eb   : > { %v3043_v10 = vpop.permute.xlu1 %3042  ;;  %v3113_v46 = vpop.permute.xlu2 %3112 }
 0x5ec   : > { %v3047_v12 = vadd.f32 %v3043_v10, %v3033_v34  ;;  %v3507_v10 = vmul.f32 %v3506_v50, %v7051_v16  ;;  %v3592_v50 = vstv %s7064_s10  ;;  %s7224_s10 = sld [smem:[#allocation12 + $0x79]] }
 0x5ee   : > { %v3055_v59 = vadd.f32 %v3053_v40, %v3047_v12  ;;  %v3159_v12 = vstv %s7047_s6  ;;  %s7209_s6 = sld [smem:[#allocation12 + $0x77]] }
 0x5f0   : > { %v3069_v14 = vadd.f32 %v3065_v55, %v3055_v59  ;;  %3489 = vrot.lane.b32.xlu0 %v3485_v6, %s7507_s5  ;;  %v4792_v59 = vld [vmem:[#allocation3 + $0x49] sm:$0xff] }
 0x5f1   : > { %3475 = vrot.lane.b32.xlu1 %v3471_v48, %s7508_s26  ;;  %3453 = vrot.lane.b32.xlu2 %v3449_v5, %s7507_s5  ;;  %v3160_v6 = vmul.f32 %v4792_v59, %v3159_v12  ;;  %v4517_v59 = vld [vmem:[%s5155_s23 + $0x10] sm:$0xff] }
 0x5f2   : > { %v3083_v2 = vadd.f32 %v3079_v58, %v3069_v14  ;;  %v3099_v7 = vpop.permute.xlu0 %3098  ;;  %v7049_v58 = vld [vmem:[#allocation3 + $0x32] sm:$0xff]  ;;  %v3544_v14 = vmul.f32 %v3542_v29, %v7066_v9 }
 0x5f3   : > { %v3077_v26 = vpop.permute.xlu1 %3076  ;;  %v3137_v3 = vpop.permute.xlu2 %3136  ;;  %v3543_v51 = vmul.f32 %v3542_v29, %v7049_v58  ;;  %v7100_v29 = vld [vmem:[#allocation3 + $0x50] sm:$0xff] }
 0x5f4   : > { %v3082_v19 = vadd.f32 %v3077_v26, %v3068_v22  ;;  %v3091_v62 = vadd.f32 %v3089_v21, %v3083_v2  ;;  %v3522_v2 = vmul.f32 %v3520_v60, %v7031_v28 }
 0x5f6   : > { %v3090_v53 = vadd.f32 %v3088_v20, %v3082_v19  ;;  %v4793_v19 = vld [vmem:[#allocation3 + $0x51] sm:$0xff]  ;;  %v7079_v20 = vld [vmem:[#allocation3 + $0x48] sm:$0xff] }
 0x5f7   : > { %v3161_v39 = vmul.f32 %v4793_v19, %v3159_v12 }
 0x5f8   : > { %v3104_v32 = vadd.f32 %v3099_v7, %v3090_v53  ;;  %3513 = vrot.lane.b32.xlu0 %v3508_v27, %s7508_s26  ;;  %v3593_v27 = vmul.f32 %v3592_v50, %v7079_v20 }
 0x5f9   : > { %3491 = vrot.lane.b32.xlu1 %v3486_v43, %s7507_s5  ;;  %3477 = vrot.lane.b32.xlu2 %v3472_v23, %s7508_s26 }
 0x5fa   : > { %v3118_v54 = vadd.f32 %v3113_v46, %v3104_v32  ;;  %v3115_v52 = vpop.permute.xlu0 %3114 }
 0x5fb   : > { %v3101_v30 = vpop.permute.xlu1 %3100  ;;  %v3171_v49 = vpop.permute.xlu2 %3170 }
 0x5fc   : > { %v3105_v4 = vadd.f32 %v3101_v30, %v3091_v62  ;;  %v3126_v15 = vadd.f32 %v3124_v11, %v3118_v54  ;;  %v3578_v62 = vstv %s7069_s4  ;;  %v3197_v11 = vmul.f32 %v4794_v38, %v3195_v57  ;;  %s7229_s4 = sld [smem:[#allocation12 + $0x5a]] }
 0x5fd   : > { %v3579_v43 = vmul.f32 %v3578_v62, %v7079_v20 }
 0x5fe   : > { %v3119_v1 = vadd.f32 %v3115_v52, %v3105_v4 }
 0x600   : > { %v3127_v34 = vadd.f32 %v3125_v17, %v3119_v1  ;;  %3547 = vrot.lane.b32.xlu0 %v3543_v51, %s7508_s26  ;;  %v3196_v17 = vmul.f32 %v4795_v13, %v3195_v57  ;;  %v7098_v1 = vld [vmem:[#allocation3 + $0x51] sm:$0xff]  ;;  %v3614_v51 = vstv %s7083_s9  ;;  %s7240_s9 = sld [smem:[#allocation12 + $0x7c]] }
 0x601   : > { %3525 = vrot.lane.b32.xlu1 %v3521_v61, %s7507_s5  ;;  %3511 = vrot.lane.b32.xlu2 %v3507_v10, %s7508_s26  ;;  %v3616_v61 = vmul.f32 %v3614_v51, %v7098_v1 }
 0x602   : > { %v3149_v46 = vpop.permute.xlu0 %3148  ;;  %v3141_v22 = vadd.f32 %v3137_v3, %v3127_v34  ;;  %v3557_v3 = vmul.f32 %v3556_v0, %v7049_v58  ;;  %v3594_v34 = vmul.f32 %v3592_v50, %v7100_v29  ;;  %v3628_v0 = vstv %s7094_s1  ;;  %v4518_v50 = vld [vmem:[%s5155_s23 + $0x18] sm:$0xff]  ;;  %s7251_s1 = sld [smem:[#allocation12 + $0x5d]] }
 0x603   : > { %v3135_v55 = vpop.permute.xlu1 %3134  ;;  %v3187_v40 = vpop.permute.xlu2 %3186 }
 0x604   : > { %v3140_v35 = vadd.f32 %v3135_v55, %v3126_v15  ;;  %v3580_v55 = vmul.f32 %v3578_v62, %v7100_v29 }
 0x606   : > { %v3154_v48 = vadd.f32 %v3149_v46, %v3140_v35  ;;  %v3248_v46 = vstv %s7092_s21  ;;  %s7249_s21 = sld [smem:[#allocation12 + $0x7d]] }
 0x608   : > { %v3162_v5 = vadd.f32 %v3160_v6, %v3154_v48  ;;  %3563 = vrot.lane.b32.xlu0 %v3558_v37, %s7507_s5 }
 0x609   : > { %3549 = vrot.lane.b32.xlu1 %v3544_v14, %s7508_s26  ;;  %3527 = vrot.lane.b32.xlu2 %v3522_v2, %s7507_s5  ;;  %v7122_v14 = vld [vmem:[#allocation3 + $0x4a] sm:$0xff] }
 0x60a   : > { %v3173_v21 = vpop.permute.xlu0 %3172  ;;  %v3176_v54 = vadd.f32 %v3171_v49, %v3162_v5  ;;  %v3650_v5 = vstv %s7102_s18  ;;  %v7125_v2 = vld [vmem:[#allocation3 + $0x49] sm:$0xff]  ;;  %s7262_s18 = sld [smem:[#allocation12 + $0x7f]] }
 0x60b   : > { %v3151_v45 = vpop.permute.xlu1 %3150  ;;  %v3221_v7 = vpop.permute.xlu2 %3220  ;;  %v3651_v19 = vmul.f32 %v3650_v5, %v7122_v14 }
 0x60c   : > { %v3155_v26 = vadd.f32 %v3151_v45, %v3141_v22 }
 0x60e   : > { %v3163_v53 = vadd.f32 %v3161_v39, %v3155_v26  ;;  %v3243_v26 = vstv %s7105_s8  ;;  %v3629_v39 = vmul.f32 %v3628_v0, %v7125_v2  ;;  %s7265_s8 = sld [smem:[#allocation12 + $0x80]] }
 0x610   : > { %v3177_v32 = vadd.f32 %v3173_v21, %v3163_v53  ;;  %3597 = vrot.lane.b32.xlu0 %v3593_v27, %s7507_s5  ;;  %v3249_v21 = vmul.f32 %v3248_v46, %v6889_v56  ;;  %v3615_v53 = vmul.f32 %v3614_v51, %v7125_v2 }
 0x611   : > { %3583 = vrot.lane.b32.xlu1 %v3579_v43, %s7508_s26  ;;  %3561 = vrot.lane.b32.xlu2 %v3557_v3, %s7507_s5  ;;  %v3284_v3 = vstv %s7113_s19  ;;  %s7271_s19 = sld [smem:[#allocation12 + $0x60]] }
 0x612   : > { %v3191_v23 = vadd.f32 %v3187_v40, %v3177_v32  ;;  %v3207_v52 = vpop.permute.xlu0 %3206  ;;  %v3251_v43 = vadd.f32 %v3249_v21, %v3243_v26 }
 0x613   : > { %v3185_v30 = vpop.permute.xlu1 %3184  ;;  %v7096_v15 = vpop.permute.xlu2 %3261 }
 0x614   : > { %v3190_v4 = vadd.f32 %v3185_v30, %v3176_v54  ;;  %v3199_v49 = vadd.f32 %v3197_v11, %v3191_v23  ;;  %v3250_v54 = vmul.f32 %v3248_v46, %v6908_v25  ;;  %v7142_v30 = vld [vmem:[#allocation3 + $0x52] sm:$0xff] }
 0x616   : > { %v3198_v60 = vadd.f32 %v3196_v17, %v3190_v4  ;;  %v3285_v4 = vmul.f32 %v3284_v3, %v6921_v31 }
 0x618   : > { %v3212_v10 = vadd.f32 %v3207_v52, %v3198_v60  ;;  %3621 = vrot.lane.b32.xlu0 %v3616_v61, %s7508_s26  ;;  %v3664_v52 = vstv %s7117_s30  ;;  %v3252_v60 = vadd.f32 %v3250_v54, %v3243_v26  ;;  %v3630_v61 = vmul.f32 %v3628_v0, %v7098_v1  ;;  %s7282_s30 = sld [smem:[#allocation12 + $0x82]] }
 0x619   : > { %3599 = vrot.lane.b32.xlu1 %v3594_v34, %s7507_s5  ;;  %3585 = vrot.lane.b32.xlu2 %v3580_v55, %s7508_s26  ;;  %v3666_v17 = vmul.f32 %v3664_v52, %v7142_v30 }
 0x61a   : > { %v3226_v12 = vadd.f32 %v3221_v7, %v3212_v10  ;;  %v3223_v40 = vpop.permute.xlu0 %3222  ;;  %v3266_v34 = vadd.f32 %v7096_v15, %v3252_v60 }
 0x61b   : > { %v3209_v35 = vpop.permute.xlu1 %3208  ;;  %v7120_v37 = vpop.permute.xlu2 %3295 }
 0x61c   : > { %vm3228_vm5 = vcmp.ge.f32.partialorder %v3226_v12, 0.0  ;;  %v3230_v6 = vmul.f32 0.2, %v3226_v12  ;;  %v3213_v48 = vadd.f32 %v3209_v35, %v3199_v49  ;;  %v3652_v49 = vmul.f32 %v3650_v5, %v7142_v30 }
 0x61d   : > { %v3286_v35 = vmul.f32 %v6946_v33, %v3284_v3  ;;  %v3320_v5 = vstv %s7152_s20  ;;  %s7298_s20 = sld [smem:[#allocation12 + $0x85]] }
 0x61e   : > { %v3232_v22 = vsel %vm3228_vm5, %v3226_v12, %v3230_v6  ;;  %v3227_v45 = vadd.f32 %v3223_v40, %v3213_v48  ;;  %v3717_v40 = vstv %s7139_s13  ;;  %v3322_v21 = vmul.f32 %v3320_v5, %v6936_v8  ;;  %s7287_s13 = sld [smem:[#allocation12 + $0x63]] }
 0x61f   : > { %v3237_v7 = vadd.f32 %v4517_v59, %v3232_v22  ;;  %v3703_v59 = vstv %s7145_s14  ;;  %v3718_v0 = vmul.f32 %v3717_v40, %v6889_v56  ;;  %v3665_v22 = vmul.f32 %v3664_v52, %v7122_v14  ;;  %s7296_s14 = sld [smem:[#allocation12 + $0x83]] }
 0x620   : > { %vm3229_vm6 = vcmp.ge.f32.partialorder %v3227_v45, 0.0  ;;  %v3231_v62 = vmul.f32 0.2, %v3227_v45  ;;  %3655 = vrot.lane.b32.xlu0 %v3651_v19, %s7508_s26  ;;  %v3704_v48 = vmul.f32 %v3703_v59, %v6889_v56  ;;  %v3705_v3 = vmul.f32 %v3703_v59, %v6908_v25 }
 0x621   : > { %4519 = vst.msk [vmem:[%s6864_s29 + $0x10] sm:$0xff] %vm873_vm4, %v3237_v7  ;;  %3633 = vrot.lane.b32.xlu1 %v3629_v39, %s7507_s5  ;;  %3619 = vrot.lane.b32.xlu2 %v3615_v53, %s7508_s26  ;;  %v3321_v39 = vmul.f32 %v6963_v18, %v3320_v5  ;;  %v3392_v59 = vstv %s7197_s12  ;;  %s7339_s12 = sld [smem:[#allocation12 + $0x8b]] }
 0x622   : > { %v3233_v27 = vsel %vm3229_vm6, %v3227_v45, %v3231_v62  ;;  %v3274_v23 = vpop.permute.xlu0 %3273 }
 0x623   : > { %v3238_v57 = vadd.f32 %v4518_v50, %v3233_v27  ;;  %v3260_v32 = vpop.permute.xlu1 %3259  ;;  %v3312_v11 = vpop.permute.xlu2 %3311  ;;  %v7178_v50 = vld [vmem:[#allocation3 + $0x9] sm:$0xff]  ;;  %v3739_v27 = vstv %s7162_s17  ;;  %s7308_s17 = sld [smem:[#allocation12 + $0x66]] }
 0x624   : > { %v3265_v38 = vadd.f32 %v3260_v32, %v3251_v43  ;;  %v3741_v43 = vmul.f32 %v3739_v27, %v7178_v50 }
 0x625   : > { %4520 = vst.msk [vmem:[%s6864_s29 + $0x18] sm:$0xff] %vm873_vm4, %v3238_v57  ;;  %v3356_v57 = vstv %s7167_s15  ;;  %s7310_s15 = sld [smem:[#allocation12 + $0x86]] }
 0x626   : > { %v3279_v13 = vadd.f32 %v3274_v23, %v3265_v38  ;;  %v3357_v23 = vmul.f32 %v3356_v57, %v6952_v42 }
 0x628   : > { %v3287_v51 = vadd.f32 %v3285_v4, %v3279_v13  ;;  %3671 = vrot.lane.b32.xlu0 %v3666_v17, %s7507_s5  ;;  %v3753_v4 = vstv %s7175_s0  ;;  %v7192_v13 = vld [vmem:[#allocation3 + $0x2] sm:$0xff]  ;;  %v3775_v17 = vstv %s7180_s22  ;;  %s7322_s0 = sld [smem:[#allocation12 + $0x88]] }
 0x629   : > { %3657 = vrot.lane.b32.xlu1 %v3652_v49, %s7508_s26  ;;  %3635 = vrot.lane.b32.xlu2 %v3630_v61, %s7507_s5  ;;  %v3776_v61 = vmul.f32 %v3775_v17, %v7192_v13  ;;  %s7325_s22 = sld [smem:[#allocation12 + $0x89]] }
 0x62a   : > { %v3298_v55 = vpop.permute.xlu0 %3297  ;;  %v3301_v45 = vadd.f32 %v7120_v37, %v3287_v51  ;;  %v3719_v37 = vmul.f32 %v3717_v40, %v6908_v25  ;;  %v3358_v25 = vmul.f32 %v3356_v57, %v6972_v47  ;;  %v3754_v51 = vmul.f32 %v3753_v4, %v6921_v31 }
 0x62b   : > { %v3276_v10 = vpop.permute.xlu1 %3275  ;;  %v3346_v46 = vpop.permute.xlu2 %3345  ;;  %v3789_v40 = vstv %s7195_s24  ;;  %s7330_s24 = sld [smem:[#allocation12 + $0x69]] }
 0x62c   : > { %v3280_v12 = vadd.f32 %v3276_v10, %v3266_v34  ;;  %v3740_v10 = vmul.f32 %v3739_v27, %v6921_v31  ;;  %v3428_v27 = vstv %s7215_s2  ;;  %s7356_s2 = sld [smem:[#allocation12 + $0x8e]] }
 0x62e   : > { %v3288_v6 = vadd.f32 %v3286_v35, %v3280_v12 }
 0x630   : > { %v3302_v15 = vadd.f32 %v3298_v55, %v3288_v6  ;;  %3722 = vrot.lane.b32.xlu0 %v3718_v0, %s7507_s5  ;;  %v3393_v6 = vmul.f32 %v3392_v59, %v6988_v63  ;;  %v3777_v0 = vmul.f32 %v3775_v17, %v6936_v8 }
 0x631   : > { %3708 = vrot.lane.b32.xlu1 %v3704_v48, %s7508_s26  ;;  %3669 = vrot.lane.b32.xlu2 %v3665_v22, %s7507_s5  ;;  %v3791_v48 = vmul.f32 %v3789_v40, %v6936_v8  ;;  %v3811_v8 = vstv %s7206_s16  ;;  %s7348_s16 = sld [smem:[#allocation12 + $0x6c]] }
 0x632   : > { %v3316_v33 = vadd.f32 %v3312_v11, %v3302_v15  ;;  %v3332_v26 = vpop.permute.xlu0 %3331  ;;  %v3755_v15 = vmul.f32 %v3753_v4, %v7178_v50 }
 0x633   : > { %v3310_v56 = vpop.permute.xlu1 %3309  ;;  %v3370_v19 = vpop.permute.xlu2 %3369 }
 0x634   : > { %v3315_v7 = vadd.f32 %v3310_v56, %v3301_v45  ;;  %v3324_v62 = vadd.f32 %v3322_v21, %v3316_v33 }
 0x636   : > { %v3323_v53 = vadd.f32 %v3321_v39, %v3315_v7  ;;  %v3825_v7 = vstv %s7209_s6  ;;  %s7351_s6 = sld [smem:[#allocation12 + $0x8c]] }
 0x637   : > { %v3827_v17 = vmul.f32 %v3825_v7, %v6972_v47 }
 0x638   : > { %v3337_v32 = vadd.f32 %v3332_v26, %v3323_v53  ;;  %3746 = vrot.lane.b32.xlu0 %v3741_v43, %s7508_s26  ;;  %v3394_v26 = vmul.f32 %v3392_v59, %v6969_v24  ;;  %v3826_v53 = vmul.f32 %v3825_v7, %v6952_v42  ;;  %v3861_v59 = vstv %s7238_s3  ;;  %s7373_s3 = sld [smem:[#allocation12 + $0x8f]] }
 0x639   : > { %3724 = vrot.lane.b32.xlu1 %v3719_v37, %s7507_s5  ;;  %3710 = vrot.lane.b32.xlu2 %v3705_v3, %s7508_s26  ;;  %v3790_v37 = vmul.f32 %v3789_v40, %v7192_v13 }
 0x63a   : > { %v3351_v18 = vadd.f32 %v3346_v46, %v3337_v32  ;;  %v3348_v38 = vpop.permute.xlu0 %3347  ;;  %v3430_v32 = vmul.f32 %v3428_v27, %v7004_v41 }
 0x63b   : > { %v3334_v54 = vpop.permute.xlu1 %3333  ;;  %v3404_v52 = vpop.permute.xlu2 %3403 }
 0x63c   : > { %v3338_v11 = vadd.f32 %v3334_v54, %v3324_v62  ;;  %v3359_v49 = vadd.f32 %v3357_v23, %v3351_v18  ;;  %v3812_v62 = vmul.f32 %v3811_v8, %v6952_v42  ;;  %v3429_v54 = vmul.f32 %v3428_v27, %v6986_v44 }
 0x63e   : > { %v3352_v60 = vadd.f32 %v3348_v38, %v3338_v11  ;;  %v3847_v38 = vstv %s7224_s10  ;;  %s7359_s10 = sld [smem:[#allocation13 + $0x3]] }
 0x640   : > { %v3360_v34 = vadd.f32 %v3358_v25, %v3352_v60  ;;  %3780 = vrot.lane.b32.xlu0 %v3776_v61, %s7508_s26  ;;  %v3813_v60 = vmul.f32 %v3811_v8, %v6972_v47  ;;  %v4796_v61 = vld [vmem:[#allocation3 + $0x30] sm:$0xff] }
 0x641   : > { %3758 = vrot.lane.b32.xlu1 %v3754_v51, %s7507_s5  ;;  %3744 = vrot.lane.b32.xlu2 %v3740_v10, %s7508_s26 }
 0x642   : > { %v3382_v12 = vpop.permute.xlu0 %3381  ;;  %v3374_v22 = vadd.f32 %v3370_v19, %v3360_v34 }
 0x643   : > { %v3368_v55 = vpop.permute.xlu1 %3367  ;;  %v3420_v35 = vpop.permute.xlu2 %3419 }
 0x644   : > { %v3373_v46 = vadd.f32 %v3368_v55, %v3359_v49  ;;  %v3849_v49 = vmul.f32 %v3847_v38, %v6969_v24 }
 0x646   : > { %v3387_v31 = vadd.f32 %v3382_v12, %v3373_v46 }
 0x648   : > { %v3395_v5 = vadd.f32 %v3393_v6, %v3387_v31  ;;  %3796 = vrot.lane.b32.xlu0 %v3791_v48, %s7507_s5  ;;  %v3883_v6 = vstv %s7240_s9  ;;  %v3862_v31 = vmul.f32 %v3861_v59, %v6988_v63  ;;  %s4569_s9 = sld [smem:[#allocation12 + $0x72]] }
 0x649   : > { %3782 = vrot.lane.b32.xlu1 %v3777_v0, %s7508_s26  ;;  %3760 = vrot.lane.b32.xlu2 %v3755_v15, %s7507_s5  ;;  %v3884_v0 = vmul.f32 %v3883_v6, %v6986_v44 }
 0x64a   : > { %v3406_v45 = vpop.permute.xlu0 %3405  ;;  %v3409_v57 = vadd.f32 %v3404_v52, %v3395_v5  ;;  %v3464_v52 = vstv %s7229_s4  ;;  %v3848_v5 = vmul.f32 %v3847_v38, %v6988_v63  ;;  %v3885_v63 = vmul.f32 %v3883_v6, %v7004_v41  ;;  %s7369_s4 = sld [smem:[#allocation12 + $0x6f]] }
 0x64b   : > { %v3384_v33 = vpop.permute.xlu1 %3383  ;;  %v3454_v56 = vpop.permute.xlu2 %3453  ;;  %v3465_v34 = vmul.f32 %v4796_v61, %v3464_v52  ;;  %v3466_v47 = vmul.f32 %v3464_v52, %v7034_v36  ;;  %v3955_v61 = vstv %s7282_s30  ;;  %s4593_s30 = sld [smem:[#allocation12 + $0x8a]] }
 0x64c   : > { %v3388_v21 = vadd.f32 %v3384_v33, %v3374_v22 }
 0x64e   : > { %v3396_v39 = vadd.f32 %v3394_v26, %v3388_v21  ;;  %v3897_v21 = vstv %s7249_s21  ;;  %s4572_s21 = sld [smem:[#allocation12 + $0x75]] }
 0x64f   : > { %v3899_v7 = vmul.f32 %v3897_v21, %v7004_v41  ;;  %v7278_v41 = vld [vmem:[#allocation3 + $0x30] sm:$0xff]  ;;  %v3898_v38 = vmul.f32 %v3897_v21, %v6986_v44 }
 0x650   : > { %v3410_v19 = vadd.f32 %v3406_v45, %v3396_v39  ;;  %3830 = vrot.lane.b32.xlu0 %v3826_v53, %s7507_s5 }
 0x651   : > { %3816 = vrot.lane.b32.xlu1 %v3812_v62, %s7508_s26  ;;  %3794 = vrot.lane.b32.xlu2 %v3790_v37, %s7507_s5  ;;  %v3863_v62 = vmul.f32 %v3861_v59, %v6969_v24 }
 0x652   : > { %v3424_v43 = vadd.f32 %v3420_v35, %v3410_v19  ;;  %v3440_v42 = vpop.permute.xlu0 %3439 }
 0x653   : > { %v3418_v3 = vpop.permute.xlu1 %3417  ;;  %v3478_v23 = vpop.permute.xlu2 %3477 }
 0x654   : > { %v3423_v18 = vadd.f32 %v3418_v3, %v3409_v57  ;;  %v3432_v11 = vadd.f32 %v3430_v32, %v3424_v43  ;;  %v3919_v32 = vstv %s7262_s18  ;;  %v3933_v3 = vstv %s7265_s8  ;;  %s4584_s18 = sld [smem:[#allocation12 + $0x81]] }
 0x655   : > { %s4587_s8 = sld [smem:[#allocation12 + $0x84]] }
 0x656   : > { %v3431_v4 = vadd.f32 %v3429_v54, %v3423_v18  ;;  %v3934_v18 = vmul.f32 %v3933_v3, %v7278_v41  ;;  %v3536_v54 = vstv %s7271_s19  ;;  %s4590_s19 = sld [smem:[#allocation12 + $0x87]] }
 0x658   : > { %v3445_v25 = vadd.f32 %v3440_v42, %v3431_v4  ;;  %3854 = vrot.lane.b32.xlu0 %v3849_v49, %s7508_s26  ;;  %v3920_v42 = vmul.f32 %v3919_v32, %v7278_v41 }
 0x659   : > { %3832 = vrot.lane.b32.xlu1 %v3827_v17, %s7507_s5  ;;  %3818 = vrot.lane.b32.xlu2 %v3813_v60, %s7508_s26  ;;  %v3538_v17 = vmul.f32 %v3536_v54, %v7066_v9 }
 0x65a   : > { %v3459_v51 = vadd.f32 %v3454_v56, %v3445_v25  ;;  %v3456_v55 = vpop.permute.xlu0 %3455  ;;  %v3500_v56 = vstv %s7251_s1  ;;  %s4581_s1 = sld [smem:[#allocation12 + $0x7e]] }
 0x65b   : > { %v3442_v10 = vpop.permute.xlu1 %3441  ;;  %v3512_v46 = vpop.permute.xlu2 %3511  ;;  %v3501_v26 = vmul.f32 %v3500_v56, %v7051_v16  ;;  %v3502_v57 = vmul.f32 %v3500_v56, %v7031_v28  ;;  %v3956_v56 = vmul.f32 %v3955_v61, %v7051_v16 }
 0x65c   : > { %v3446_v12 = vadd.f32 %v3442_v10, %v3432_v11  ;;  %v3467_v35 = vadd.f32 %v3465_v34, %v3459_v51  ;;  %v3537_v51 = vmul.f32 %v3536_v54, %v7049_v58  ;;  %v3935_v10 = vmul.f32 %v3933_v3, %v7034_v36 }
 0x65d   : > { %v4041_v54 = vstv %s7325_s22  ;;  %s4141_s22 = scalar_lea.sflag [#allocation5], %s346_s27 }
 0x65e   : > { %v3460_v40 = vadd.f32 %v3456_v55, %v3446_v12  ;;  %v3957_v55 = vmul.f32 %v3955_v61, %v7031_v28  ;;  %v3572_v12 = vstv %s7287_s13  ;;  %s4596_s13 = sld [smem:[#allocation12 + $0x8d]] }
 0x660   : > { %v3468_v48 = vadd.f32 %v3466_v47, %v3460_v40  ;;  %3888 = vrot.lane.b32.xlu0 %v3884_v0, %s7508_s26  ;;  %v3573_v40 = vmul.f32 %v3572_v12, %v7079_v20 }
 0x661   : > { %3866 = vrot.lane.b32.xlu1 %v3862_v31, %s7507_s5  ;;  %3852 = vrot.lane.b32.xlu2 %v3848_v5, %s7508_s26 }
 0x662   : > { %v3490_v22 = vpop.permute.xlu0 %3489  ;;  %v3482_v53 = vadd.f32 %v3478_v23, %v3468_v48 }
 0x663   : > { %v3476_v15 = vpop.permute.xlu1 %3475  ;;  %v3528_v45 = vpop.permute.xlu2 %3527 }
 0x664   : > { %v3481_v33 = vadd.f32 %v3476_v15, %v3467_v35  ;;  %v3921_v35 = vmul.f32 %v3919_v32, %v7034_v36  ;;  %v3574_v36 = vmul.f32 %v3572_v12, %v7100_v29  ;;  %v3969_v15 = vstv %s7296_s14  ;;  %s4609_s14 = sshll.u32 %s5058_s28, 6 }
 0x666   : > { %v3495_v8 = vadd.f32 %v3490_v22, %v3481_v33  ;;  %v3991_v22 = vstv %s7298_s20  ;;  %v3970_v33 = vmul.f32 %v3969_v15, %v7051_v16 }
 0x668   : > { %v3503_v39 = vadd.f32 %v3501_v26, %v3495_v8  ;;  %3904 = vrot.lane.b32.xlu0 %v3899_v7, %s7507_s5  ;;  %v3608_v8 = vstv %s7308_s17 }
 0x669   : > { %3890 = vrot.lane.b32.xlu1 %v3885_v63, %s7508_s26  ;;  %3868 = vrot.lane.b32.xlu2 %v3863_v62, %s7507_s5  ;;  %v4005_v62 = vstv %s7310_s15  ;;  %s4152_s15 = scalar_lea.hbm %s7451_s7, %s4609_s14 }
 0x66a   : > { %v3514_v19 = vpop.permute.xlu0 %3513  ;;  %v3517_v4 = vadd.f32 %v3512_v46, %v3503_v39  ;;  %s4155_s28 = sshll.u32 %s4152_s15, 4  ;;  %s4156_s28 = int_to_ptr.hbm [resolvable:$true] %s4155_s28 }
 0x66b   : > { %v3492_v27 = vpop.permute.xlu1 %3491  ;;  %v3562_v43 = vpop.permute.xlu2 %3561 }
 0x66c   : > { %v3496_v37 = vadd.f32 %v3492_v27, %v3482_v53  ;;  %v3609_v53 = vmul.f32 %v3608_v8, %v7125_v2  ;;  %v3993_v27 = vmul.f32 %v3991_v22, %v7066_v9 }
 0x66e   : > { %v3504_v24 = vadd.f32 %v3502_v57, %v3496_v37 }
 0x670   : > { %v3518_v23 = vadd.f32 %v3514_v19, %v3504_v24  ;;  %3938 = vrot.lane.b32.xlu0 %v3934_v18, %s7507_s5  ;;  %v4007_v19 = vmul.f32 %v4005_v62, %v7066_v9  ;;  %v3610_v18 = vmul.f32 %v3608_v8, %v7098_v1  ;;  %v4027_v9 = vstv %s7322_s0  ;;  %s4153_s0 = sshll.u32 %s6864_s29, 4  ;;  %s4154_s0 = int_to_ptr.vmem [resolvable:$true] %s4153_s0 }
 0x671   : > { %3924 = vrot.lane.b32.xlu1 %v3920_v42, %s7508_s26  ;;  %3902 = vrot.lane.b32.xlu2 %v3898_v38, %s7507_s5  ;;  %v4042_v38 = vmul.f32 %v4041_v54, %v7079_v20 }
 0x672   : > { %v3532_v11 = vadd.f32 %v3528_v45, %v3518_v23  ;;  %v3548_v52 = vpop.permute.xlu0 %3547  ;;  %v3992_v45 = vmul.f32 %v3991_v22, %v7049_v58 }
 0x673   : > { %v3526_v49 = vpop.permute.xlu1 %3525  ;;  %v3586_v60 = vpop.permute.xlu2 %3585 }
 0x674   : > { %v3531_v25 = vadd.f32 %v3526_v49, %v3517_v4  ;;  %v3540_v34 = vadd.f32 %v3538_v17, %v3532_v11  ;;  %v3644_v11 = vstv %s7330_s24  ;;  %v4006_v17 = vmul.f32 %v4005_v62, %v7049_v58  ;;  %s4919_s24 = sshra.s32 %s4156_s28, 4  ;;  %s4920_s24 = int_to_ptr.hbm [resolvable:$true] %s4919_s24 }
 0x675   : > { %v3645_v61 = vmul.f32 %v3644_v11, %v7122_v14  ;;  %p4926_p3 = scmp.lt.s32.totalorder %s4920_s24, %s7451_s7 }
 0x676   : > { %v3539_v44 = vadd.f32 %v3537_v51, %v3531_v25  ;;  %v3646_v25 = vmul.f32 %v3644_v11, %v7142_v30 }
 0x678   : > { %v3553_v46 = vadd.f32 %v3548_v52, %v3539_v44  ;;  %3962 = vrot.lane.b32.xlu0 %v3957_v55, %s7508_s26  ;;  %v4043_v55 = vmul.f32 %v4041_v54, %v7100_v29 }
 0x679   : > { %3940 = vrot.lane.b32.xlu1 %v3935_v10, %s7507_s5  ;;  %3926 = vrot.lane.b32.xlu2 %v3921_v35, %s7508_s26  ;;  %v4063_v10 = vstv %s7339_s12  ;;  %v4029_v35 = vmul.f32 %v4027_v9, %v7100_v29  ;;  %s4921_s12 = scalar_lea.hbm %s4920_s24, 64 }
 0x67a   : > { %v3567_v47 = vadd.f32 %v3562_v43, %v3553_v46  ;;  %v3564_v6 = vpop.permute.xlu0 %3563  ;;  %v3971_v43 = vmul.f32 %v3969_v15, %v7031_v28  ;;  %v4028_v28 = vmul.f32 %v4027_v9, %v7079_v20  ;;  %v4065_v12 = vmul.f32 %v4063_v10, %v7098_v1  ;;  %p4922_p0 = scmp.ne.s32.totalorder %s4920_s24, %s4921_s12 }
 0x67b   : > { %v3550_v59 = vpop.permute.xlu1 %3549  ;;  %v3620_v0 = vpop.permute.xlu2 %3619  ;;  %v4099_v15 = vstv %s7356_s2  ;;  %v4064_v62 = vmul.f32 %v4063_v10, %v7125_v2 }
 0x67c   : > { %v3554_v31 = vadd.f32 %v3550_v59, %v3540_v34  ;;  %v3575_v48 = vadd.f32 %v3573_v40, %v3567_v47  ;;  %v3697_v40 = vstv %s7348_s16  ;;  %p4923_p1 = pnand %p4922_p0, %p5075_p5 }
 0x67e   : > { %v3568_v5 = vadd.f32 %v3564_v6, %v3554_v31  ;;  %v4077_v31 = vstv %s7351_s6  ;;  %p4924_p2 = pneg %p4923_p1  ;;  %s4925_s6 = scalar_lea.hbm %s7451_s7, 128 }
 0x67f   : > { %v4078_v8 = vmul.f32 %v4077_v31, %v7125_v2  ;;  %p4927_p4 = scmp.lt.s32.totalorder %s4925_s6, %s4921_s12 }
 0x680   : > { %v3576_v21 = vadd.f32 %v3574_v36, %v3568_v5  ;;  %3996 = vrot.lane.b32.xlu0 %v3992_v45, %s7508_s26  ;;  %v4797_v45 = vld [vmem:[#allocation3] sm:$0xff] }
 0x681   : > { %3974 = vrot.lane.b32.xlu1 %v3970_v33, %s7507_s5  ;;  %3960 = vrot.lane.b32.xlu2 %v3956_v56, %s7508_s26  ;;  %v3692_v56 = vstv %s7359_s10  ;;  %p4928_p7 = por %p4927_p4, %p4926_p3 }
 0x682   : > { %v3598_v63 = vpop.permute.xlu0 %3597  ;;  %v3590_v57 = vadd.f32 %v3586_v60, %v3576_v21  ;;  %v3698_v21 = vmul.f32 %v4797_v45, %v3697_v40  ;;  %v4802_v45 = vld [vmem:[#allocation3 + $0x20] sm:$0xff] }
 0x683   : > { %v3584_v26 = vpop.permute.xlu1 %3583  ;;  %v3636_v39 = vpop.permute.xlu2 %3635  ;;  %p4929_p8 = pnand %p4928_p7, %p4924_p2 }
 0x684   : > { %v3589_v7 = vadd.f32 %v3584_v26, %v3575_v48 }
 0x686   : > { %v3603_v16 = vadd.f32 %v3598_v63, %v3589_v7  ;;  %v4100_v63 = vmul.f32 %v4099_v15, %v7122_v14  ;;  %v4559_v7 = vld [vmem:[%s5155_s23 + $0x28] sm:$0xff] }
 0x688   : > { %v3611_v37 = vadd.f32 %v3609_v53, %v3603_v16  ;;  %4012 = vrot.lane.b32.xlu0 %v4007_v19, %s7507_s5  ;;  %v3700_v16 = vadd.f32 %v3698_v21, %v3692_v56 }
 0x689   : > { %3998 = vrot.lane.b32.xlu1 %v3993_v27, %s7508_s26  ;;  %3976 = vrot.lane.b32.xlu2 %v3971_v43, %s7507_s5 }
 0x68a   : > { %v3622_v3 = vpop.permute.xlu0 %3621  ;;  %v3625_v52 = vadd.f32 %v3620_v0, %v3611_v37  ;;  %v4558_v0 = vld [vmem:[%s5155_s23 + $0x20] sm:$0xff]  ;;  %v3733_v37 = vstv %s7369_s4 }
 0x68b   : > { %v3600_v32 = vpop.permute.xlu1 %3599  ;;  %v3670_v42 = vpop.permute.xlu2 %3669 }
 0x68c   : > { %v3604_v24 = vadd.f32 %v3600_v32, %v3590_v57  ;;  %v4798_v57 = vld [vmem:[#allocation3 + $0x8] sm:$0xff] }
 0x68d   : > { %v3699_v32 = vmul.f32 %v4798_v57, %v3697_v40 }
 0x68e   : > { %v3612_v23 = vadd.f32 %v3610_v18, %v3604_v24  ;;  %v4799_v18 = vld [vmem:[#allocation3 + $0x1] sm:$0xff] }
 0x68f   : > { %v3734_v9 = vmul.f32 %v4799_v18, %v3733_v37 }
 0x690   : > { %v3626_v4 = vadd.f32 %v3622_v3, %v3612_v23  ;;  %4046 = vrot.lane.b32.xlu0 %v4042_v38, %s7507_s5  ;;  %v4101_v23 = vmul.f32 %v4099_v15, %v7142_v30  ;;  %v3701_v38 = vadd.f32 %v3699_v32, %v3692_v56 }
 0x691   : > { %4032 = vrot.lane.b32.xlu1 %v4028_v28, %s7508_s26  ;;  %4010 = vrot.lane.b32.xlu2 %v4006_v17, %s7507_s5 }
 0x692   : > { %v3640_v49 = vadd.f32 %v3636_v39, %v3626_v4  ;;  %v3656_v51 = vpop.permute.xlu0 %3655  ;;  %v4079_v4 = vmul.f32 %v4077_v31, %v7098_v1 }
 0x693   : > { %v3634_v60 = vpop.permute.xlu1 %3633  ;;  %v7353_v58 = vpop.permute.xlu2 %3710 }
 0x694   : > { %v3639_v20 = vadd.f32 %v3634_v60, %v3625_v52  ;;  %v3648_v34 = vadd.f32 %v3646_v25, %v3640_v49  ;;  %v3715_v17 = vadd.f32 %v7353_v58, %v3701_v38 }
 0x696   : > { %v3647_v44 = vadd.f32 %v3645_v61, %v3639_v20  ;;  %v3769_v61 = vstv %s4569_s9 }
 0x697   : > { %v3770_v40 = vmul.f32 %v3769_v61, %v7192_v13 }
 0x698   : > { %v3661_v46 = vadd.f32 %v3656_v51, %v3647_v44  ;;  %4070 = vrot.lane.b32.xlu0 %v4065_v12, %s7508_s26  ;;  %v3735_v51 = vmul.f32 %v3733_v37, %v7178_v50 }
 0x699   : > { %4048 = vrot.lane.b32.xlu1 %v4043_v55, %s7507_s5  ;;  %4034 = vrot.lane.b32.xlu2 %v4029_v35, %s7508_s26  ;;  %v4800_v55 = vld [vmem:[#allocation3 + $0xa] sm:$0xff] }
 0x69a   : > { %v3675_v47 = vadd.f32 %v3670_v42, %v3661_v46  ;;  %v3672_v6 = vpop.permute.xlu0 %3671  ;;  %v4113_v42 = vstv %s7373_s3  ;;  %v3771_v58 = vmul.f32 %v4800_v55, %v3769_v61 }
 0x69b   : > { %v3658_v59 = vpop.permute.xlu1 %3657  ;;  %v3745_v5 = vpop.permute.xlu2 %3744  ;;  %v4115_v28 = vmul.f32 %v4113_v42, %v7142_v30  ;;  %v4114_v1 = vmul.f32 %v4113_v42, %v7122_v14 }
 0x69c   : > { %vm3677_vm7 = vcmp.ge.f32.partialorder %v3675_v47, 0.0  ;;  %v3679_v48 = vmul.f32 0.2, %v3675_v47  ;;  %v3662_v36 = vadd.f32 %v3658_v59, %v3648_v34 }
 0x69e   : > { %v3681_v22 = vsel %vm3677_vm7, %v3675_v47, %v3679_v48  ;;  %v3676_v33 = vadd.f32 %v3672_v6, %v3662_v36  ;;  %v3805_v6 = vstv %s4572_s21  ;;  %v4801_v48 = vld [vmem:[#allocation3 + $0x18] sm:$0xff] }
 0x69f   : > { %v3686_v26 = vadd.f32 %v4558_v0, %v3681_v22  ;;  %v3806_v36 = vmul.f32 %v4801_v48, %v3805_v6  ;;  %v3807_v21 = vmul.f32 %v4802_v45, %v3805_v6  ;;  %v4808_v48 = vld [vmem:[#allocation3 + $0x31] sm:$0xff]  ;;  %v4809_v45 = vld [vmem:[#allocation3 + $0x39] sm:$0xff] }
 0x6a0   : > { %vm3678_vm8 = vcmp.ge.f32.partialorder %v3676_v33, 0.0  ;;  %v3680_v39 = vmul.f32 0.2, %v3676_v33  ;;  %4104 = vrot.lane.b32.xlu0 %v4100_v63, %s7508_s26 }
 0x6a1   : > { %4560 = vst.msk [vmem:[%s6864_s29 + $0x20] sm:$0xff] %vm873_vm4, %v3686_v26  ;;  %4082 = vrot.lane.b32.xlu1 %v4078_v8, %s7507_s5  ;;  %4068 = vrot.lane.b32.xlu2 %v4064_v62, %s7508_s26  ;;  %v4803_v62 = vld [vmem:[#allocation3 + $0x19] sm:$0xff] }
 0x6a2   : > { %v3682_v53 = vsel %vm3678_vm8, %v3676_v33, %v3680_v39  ;;  %v3723_v43 = vpop.permute.xlu0 %3722 }
 0x6a3   : > { %v3687_v27 = vadd.f32 %v4559_v7, %v3682_v53  ;;  %v3709_v19 = vpop.permute.xlu1 %3708  ;;  %v3761_v24 = vpop.permute.xlu2 %3760 }
 0x6a4   : > { %v3714_v3 = vadd.f32 %v3709_v19, %v3700_v16 }
 0x6a5   : > { %4561 = vst.msk [vmem:[%s6864_s29 + $0x28] sm:$0xff] %vm873_vm4, %v3687_v27 }
 0x6a6   : > { %v3728_v54 = vadd.f32 %v3723_v43, %v3714_v3  ;;  %v4804_v3 = vld [vmem:[#allocation3 + $0x21] sm:$0xff] }
 0x6a8   : > { %v3736_v11 = vadd.f32 %v3734_v9, %v3728_v54  ;;  %4120 = vrot.lane.b32.xlu0 %v4115_v28, %s7507_s5  ;;  %v4805_v28 = vld [vmem:[#allocation3 + $0x22] sm:$0xff] }
 0x6a9   : > { %4106 = vrot.lane.b32.xlu1 %v4101_v23, %s7508_s26  ;;  %4084 = vrot.lane.b32.xlu2 %v4079_v4, %s7507_s5  ;;  %s4575_s26 = sld [smem:[#allocation12 + $0x78]] }
 0x6aa   : > { %v3747_v52 = vpop.permute.xlu0 %3746  ;;  %v3750_v10 = vadd.f32 %v3745_v5, %v3736_v11 }
 0x6ab   : > { %v3725_v49 = vpop.permute.xlu1 %3724  ;;  %v3795_v60 = vpop.permute.xlu2 %3794 }
 0x6ac   : > { %v3729_v25 = vadd.f32 %v3725_v49, %v3715_v17 }
 0x6ae   : > { %v3737_v20 = vadd.f32 %v3735_v51, %v3729_v25 }
 0x6af   : > { %v3841_v39 = vstv %s4575_s26 }
 0x6b0   : > { %v3751_v34 = vadd.f32 %v3747_v52, %v3737_v20  ;;  %v3842_v53 = vmul.f32 %v4803_v62, %v3841_v39  ;;  %v4806_v52 = vld [vmem:[#allocation3 + $0x1a] sm:$0xff]  ;;  %v3913_v20 = vstv %s4581_s1 }
 0x6b1   : > { %4118 = vrot.lane.b32.xlu2 %v4114_v1, %s7507_s5  ;;  %s4578_s5 = sld [smem:[#allocation12 + $0x7b]]  ;;  %v3914_v1 = vmul.f32 %v3913_v20, %v7278_v41 }
 0x6b2   : > { %v3765_v44 = vadd.f32 %v3761_v24, %v3751_v34  ;;  %v3781_v46 = vpop.permute.xlu0 %3780  ;;  %v3843_v24 = vmul.f32 %v4804_v3, %v3841_v39  ;;  %v4810_v39 = vld [vmem:[#allocation3 + $0x3a] sm:$0xff] }
 0x6b3   : > { %v3759_v12 = vpop.permute.xlu1 %3758  ;;  %v3819_v47 = vpop.permute.xlu2 %3818 }
 0x6b4   : > { %v3764_v35 = vadd.f32 %v3759_v12, %v3750_v10  ;;  %v3773_v59 = vadd.f32 %v3771_v58, %v3765_v44 }
 0x6b6   : > { %v3772_v50 = vadd.f32 %v3770_v40, %v3764_v35 }
 0x6b7   : > { %v3877_v18 = vstv %s4578_s5 }
 0x6b8   : > { %v3786_v31 = vadd.f32 %v3781_v46, %v3772_v50  ;;  %v3879_v38 = vmul.f32 %v4805_v28, %v3877_v18  ;;  %v3878_v25 = vmul.f32 %v4806_v52, %v3877_v18  ;;  %v4807_v46 = vld [vmem:[#allocation3 + $0x38] sm:$0xff]  ;;  %v4812_v18 = vld [vmem:[#allocation3 + $0x48] sm:$0xff]  ;;  %v4057_v52 = vstv %s4593_s30 }
 0x6b9   : > { %v3915_v35 = vmul.f32 %v4807_v46, %v3913_v20  ;;  %v4058_v20 = vmul.f32 %v4057_v52, %v7125_v2 }
 0x6ba   : > { %v3800_v0 = vadd.f32 %v3795_v60, %v3786_v31  ;;  %v3797_v15 = vpop.permute.xlu0 %3796  ;;  %v3949_v31 = vstv %s4584_s18 }
 0x6bb   : > { %v3783_v14 = vpop.permute.xlu1 %3782  ;;  %v3853_v33 = vpop.permute.xlu2 %3852 }
 0x6bc   : > { %v3787_v22 = vadd.f32 %v3783_v14, %v3773_v59  ;;  %v3808_v5 = vadd.f32 %v3806_v36, %v3800_v0  ;;  %v3950_v36 = vmul.f32 %v4808_v48, %v3949_v31 }
 0x6be   : > { %v3801_v56 = vadd.f32 %v3797_v15, %v3787_v22 }
 0x6c0   : > { %v3809_v26 = vadd.f32 %v3807_v21, %v3801_v56  ;;  %v3951_v21 = vmul.f32 %v4809_v45, %v3949_v31 }
 0x6c2   : > { %v3831_v63 = vpop.permute.xlu0 %3830  ;;  %v3823_v19 = vadd.f32 %v3819_v47, %v3809_v26  ;;  %v3985_v26 = vstv %s4587_s8 }
 0x6c3   : > { %v3817_v8 = vpop.permute.xlu1 %3816  ;;  %v3869_v7 = vpop.permute.xlu2 %3868  ;;  %v3987_v62 = vmul.f32 %v4810_v39, %v3985_v26 }
 0x6c4   : > { %v3822_v13 = vadd.f32 %v3817_v8, %v3808_v5 }
 0x6c6   : > { %v3836_v16 = vadd.f32 %v3831_v63, %v3822_v13 }
 0x6c8   : > { %v3844_v27 = vadd.f32 %v3842_v53, %v3836_v16 }
 0x6ca   : > { %v3855_v43 = vpop.permute.xlu0 %3854  ;;  %v3858_v23 = vadd.f32 %v3853_v33, %v3844_v27 }
 0x6cb   : > { %v3833_v37 = vpop.permute.xlu1 %3832  ;;  %v3903_v32 = vpop.permute.xlu2 %3902 }
 0x6cc   : > { %v3837_v57 = vadd.f32 %v3833_v37, %v3823_v19  ;;  %v4811_v19 = vld [vmem:[#allocation3 + $0x32] sm:$0xff] }
 0x6cd   : > { %v3986_v37 = vmul.f32 %v4811_v19, %v3985_v26 }
 0x6ce   : > { %v3845_v42 = vadd.f32 %v3843_v24, %v3837_v57 }
 0x6d0   : > { %v3859_v9 = vadd.f32 %v3855_v43, %v3845_v42 }
 0x6d2   : > { %v3873_v54 = vadd.f32 %v3869_v7, %v3859_v9  ;;  %v3889_v4 = vpop.permute.xlu0 %3888 }
 0x6d3   : > { %v3867_v11 = vpop.permute.xlu1 %3866  ;;  %v3927_v49 = vpop.permute.xlu2 %3926 }
 0x6d4   : > { %v3872_v17 = vadd.f32 %v3867_v11, %v3858_v23  ;;  %v3881_v60 = vadd.f32 %v3879_v38, %v3873_v54 }
 0x6d6   : > { %v3880_v51 = vadd.f32 %v3878_v25, %v3872_v17 }
 0x6d8   : > { %v3894_v61 = vadd.f32 %v3889_v4, %v3880_v51 }
 0x6da   : > { %v3908_v34 = vadd.f32 %v3903_v32, %v3894_v61  ;;  %v3905_v10 = vpop.permute.xlu0 %3904  ;;  %v4021_v32 = vstv %s4590_s19 }
 0x6db   : > { %v3891_v44 = vpop.permute.xlu1 %3890  ;;  %v3961_v58 = vpop.permute.xlu2 %3960  ;;  %v4022_v9 = vmul.f32 %v4812_v18, %v4021_v32  ;;  %v4023_v11 = vmul.f32 %v4021_v32, %v7100_v29 }
 0x6dc   : > { %v3895_v55 = vadd.f32 %v3891_v44, %v3881_v60  ;;  %v3916_v12 = vadd.f32 %v3914_v1, %v3908_v34 }
 0x6de   : > { %v3909_v47 = vadd.f32 %v3905_v10, %v3895_v55 }
 0x6e0   : > { %v3917_v40 = vadd.f32 %v3915_v35, %v3909_v47  ;;  %v4093_v35 = vstv %s4596_s13 }
 0x6e2   : > { %v3939_v50 = vpop.permute.xlu0 %3938  ;;  %v3931_v15 = vadd.f32 %v3927_v49, %v3917_v40 }
 0x6e3   : > { %v3925_v59 = vpop.permute.xlu1 %3924  ;;  %v3977_v0 = vpop.permute.xlu2 %3976 }
 0x6e4   : > { %v3930_v6 = vadd.f32 %v3925_v59, %v3916_v12 }
 0x6e6   : > { %v3944_v14 = vadd.f32 %v3939_v50, %v3930_v6  ;;  %v4095_v50 = vmul.f32 %v4093_v35, %v7142_v30 }
 0x6e8   : > { %v3952_v41 = vadd.f32 %v3950_v36, %v3944_v14 }
 0x6ea   : > { %v3963_v33 = vpop.permute.xlu0 %3962  ;;  %v3966_v7 = vadd.f32 %v3961_v58, %v3952_v41  ;;  %v4813_v58 = vld [vmem:[#allocation3 + $0x51] sm:$0xff] }
 0x6eb   : > { %v3941_v22 = vpop.permute.xlu1 %3940  ;;  %v4011_v8 = vpop.permute.xlu2 %4010  ;;  %v4059_v12 = vmul.f32 %v4813_v58, %v4057_v52 }
 0x6ec   : > { %v3945_v5 = vadd.f32 %v3941_v22, %v3931_v15 }
 0x6ee   : > { %v3953_v56 = vadd.f32 %v3951_v21, %v3945_v5  ;;  %v4599_v5 = vld [vmem:[%s5155_s23 + $0x30] sm:$0xff] }
 0x6f0   : > { %v3967_v63 = vadd.f32 %v3963_v33, %v3953_v56 }
 0x6f2   : > { %v3981_v13 = vadd.f32 %v3977_v0, %v3967_v63  ;;  %v3997_v16 = vpop.permute.xlu0 %3996  ;;  %v4814_v0 = vld [vmem:[#allocation3 + $0x4a] sm:$0xff]  ;;  %v4600_v63 = vld [vmem:[%s5155_s23 + $0x38] sm:$0xff] }
 0x6f3   : > { %v3975_v53 = vpop.permute.xlu1 %3974  ;;  %v4035_v24 = vpop.permute.xlu2 %4034  ;;  %v4094_v48 = vmul.f32 %v4814_v0, %v4093_v35 }
 0x6f4   : > { %v3980_v27 = vadd.f32 %v3975_v53, %v3966_v7  ;;  %v3989_v43 = vadd.f32 %v3987_v62, %v3981_v13 }
 0x6f6   : > { %v3988_v57 = vadd.f32 %v3986_v37, %v3980_v27 }
 0x6f8   : > { %v4002_v3 = vadd.f32 %v3997_v16, %v3988_v57 }
 0x6fa   : > { %v4016_v42 = vadd.f32 %v4011_v8, %v4002_v3  ;;  %v4013_v23 = vpop.permute.xlu0 %4012 }
 0x6fb   : > { %v3999_v54 = vpop.permute.xlu1 %3998  ;;  %v4069_v51 = vpop.permute.xlu2 %4068 }
 0x6fc   : > { %v4003_v28 = vadd.f32 %v3999_v54, %v3989_v43  ;;  %v4024_v38 = vadd.f32 %v4022_v9, %v4016_v42 }
 0x6fe   : > { %v4017_v4 = vadd.f32 %v4013_v23, %v4003_v28 }
 0x700   : > { %v4025_v17 = vadd.f32 %v4023_v11, %v4017_v4 }
 0x702   : > { %v4047_v25 = vpop.permute.xlu0 %4046  ;;  %v4039_v1 = vadd.f32 %v4035_v24, %v4025_v17 }
 0x703   : > { %v4033_v49 = vpop.permute.xlu1 %4032  ;;  %v4085_v29 = vpop.permute.xlu2 %4084 }
 0x704   : > { %v4038_v60 = vadd.f32 %v4033_v49, %v4024_v38 }
 0x706   : > { %v4052_v61 = vadd.f32 %v4047_v25, %v4038_v60 }
 0x708   : > { %v4060_v34 = vadd.f32 %v4058_v20, %v4052_v61 }
 0x70a   : > { %v4071_v10 = vpop.permute.xlu0 %4070  ;;  %v4074_v59 = vadd.f32 %v4069_v51, %v4060_v34 }
 0x70b   : > { %v4049_v44 = vpop.permute.xlu1 %4048  ;;  %v4119_v15 = vpop.permute.xlu2 %4118 }
 0x70c   : > { %v4053_v55 = vadd.f32 %v4049_v44, %v4039_v1 }
 0x70e   : > { %v4061_v46 = vadd.f32 %v4059_v12, %v4053_v55 }
 0x710   : > { %v4075_v47 = vadd.f32 %v4071_v10, %v4061_v46 }
 0x712   : > { %v4089_v40 = vadd.f32 %v4085_v29, %v4075_v47  ;;  %v4105_v6 = vpop.permute.xlu0 %4104 }
 0x713   : > { %v4083_v2 = vpop.permute.xlu1 %4082 }
 0x714   : > { %v4088_v31 = vadd.f32 %v4083_v2, %v4074_v59  ;;  %v4097_v36 = vadd.f32 %v4095_v50, %v4089_v40 }
 0x716   : > { %v4096_v14 = vadd.f32 %v4094_v48, %v4088_v31 }
 0x718   : > { %v4110_v41 = vadd.f32 %v4105_v6, %v4096_v14 }
 0x71a   : > { %v4124_v22 = vadd.f32 %v4119_v15, %v4110_v41  ;;  %v4121_v30 = vpop.permute.xlu0 %4120 }
 0x71b   : > { %v4107_v33 = vpop.permute.xlu1 %4106 }
 0x71c   : > { %vm4126_vm9 = vcmp.ge.f32.partialorder %v4124_v22, 0.0  ;;  %v4128_v45 = vmul.f32 0.2, %v4124_v22  ;;  %v4111_v21 = vadd.f32 %v4107_v33, %v4097_v36 }
 0x71e   : > { %v4130_v56 = vsel %vm4126_vm9, %v4124_v22, %v4128_v45  ;;  %v4125_v26 = vadd.f32 %v4121_v30, %v4111_v21 }
 0x71f   : > { %v4135_v8 = vadd.f32 %v4599_v5, %v4130_v56 }
 0x720   : > { %vm4127_vm10 = vcmp.ge.f32.partialorder %v4125_v26, 0.0  ;;  %v4129_v13 = vmul.f32 0.2, %v4125_v26 }
 0x721   : > { %4601 = vst.msk [vmem:[%s6864_s29 + $0x30] sm:$0xff] %vm873_vm4, %v4135_v8 }
 0x722   : > { %v4131_v7 = vsel %vm4127_vm10, %v4125_v26, %v4129_v13 }
 0x723   : > { %v4136_v39 = vadd.f32 %v4600_v63, %v4131_v7 }
 0x725   : > { %4602 = vst.msk [vmem:[%s6864_s29 + $0x38] sm:$0xff] %vm873_vm4, %v4136_v39 }
 0x726   : > { %4932 = shalt.err (!%p4929_p8)
}
 0x727   : > { %s4995_s27 = smov 128   ;;  %s4996_s29 = smov 8  }
 0x728   : > { %4634 = dma.vmem_to_hbm [thread:$0]  (%p5075_p5), %s4154_s0, 1024, %s4156_s28, %s4141_s22, %s4995_s27, %s4995_s27, %s4996_s29  }
 0x729 PF: > { %s7529_s4 = sld [smem:[#allocation23_spill]] }
 0x72a   : > { %s7530_s3 = sld [smem:[#allocation21_spill]] }
 0x72f   : > { %p4671_p9 = scmp.ge.s32.totalorder %s7529_s4, 2 }
 0x730   : > { %s4170_s21 = sand.u32 1, %s7530_s3  }
 0x731   : > { %p4656_p10 = pnand %p4671_p9, %p5079_p6  ;;  %s4171_s26 = scalar_lea.sflag [#allocation5], %s4170_s21 }
 0x733   : > { %p4657_p11 = pneg %p4656_p10 }
 0x735   : > { %4966 = dma.done.wait (%p4657_p11), %s4171_s26, 1024  }
 0x736   : > { %4968 = vsyncadd (%p4657_p11), %s4171_s26, 4294966272  ;;  %s7532_s27 = sld [smem:[#allocation24_spill]]  ;;  %s7535_s24 = smov %s4975_s25 }
 0x737   : > { %s7533_s5 = sld [smem:[#allocation22_spill]] }
 0x738   : > { %s7534_s26 = sld [smem:[#allocation25_spill]] }
 0x73c   : > { %p21_p12 = scmp.ge.s32.totalorder %s7532_s27, 4  }
 0x73d   : > { %s7536_s25 = smov %s7533_s5 }
 0x73e   :  { %23 = sbr.rel (!%p21_p12) target bundleno = 15 (0xf), region = 120 }
 0x743   :  { %4177 = vsyncpa [#allocation5], 1 }
 0x744   :  { %4179 = vsyncpa [#allocation5 + $0x1], 1 }
 0x745   :  { %4180 = vsyncpa [#allocation6], 1 }
 0x746   :  { %4182 = vsyncpa [#allocation6 + $0x1], 1 }
 0x747   :  { %4183 = vsyncpa [#allocation8], 1 }
 0x748   :  { %4184 = vsyncpa [#allocation11], 1 }
 0x749   :  { %4185 = vsyncpa [#allocation14], 1 }

</bundles_post_ra>
